<compile_context>
chip_gen: v6e
topology: v6e:2x2x1
jax: 0.10.0
libtpu: 0.0.40
codegen_flags: <defaults>
</compile_context>

<pallas_src>
import functools

import jax
import jax.numpy as jnp
from jax.experimental import pallas as pl
from jax.experimental.pallas import tpu as pltpu


def _pick_images_per_step(batch):
    """Images per grid step: batch a few images (amortize ~0.35us/step overhead, fill the
    MXU M dim) while keeping the grid length >= 2 so both v7x TensorCores get work and the
    per-step VMEM footprint stays well under the v5e 16 MiB scoped default."""
    for nb in (4, 2):
        if batch % nb == 0 and batch // nb >= 2:
            return nb
    return 1


# ---------------------------------------------------------------------------
# Kernel 1: conv1 = single im2col matmul (K=32) + bias + ReLU + 2x2/2 max-pool.
# ---------------------------------------------------------------------------
def _conv1_kernel(cols_ref, w_ref, b_ref, o_ref, *, nb):
    """cols_ref:(nb,1024,32) bf16 im2col patch (27 real K columns + 5 zero pad, (kh,kw,cin)
    order); w_ref:(32,32) bf16 (rows padded to match); b_ref:(1,32) f32.
    o_ref:(nb,16,16,32) bf16 pooled NHWC activations (channel-minor so conv2's halo fill and
    tap slices need no relayout)."""
    patch = cols_ref[...].reshape(nb * 1024, 32)
    y = jnp.dot(patch, w_ref[...], preferred_element_type=jnp.float32)   # (nb*1024, 32)
    y = jnp.maximum(y + b_ref[...], 0.0)

    # 2x2/2 max-pool.  Rows are ordered (image, y, x): the y-direction max works on
    # sublane-tile-aligned halves, the x-direction max is a stride-2 sublane select.
    t = y.reshape(nb, 16, 2, 32, 32)
    ym = jnp.maximum(t[:, :, 0], t[:, :, 1])                             # (nb,16,32,32)
    u = ym.reshape(nb, 16, 16, 2, 32)
    pooled = jnp.maximum(u[:, :, :, 0, :], u[:, :, :, 1, :])             # (nb,16,16,32)
    o_ref[...] = pooled.astype(o_ref.dtype)


def conv1_call(cols, w, b, *, nb):
    B = cols.shape[0]
    kern = functools.partial(_conv1_kernel, nb=nb)
    return pl.pallas_call(
        kern,
        out_shape=jax.ShapeDtypeStruct((B, 16, 16, 32), jnp.bfloat16),
        grid=(B // nb,),
        in_specs=[
            pl.BlockSpec((nb, 1024, 32), lambda i: (i, 0, 0)),
            pl.BlockSpec((32, 32), lambda i: (0, 0)),
            pl.BlockSpec((1, 32), lambda i: (0, 0)),
        ],
        out_specs=pl.BlockSpec((nb, 16, 16, 32), lambda i: (i, 0, 0, 0)),
        compiler_params=pltpu.CompilerParams(
            dimension_semantics=("parallel",),   # shard images across v7x's 2 TensorCores
        ),
    )(cols, w, b)


# ---------------------------------------------------------------------------
# Kernel 2: conv2 = in-VMEM im2col (zero-halo scratch) + single K=288 matmul
#           + bias + ReLU + 2x2/2 max-pool, lane-dense (nb, 8, 512) store.
# ---------------------------------------------------------------------------
def _conv2_kernel(x_ref, w_ref, b_ref, o_ref, xpad, patch, *, nb):
    """x_ref:(nb,16,16,32) bf16; w_ref:(288,64) bf16 ((kh,kw,cin) rows); b_ref:(1,64) f32.
    xpad:(nb,18,18,32) bf16 VMEM scratch with a 1-pixel zero halo; patch:(nb*256,288) bf16
    VMEM scratch holding the im2col matrix.  o_ref:(nb,8,512) bf16, lanes packed as (x,c)."""
    # Halo: zero only the 4 border strips (not a full zero + overwrite), then fill interior.
    zrow = jnp.zeros((nb, 1, 18, 32), jnp.bfloat16)
    zcol = jnp.zeros((nb, 18, 1, 32), jnp.bfloat16)
    xpad[:, 0:1, :, :] = zrow
    xpad[:, 17:18, :, :] = zrow
    xpad[:, :, 0:1, :] = zcol
    xpad[:, :, 17:18, :] = zcol
    xpad[:, 1:17, 1:17, :] = x_ref[...]

    # im2col in VMEM: 9 shifted NHWC views -> (nb*256, 288) patch, columns ordered (kh,kw,c).
    for k in range(9):
        dy, dx = k // 3, k % 3
        tap = xpad[:, dy:dy + 16, dx:dx + 16, :]                         # (nb,16,16,32)
        patch[:, k * 32:(k + 1) * 32] = tap.reshape(nb * 256, 32)

    y = jnp.dot(patch[...], w_ref[...], preferred_element_type=jnp.float32)  # (nb*256, 64)
    y = jnp.maximum(y + b_ref[...], 0.0)

    t = y.reshape(nb, 8, 2, 16, 64)
    ym = jnp.maximum(t[:, :, 0], t[:, :, 1])                             # (nb,8,16,64)
    u = ym.reshape(nb, 8, 8, 2, 64)
    pooled = jnp.maximum(u[:, :, :, 0, :], u[:, :, :, 1, :]).astype(o_ref.dtype)  # (nb,8,8,64)

    # Lane-dense store: pack (x, c) into the 512-lane minor dim -> unmasked HBM writeback,
    # and the fc head's NHWC flatten becomes a free reshape.
    for xi in range(8):
        o_ref[:, :, xi * 64:(xi + 1) * 64] = pooled[:, :, xi, :]


def conv2_call(x, w, b, *, nb):
    B = x.shape[0]
    kern = functools.partial(_conv2_kernel, nb=nb)
    return pl.pallas_call(
        kern,
        out_shape=jax.ShapeDtypeStruct((B, 8, 512), jnp.bfloat16),
        grid=(B // nb,),
        in_specs=[
            pl.BlockSpec((nb, 16, 16, 32), lambda i: (i, 0, 0, 0)),
            pl.BlockSpec((288, 64), lambda i: (0, 0)),
            pl.BlockSpec((1, 64), lambda i: (0, 0)),
        ],
        out_specs=pl.BlockSpec((nb, 8, 512), lambda i: (i, 0, 0)),
        scratch_shapes=[
            pltpu.VMEM((nb, 18, 18, 32), jnp.bfloat16),
            pltpu.VMEM((nb * 256, 288), jnp.bfloat16),
        ],
        compiler_params=pltpu.CompilerParams(
            dimension_semantics=("parallel",),
        ),
    )(x, w, b)


# ---------------------------------------------------------------------------
# Kernel 3: fused fc1 (+ReLU) and fc2 — the (B,128) intermediate never leaves VMEM.
#           fc2's N is pre-padded to 128 so the second matmul/store are unmasked.
# ---------------------------------------------------------------------------
def _fc_head_kernel(x_ref, w1_ref, b1_ref, w2_ref, b2_ref, o_ref):
    h = jnp.dot(x_ref[...], w1_ref[...], preferred_element_type=jnp.float32)
    h = jnp.maximum(h + b1_ref[...], 0.0)
    y = jnp.dot(h.astype(w2_ref.dtype), w2_ref[...], preferred_element_type=jnp.float32)
    o_ref[...] = (y + b2_ref[...]).astype(o_ref.dtype)


def fc_head(x_flat, w1, b1, w2, b2):
    B, K1 = x_flat.shape
    N1, N2 = w1.shape[1], w2.shape[1]
    return pl.pallas_call(
        _fc_head_kernel,
        out_shape=jax.ShapeDtypeStruct((B, N2), jnp.float32),
        grid=(1,),
        in_specs=[
            pl.BlockSpec((B, K1), lambda i: (0, 0)),
            pl.BlockSpec((K1, N1), lambda i: (0, 0)),
            pl.BlockSpec((1, N1), lambda i: (0, 0)),
            pl.BlockSpec((N1, N2), lambda i: (0, 0)),
            pl.BlockSpec((1, N2), lambda i: (0, 0)),
        ],
        out_specs=pl.BlockSpec((B, N2), lambda i: (0, 0)),
    )(x_flat, w1, b1, w2, b2)


# ---------------------------------------------------------------------------
# SimpleCNN forward
# ---------------------------------------------------------------------------
def _im2col_3x3(x_pad, H, W):
    """x_pad:(B,H+2,W+2,C) -> (B, H*W, 9*C) with columns ordered (kh, kw, c)."""
    B, C = x_pad.shape[0], x_pad.shape[-1]
    taps = [x_pad[:, dy:dy + H, dx:dx + W, :] for dy in range(3) for dx in range(3)]
    cols = jnp.stack(taps, axis=3)                       # (B, H, W, 9, C)
    return cols.reshape(B, H * W, 9 * C)


def simple_cnn_forward(x_nchw, p):
    """x_nchw:(B,3,32,32) f32; p = prepare_params(PyTorch-layout params)."""
    B = x_nchw.shape[0]
    nb = _pick_images_per_step(B)

    x = jnp.transpose(x_nchw, (0, 2, 3, 1)).astype(jnp.bfloat16)            # (B,32,32,3)
    xp = jnp.pad(x, ((0, 0), (1, 1), (1, 1), (0, 0)))                       # (B,34,34,3)
    cols1 = _im2col_3x3(xp, 32, 32)                                         # (B,1024,27)
    cols1 = jnp.pad(cols1, ((0, 0), (0, 0), (0, 5)))                        # (B,1024,32)

    h1 = conv1_call(cols1, p["conv1_w"], p["conv1_b"], nb=nb)               # (B,16,16,32)
    h2 = conv2_call(h1, p["conv2_w"], p["conv2_b"], nb=nb)                  # (B,8,512)

    feat = h2.reshape(B, 8 * 8 * 64)    # NHWC flatten; fc1_w columns were permuted to match
    logits = fc_head(feat, p["fc1_w"], p["fc1_b"], p["fc2_w"], p["fc2_b"])  # (B,128) f32
    return logits[:, :10]


def init_params(key):
    """PyTorch-layout parameters (same shapes / init style as the nn.Module)."""
    ks = jax.random.split(key, 8)

    def u(k, shape, fan_in):
        bound = 1.0 / jnp.sqrt(jnp.float32(fan_in))
        return jax.random.uniform(k, shape, jnp.float32, -bound, bound)

    return {
        "conv1_w": u(ks[0], (32, 3, 3, 3), 3 * 9),
        "conv1_b": u(ks[1], (32,), 3 * 9),
        "conv2_w": u(ks[2], (64, 32, 3, 3), 32 * 9),
        "conv2_b": u(ks[3], (64,), 32 * 9),
        "fc1_w": u(ks[4], (128, 64 * 8 * 8), 64 * 8 * 8),
        "fc1_b": u(ks[5], (128,), 64 * 8 * 8),
        "fc2_w": u(ks[6], (10, 128), 128),
        "fc2_b": u(ks[7], (10,), 128),
    }


def prepare_params(p):
    """One-time layout/dtype prep (outside jit): conv weights to (kh,kw,cin)-major (K,Cout)
    bf16 (conv1's K zero-padded 27->32); fc1 input columns permuted from PyTorch's NCHW
    flatten order to NHWC; fc weights pre-transposed to (K,N) bf16 with fc2's N padded
    10->128; biases as (1,N) f32 rows."""
    def conv_w(w, pad_k=None):                 # (Cout,Cin,3,3) -> (9*Cin [pad], Cout)
        cout, cin = w.shape[0], w.shape[1]
        m = jnp.transpose(w, (2, 3, 1, 0)).reshape(9 * cin, cout)
        if pad_k is not None and pad_k > 9 * cin:
            m = jnp.pad(m, ((0, pad_k - 9 * cin), (0, 0)))
        return m.astype(jnp.bfloat16)

    fc1 = p["fc1_w"].reshape(128, 64, 8, 8)            # (n, c, h, w): NCHW flatten columns
    fc1 = jnp.transpose(fc1, (0, 2, 3, 1))             # (n, h, w, c): NHWC flatten columns
    fc1 = fc1.reshape(128, 64 * 8 * 8).T.astype(jnp.bfloat16)               # (4096, 128)

    fc2 = jnp.pad(p["fc2_w"].T, ((0, 0), (0, 118))).astype(jnp.bfloat16)    # (128, 128)
    fc2_b = jnp.pad(p["fc2_b"].reshape(1, -1), ((0, 0), (0, 118))).astype(jnp.float32)

    return {
        "conv1_w": conv_w(p["conv1_w"], pad_k=32),                          # (32, 32)
        "conv1_b": p["conv1_b"].reshape(1, -1).astype(jnp.float32),
        "conv2_w": conv_w(p["conv2_w"]),                                    # (288, 64)
        "conv2_b": p["conv2_b"].reshape(1, -1).astype(jnp.float32),
        "fc1_w": fc1,
        "fc1_b": p["fc1_b"].reshape(1, -1).astype(jnp.float32),
        "fc2_w": fc2,
        "fc2_b": fc2_b,
    }


def reference_forward(x_nchw, p_raw):
    """Pure-JAX reference with the same bf16/f32 mixed precision as the kernels."""
    x = jnp.transpose(x_nchw, (0, 2, 3, 1)).astype(jnp.bfloat16)
    for wn, bn in (("conv1_w", "conv1_b"), ("conv2_w", "conv2_b")):
        w = jnp.transpose(p_raw[wn], (2, 3, 1, 0)).astype(jnp.bfloat16)     # HWIO
        y = jax.lax.conv_general_dilated(
            x, w, window_strides=(1, 1), padding="SAME",
            dimension_numbers=("NHWC", "HWIO", "NHWC"),
            preferred_element_type=jnp.float32)
        y = jnp.maximum(y + p_raw[bn].astype(jnp.float32), 0.0)
        y = jax.lax.reduce_window(y, -jnp.inf, jax.lax.max,
                                  (1, 2, 2, 1), (1, 2, 2, 1), "VALID")
        x = y.astype(jnp.bfloat16)
    feat = jnp.transpose(x, (0, 3, 1, 2)).reshape(x.shape[0], -1)           # NCHW flatten
    h = jnp.dot(feat, p_raw["fc1_w"].T.astype(jnp.bfloat16),
                preferred_element_type=jnp.float32)
    h = jnp.maximum(h + p_raw["fc1_b"], 0.0).astype(jnp.bfloat16)
    y = jnp.dot(h, p_raw["fc2_w"].T.astype(jnp.bfloat16),
                preferred_element_type=jnp.float32)
    return y + p_raw["fc2_b"]


if __name__ == "__main__":
    key = jax.random.PRNGKey(0)
    k_x, k_p = jax.random.split(key)
    # The module's fc1 (64*8*8 input features) pins the input to 32x32, 3 channels.
    x = jax.random.normal(k_x, (2, 3, 32, 32), dtype=jnp.float32)
    raw = init_params(k_p)
    params = prepare_params(raw)          # one-time weight layout/dtype prep, outside jit

    fwd = jax.jit(simple_cnn_forward)
    out = jax.block_until_ready(fwd(x, params))
    assert out.shape == (2, 10)
    assert bool(jnp.all(jnp.isfinite(out)))

    ref = jax.block_until_ready(reference_forward(x, raw))
    assert jnp.allclose(out, ref.astype(jnp.float32), atol=2e-2, rtol=2e-2), (
        "max abs diff vs reference: %f" % float(jnp.max(jnp.abs(out - ref))))
    print("KERNEL_OK")
</pallas_src>

<mosaic_0001>
module attributes {stable_mosaic.version = 11 : i64} {
  func.func @_conv1_kernel(%arg0: i32, %arg1: memref<1x1024x32xbf16, #tpu.memory_space<vmem>>, %arg2: memref<32x32xbf16, #tpu.memory_space<vmem>>, %arg3: memref<1x32xf32, #tpu.memory_space<vmem>>, %arg4: memref<1x16x16x32xbf16, #tpu.memory_space<vmem>>) attributes {dimension_semantics = [#tpu.dimension_semantics<parallel>], iteration_bounds = array<i64: 2>, scalar_prefetch = 0 : i64, scratch_operands = 0 : i64, tpu.core_type = #tpu.core_type<tc>, window_params = [{transform_indices = @transform_0, window_bounds = array<i64: 1, 1024, 32>}, {pipeline_mode = #tpu.pipeline_mode<synchronous>, transform_indices = @transform_1, window_bounds = array<i64: 32, 32>}, {pipeline_mode = #tpu.pipeline_mode<synchronous>, transform_indices = @transform_2, window_bounds = array<i64: 1, 32>}, {transform_indices = @transform_3, window_bounds = array<i64: 1, 16, 16, 32>}]} {
    %c0 = arith.constant 0 : index
    %c0_0 = arith.constant 0 : index
    %c0_1 = arith.constant 0 : index
    %0 = vector.load %arg1[%c0, %c0_0, %c0_1] : memref<1x1024x32xbf16, #tpu.memory_space<vmem>>, vector<1x1024x32xbf16>
    %1 = vector.shape_cast %0 : vector<1x1024x32xbf16> to vector<1024x32xbf16>
    %c0_2 = arith.constant 0 : index
    %c0_3 = arith.constant 0 : index
    %2 = vector.load %arg2[%c0_2, %c0_3] : memref<32x32xbf16, #tpu.memory_space<vmem>>, vector<32x32xbf16>
    %cst = arith.constant dense<0.000000e+00> : vector<1024x32xf32>
    %3 = tpu.matmul %1, %2, %cst {dimension_numbers = #tpu.dot_dimension_numbers<[1], [0], [0], [1], [0, 0, 1, 1], [], []>} : vector<1024x32xbf16>, vector<32x32xbf16>, vector<1024x32xf32> -> vector<1024x32xf32>
    %c0_4 = arith.constant 0 : index
    %c0_5 = arith.constant 0 : index
    %4 = vector.load %arg3[%c0_4, %c0_5] : memref<1x32xf32, #tpu.memory_space<vmem>>, vector<1x32xf32>
    %5 = vector.broadcast %4 : vector<1x32xf32> to vector<1024x32xf32>
    %6 = arith.addf %3, %5 : vector<1024x32xf32>
    %cst_6 = arith.constant 0.000000e+00 : f32
    %7 = vector.broadcast %cst_6 : f32 to vector<1024x32xf32>
    %8 = arith.maximumf %6, %7 : vector<1024x32xf32>
    %9 = vector.shape_cast %8 : vector<1024x32xf32> to vector<1x16x2x32x32xf32>
    %10 = vector.extract_strided_slice %9 {offsets = [0, 0, 0, 0, 0], sizes = [1, 16, 1, 32, 32], strides = [1, 1, 1, 1, 1]} : vector<1x16x2x32x32xf32> to vector<1x16x1x32x32xf32>
    %11 = vector.shape_cast %10 : vector<1x16x1x32x32xf32> to vector<1x16x32x32xf32>
    %12 = vector.extract_strided_slice %9 {offsets = [0, 0, 1, 0, 0], sizes = [1, 16, 1, 32, 32], strides = [1, 1, 1, 1, 1]} : vector<1x16x2x32x32xf32> to vector<1x16x1x32x32xf32>
    %13 = vector.shape_cast %12 : vector<1x16x1x32x32xf32> to vector<1x16x32x32xf32>
    %14 = arith.maximumf %11, %13 : vector<1x16x32x32xf32>
    %15 = vector.shape_cast %14 : vector<1x16x32x32xf32> to vector<1x16x16x2x32xf32>
    %16 = vector.extract_strided_slice %15 {offsets = [0, 0, 0, 0, 0], sizes = [1, 16, 16, 1, 32], strides = [1, 1, 1, 1, 1]} : vector<1x16x16x2x32xf32> to vector<1x16x16x1x32xf32>
    %17 = vector.shape_cast %16 : vector<1x16x16x1x32xf32> to vector<1x16x16x32xf32>
    %18 = vector.extract_strided_slice %15 {offsets = [0, 0, 0, 1, 0], sizes = [1, 16, 16, 1, 32], strides = [1, 1, 1, 1, 1]} : vector<1x16x16x2x32xf32> to vector<1x16x16x1x32xf32>
    %19 = vector.shape_cast %18 : vector<1x16x16x1x32xf32> to vector<1x16x16x32xf32>
    %20 = arith.maximumf %17, %19 : vector<1x16x16x32xf32>
    %21 = arith.truncf %20 : vector<1x16x16x32xf32> to vector<1x16x16x32xbf16>
    %c0_7 = arith.constant 0 : index
    %c0_8 = arith.constant 0 : index
    %c0_9 = arith.constant 0 : index
    %c0_10 = arith.constant 0 : index
    %22 = vector.load %arg4[%c0_7, %c0_8, %c0_9, %c0_10] : memref<1x16x16x32xbf16, #tpu.memory_space<vmem>>, vector<1x16x16x32xbf16>
    tpu.vector_store %arg4[%c0_7, %c0_8, %c0_9, %c0_10], %21 {strides = array<i32>} : memref<1x16x16x32xbf16, #tpu.memory_space<vmem>>, vector<1x16x16x32xbf16>,
    return
  }
  func.func @transform_0(%arg0: i32) -> (i32, i32, i32) {
    %c0_i32 = arith.constant 0 : i32
    %c0_i32_0 = arith.constant 0 : i32
    %c0_i32_1 = arith.constant 0 : i32
    return %arg0, %c0_i32, %c0_i32_0 : i32, i32, i32
  }
  func.func @transform_1(%arg0: i32) -> (i32, i32) {
    %c0_i32 = arith.constant 0 : i32
    %c0_i32_0 = arith.constant 0 : i32
    %c0_i32_1 = arith.constant 0 : i32
    return %c0_i32, %c0_i32_0 : i32, i32
  }
  func.func @transform_2(%arg0: i32) -> (i32, i32) {
    %c0_i32 = arith.constant 0 : i32
    %c0_i32_0 = arith.constant 0 : i32
    %c0_i32_1 = arith.constant 0 : i32
    return %c0_i32, %c0_i32_0 : i32, i32
  }
  func.func @transform_3(%arg0: i32) -> (i32, i32, i32, i32) {
    %c0_i32 = arith.constant 0 : i32
    %c0_i32_0 = arith.constant 0 : i32
    %c0_i32_1 = arith.constant 0 : i32
    %c0_i32_2 = arith.constant 0 : i32
    return %arg0, %c0_i32, %c0_i32_0, %c0_i32_1 : i32, i32, i32, i32
  }
}

module attributes {stable_mosaic.version = 11 : i64} {
  func.func @_conv2_kernel(%arg0: i32, %arg1: memref<1x16x16x32xbf16, #tpu.memory_space<vmem>>, %arg2: memref<288x64xbf16, #tpu.memory_space<vmem>>, %arg3: memref<1x64xf32, #tpu.memory_space<vmem>>, %arg4: memref<1x8x512xbf16, #tpu.memory_space<vmem>>, %arg5: memref<1x18x18x32xbf16, #tpu.memory_space<vmem>>, %arg6: memref<256x288xbf16, #tpu.memory_space<vmem>>) attributes {dimension_semantics = [#tpu.dimension_semantics<parallel>], iteration_bounds = array<i64: 2>, scalar_prefetch = 0 : i64, scratch_operands = 2 : i64, tpu.core_type = #tpu.core_type<tc>, window_params = [{transform_indices = @transform_0, window_bounds = array<i64: 1, 16, 16, 32>}, {pipeline_mode = #tpu.pipeline_mode<synchronous>, transform_indices = @transform_1, window_bounds = array<i64: 288, 64>}, {pipeline_mode = #tpu.pipeline_mode<synchronous>, transform_indices = @transform_2, window_bounds = array<i64: 1, 64>}, {transform_indices = @transform_3, window_bounds = array<i64: 1, 8, 512>}]} {
    %cst = arith.constant 0.000000e+00 : bf16
    %0 = vector.broadcast %cst : bf16 to vector<1x1x18x32xbf16>
    %cst_0 = arith.constant 0.000000e+00 : bf16
    %1 = vector.broadcast %cst_0 : bf16 to vector<1x18x1x32xbf16>
    %c0 = arith.constant 0 : index
    %c0_1 = arith.constant 0 : index
    %c0_2 = arith.constant 0 : index
    %c0_3 = arith.constant 0 : index
    %2 = vector.load %arg5[%c0, %c0_1, %c0_2, %c0_3] : memref<1x18x18x32xbf16, #tpu.memory_space<vmem>>, vector<1x1x18x32xbf16>
    tpu.vector_store %arg5[%c0, %c0_1, %c0_2, %c0_3], %0 {strides = array<i32>} : memref<1x18x18x32xbf16, #tpu.memory_space<vmem>>, vector<1x1x18x32xbf16>,
    %c0_4 = arith.constant 0 : index
    %c17 = arith.constant 17 : index
    %c0_5 = arith.constant 0 : index
    %c0_6 = arith.constant 0 : index
    %3 = vector.load %arg5[%c0_4, %c17, %c0_5, %c0_6] : memref<1x18x18x32xbf16, #tpu.memory_space<vmem>>, vector<1x1x18x32xbf16>
    tpu.vector_store %arg5[%c0_4, %c17, %c0_5, %c0_6], %0 {strides = array<i32>} : memref<1x18x18x32xbf16, #tpu.memory_space<vmem>>, vector<1x1x18x32xbf16>,
    %c0_7 = arith.constant 0 : index
    %c0_8 = arith.constant 0 : index
    %c0_9 = arith.constant 0 : index
    %c0_10 = arith.constant 0 : index
    %4 = vector.load %arg5[%c0_7, %c0_8, %c0_9, %c0_10] : memref<1x18x18x32xbf16, #tpu.memory_space<vmem>>, vector<1x18x1x32xbf16>
    tpu.vector_store %arg5[%c0_7, %c0_8, %c0_9, %c0_10], %1 {strides = array<i32>} : memref<1x18x18x32xbf16, #tpu.memory_space<vmem>>, vector<1x18x1x32xbf16>,
    %c0_11 = arith.constant 0 : index
    %c0_12 = arith.constant 0 : index
    %c17_13 = arith.constant 17 : index
    %c0_14 = arith.constant 0 : index
    %5 = vector.load %arg5[%c0_11, %c0_12, %c17_13, %c0_14] : memref<1x18x18x32xbf16, #tpu.memory_space<vmem>>, vector<1x18x1x32xbf16>
    tpu.vector_store %arg5[%c0_11, %c0_12, %c17_13, %c0_14], %1 {strides = array<i32>} : memref<1x18x18x32xbf16, #tpu.memory_space<vmem>>, vector<1x18x1x32xbf16>,
    %c0_15 = arith.constant 0 : index
    %c0_16 = arith.constant 0 : index
    %c0_17 = arith.constant 0 : index
    %c0_18 = arith.constant 0 : index
    %6 = vector.load %arg1[%c0_15, %c0_16, %c0_17, %c0_18] : memref<1x16x16x32xbf16, #tpu.memory_space<vmem>>, vector<1x16x16x32xbf16>
    %c0_19 = arith.constant 0 : index
    %c1 = arith.constant 1 : index
    %c1_20 = arith.constant 1 : index
    %c0_21 = arith.constant 0 : index
    %7 = vector.load %arg5[%c0_19, %c1, %c1_20, %c0_21] : memref<1x18x18x32xbf16, #tpu.memory_space<vmem>>, vector<1x16x16x32xbf16>
    tpu.vector_store %arg5[%c0_19, %c1, %c1_20, %c0_21], %6 {strides = array<i32>} : memref<1x18x18x32xbf16, #tpu.memory_space<vmem>>, vector<1x16x16x32xbf16>,
    %c0_22 = arith.constant 0 : index
    %c0_23 = arith.constant 0 : index
    %c0_24 = arith.constant 0 : index
    %c0_25 = arith.constant 0 : index
    %8 = vector.load %arg5[%c0_22, %c0_23, %c0_24, %c0_25] : memref<1x18x18x32xbf16, #tpu.memory_space<vmem>>, vector<1x16x16x32xbf16>
    %9 = vector.shape_cast %8 : vector<1x16x16x32xbf16> to vector<256x32xbf16>
    %c0_26 = arith.constant 0 : index
    %c0_27 = arith.constant 0 : index
    %10 = vector.load %arg6[%c0_26, %c0_27] : memref<256x288xbf16, #tpu.memory_space<vmem>>, vector<256x32xbf16>
    tpu.vector_store %arg6[%c0_26, %c0_27], %9 {strides = array<i32>} : memref<256x288xbf16, #tpu.memory_space<vmem>>, vector<256x32xbf16>,
    %c0_28 = arith.constant 0 : index
    %c0_29 = arith.constant 0 : index
    %c1_30 = arith.constant 1 : index
    %c0_31 = arith.constant 0 : index
    %11 = vector.load %arg5[%c0_28, %c0_29, %c1_30, %c0_31] : memref<1x18x18x32xbf16, #tpu.memory_space<vmem>>, vector<1x16x16x32xbf16>
    %12 = vector.shape_cast %11 : vector<1x16x16x32xbf16> to vector<256x32xbf16>
    %c0_32 = arith.constant 0 : index
    %c32 = arith.constant 32 : index
    %13 = vector.load %arg6[%c0_32, %c32] : memref<256x288xbf16, #tpu.memory_space<vmem>>, vector<256x32xbf16>
    tpu.vector_store %arg6[%c0_32, %c32], %12 {strides = array<i32>} : memref<256x288xbf16, #tpu.memory_space<vmem>>, vector<256x32xbf16>,
    %c0_33 = arith.constant 0 : index
    %c0_34 = arith.constant 0 : index
    %c2 = arith.constant 2 : index
    %c0_35 = arith.constant 0 : index
    %14 = vector.load %arg5[%c0_33, %c0_34, %c2, %c0_35] : memref<1x18x18x32xbf16, #tpu.memory_space<vmem>>, vector<1x16x16x32xbf16>
    %15 = vector.shape_cast %14 : vector<1x16x16x32xbf16> to vector<256x32xbf16>
    %c0_36 = arith.constant 0 : index
    %c64 = arith.constant 64 : index
    %16 = vector.load %arg6[%c0_36, %c64] : memref<256x288xbf16, #tpu.memory_space<vmem>>, vector<256x32xbf16>
    tpu.vector_store %arg6[%c0_36, %c64], %15 {strides = array<i32>} : memref<256x288xbf16, #tpu.memory_space<vmem>>, vector<256x32xbf16>,
    %c0_37 = arith.constant 0 : index
    %c1_38 = arith.constant 1 : index
    %c0_39 = arith.constant 0 : index
    %c0_40 = arith.constant 0 : index
    %17 = vector.load %arg5[%c0_37, %c1_38, %c0_39, %c0_40] : memref<1x18x18x32xbf16, #tpu.memory_space<vmem>>, vector<1x16x16x32xbf16>
    %18 = vector.shape_cast %17 : vector<1x16x16x32xbf16> to vector<256x32xbf16>
    %c0_41 = arith.constant 0 : index
    %c96 = arith.constant 96 : index
    %19 = vector.load %arg6[%c0_41, %c96] : memref<256x288xbf16, #tpu.memory_space<vmem>>, vector<256x32xbf16>
    tpu.vector_store %arg6[%c0_41, %c96], %18 {strides = array<i32>} : memref<256x288xbf16, #tpu.memory_space<vmem>>, vector<256x32xbf16>,
    %c0_42 = arith.constant 0 : index
    %c1_43 = arith.constant 1 : index
    %c1_44 = arith.constant 1 : index
    %c0_45 = arith.constant 0 : index
    %20 = vector.load %arg5[%c0_42, %c1_43, %c1_44, %c0_45] : memref<1x18x18x32xbf16, #tpu.memory_space<vmem>>, vector<1x16x16x32xbf16>
    %21 = vector.shape_cast %20 : vector<1x16x16x32xbf16> to vector<256x32xbf16>
    %c0_46 = arith.constant 0 : index
    %c128 = arith.constant 128 : index
    %22 = vector.load %arg6[%c0_46, %c128] : memref<256x288xbf16, #tpu.memory_space<vmem>>, vector<256x32xbf16>
    tpu.vector_store %arg6[%c0_46, %c128], %21 {strides = array<i32>} : memref<256x288xbf16, #tpu.memory_space<vmem>>, vector<256x32xbf16>,
    %c0_47 = arith.constant 0 : index
    %c1_48 = arith.constant 1 : index
    %c2_49 = arith.constant 2 : index
    %c0_50 = arith.constant 0 : index
    %23 = vector.load %arg5[%c0_47, %c1_48, %c2_49, %c0_50] : memref<1x18x18x32xbf16, #tpu.memory_space<vmem>>, vector<1x16x16x32xbf16>
    %24 = vector.shape_cast %23 : vector<1x16x16x32xbf16> to vector<256x32xbf16>
    %c0_51 = arith.constant 0 : index
    %c160 = arith.constant 160 : index
    %25 = vector.load %arg6[%c0_51, %c160] : memref<256x288xbf16, #tpu.memory_space<vmem>>, vector<256x32xbf16>
    tpu.vector_store %arg6[%c0_51, %c160], %24 {strides = array<i32>} : memref<256x288xbf16, #tpu.memory_space<vmem>>, vector<256x32xbf16>,
    %c0_52 = arith.constant 0 : index
    %c2_53 = arith.constant 2 : index
    %c0_54 = arith.constant 0 : index
    %c0_55 = arith.constant 0 : index
    %26 = vector.load %arg5[%c0_52, %c2_53, %c0_54, %c0_55] : memref<1x18x18x32xbf16, #tpu.memory_space<vmem>>, vector<1x16x16x32xbf16>
    %27 = vector.shape_cast %26 : vector<1x16x16x32xbf16> to vector<256x32xbf16>
    %c0_56 = arith.constant 0 : index
    %c192 = arith.constant 192 : index
    %28 = vector.load %arg6[%c0_56, %c192] : memref<256x288xbf16, #tpu.memory_space<vmem>>, vector<256x32xbf16>
    tpu.vector_store %arg6[%c0_56, %c192], %27 {strides = array<i32>} : memref<256x288xbf16, #tpu.memory_space<vmem>>, vector<256x32xbf16>,
    %c0_57 = arith.constant 0 : index
    %c2_58 = arith.constant 2 : index
    %c1_59 = arith.constant 1 : index
    %c0_60 = arith.constant 0 : index
    %29 = vector.load %arg5[%c0_57, %c2_58, %c1_59, %c0_60] : memref<1x18x18x32xbf16, #tpu.memory_space<vmem>>, vector<1x16x16x32xbf16>
    %30 = vector.shape_cast %29 : vector<1x16x16x32xbf16> to vector<256x32xbf16>
    %c0_61 = arith.constant 0 : index
    %c224 = arith.constant 224 : index
    %31 = vector.load %arg6[%c0_61, %c224] : memref<256x288xbf16, #tpu.memory_space<vmem>>, vector<256x32xbf16>
    tpu.vector_store %arg6[%c0_61, %c224], %30 {strides = array<i32>} : memref<256x288xbf16, #tpu.memory_space<vmem>>, vector<256x32xbf16>,
    %c0_62 = arith.constant 0 : index
    %c2_63 = arith.constant 2 : index
    %c2_64 = arith.constant 2 : index
    %c0_65 = arith.constant 0 : index
    %32 = vector.load %arg5[%c0_62, %c2_63, %c2_64, %c0_65] : memref<1x18x18x32xbf16, #tpu.memory_space<vmem>>, vector<1x16x16x32xbf16>
    %33 = vector.shape_cast %32 : vector<1x16x16x32xbf16> to vector<256x32xbf16>
    %c0_66 = arith.constant 0 : index
    %c256 = arith.constant 256 : index
    %34 = vector.load %arg6[%c0_66, %c256] : memref<256x288xbf16, #tpu.memory_space<vmem>>, vector<256x32xbf16>
    tpu.vector_store %arg6[%c0_66, %c256], %33 {strides = array<i32>} : memref<256x288xbf16, #tpu.memory_space<vmem>>, vector<256x32xbf16>,
    %c0_67 = arith.constant 0 : index
    %c0_68 = arith.constant 0 : index
    %35 = vector.load %arg6[%c0_67, %c0_68] : memref<256x288xbf16, #tpu.memory_space<vmem>>, vector<256x288xbf16>
    %c0_69 = arith.constant 0 : index
    %c0_70 = arith.constant 0 : index
    %36 = vector.load %arg2[%c0_69, %c0_70] : memref<288x64xbf16, #tpu.memory_space<vmem>>, vector<288x64xbf16>
    %cst_71 = arith.constant dense<0.000000e+00> : vector<256x64xf32>
    %37 = tpu.matmul %35, %36, %cst_71 {dimension_numbers = #tpu.dot_dimension_numbers<[1], [0], [0], [1], [0, 0, 1, 1], [], []>} : vector<256x288xbf16>, vector<288x64xbf16>, vector<256x64xf32> -> vector<256x64xf32>
    %c0_72 = arith.constant 0 : index
    %c0_73 = arith.constant 0 : index
    %38 = vector.load %arg3[%c0_72, %c0_73] : memref<1x64xf32, #tpu.memory_space<vmem>>, vector<1x64xf32>
    %39 = vector.broadcast %38 : vector<1x64xf32> to vector<256x64xf32>
    %40 = arith.addf %37, %39 : vector<256x64xf32>
    %cst_74 = arith.constant 0.000000e+00 : f32
    %41 = vector.broadcast %cst_74 : f32 to vector<256x64xf32>
    %42 = arith.maximumf %40, %41 : vector<256x64xf32>
    %43 = vector.shape_cast %42 : vector<256x64xf32> to vector<1x8x2x16x64xf32>
    %44 = vector.extract_strided_slice %43 {offsets = [0, 0, 0, 0, 0], sizes = [1, 8, 1, 16, 64], strides = [1, 1, 1, 1, 1]} : vector<1x8x2x16x64xf32> to vector<1x8x1x16x64xf32>
    %45 = vector.shape_cast %44 : vector<1x8x1x16x64xf32> to vector<1x8x16x64xf32>
    %46 = vector.extract_strided_slice %43 {offsets = [0, 0, 1, 0, 0], sizes = [1, 8, 1, 16, 64], strides = [1, 1, 1, 1, 1]} : vector<1x8x2x16x64xf32> to vector<1x8x1x16x64xf32>
    %47 = vector.shape_cast %46 : vector<1x8x1x16x64xf32> to vector<1x8x16x64xf32>
    %48 = arith.maximumf %45, %47 : vector<1x8x16x64xf32>
    %49 = vector.shape_cast %48 : vector<1x8x16x64xf32> to vector<1x8x8x2x64xf32>
    %50 = vector.extract_strided_slice %49 {offsets = [0, 0, 0, 0, 0], sizes = [1, 8, 8, 1, 64], strides = [1, 1, 1, 1, 1]} : vector<1x8x8x2x64xf32> to vector<1x8x8x1x64xf32>
    %51 = vector.shape_cast %50 : vector<1x8x8x1x64xf32> to vector<1x8x8x64xf32>
    %52 = vector.extract_strided_slice %49 {offsets = [0, 0, 0, 1, 0], sizes = [1, 8, 8, 1, 64], strides = [1, 1, 1, 1, 1]} : vector<1x8x8x2x64xf32> to vector<1x8x8x1x64xf32>
    %53 = vector.shape_cast %52 : vector<1x8x8x1x64xf32> to vector<1x8x8x64xf32>
    %54 = arith.maximumf %51, %53 : vector<1x8x8x64xf32>
    %55 = arith.truncf %54 : vector<1x8x8x64xf32> to vector<1x8x8x64xbf16>
    %56 = vector.extract_strided_slice %55 {offsets = [0, 0, 0, 0], sizes = [1, 8, 1, 64], strides = [1, 1, 1, 1]} : vector<1x8x8x64xbf16> to vector<1x8x1x64xbf16>
    %57 = vector.shape_cast %56 : vector<1x8x1x64xbf16> to vector<1x8x64xbf16>
    %c0_75 = arith.constant 0 : index
    %c0_76 = arith.constant 0 : index
    %c0_77 = arith.constant 0 : index
    %58 = vector.load %arg4[%c0_75, %c0_76, %c0_77] : memref<1x8x512xbf16, #tpu.memory_space<vmem>>, vector<1x8x64xbf16>
    tpu.vector_store %arg4[%c0_75, %c0_76, %c0_77], %57 {strides = array<i32>} : memref<1x8x512xbf16, #tpu.memory_space<vmem>>, vector<1x8x64xbf16>,
    %59 = vector.extract_strided_slice %55 {offsets = [0, 0, 1, 0], sizes = [1, 8, 1, 64], strides = [1, 1, 1, 1]} : vector<1x8x8x64xbf16> to vector<1x8x1x64xbf16>
    %60 = vector.shape_cast %59 : vector<1x8x1x64xbf16> to vector<1x8x64xbf16>
    %c0_78 = arith.constant 0 : index
    %c0_79 = arith.constant 0 : index
    %c64_80 = arith.constant 64 : index
    %61 = vector.load %arg4[%c0_78, %c0_79, %c64_80] : memref<1x8x512xbf16, #tpu.memory_space<vmem>>, vector<1x8x64xbf16>
    tpu.vector_store %arg4[%c0_78, %c0_79, %c64_80], %60 {strides = array<i32>} : memref<1x8x512xbf16, #tpu.memory_space<vmem>>, vector<1x8x64xbf16>,
    %62 = vector.extract_strided_slice %55 {offsets = [0, 0, 2, 0], sizes = [1, 8, 1, 64], strides = [1, 1, 1, 1]} : vector<1x8x8x64xbf16> to vector<1x8x1x64xbf16>
    %63 = vector.shape_cast %62 : vector<1x8x1x64xbf16> to vector<1x8x64xbf16>
    %c0_81 = arith.constant 0 : index
    %c0_82 = arith.constant 0 : index
    %c128_83 = arith.constant 128 : index
    %64 = vector.load %arg4[%c0_81, %c0_82, %c128_83] : memref<1x8x512xbf16, #tpu.memory_space<vmem>>, vector<1x8x64xbf16>
    tpu.vector_store %arg4[%c0_81, %c0_82, %c128_83], %63 {strides = array<i32>} : memref<1x8x512xbf16, #tpu.memory_space<vmem>>, vector<1x8x64xbf16>,
    %65 = vector.extract_strided_slice %55 {offsets = [0, 0, 3, 0], sizes = [1, 8, 1, 64], strides = [1, 1, 1, 1]} : vector<1x8x8x64xbf16> to vector<1x8x1x64xbf16>
    %66 = vector.shape_cast %65 : vector<1x8x1x64xbf16> to vector<1x8x64xbf16>
    %c0_84 = arith.constant 0 : index
    %c0_85 = arith.constant 0 : index
    %c192_86 = arith.constant 192 : index
    %67 = vector.load %arg4[%c0_84, %c0_85, %c192_86] : memref<1x8x512xbf16, #tpu.memory_space<vmem>>, vector<1x8x64xbf16>
    tpu.vector_store %arg4[%c0_84, %c0_85, %c192_86], %66 {strides = array<i32>} : memref<1x8x512xbf16, #tpu.memory_space<vmem>>, vector<1x8x64xbf16>,
    %68 = vector.extract_strided_slice %55 {offsets = [0, 0, 4, 0], sizes = [1, 8, 1, 64], strides = [1, 1, 1, 1]} : vector<1x8x8x64xbf16> to vector<1x8x1x64xbf16>
    %69 = vector.shape_cast %68 : vector<1x8x1x64xbf16> to vector<1x8x64xbf16>
    %c0_87 = arith.constant 0 : index
    %c0_88 = arith.constant 0 : index
    %c256_89 = arith.constant 256 : index
    %70 = vector.load %arg4[%c0_87, %c0_88, %c256_89] : memref<1x8x512xbf16, #tpu.memory_space<vmem>>, vector<1x8x64xbf16>
    tpu.vector_store %arg4[%c0_87, %c0_88, %c256_89], %69 {strides = array<i32>} : memref<1x8x512xbf16, #tpu.memory_space<vmem>>, vector<1x8x64xbf16>,
    %71 = vector.extract_strided_slice %55 {offsets = [0, 0, 5, 0], sizes = [1, 8, 1, 64], strides = [1, 1, 1, 1]} : vector<1x8x8x64xbf16> to vector<1x8x1x64xbf16>
    %72 = vector.shape_cast %71 : vector<1x8x1x64xbf16> to vector<1x8x64xbf16>
    %c0_90 = arith.constant 0 : index
    %c0_91 = arith.constant 0 : index
    %c320 = arith.constant 320 : index
    %73 = vector.load %arg4[%c0_90, %c0_91, %c320] : memref<1x8x512xbf16, #tpu.memory_space<vmem>>, vector<1x8x64xbf16>
    tpu.vector_store %arg4[%c0_90, %c0_91, %c320], %72 {strides = array<i32>} : memref<1x8x512xbf16, #tpu.memory_space<vmem>>, vector<1x8x64xbf16>,
    %74 = vector.extract_strided_slice %55 {offsets = [0, 0, 6, 0], sizes = [1, 8, 1, 64], strides = [1, 1, 1, 1]} : vector<1x8x8x64xbf16> to vector<1x8x1x64xbf16>
    %75 = vector.shape_cast %74 : vector<1x8x1x64xbf16> to vector<1x8x64xbf16>
    %c0_92 = arith.constant 0 : index
    %c0_93 = arith.constant 0 : index
    %c384 = arith.constant 384 : index
    %76 = vector.load %arg4[%c0_92, %c0_93, %c384] : memref<1x8x512xbf16, #tpu.memory_space<vmem>>, vector<1x8x64xbf16>
    tpu.vector_store %arg4[%c0_92, %c0_93, %c384], %75 {strides = array<i32>} : memref<1x8x512xbf16, #tpu.memory_space<vmem>>, vector<1x8x64xbf16>,
    %77 = vector.extract_strided_slice %55 {offsets = [0, 0, 7, 0], sizes = [1, 8, 1, 64], strides = [1, 1, 1, 1]} : vector<1x8x8x64xbf16> to vector<1x8x1x64xbf16>
    %78 = vector.shape_cast %77 : vector<1x8x1x64xbf16> to vector<1x8x64xbf16>
    %c0_94 = arith.constant 0 : index
    %c0_95 = arith.constant 0 : index
    %c448 = arith.constant 448 : index
    %79 = vector.load %arg4[%c0_94, %c0_95, %c448] : memref<1x8x512xbf16, #tpu.memory_space<vmem>>, vector<1x8x64xbf16>
    tpu.vector_store %arg4[%c0_94, %c0_95, %c448], %78 {strides = array<i32>} : memref<1x8x512xbf16, #tpu.memory_space<vmem>>, vector<1x8x64xbf16>,
    return
  }
  func.func @transform_0(%arg0: i32) -> (i32, i32, i32, i32) {
    %c0_i32 = arith.constant 0 : i32
    %c0_i32_0 = arith.constant 0 : i32
    %c0_i32_1 = arith.constant 0 : i32
    %c0_i32_2 = arith.constant 0 : i32
    return %arg0, %c0_i32, %c0_i32_0, %c0_i32_1 : i32, i32, i32, i32
  }
  func.func @transform_1(%arg0: i32) -> (i32, i32) {
    %c0_i32 = arith.constant 0 : i32
    %c0_i32_0 = arith.constant 0 : i32
    %c0_i32_1 = arith.constant 0 : i32
    return %c0_i32, %c0_i32_0 : i32, i32
  }
  func.func @transform_2(%arg0: i32) -> (i32, i32) {
    %c0_i32 = arith.constant 0 : i32
    %c0_i32_0 = arith.constant 0 : i32
    %c0_i32_1 = arith.constant 0 : i32
    return %c0_i32, %c0_i32_0 : i32, i32
  }
  func.func @transform_3(%arg0: i32) -> (i32, i32, i32) {
    %c0_i32 = arith.constant 0 : i32
    %c0_i32_0 = arith.constant 0 : i32
    %c0_i32_1 = arith.constant 0 : i32
    return %arg0, %c0_i32, %c0_i32_0 : i32, i32, i32
  }
}

module attributes {stable_mosaic.version = 11 : i64} {
  func.func @_fc_head_kernel(%arg0: i32, %arg1: memref<2x4096xbf16, #tpu.memory_space<vmem>>, %arg2: memref<4096x128xbf16, #tpu.memory_space<vmem>>, %arg3: memref<1x128xf32, #tpu.memory_space<vmem>>, %arg4: memref<128x128xbf16, #tpu.memory_space<vmem>>, %arg5: memref<1x128xf32, #tpu.memory_space<vmem>>, %arg6: memref<2x128xf32, #tpu.memory_space<vmem>>) attributes {dimension_semantics = [#tpu.dimension_semantics<arbitrary>], iteration_bounds = array<i64: 1>, scalar_prefetch = 0 : i64, scratch_operands = 0 : i64, tpu.core_type = #tpu.core_type<tc>, window_params = [{pipeline_mode = #tpu.pipeline_mode<synchronous>, transform_indices = @transform_0, window_bounds = array<i64: 2, 4096>}, {pipeline_mode = #tpu.pipeline_mode<synchronous>, transform_indices = @transform_1, window_bounds = array<i64: 4096, 128>}, {pipeline_mode = #tpu.pipeline_mode<synchronous>, transform_indices = @transform_2, window_bounds = array<i64: 1, 128>}, {pipeline_mode = #tpu.pipeline_mode<synchronous>, transform_indices = @transform_3, window_bounds = array<i64: 128, 128>}, {pipeline_mode = #tpu.pipeline_mode<synchronous>, transform_indices = @transform_4, window_bounds = array<i64: 1, 128>}, {pipeline_mode = #tpu.pipeline_mode<synchronous>, transform_indices = @transform_5, window_bounds = array<i64: 2, 128>}]} {
    %c0 = arith.constant 0 : index
    %c0_0 = arith.constant 0 : index
    %0 = vector.load %arg1[%c0, %c0_0] : memref<2x4096xbf16, #tpu.memory_space<vmem>>, vector<2x4096xbf16>
    %c0_1 = arith.constant 0 : index
    %c0_2 = arith.constant 0 : index
    %1 = vector.load %arg2[%c0_1, %c0_2] : memref<4096x128xbf16, #tpu.memory_space<vmem>>, vector<4096x128xbf16>
    %cst = arith.constant dense<0.000000e+00> : vector<2x128xf32>
    %2 = tpu.matmul %0, %1, %cst {dimension_numbers = #tpu.dot_dimension_numbers<[1], [0], [0], [1], [0, 0, 1, 1], [], []>} : vector<2x4096xbf16>, vector<4096x128xbf16>, vector<2x128xf32> -> vector<2x128xf32>
    %c0_3 = arith.constant 0 : index
    %c0_4 = arith.constant 0 : index
    %3 = vector.load %arg3[%c0_3, %c0_4] : memref<1x128xf32, #tpu.memory_space<vmem>>, vector<1x128xf32>
    %4 = vector.broadcast %3 : vector<1x128xf32> to vector<2x128xf32>
    %5 = arith.addf %2, %4 : vector<2x128xf32>
    %cst_5 = arith.constant 0.000000e+00 : f32
    %6 = vector.broadcast %cst_5 : f32 to vector<2x128xf32>
    %7 = arith.maximumf %5, %6 : vector<2x128xf32>
    %8 = arith.truncf %7 : vector<2x128xf32> to vector<2x128xbf16>
    %c0_6 = arith.constant 0 : index
    %c0_7 = arith.constant 0 : index
    %9 = vector.load %arg4[%c0_6, %c0_7] : memref<128x128xbf16, #tpu.memory_space<vmem>>, vector<128x128xbf16>
    %cst_8 = arith.constant dense<0.000000e+00> : vector<2x128xf32>
    %10 = tpu.matmul %8, %9, %cst_8 {dimension_numbers = #tpu.dot_dimension_numbers<[1], [0], [0], [1], [0, 0, 1, 1], [], []>} : vector<2x128xbf16>, vector<128x128xbf16>, vector<2x128xf32> -> vector<2x128xf32>
    %c0_9 = arith.constant 0 : index
    %c0_10 = arith.constant 0 : index
    %11 = vector.load %arg5[%c0_9, %c0_10] : memref<1x128xf32, #tpu.memory_space<vmem>>, vector<1x128xf32>
    %12 = vector.broadcast %11 : vector<1x128xf32> to vector<2x128xf32>
    %13 = arith.addf %10, %12 : vector<2x128xf32>
    %c0_11 = arith.constant 0 : index
    %c0_12 = arith.constant 0 : index
    %14 = vector.load %arg6[%c0_11, %c0_12] : memref<2x128xf32, #tpu.memory_space<vmem>>, vector<2x128xf32>
    tpu.vector_store %arg6[%c0_11, %c0_12], %13 {strides = array<i32>} : memref<2x128xf32, #tpu.memory_space<vmem>>, vector<2x128xf32>,
    return
  }
  func.func @transform_0(%arg0: i32) -> (i32, i32) {
    %c0_i32 = arith.constant 0 : i32
    %c0_i32_0 = arith.constant 0 : i32
    %c0_i32_1 = arith.constant 0 : i32
    return %c0_i32, %c0_i32_0 : i32, i32
  }
  func.func @transform_1(%arg0: i32) -> (i32, i32) {
    %c0_i32 = arith.constant 0 : i32
    %c0_i32_0 = arith.constant 0 : i32
    %c0_i32_1 = arith.constant 0 : i32
    return %c0_i32, %c0_i32_0 : i32, i32
  }
  func.func @transform_2(%arg0: i32) -> (i32, i32) {
    %c0_i32 = arith.constant 0 : i32
    %c0_i32_0 = arith.constant 0 : i32
    %c0_i32_1 = arith.constant 0 : i32
    return %c0_i32, %c0_i32_0 : i32, i32
  }
  func.func @transform_3(%arg0: i32) -> (i32, i32) {
    %c0_i32 = arith.constant 0 : i32
    %c0_i32_0 = arith.constant 0 : i32
    %c0_i32_1 = arith.constant 0 : i32
    return %c0_i32, %c0_i32_0 : i32, i32
  }
  func.func @transform_4(%arg0: i32) -> (i32, i32) {
    %c0_i32 = arith.constant 0 : i32
    %c0_i32_0 = arith.constant 0 : i32
    %c0_i32_1 = arith.constant 0 : i32
    return %c0_i32, %c0_i32_0 : i32, i32
  }
  func.func @transform_5(%arg0: i32) -> (i32, i32) {
    %c0_i32 = arith.constant 0 : i32
    %c0_i32_0 = arith.constant 0 : i32
    %c0_i32_1 = arith.constant 0 : i32
    return %c0_i32, %c0_i32_0 : i32, i32
  }
}

</mosaic_0001>

<bundles_post_ra>
// kernel: simple_cnn_forward.3
= control target key start
LH: loop header
LB: loop body
LE: loop exit
PB: predicated region body
PF: predicated region fallthrough
CT: control target
= control target key end

     0   :  { %s7113_s12 = smov 0   ;;  %s8446_s0 = inlined_call_operand.vmem [shape: bf16[2,1024,32], index: 0, kind: input, shape index: {}]   ;;  %s8447_s1 = inlined_call_operand.vmem [shape: bf16[32,32], index: 1, kind: input, shape index: {}]   ;;  %s8448_s2 = inlined_call_operand.vmem [shape: f32[1,32], index: 2, kind: input, shape index: {}]   ;;  %s8449_s3 = inlined_call_operand.vmem [shape: bf16[2,16,16,32], index: 3, kind: output, shape index: {}]  }
   0x1 LB: > { %s5892_s13 = sadd.s32 4294967295, %s7090_s12   ;;  %p5896_p0 = scmp.ge.s32.totalorder %s7090_s12, 1  ;;  %s7090_s12 = sphi %s7113_s12, %s13_s12  }
   0x2   : > { %p137_p1 = scmp.lt.s32.totalorder %s7090_s12, 3 }
   0x4   : > { %p138_p2 = pnand %p5896_p0, %p137_p1 }
   0x5   : > { %p161_p3 = scmp.lt.s32.totalorder (!%p138_p2), %s5892_s13, 1 }
   0x6   : > { %141 = sbr.rel (%p138_p2) target bundleno = 764 (0x2fc), region = 32 }
   0xb   : > { %v7015_v0 = vld [vmem:[%s8447_s1 + $0x8] sm:$0xff]   ;;  %v7016_v1 = vld [vmem:[%s8447_s1] sm:$0xff]   ;;  %s8451_s13 = smov (!%p161_p3, %s5892_s13), 1  ;;  %vm643_vm0 = vcmask 261120   ;;  %vm5286_vm1 = vcmask 1041409   ;;  %vm5289_vm2 = vcmask 1042434  }
   0xc   : > { %6870 = vmatprep.subr.bf16.mxu0 %v7015_v0  ;;  %7002 = vmatprep.subr.bf16.mxu1 %v7015_v0  ;;  %s6546_s18 = sshll.u32 %s8451_s13, 9  ;;  %vm5292_vm3 = vcmask 1043459   ;;  %vm5295_vm4 = vcmask 1044484   ;;  %vm5298_vm5 = vcmask 1045509   ;;  %vm5301_vm6 = vcmask 1046534   ;;  %s6547_s24 = sshll.u32 %s8451_s13, 7 }
   0xd   : > { %6871 = vmatpush3.bf16.msra.mxu0 %v7015_v0  ;;  %7004 = vmatpush3.bf16.msra.mxu1 %v7015_v0  ;;  %s7133_s21 = scalar_lea.vmem %s8446_s0, %s6546_s18  ;;  %vm5304_vm7 = vcmask 1047559   ;;  %vm5804_vm8 = vcmask 257024   ;;  %s7364_s27 = scalar_lea.vmem %s8449_s3, %s6547_s24 }
   0xe   : > { %6872 = vmatprep.subr.bf16.mxu0 %v7016_v1  ;;  %7003 = vmatprep.subr.bf16.mxu1 %v7016_v1  ;;  %v7017_v2 = vld [vmem:[%s7133_s21] sm:$0xff]   ;;  %v7019_v4 = vld [vmem:[%s7133_s21 + $0x8] sm:$0xff]   ;;  %v7021_v6 = vld [vmem:[%s7133_s21 + $0x10] sm:$0xff]  }
   0xf   : > { %v7018_v3 = vld [vmem:[%s7133_s21 + $0x100] sm:$0xff]   ;;  %6874 = vmatprep.mubr.msk.bf16.mxu0 %vm643_vm0, %v7017_v2  ;;  %v7020_v5 = vld [vmem:[%s7133_s21 + $0x108] sm:$0xff]   ;;  %v7022_v7 = vld [vmem:[%s7133_s21 + $0x110] sm:$0xff]  }
  0x10   : > { %6938 = vmatprep.mubr.msk.bf16.mxu1 %vm643_vm0, %v7018_v3  ;;  %v7023_v8 = vld [vmem:[%s7133_s21 + $0x18] sm:$0xff]   ;;  %v7025_v10 = vld [vmem:[%s7133_s21 + $0x20] sm:$0xff]   ;;  %v7027_v12 = vld [vmem:[%s7133_s21 + $0x28] sm:$0xff]  }
  0x11   : > { %6873 = vmatpush3.bf16.msra.mxu0 %v7016_v1  ;;  %7005 = vmatpush3.bf16.msra.mxu1 %v7016_v1  ;;  %v7024_v9 = vld [vmem:[%s7133_s21 + $0x118] sm:$0xff]   ;;  %v7026_v11 = vld [vmem:[%s7133_s21 + $0x120] sm:$0xff]   ;;  %v7028_v13 = vld [vmem:[%s7133_s21 + $0x128] sm:$0xff]  }
  0x12   : > { %v7029_v14 = vld [vmem:[%s7133_s21 + $0x30] sm:$0xff]   ;;  %v7031_v16 = vld [vmem:[%s7133_s21 + $0x38] sm:$0xff]   ;;  %v7033_v18 = vld [vmem:[%s7133_s21 + $0x40] sm:$0xff]  }
  0x13   : > { %v7030_v15 = vld [vmem:[%s7133_s21 + $0x130] sm:$0xff]   ;;  %v7032_v17 = vld [vmem:[%s7133_s21 + $0x138] sm:$0xff]   ;;  %v7034_v19 = vld [vmem:[%s7133_s21 + $0x140] sm:$0xff]  }
  0x14   : > { %6875 = vmatmul.mubr.msk.bf16.vlgmr.msra.gmra.mxu0 %vm643_vm0, %v7019_v4  ;;  %6939 = vmatmul.mubr.msk.bf16.vlgmr.msra.gmra.mxu1 %vm643_vm0, %v7020_v5  ;;  %v7035_v20 = vld [vmem:[%s7133_s21 + $0x48] sm:$0xff]   ;;  %v7037_v22 = vld [vmem:[%s7133_s21 + $0x50] sm:$0xff]   ;;  %v7039_v24 = vld [vmem:[%s7133_s21 + $0x58] sm:$0xff]   ;;  %v7092_v4 = vmov 1983009808  }
  0x15   : > { %6878 = vmatprep.mubr.msk.bf16.mxu0 %vm643_vm0, %v7021_v6  ;;  %6942 = vmatprep.mubr.msk.bf16.mxu1 %vm643_vm0, %v7022_v7  ;;  %v7036_v21 = vld [vmem:[%s7133_s21 + $0x148] sm:$0xff]   ;;  %v7038_v23 = vld [vmem:[%s7133_s21 + $0x150] sm:$0xff]   ;;  %v7040_v25 = vld [vmem:[%s7133_s21 + $0x158] sm:$0xff]   ;;  %v1639_v5 = vunpack.c.l.s4 %v7092_v4  ;;  %v1641_v6 = vlaneseq }
  0x16   : > { %v7041_v26 = vld [vmem:[%s7133_s21 + $0x60] sm:$0xff]   ;;  %v7043_v28 = vld [vmem:[%s7133_s21 + $0x68] sm:$0xff]   ;;  %v7045_v30 = vld [vmem:[%s7133_s21 + $0x70] sm:$0xff]  }
  0x17   : > { %v7042_v27 = vld [vmem:[%s7133_s21 + $0x160] sm:$0xff]   ;;  %v7044_v29 = vld [vmem:[%s7133_s21 + $0x168] sm:$0xff]   ;;  %v7046_v31 = vld [vmem:[%s7133_s21 + $0x170] sm:$0xff]  }
  0x18   : > { %v7047_v32 = vld [vmem:[%s7133_s21 + $0x78] sm:$0xff]   ;;  %v7049_v34 = vld [vmem:[%s7133_s21 + $0x80] sm:$0xff]   ;;  %v7051_v36 = vld [vmem:[%s7133_s21 + $0x88] sm:$0xff]  }
  0x19   : > { %v7048_v33 = vld [vmem:[%s7133_s21 + $0x178] sm:$0xff]   ;;  %v7050_v35 = vld [vmem:[%s7133_s21 + $0x180] sm:$0xff]   ;;  %v7052_v37 = vld [vmem:[%s7133_s21 + $0x188] sm:$0xff]  }
  0x1a   : > { %v7053_v38 = vld [vmem:[%s7133_s21 + $0x90] sm:$0xff]   ;;  %v7055_v40 = vld [vmem:[%s7133_s21 + $0x98] sm:$0xff]   ;;  %v7057_v42 = vld [vmem:[%s7133_s21 + $0xa0] sm:$0xff]  }
  0x1b   : > { %v7054_v39 = vld [vmem:[%s7133_s21 + $0x190] sm:$0xff]   ;;  %v7056_v41 = vld [vmem:[%s7133_s21 + $0x198] sm:$0xff]   ;;  %v7058_v43 = vld [vmem:[%s7133_s21 + $0x1a0] sm:$0xff]  }
  0x1c   : > { %6879 = vmatmul.mubr.msk.bf16.gmra.mxu0 %vm643_vm0, %v7023_v8  ;;  %6943 = vmatmul.mubr.msk.bf16.gmra.mxu1 %vm643_vm0, %v7024_v9  ;;  %v7059_v44 = vld [vmem:[%s7133_s21 + $0xa8] sm:$0xff]   ;;  %v7061_v46 = vld [vmem:[%s7133_s21 + $0xb0] sm:$0xff]   ;;  %v7063_v48 = vld [vmem:[%s7133_s21 + $0xb8] sm:$0xff]  }
  0x1d   : > { %6882 = vmatprep.mubr.msk.bf16.mxu0 %vm643_vm0, %v7025_v10  ;;  %6946 = vmatprep.mubr.msk.bf16.mxu1 %vm643_vm0, %v7026_v11  ;;  %v7060_v45 = vld [vmem:[%s7133_s21 + $0x1a8] sm:$0xff]   ;;  %v7062_v47 = vld [vmem:[%s7133_s21 + $0x1b0] sm:$0xff]   ;;  %v7064_v49 = vld [vmem:[%s7133_s21 + $0x1b8] sm:$0xff]  }
  0x1e   : > { %v7065_v50 = vld [vmem:[%s7133_s21 + $0xc0] sm:$0xff]   ;;  %v7067_v52 = vld [vmem:[%s7133_s21 + $0xc8] sm:$0xff]   ;;  %v7069_v54 = vld [vmem:[%s7133_s21 + $0xd0] sm:$0xff]  }
  0x1f   : > { %v7066_v51 = vld [vmem:[%s7133_s21 + $0x1c0] sm:$0xff]   ;;  %v7068_v53 = vld [vmem:[%s7133_s21 + $0x1c8] sm:$0xff]   ;;  %v7070_v55 = vld [vmem:[%s7133_s21 + $0x1d0] sm:$0xff]  }
  0x20   : > { %v7071_v56 = vld [vmem:[%s7133_s21 + $0xd8] sm:$0xff]   ;;  %v7073_v58 = vld [vmem:[%s7133_s21 + $0xe0] sm:$0xff]   ;;  %v7075_v60 = vld [vmem:[%s7133_s21 + $0xe8] sm:$0xff]  }
  0x21   : > { %v7072_v57 = vld [vmem:[%s7133_s21 + $0x1d8] sm:$0xff]   ;;  %v7074_v59 = vld [vmem:[%s7133_s21 + $0x1e0] sm:$0xff]   ;;  %v7076_v61 = vld [vmem:[%s7133_s21 + $0x1e8] sm:$0xff]  }
  0x22   : > { %v7077_v62 = vld [vmem:[%s7133_s21 + $0xf0] sm:$0xff]   ;;  %v7079_v0 = vld [vmem:[%s7133_s21 + $0xf8] sm:$0xff]   ;;  %v7266_v8 = vld [vmem:[%s8448_s2] ss:$0 sm:$0xff] }
  0x23   : > { %v7078_v63 = vld [vmem:[%s7133_s21 + $0x1f0] sm:$0xff]   ;;  %v7080_v1 = vld [vmem:[%s7133_s21 + $0x1f8] sm:$0xff]  }
  0x24   : > { %6883 = vmatmul.mubr.msk.bf16.gmra.mxu0 %vm643_vm0, %v7027_v12  ;;  %6947 = vmatmul.mubr.msk.bf16.gmra.mxu1 %vm643_vm0, %v7028_v13  ;;  %v1640_v12 = vunpack.c.0.s8 %v1639_v5  ;;  %v1642_v13 = vshrl.u32 %v1641_v6, 7 }
  0x25   : > { %6886 = vmatprep.mubr.msk.bf16.mxu0 %vm643_vm0, %v7029_v14  ;;  %6950 = vmatprep.mubr.msk.bf16.mxu1 %vm643_vm0, %v7030_v15 }
  0x2c   : > { %6887 = vmatmul.mubr.msk.bf16.gmra.mxu0 %vm643_vm0, %v7031_v16  ;;  %6951 = vmatmul.mubr.msk.bf16.gmra.mxu1 %vm643_vm0, %v7032_v17 }
  0x2d   : > { %6890 = vmatprep.mubr.msk.bf16.mxu0 %vm643_vm0, %v7033_v18  ;;  %6954 = vmatprep.mubr.msk.bf16.mxu1 %vm643_vm0, %v7034_v19 }
  0x34   : > { %6891 = vmatmul.mubr.msk.bf16.gmra.mxu0 %vm643_vm0, %v7035_v20  ;;  %6955 = vmatmul.mubr.msk.bf16.gmra.mxu1 %vm643_vm0, %v7036_v21 }
  0x35   : > { %6894 = vmatprep.mubr.msk.bf16.mxu0 %vm643_vm0, %v7037_v22  ;;  %6958 = vmatprep.mubr.msk.bf16.mxu1 %vm643_vm0, %v7038_v23 }
  0x3c   : > { %6895 = vmatmul.mubr.msk.bf16.gmra.mxu0 %vm643_vm0, %v7039_v24  ;;  %6959 = vmatmul.mubr.msk.bf16.gmra.mxu1 %vm643_vm0, %v7040_v25  ;;  %v7279_v24 = vsub.s32 %v1640_v12, %v1642_v13 }
  0x3d   : > { %6898 = vmatprep.mubr.msk.bf16.mxu0 %vm643_vm0, %v7041_v26  ;;  %6962 = vmatprep.mubr.msk.bf16.mxu1 %vm643_vm0, %v7042_v27 }
  0x44   : > { %6899 = vmatmul.mubr.msk.bf16.gmra.mxu0 %vm643_vm0, %v7043_v28  ;;  %6963 = vmatmul.mubr.msk.bf16.gmra.mxu1 %vm643_vm0, %v7044_v29 }
  0x45   : > { %6902 = vmatprep.mubr.msk.bf16.mxu0 %vm643_vm0, %v7045_v30  ;;  %6966 = vmatprep.mubr.msk.bf16.mxu1 %vm643_vm0, %v7046_v31 }
  0x4c   : > { %6903 = vmatmul.mubr.msk.bf16.gmra.mxu0 %vm643_vm0, %v7047_v32  ;;  %6967 = vmatmul.mubr.msk.bf16.gmra.mxu1 %vm643_vm0, %v7048_v33 }
  0x4d   : > { %6906 = vmatprep.mubr.msk.bf16.mxu0 %vm643_vm0, %v7049_v34  ;;  %6970 = vmatprep.mubr.msk.bf16.mxu1 %vm643_vm0, %v7050_v35 }
  0x54   : > { %6907 = vmatmul.mubr.msk.bf16.gmra.mxu0 %vm643_vm0, %v7051_v36  ;;  %6971 = vmatmul.mubr.msk.bf16.gmra.mxu1 %vm643_vm0, %v7052_v37 }
  0x55   : > { %6910 = vmatprep.mubr.msk.bf16.mxu0 %vm643_vm0, %v7053_v38  ;;  %6974 = vmatprep.mubr.msk.bf16.mxu1 %vm643_vm0, %v7054_v39 }
  0x5c   : > { %6911 = vmatmul.mubr.msk.bf16.gmra.mxu0 %vm643_vm0, %v7055_v40  ;;  %6975 = vmatmul.mubr.msk.bf16.gmra.mxu1 %vm643_vm0, %v7056_v41 }
  0x5d   : > { %6914 = vmatprep.mubr.msk.bf16.mxu0 %vm643_vm0, %v7057_v42  ;;  %6978 = vmatprep.mubr.msk.bf16.mxu1 %vm643_vm0, %v7058_v43 }
  0x64   : > { %6915 = vmatmul.mubr.msk.bf16.gmra.mxu0 %vm643_vm0, %v7059_v44  ;;  %6979 = vmatmul.mubr.msk.bf16.gmra.mxu1 %vm643_vm0, %v7060_v45 }
  0x65   : > { %6918 = vmatprep.mubr.msk.bf16.mxu0 %vm643_vm0, %v7061_v46  ;;  %6982 = vmatprep.mubr.msk.bf16.mxu1 %vm643_vm0, %v7062_v47 }
  0x6c   : > { %6919 = vmatmul.mubr.msk.bf16.gmra.mxu0 %vm643_vm0, %v7063_v48  ;;  %6983 = vmatmul.mubr.msk.bf16.gmra.mxu1 %vm643_vm0, %v7064_v49 }
  0x6d   : > { %6922 = vmatprep.mubr.msk.bf16.mxu0 %vm643_vm0, %v7065_v50  ;;  %6986 = vmatprep.mubr.msk.bf16.mxu1 %vm643_vm0, %v7066_v51 }
  0x74   : > { %6923 = vmatmul.mubr.msk.bf16.gmra.mxu0 %vm643_vm0, %v7067_v52  ;;  %6987 = vmatmul.mubr.msk.bf16.gmra.mxu1 %vm643_vm0, %v7068_v53 }
  0x75   : > { %6926 = vmatprep.mubr.msk.bf16.mxu0 %vm643_vm0, %v7069_v54  ;;  %6990 = vmatprep.mubr.msk.bf16.mxu1 %vm643_vm0, %v7070_v55 }
  0x7c   : > { %6927 = vmatmul.mubr.msk.bf16.gmra.mxu0 %vm643_vm0, %v7071_v56  ;;  %6991 = vmatmul.mubr.msk.bf16.gmra.mxu1 %vm643_vm0, %v7072_v57 }
  0x7d   : > { %6930 = vmatprep.mubr.msk.bf16.mxu0 %vm643_vm0, %v7073_v58  ;;  %6994 = vmatprep.mubr.msk.bf16.mxu1 %vm643_vm0, %v7074_v59 }
  0x84   : > { %6931 = vmatmul.mubr.msk.bf16.gmra.mxu0 %vm643_vm0, %v7075_v60  ;;  %6995 = vmatmul.mubr.msk.bf16.gmra.mxu1 %vm643_vm0, %v7076_v61 }
  0x85   : > { %6934 = vmatprep.mubr.msk.bf16.mxu0 %vm643_vm0, %v7077_v62  ;;  %6998 = vmatprep.mubr.msk.bf16.mxu1 %vm643_vm0, %v7078_v63 }
  0x8c   : > { %6935 = vmatmul.mubr.msk.bf16.gmra.mxu0 %vm643_vm0, %v7079_v0  ;;  %6999 = vmatmul.mubr.msk.bf16.gmra.mxu1 %vm643_vm0, %v7080_v1 }
  0xd4   : > { %v6876_v2 = vpop.f32.mrf.mxu0  ;;  %v6940_v3 = vpop.f32.mrf.mxu1 }
  0xd5   : > { %v879_v14 = vadd.f32 %v6876_v2, %v7266_v8  ;;  %v1135_v15 = vadd.f32 %v6940_v3, %v7266_v8 }
  0xd6   : > { %v870_v7 = vpop.f32.mrf.mxu0  ;;  %v1126_v9 = vpop.f32.mrf.mxu1 }
  0xd7   : > { %v871_v17 = vadd.f32 %v7266_v8, %v870_v7  ;;  %v1127_v19 = vadd.f32 %v7266_v8, %v1126_v9  ;;  %v1383_v26 = vmax.f32 %v879_v14, 0.0  ;;  %v1447_v27 = vmax.f32 %v1135_v15, 0.0 }
  0xd8   : > { %v6877_v10 = vpop.f32.mrf.mxu0  ;;  %v6941_v11 = vpop.f32.mrf.mxu1 }
  0xd9   : > { %v7273_v20 = vadd.f32 %v6877_v10, %v7266_v8  ;;  %v7276_v22 = vadd.f32 %v6941_v11, %v7266_v8  ;;  %v1381_v31 = vmax.f32 %v871_v17, 0.0  ;;  %v1445_v36 = vmax.f32 %v1127_v19, 0.0 }
  0xda   : > { %v873_v16 = vpop.f32.mrf.mxu0  ;;  %v1129_v18 = vpop.f32.mrf.mxu1 }
  0xdb   : > { %v7282_v28 = vadd.f32 %v7266_v8, %v873_v16  ;;  %v7286_v32 = vadd.f32 %v7266_v8, %v1129_v18  ;;  %v1384_v37 = vmax.f32 %v7273_v20, 0.0  ;;  %v1448_v41 = vmax.f32 %v7276_v22, 0.0 }
  0xdc   : > { %v6880_v21 = vpop.f32.mrf.mxu0  ;;  %v6944_v25 = vpop.f32.mrf.mxu1 }
  0xdd   : > { %v895_v23 = vadd.f32 %v6880_v21, %v7266_v8  ;;  %v1151_v29 = vadd.f32 %v6944_v25, %v7266_v8  ;;  %v1382_v46 = vmax.f32 %v7282_v28, 0.0  ;;  %v1446_v50 = vmax.f32 %v7286_v32, 0.0 }
  0xde   : > { %v886_v30 = vpop.f32.mrf.mxu0  ;;  %v1142_v35 = vpop.f32.mrf.mxu1 }
  0xdf   : > { %v1387_v33 = vmax.f32 %v895_v23, 0.0  ;;  %v887_v34 = vadd.f32 %v7266_v8, %v886_v30  ;;  %v1451_v38 = vmax.f32 %v1151_v29, 0.0  ;;  %v1143_v39 = vadd.f32 %v7266_v8, %v1142_v35 }
  0xe0   : > { %v6881_v40 = vpop.f32.mrf.mxu0  ;;  %v6945_v45 = vpop.f32.mrf.mxu1 }
  0xe1   : > { %v1511_v42 = vmax.f32 %v1383_v26, %v1387_v33  ;;  %v1385_v43 = vmax.f32 %v887_v34, 0.0  ;;  %v7293_v44 = vadd.f32 %v6881_v40, %v7266_v8  ;;  %v1543_v47 = vmax.f32 %v1447_v27, %v1451_v38 }
  0xe2   : > { %v1449_v48 = vmax.f32 %v1143_v39, 0.0  ;;  %v7297_v49 = vadd.f32 %v6945_v45, %v7266_v8 }
  0xe3   : > { %v1671_v51 = vcombine.high %v1511_v42, %v1511_v42  ;;  %v1678_v52 = vrot.slane %v1511_v42, %v7279_v24  ;;  %v1509_v53 = vmax.f32 %v1381_v31, %v1385_v43  ;;  %v2215_v54 = vcombine.high %v1543_v47, %v1543_v47 }
  0xe4   : > { %v2222_v55 = vrot.slane %v1543_v47, %v7279_v24  ;;  %v7302_v56 = vmax.f32 %v1445_v36, %v1449_v48  ;;  %v1388_v57 = vmax.f32 %v7293_v44, 0.0  ;;  %v1452_v61 = vmax.f32 %v7297_v49, 0.0 }
  0xe5   : > { %v1685_v58 = vrot.slane %v1671_v51, %v7279_v24  ;;  %v1686_v59 = vcombine.high %v1678_v52, %v1678_v52  ;;  %v6040_v60 = vrot.slane %v1678_v52, 9  ;;  %v2229_v62 = vrot.slane %v2215_v54, %v7279_v24 }
  0xe6   : > { %v2230_v63 = vcombine.high %v2222_v55, %v2222_v55  ;;  %v6168_v0 = vrot.slane %v2222_v55, 9  ;;  %v1637_v1 = vcombine.high %v1509_v53, %v1509_v53  ;;  %v1644_v18 = vrot.slane %v1509_v53, %v7279_v24 }
  0xe7   : > { %v1687_v2 = vcombine.high %v1685_v58, %v1685_v58  ;;  %v6041_v3 = vrot.slane %v1686_v59, 9  ;;  %v6042_v4 = vrot.slane %v1685_v58, 9  ;;  %v3757_v5 = vmax.f32 %v1678_v52, %v6040_v60 }
  0xe8   : > { %v2231_v6 = vcombine.high %v2229_v62, %v2229_v62  ;;  %v6169_v7 = vrot.slane %v2230_v63, 9  ;;  %v6170_v9 = vrot.slane %v2229_v62, 9  ;;  %v3885_v10 = vmax.f32 %v2222_v55, %v6168_v0 }
  0xe9   : > { %v6043_v11 = vrot.slane %v1687_v2, 9  ;;  %v3758_v12 = vmax.f32 %v1686_v59, %v6041_v3  ;;  %v3759_v13 = vmax.f32 %v1685_v58, %v6042_v4  ;;  %v6556_v14 = vpack.c.bf16 %v3757_v5, %v3757_v5 }
  0xea   : > { %v6171_v15 = vrot.slane %v2231_v6, 9  ;;  %v3886_v16 = vmax.f32 %v2230_v63, %v6169_v7  ;;  %v3887_v17 = vmax.f32 %v2229_v62, %v6170_v9  ;;  %v6684_v25 = vpack.c.bf16 %v3885_v10, %v3885_v10 }
  0xeb   : > { %v3760_v19 = vmax.f32 %v1687_v2, %v6043_v11  ;;  %v6557_v21 = vpack.c.bf16 %v3758_v12, %v3758_v12  ;;  %v6558_v23 = vpack.c.bf16 %v3759_v13, %v3759_v13  ;;  %v5037_v26 = vunpack.c.l.b16 %v6556_v14 }
  0xec   : > { %v3888_v27 = vmax.f32 %v2231_v6, %v6171_v15  ;;  %v6685_v29 = vpack.c.bf16 %v3886_v16, %v3886_v16  ;;  %v6686_v30 = vpack.c.bf16 %v3887_v17, %v3887_v17  ;;  %v1651_v35 = vrot.slane %v1637_v1, %v7279_v24 }
  0xed   : > { %v6559_v31 = vpack.c.bf16 %v3760_v19, %v3760_v19  ;;  %v5038_v33 = vunpack.c.l.b16 %v6557_v21  ;;  %v5039_v34 = vunpack.c.l.b16 %v6558_v23  ;;  %v1652_v40 = vcombine.high %v1644_v18, %v1644_v18 }
  0xee   : > { %v6687_v36 = vpack.c.bf16 %v3888_v27, %v3888_v27  ;;  %v5166_v38 = vunpack.c.l.b16 %v6685_v29  ;;  %v5167_v39 = vunpack.c.l.b16 %v6686_v30  ;;  %v1653_v47 = vcombine.high %v1651_v35, %v1651_v35 }
  0xef   : > { %v5040_v42 = vunpack.c.l.b16 %v6559_v31  ;;  %v5306_v43 = vrot.slane %v5038_v33, 7  ;;  %v5308_v45 = vrot.slane %v5039_v34, 6  ;;  %v5165_v48 = vunpack.c.l.b16 %v6684_v25 }
  0xf0   : > { %v7310_v51 = vunpack.c.l.b16 %v6687_v36  ;;  %v5530_v52 = vrot.slane %v5166_v38, 7  ;;  %v6032_v53 = vrot.slane %v1644_v18, 9  ;;  %v5532_v55 = vrot.slane %v5167_v39, 6 }
  0xf1   : > { %v5307_v54 = vsel %vm5286_vm1, %v5306_v43, %v5037_v26  ;;  %v6033_v58 = vrot.slane %v1652_v40, 9  ;;  %v6034_v59 = vrot.slane %v1651_v35, 9  ;;  %v5310_v62 = vrot.slane %v5040_v42, 5 }
  0xf2   : > { %v5309_v60 = vsel %vm5289_vm2, %v5308_v45, %v5307_v54  ;;  %v5531_v63 = vsel %vm5286_vm1, %v5530_v52, %v5165_v48  ;;  %v6035_v0 = vrot.slane %v1653_v47, 9  ;;  %v5534_v1 = vrot.slane %v7310_v51, 5 }
  0xf3   : > { %v3749_v2 = vmax.f32 %v1644_v18, %v6032_v53  ;;  %v3750_v3 = vmax.f32 %v1652_v40, %v6033_v58  ;;  %v3751_v4 = vmax.f32 %v1651_v35, %v6034_v59  ;;  %v2181_v6 = vcombine.high %v7302_v56, %v7302_v56 }
  0xf4   : > { %v3752_v5 = vmax.f32 %v1653_v47, %v6035_v0  ;;  %v2188_v7 = vrot.slane %v7302_v56, %v7279_v24  ;;  %v1512_v9 = vmax.f32 %v1384_v37, %v1388_v57  ;;  %v7325_v10 = vsel %vm5289_vm2, %v5532_v55, %v5531_v63 }
  0xf5   : > { %v6548_v11 = vpack.c.bf16 %v3749_v2, %v3749_v2  ;;  %v6549_v12 = vpack.c.bf16 %v3750_v3, %v3750_v3  ;;  %v6550_v13 = vpack.c.bf16 %v3751_v4, %v3751_v4  ;;  %v2195_v15 = vrot.slane %v2181_v6, %v7279_v24 }
  0xf6   : > { %v6551_v14 = vpack.c.bf16 %v3752_v5, %v3752_v5  ;;  %v2196_v16 = vcombine.high %v2188_v7, %v2188_v7  ;;  %v6160_v17 = vrot.slane %v2188_v7, 9  ;;  %v1688_v21 = vcombine.high %v1512_v9, %v1512_v9 }
  0xf7   : > { %v5030_v18 = vunpack.c.l.b16 %v6549_v12  ;;  %v5031_v19 = vunpack.c.l.b16 %v6550_v13  ;;  %v7329_v56 = vsel %vm5292_vm3, %v5310_v62, %v5309_v60  ;;  %v2197_v20 = vcombine.high %v2195_v15, %v2195_v15 }
  0xf8   : > { %v7331_v44 = vunpack.c.l.b16 %v6551_v14  ;;  %v6161_v37 = vrot.slane %v2196_v16, 9  ;;  %v6162_v57 = vrot.slane %v2195_v15, 9  ;;  %v5029_v23 = vunpack.c.l.b16 %v6548_v11  ;;  %v889_v14 = vpop.f32.mrf.mxu0 }
  0xf9   : > { %v5285_v25 = vrot.slane %v5030_v18, 7  ;;  %v3877_v26 = vmax.f32 %v2188_v7, %v6160_v17  ;;  %v1695_v27 = vrot.slane %v1512_v9, %v7279_v24  ;;  %v5288_v29 = vrot.slane %v5031_v19, 6 }
  0xfa   : > { %v6163_v30 = vrot.slane %v2197_v20, 9  ;;  %v3878_v31 = vmax.f32 %v2196_v16, %v6161_v37  ;;  %v3879_v33 = vmax.f32 %v2195_v15, %v6162_v57  ;;  %v5291_v34 = vrot.slane %v7331_v44, 5  ;;  %v1145_v16 = vpop.f32.mrf.mxu1 }
  0xfb   : > { %v6676_v35 = vpack.c.bf16 %v3877_v26, %v3877_v26  ;;  %v1702_v36 = vrot.slane %v1688_v21, %v7279_v24  ;;  %v1703_v38 = vcombine.high %v1695_v27, %v1695_v27  ;;  %v5287_v39 = vsel %vm5286_vm1, %v5285_v25, %v5029_v23 }
  0xfc   : > { %v3880_v40 = vmax.f32 %v2197_v20, %v6163_v30  ;;  %v6677_v42 = vpack.c.bf16 %v3878_v31, %v3878_v31  ;;  %v6678_v43 = vpack.c.bf16 %v3879_v33, %v3879_v33  ;;  %v6044_v48 = vrot.slane %v1695_v27, 9  ;;  %v6884_v30 = vpop.f32.mrf.mxu0 }
  0xfd   : > { %v5157_v45 = vunpack.c.l.b16 %v6676_v35  ;;  %v1704_v47 = vcombine.high %v1702_v36, %v1702_v36  ;;  %v6045_v52 = vrot.slane %v1703_v38, 9  ;;  %v6046_v58 = vrot.slane %v1702_v36, 9 }
  0xfe   : > { %v6679_v53 = vpack.c.bf16 %v3880_v40, %v3880_v40  ;;  %v5158_v54 = vunpack.c.l.b16 %v6677_v42  ;;  %v5159_v55 = vunpack.c.l.b16 %v6678_v43  ;;  %v3761_v60 = vmax.f32 %v1695_v27, %v6044_v48 }
  0xff   : > { %v6047_v59 = vrot.slane %v1704_v47, 9  ;;  %v3762_v62 = vmax.f32 %v1703_v38, %v6045_v52  ;;  %v1544_v63 = vmax.f32 %v1448_v41, %v1452_v61  ;;  %v3763_v4 = vmax.f32 %v1702_v36, %v6046_v58  ;;  %v7353_v38 = vpop.f32.mrf.mxu1  ;;  %v7367_v58 = vpop.f32.mrf.mxu0 }
 0x100   : > { %v7341_v0 = vunpack.c.l.b16 %v6679_v53  ;;  %v5516_v2 = vrot.slane %v5158_v54, 7  ;;  %v5518_v3 = vrot.slane %v5159_v55, 6  ;;  %v6560_v6 = vpack.c.bf16 %v3761_v60, %v3761_v60 }
 0x101   : > { %v3764_v5 = vmax.f32 %v1704_v47, %v6047_v59  ;;  %v6561_v7 = vpack.c.bf16 %v3762_v62, %v3762_v62  ;;  %v2232_v9 = vcombine.high %v1544_v63, %v1544_v63  ;;  %v5290_v11 = vsel %vm5289_vm2, %v5288_v29, %v5287_v39 }
 0x102   : > { %v5517_v12 = vsel %vm5286_vm1, %v5516_v2, %v5157_v45  ;;  %v6562_v13 = vpack.c.bf16 %v3763_v4, %v3763_v4  ;;  %v2239_v49 = vrot.slane %v1544_v63, %v7279_v24  ;;  %v5520_v22 = vrot.slane %v7341_v0, 5 }
 0x103   : > { %v6563_v41 = vpack.c.bf16 %v3764_v5, %v3764_v5  ;;  %v5041_v61 = vunpack.c.l.b16 %v6560_v6  ;;  %v5042_v15 = vunpack.c.l.b16 %v6561_v7  ;;  %v2246_v18 = vrot.slane %v2232_v9, %v7279_v24 }
 0x104   : > { %v5043_v17 = vunpack.c.l.b16 %v6562_v13  ;;  %v2247_v19 = vcombine.high %v2239_v49, %v2239_v49  ;;  %v6172_v21 = vrot.slane %v2239_v49, 9  ;;  %v5519_v20 = vsel %vm5289_vm2, %v5518_v3, %v5517_v12  ;;  %v7383_v12 = vpop.f32.mrf.mxu0 }
 0x105   : > { %v5044_v37 = vunpack.c.l.b16 %v6563_v41  ;;  %v5312_v57 = vrot.slane %v5041_v61, 4  ;;  %v5314_v23 = vrot.slane %v5042_v15, 3  ;;  %v2248_v26 = vcombine.high %v2246_v18, %v2246_v18 }
 0x106   : > { %v5316_v25 = vrot.slane %v5043_v17, 2  ;;  %v6173_v27 = vrot.slane %v2247_v19, 9  ;;  %v6174_v29 = vrot.slane %v2246_v18, 9  ;;  %v3889_v35 = vmax.f32 %v2239_v49, %v6172_v21 }
 0x107   : > { %v5313_v31 = vsel %vm5295_vm4, %v5312_v57, %v7329_v56  ;;  %v5318_v33 = vrot.slane %v5044_v37, 1  ;;  %v890_v36 = vadd.f32 %v7266_v8, %v889_v14  ;;  %v6175_v40 = vrot.slane %v2248_v26, 9  ;;  %v7398_v57 = vpop.f32.mrf.mxu0 }
 0x108   : > { %v5315_v39 = vsel %vm5298_vm5, %v5314_v23, %v5313_v31  ;;  %v3890_v42 = vmax.f32 %v2247_v19, %v6173_v27  ;;  %v3891_v43 = vmax.f32 %v2246_v18, %v6174_v29  ;;  %v6688_v47 = vpack.c.bf16 %v3889_v35, %v3889_v35 }
 0x109   : > { %v5317_v45 = vsel %vm5301_vm6, %v5316_v25, %v5315_v39  ;;  %v5535_v48 = vsel %vm5292_vm3, %v5534_v1, %v7325_v10  ;;  %v1386_v56 = vmax.f32 %v890_v36, 0.0  ;;  %v3892_v53 = vmax.f32 %v2248_v26, %v6175_v40  ;;  %v7372_v10 = vpop.f32.mrf.mxu1 }
 0x10a   : > { %v5319_v52 = vsel %vm5304_vm7, %v5318_v33, %v5317_v45  ;;  %v6689_v54 = vpack.c.bf16 %v3890_v42, %v3890_v42  ;;  %v6690_v55 = vpack.c.bf16 %v3891_v43, %v3891_v43  ;;  %v5169_v60 = vunpack.c.l.b16 %v6688_v47  ;;  %v6888_v47 = vpop.f32.mrf.mxu0 }
 0x10b   : > { %v5741_v59 = vpack.c.b16 %v5319_v52, %v5319_v52  ;;  %v1510_v51 = vmax.f32 %v1382_v46, %v1386_v56  ;;  %v1146_v1 = vadd.f32 %v7266_v8, %v1145_v16  ;;  %v6691_v62 = vpack.c.bf16 %v3892_v53, %v3892_v53  ;;  %v7387_v49 = vpop.f32.mrf.mxu1 }
 0x10c   : > { %v5170_v63 = vunpack.c.l.b16 %v6689_v54  ;;  %v5171_v0 = vunpack.c.l.b16 %v6690_v55  ;;  %v5293_v2 = vsel %vm5292_vm3, %v5291_v34, %v5290_v11  ;;  %v5536_v3 = vrot.slane %v5169_v60, 4 }
 0x10d   : > { %5806 = vst.msk [vmem:[%s7364_s27 + $0x4] sm:$0xf] %vm5804_vm8, %v5741_v59  ;;  %v1654_v4 = vcombine.high %v1510_v51, %v1510_v51  ;;  %v1661_v5 = vrot.slane %v1510_v51, %v7279_v24  ;;  %v1450_v6 = vmax.f32 %v1146_v1, 0.0  ;;  %v5172_v28 = vunpack.c.l.b16 %v6691_v62  ;;  %v7400_v26 = vpop.f32.mrf.mxu1 }
 0x10e   : > { %v5538_v46 = vrot.slane %v5170_v63, 3  ;;  %v5540_v7 = vrot.slane %v5171_v0, 2  ;;  %v7381_v9 = vsel %vm5292_vm3, %v5520_v22, %v5519_v20  ;;  %v5537_v13 = vsel %vm5295_vm4, %v5536_v3, %v5535_v48 }
 0x10f   : > { %v1668_v44 = vrot.slane %v1654_v4, %v7279_v24  ;;  %v1669_v34 = vcombine.high %v1661_v5, %v1661_v5  ;;  %v6036_v11 = vrot.slane %v1661_v5, 9  ;;  %v5542_v41 = vrot.slane %v5172_v28, 1  ;;  %v6952_v54 = vpop.f32.mrf.mxu1  ;;  %v918_v28 = vpop.f32.mrf.mxu0 }
 0x110   : > { %v5539_v14 = vsel %vm5298_vm5, %v5538_v46, %v5537_v13  ;;  %v1542_v61 = vmax.f32 %v1446_v50, %v1450_v6  ;;  %v7393_v15 = vadd.f32 %v6884_v30, %v7266_v8 }
 0x111   : > { %v5541_v22 = vsel %vm5301_vm6, %v5540_v7, %v5539_v14  ;;  %v1670_v16 = vcombine.high %v1668_v44, %v1668_v44  ;;  %v6037_v17 = vrot.slane %v1669_v34, 9  ;;  %v6038_v18 = vrot.slane %v1668_v44, 9 }
 0x112   : > { %v5543_v19 = vsel %vm5304_vm7, %v5542_v41, %v5541_v22  ;;  %v3753_v21 = vmax.f32 %v1661_v5, %v6036_v11  ;;  %v2198_v20 = vcombine.high %v1542_v61, %v1542_v61  ;;  %v2205_v37 = vrot.slane %v1542_v61, %v7279_v24 }
 0x113   : > { %v5757_v23 = vpack.c.b16 %v5543_v19, %v5543_v19  ;;  %v6039_v32 = vrot.slane %v1670_v16, 9  ;;  %v3754_v50 = vmax.f32 %v1669_v34, %v6037_v17  ;;  %v3755_v25 = vmax.f32 %v1668_v44, %v6038_v18  ;;  %v1174_v34 = vpop.f32.mrf.mxu1 }
 0x114   : > { %v6552_v27 = vpack.c.bf16 %v3753_v21, %v3753_v21  ;;  %v2212_v29 = vrot.slane %v2198_v20, %v7279_v24  ;;  %v2213_v30 = vcombine.high %v2205_v37, %v2205_v37  ;;  %v6164_v31 = vrot.slane %v2205_v37, 9  ;;  %v6889_v20 = vpop.f32.mrf.mxu0 }
 0x115   : > { %5822 = vst.msk [vmem:[%s7364_s27 + $0x44] sm:$0xf] %vm5804_vm8, %v5757_v23  ;;  %v3756_v33 = vmax.f32 %v1670_v16, %v6039_v32  ;;  %v6553_v35 = vpack.c.bf16 %v3754_v50, %v3754_v50  ;;  %v6554_v36 = vpack.c.bf16 %v3755_v25, %v3755_v25  ;;  %v1391_v39 = vmax.f32 %v7393_v15, 0.0  ;;  %v6953_v25 = vpop.f32.mrf.mxu1 }
 0x116   : > { %v5033_v40 = vunpack.c.l.b16 %v6552_v27  ;;  %v2214_v42 = vcombine.high %v2212_v29, %v2212_v29  ;;  %v6165_v43 = vrot.slane %v2213_v30, 9  ;;  %v6166_v45 = vrot.slane %v2212_v29, 9 }
 0x117   : > { %v6555_v48 = vpack.c.bf16 %v3756_v33, %v3756_v33  ;;  %v5034_v56 = vunpack.c.l.b16 %v6553_v35  ;;  %v5035_v52 = vunpack.c.l.b16 %v6554_v36  ;;  %v3881_v53 = vmax.f32 %v2205_v37, %v6164_v31 }
 0x118   : > { %v5294_v55 = vrot.slane %v5033_v40, 4  ;;  %v6167_v59 = vrot.slane %v2214_v42, 9  ;;  %v3882_v60 = vmax.f32 %v2213_v30, %v6165_v43  ;;  %v3883_v51 = vmax.f32 %v2212_v29, %v6166_v45  ;;  %v921_v40 = vpop.f32.mrf.mxu0 }
 0x119   : > { %v5036_v1 = vunpack.c.l.b16 %v6555_v48  ;;  %v5297_v62 = vrot.slane %v5034_v56, 3  ;;  %v5300_v63 = vrot.slane %v5035_v52, 2  ;;  %v6680_v0 = vpack.c.bf16 %v3881_v53, %v3881_v53  ;;  %v1177_v48 = vpop.f32.mrf.mxu1 }
 0x11a   : > { %v5296_v3 = vsel %vm5295_vm4, %v5294_v55, %v5293_v2  ;;  %v3884_v4 = vmax.f32 %v2214_v42, %v6167_v59  ;;  %v6681_v5 = vpack.c.bf16 %v3882_v60, %v3882_v60  ;;  %v6682_v6 = vpack.c.bf16 %v3883_v51, %v3883_v51 }
 0x11b   : > { %v5299_v46 = vsel %vm5298_vm5, %v5297_v62, %v5296_v3  ;;  %v5303_v7 = vrot.slane %v5036_v1, 1  ;;  %v5161_v13 = vunpack.c.l.b16 %v6680_v0  ;;  %v1167_v44 = vadd.f32 %v7353_v38, %v7266_v8 }
 0x11c   : > { %v5302_v11 = vsel %vm5301_vm6, %v5300_v63, %v5299_v46  ;;  %v6683_v14 = vpack.c.bf16 %v3884_v4, %v3884_v4  ;;  %v5162_v41 = vunpack.c.l.b16 %v6681_v5  ;;  %v5163_v61 = vunpack.c.l.b16 %v6682_v6 }
 0x11d   : > { %v5305_v2 = vsel %vm5304_vm7, %v5303_v7, %v5302_v11  ;;  %v5522_v22 = vrot.slane %v5161_v13, 4  ;;  %v903_v16 = vadd.f32 %v7266_v8, %v7367_v58  ;;  %v1159_v17 = vadd.f32 %v7266_v8, %v7372_v10 }
 0x11e   : > { %v5740_v18 = vpack.c.b16 %v5305_v2, %v5305_v2  ;;  %v5164_v19 = vunpack.c.l.b16 %v6683_v14  ;;  %v5524_v21 = vrot.slane %v5162_v41, 3  ;;  %v5526_v38 = vrot.slane %v5163_v61, 2 }
 0x11f   : > { %v5523_v37 = vsel %vm5295_vm4, %v5522_v22, %v7381_v9  ;;  %v1455_v23 = vmax.f32 %v1167_v44, 0.0  ;;  %v1389_v32 = vmax.f32 %v903_v16, 0.0  ;;  %v914_v50 = vadd.f32 %v7383_v12, %v7266_v8 }
 0x120   : > { %5805 = vst.msk [vmem:[%s7364_s27] sm:$0xf] %vm5804_vm8, %v5740_v18  ;;  %v5525_v58 = vsel %vm5298_vm5, %v5524_v21, %v5523_v37  ;;  %v5528_v27 = vrot.slane %v5164_v19, 1  ;;  %v7425_v10 = vadd.f32 %v7387_v49, %v7266_v8  ;;  %v7429_v29 = vadd.f32 %v7266_v8, %v7398_v57 }
 0x121   : > { %v5527_v9 = vsel %vm5301_vm6, %v5526_v38, %v5525_v58  ;;  %v1453_v30 = vmax.f32 %v1159_v17, 0.0  ;;  %v7434_v12 = vadd.f32 %v7266_v8, %v7400_v26  ;;  %v927_v31 = vadd.f32 %v6888_v47, %v7266_v8 }
 0x122   : > { %v5529_v33 = vsel %vm5304_vm7, %v5528_v27, %v5527_v9  ;;  %v1392_v35 = vmax.f32 %v914_v50, 0.0  ;;  %v1456_v49 = vmax.f32 %v7425_v10, 0.0  ;;  %v1183_v36 = vadd.f32 %v6952_v54, %v7266_v8 }
 0x123   : > { %v5756_v57 = vpack.c.b16 %v5529_v33, %v5529_v33  ;;  %v1390_v42 = vmax.f32 %v7429_v29, 0.0  ;;  %v1395_v43 = vmax.f32 %v927_v31, 0.0  ;;  %v919_v45 = vadd.f32 %v7266_v8, %v918_v28 }
 0x124   : > { %v1459_v26 = vmax.f32 %v1183_v36, 0.0  ;;  %v1175_v56 = vadd.f32 %v7266_v8, %v1174_v34  ;;  %v930_v47 = vadd.f32 %v6889_v20, %v7266_v8  ;;  %v7445_v52 = vadd.f32 %v6953_v25, %v7266_v8 }
 0x125   : > { %5821 = vst.msk [vmem:[%s7364_s27 + $0x40] sm:$0xf] %vm5804_vm8, %v5756_v57  ;;  %v1454_v53 = vmax.f32 %v7434_v12, 0.0  ;;  %v1515_v54 = vmax.f32 %v1391_v39, %v1395_v43  ;;  %v1393_v55 = vmax.f32 %v919_v45, 0.0  ;;  %v7453_v59 = vadd.f32 %v7266_v8, %v921_v40 }
 0x126   : > { %v1547_v60 = vmax.f32 %v1455_v23, %v1459_v26  ;;  %v1457_v51 = vmax.f32 %v1175_v56, 0.0  ;;  %v1396_v1 = vmax.f32 %v930_v47, 0.0  ;;  %v7456_v62 = vadd.f32 %v7266_v8, %v1177_v48 }
 0x127   : > { %v1739_v63 = vcombine.high %v1515_v54, %v1515_v54  ;;  %v1746_v0 = vrot.slane %v1515_v54, %v7279_v24  ;;  %v1513_v3 = vmax.f32 %v1389_v32, %v1393_v55  ;;  %v1460_v4 = vmax.f32 %v7445_v52, 0.0 }
 0x128   : > { %v2283_v5 = vcombine.high %v1547_v60, %v1547_v60  ;;  %v2290_v15 = vrot.slane %v1547_v60, %v7279_v24  ;;  %v7461_v39 = vmax.f32 %v1453_v30, %v1457_v51  ;;  %v1394_v6 = vmax.f32 %v7453_v59, 0.0 }
 0x129   : > { %v1753_v28 = vrot.slane %v1739_v63, %v7279_v24  ;;  %v1754_v46 = vcombine.high %v1746_v0, %v1746_v0  ;;  %v6056_v7 = vrot.slane %v1746_v0, 9  ;;  %v7465_v13 = vmax.f32 %v1392_v35, %v1396_v1 }
 0x12a   : > { %v2297_v8 = vrot.slane %v2283_v5, %v7279_v24  ;;  %v2298_v44 = vcombine.high %v2290_v15, %v2290_v15  ;;  %v6184_v34 = vrot.slane %v2290_v15, 9  ;;  %v1705_v11 = vcombine.high %v1513_v3, %v1513_v3 }
 0x12b   : > { %v1755_v14 = vcombine.high %v1753_v28, %v1753_v28  ;;  %v6057_v41 = vrot.slane %v1754_v46, 9  ;;  %v6058_v61 = vrot.slane %v1753_v28, 9  ;;  %v3773_v2 = vmax.f32 %v1746_v0, %v6056_v7 }
 0x12c   : > { %v2299_v22 = vcombine.high %v2297_v8, %v2297_v8  ;;  %v6185_v16 = vrot.slane %v2298_v44, 9  ;;  %v6186_v17 = vrot.slane %v2297_v8, 9  ;;  %v3901_v18 = vmax.f32 %v2290_v15, %v6184_v34 }
 0x12d   : > { %v6059_v19 = vrot.slane %v1755_v14, 9  ;;  %v3774_v21 = vmax.f32 %v1754_v46, %v6057_v41  ;;  %v3775_v38 = vmax.f32 %v1753_v28, %v6058_v61  ;;  %v6572_v20 = vpack.c.bf16 %v3773_v2, %v3773_v2 }
 0x12e   : > { %v6187_v37 = vrot.slane %v2299_v22, 9  ;;  %v3902_v23 = vmax.f32 %v2298_v44, %v6185_v16  ;;  %v3903_v32 = vmax.f32 %v2297_v8, %v6186_v17  ;;  %v1712_v50 = vrot.slane %v1513_v3, %v7279_v24 }
 0x12f   : > { %v3776_v25 = vmax.f32 %v1755_v14, %v6059_v19  ;;  %v6573_v58 = vpack.c.bf16 %v3774_v21, %v3774_v21  ;;  %v6574_v27 = vpack.c.bf16 %v3775_v38, %v3775_v38  ;;  %v6700_v9 = vpack.c.bf16 %v3901_v18, %v3901_v18 }
 0x130   : > { %v5053_v30 = vunpack.c.l.b16 %v6572_v20  ;;  %v3904_v31 = vmax.f32 %v2299_v22, %v6187_v37  ;;  %v6701_v33 = vpack.c.bf16 %v3902_v23, %v3902_v23  ;;  %v6702_v35 = vpack.c.bf16 %v3903_v32, %v3903_v32 }
 0x131   : > { %v6575_v36 = vpack.c.bf16 %v3776_v25, %v3776_v25  ;;  %v5054_v40 = vunpack.c.l.b16 %v6573_v58  ;;  %v5055_v57 = vunpack.c.l.b16 %v6574_v27  ;;  %v1719_v43 = vrot.slane %v1705_v11, %v7279_v24 }
 0x132   : > { %v6703_v45 = vpack.c.bf16 %v3904_v31, %v3904_v31  ;;  %v5182_v48 = vunpack.c.l.b16 %v6701_v33  ;;  %v5183_v26 = vunpack.c.l.b16 %v6702_v35  ;;  %v1720_v56 = vcombine.high %v1712_v50, %v1712_v50 }
 0x133   : > { %v7470_v47 = vunpack.c.l.b16 %v6575_v36  ;;  %v5334_v54 = vrot.slane %v5054_v40, 7  ;;  %v5336_v55 = vrot.slane %v5055_v57, 6  ;;  %v1721_v60 = vcombine.high %v1719_v43, %v1719_v43 }
 0x134   : > { %v5181_v51 = vunpack.c.l.b16 %v6700_v9  ;;  %v7472_v1 = vunpack.c.l.b16 %v6703_v45  ;;  %v5558_v63 = vrot.slane %v5182_v48, 7  ;;  %v6048_v0 = vrot.slane %v1712_v50, 9 }
 0x135   : > { %v5335_v3 = vsel %vm5286_vm1, %v5334_v54, %v5053_v30  ;;  %v5560_v5 = vrot.slane %v5183_v26, 6  ;;  %v6049_v15 = vrot.slane %v1720_v56, 9  ;;  %v6050_v28 = vrot.slane %v1719_v43, 9 }
 0x136   : > { %v5337_v46 = vsel %vm5289_vm2, %v5336_v55, %v5335_v3  ;;  %v5338_v7 = vrot.slane %v7470_v47, 5  ;;  %v5559_v8 = vsel %vm5286_vm1, %v5558_v63, %v5181_v51  ;;  %v6051_v44 = vrot.slane %v1721_v60, 9 }
 0x137   : > { %v5562_v34 = vrot.slane %v7472_v1, 5  ;;  %v3765_v11 = vmax.f32 %v1712_v50, %v6048_v0  ;;  %v3766_v14 = vmax.f32 %v1720_v56, %v6049_v15  ;;  %v3767_v41 = vmax.f32 %v1719_v43, %v6050_v28 }
 0x138   : > { %v3768_v61 = vmax.f32 %v1721_v60, %v6051_v44  ;;  %v2249_v2 = vcombine.high %v7461_v39, %v7461_v39  ;;  %v2256_v22 = vrot.slane %v7461_v39, %v7279_v24  ;;  %v1756_v16 = vcombine.high %v7465_v13, %v7465_v13 }
 0x139   : > { %v6564_v17 = vpack.c.bf16 %v3765_v11, %v3765_v11  ;;  %v6565_v18 = vpack.c.bf16 %v3766_v14, %v3766_v14  ;;  %v6566_v19 = vpack.c.bf16 %v3767_v41, %v3767_v41  ;;  %v1763_v21 = vrot.slane %v7465_v13, %v7279_v24 }
 0x13a   : > { %v6567_v38 = vpack.c.bf16 %v3768_v61, %v3768_v61  ;;  %v2263_v20 = vrot.slane %v2249_v2, %v7279_v24  ;;  %v2264_v37 = vcombine.high %v2256_v22, %v2256_v22  ;;  %v6176_v23 = vrot.slane %v2256_v22, 9 }
 0x13b   : > { %v5045_v32 = vunpack.c.l.b16 %v6564_v17  ;;  %v5046_v50 = vunpack.c.l.b16 %v6565_v18  ;;  %v5047_v25 = vunpack.c.l.b16 %v6566_v19  ;;  %v1770_v58 = vrot.slane %v1756_v16, %v7279_v24 }
 0x13c   : > { %v5048_v39 = vunpack.c.l.b16 %v6567_v38  ;;  %v2265_v27 = vcombine.high %v2263_v20, %v2263_v20  ;;  %v6177_v9 = vrot.slane %v2264_v37, 9  ;;  %v6178_v30 = vrot.slane %v2263_v20, 9 }
 0x13d   : > { %v5320_v31 = vrot.slane %v5046_v50, 7  ;;  %v5322_v33 = vrot.slane %v5047_v25, 6  ;;  %v3893_v35 = vmax.f32 %v2256_v22, %v6176_v23  ;;  %v1771_v36 = vcombine.high %v1763_v21, %v1763_v21 }
 0x13e   : > { %v5561_v13 = vsel %vm5289_vm2, %v5560_v5, %v5559_v8  ;;  %v6179_v40 = vrot.slane %v2265_v27, 9  ;;  %v3894_v57 = vmax.f32 %v2264_v37, %v6177_v9  ;;  %v3895_v43 = vmax.f32 %v2263_v20, %v6178_v30 }
 0x13f   : > { %v5321_v45 = vsel %vm5286_vm1, %v5320_v31, %v5045_v32  ;;  %v6692_v48 = vpack.c.bf16 %v3893_v35, %v3893_v35  ;;  %v1772_v26 = vcombine.high %v1770_v58, %v1770_v58  ;;  %v6060_v56 = vrot.slane %v1763_v21, 9 }
 0x140   : > { %v5324_v47 = vrot.slane %v5048_v39, 5  ;;  %v3896_v54 = vmax.f32 %v2265_v27, %v6179_v40  ;;  %v6693_v55 = vpack.c.bf16 %v3894_v57, %v3894_v57  ;;  %v6694_v60 = vpack.c.bf16 %v3895_v43, %v3895_v43 }
 0x141   : > { %v5323_v51 = vsel %vm5289_vm2, %v5322_v33, %v5321_v45  ;;  %v6061_v63 = vrot.slane %v1771_v36, 9  ;;  %v6062_v0 = vrot.slane %v1770_v58, 9  ;;  %v6063_v3 = vrot.slane %v1772_v26, 9  ;;  %v7525_v45 = vpop.f32.mrf.mxu0 }
 0x142   : > { %v6695_v15 = vpack.c.bf16 %v3896_v54, %v3896_v54  ;;  %v5174_v28 = vunpack.c.l.b16 %v6693_v55  ;;  %v7492_v5 = vunpack.c.l.b16 %v6694_v60  ;;  %v3777_v8 = vmax.f32 %v1763_v21, %v6060_v56 }
 0x143   : > { %v5173_v44 = vunpack.c.l.b16 %v6692_v48  ;;  %v3778_v11 = vmax.f32 %v1771_v36, %v6061_v63  ;;  %v3779_v14 = vmax.f32 %v1770_v58, %v6062_v0  ;;  %v3780_v41 = vmax.f32 %v1772_v26, %v6063_v3 }
 0x144   : > { %v7494_v61 = vunpack.c.l.b16 %v6695_v15  ;;  %v5544_v2 = vrot.slane %v5174_v28, 7  ;;  %v6576_v22 = vpack.c.bf16 %v3777_v8, %v3777_v8  ;;  %v5339_v16 = vsel %vm5292_vm3, %v5338_v7, %v5337_v46 }
 0x145   : > { %v6577_v17 = vpack.c.bf16 %v3778_v11, %v3778_v11  ;;  %v6578_v18 = vpack.c.bf16 %v3779_v14, %v3779_v14  ;;  %v6579_v19 = vpack.c.bf16 %v3780_v41, %v3780_v41  ;;  %v1548_v38 = vmax.f32 %v1456_v49, %v1460_v4  ;;  %v934_v14 = vpop.f32.mrf.mxu0 }
 0x146   : > { %v7502_v21 = vsel %vm5286_vm1, %v5544_v2, %v5173_v44  ;;  %v5546_v20 = vrot.slane %v7492_v5, 6  ;;  %v5548_v37 = vrot.slane %v7494_v61, 5  ;;  %v5057_v23 = vunpack.c.l.b16 %v6576_v22  ;;  %v7550_v5 = vld [vmem:[%s8448_s2] ss:$0 sm:$0xff] }
 0x147   : > { %v5058_v32 = vunpack.c.l.b16 %v6577_v17  ;;  %v5059_v50 = vunpack.c.l.b16 %v6578_v18  ;;  %v5060_v25 = vunpack.c.l.b16 %v6579_v19  ;;  %v5563_v46 = vsel %vm5292_vm3, %v5562_v34, %v5561_v13 }
 0x148   : > { %v5340_v7 = vrot.slane %v5057_v23, 4  ;;  %v2300_v52 = vcombine.high %v1548_v38, %v1548_v38  ;;  %v2307_v10 = vrot.slane %v1548_v38, %v7279_v24  ;;  %v1514_v49 = vmax.f32 %v1390_v42, %v1394_v6 }
 0x149   : > { %v5342_v4 = vrot.slane %v5058_v32, 3  ;;  %v5344_v58 = vrot.slane %v5059_v50, 2  ;;  %v5346_v39 = vrot.slane %v5060_v25, 1  ;;  %v7515_v27 = vsel %vm5292_vm3, %v5324_v47, %v5323_v51  ;;  %v6956_v51 = vpop.f32.mrf.mxu1 }
 0x14a   : > { %v5341_v9 = vsel %vm5295_vm4, %v5340_v7, %v5339_v16  ;;  %v2314_v1 = vrot.slane %v2300_v52, %v7279_v24  ;;  %v2315_v34 = vcombine.high %v2307_v10, %v2307_v10  ;;  %v6188_v30 = vrot.slane %v2307_v10, 9 }
 0x14b   : > { %v5343_v31 = vsel %vm5298_vm5, %v5342_v4, %v5341_v9  ;;  %v1722_v33 = vcombine.high %v1514_v49, %v1514_v49  ;;  %v1729_v59 = vrot.slane %v1514_v49, %v7279_v24  ;;  %v1458_v29 = vmax.f32 %v7456_v62, 0.0  ;;  %v1190_v23 = vpop.f32.mrf.mxu1 }
 0x14c   : > { %v5345_v42 = vsel %vm5301_vm6, %v5344_v58, %v5343_v31  ;;  %v2316_v6 = vcombine.high %v2314_v1, %v2314_v1  ;;  %v6189_v35 = vrot.slane %v2315_v34, 9  ;;  %v6190_v36 = vrot.slane %v2314_v1, 9  ;;  %v6893_v58 = vpop.f32.mrf.mxu0 }
 0x14d   : > { %v5347_v13 = vsel %vm5304_vm7, %v5346_v39, %v5345_v42  ;;  %v3905_v40 = vmax.f32 %v2307_v10, %v6188_v30  ;;  %v1736_v57 = vrot.slane %v1722_v33, %v7279_v24  ;;  %v1737_v43 = vcombine.high %v1729_v59, %v1729_v59  ;;  %v6957_v42 = vpop.f32.mrf.mxu1 }
 0x14e   : > { %v5743_v48 = vpack.c.b16 %v5347_v13, %v5347_v13  ;;  %v6191_v26 = vrot.slane %v2316_v6, 9  ;;  %v3906_v56 = vmax.f32 %v2315_v34, %v6189_v35  ;;  %v3907_v47 = vmax.f32 %v2314_v1, %v6190_v36 }
 0x14f   : > { %v6704_v54 = vpack.c.bf16 %v3905_v40, %v3905_v40  ;;  %v1738_v62 = vcombine.high %v1736_v57, %v1736_v57  ;;  %v6052_v55 = vrot.slane %v1729_v59, 9  ;;  %v6053_v60 = vrot.slane %v1737_v43, 9  ;;  %v937_v40 = vpop.f32.mrf.mxu0 }
 0x150   : > { %5808 = vst.msk [vmem:[%s7364_s27 + $0xc] sm:$0xf] %vm5804_vm8, %v5743_v48  ;;  %v3908_v63 = vmax.f32 %v2316_v6, %v6191_v26  ;;  %v6705_v0 = vpack.c.bf16 %v3906_v56, %v3906_v56  ;;  %v6706_v3 = vpack.c.bf16 %v3907_v47, %v3907_v47  ;;  %v6054_v15 = vrot.slane %v1736_v57, 9  ;;  %v1193_v47 = vpop.f32.mrf.mxu1 }
 0x151   : > { %v5185_v28 = vunpack.c.l.b16 %v6704_v54  ;;  %v6055_v8 = vrot.slane %v1738_v62, 9  ;;  %v3769_v44 = vmax.f32 %v1729_v59, %v6052_v55  ;;  %v3770_v11 = vmax.f32 %v1737_v43, %v6053_v60 }
 0x152   : > { %v6707_v41 = vpack.c.bf16 %v3908_v63, %v3908_v63  ;;  %v5186_v2 = vunpack.c.l.b16 %v6705_v0  ;;  %v5187_v22 = vunpack.c.l.b16 %v6706_v3  ;;  %v3771_v16 = vmax.f32 %v1736_v57, %v6054_v15  ;;  %v6896_v15 = vpop.f32.mrf.mxu0 }
 0x153   : > { %v5564_v17 = vrot.slane %v5185_v28, 4  ;;  %v3772_v18 = vmax.f32 %v1738_v62, %v6055_v8  ;;  %v6568_v19 = vpack.c.bf16 %v3769_v44, %v3769_v44  ;;  %v6569_v38 = vpack.c.bf16 %v3770_v11, %v3770_v11 }
 0x154   : > { %v5188_v32 = vunpack.c.l.b16 %v6707_v41  ;;  %v5566_v50 = vrot.slane %v5186_v2, 3  ;;  %v5568_v25 = vrot.slane %v5187_v22, 2  ;;  %v6570_v7 = vpack.c.bf16 %v3771_v16, %v3771_v16  ;;  %v6960_v2 = vpop.f32.mrf.mxu1 }
 0x155   : > { %v5565_v52 = vsel %vm5295_vm4, %v5564_v17, %v5563_v46  ;;  %v6571_v10 = vpack.c.bf16 %v3772_v18, %v3772_v18  ;;  %v5049_v49 = vunpack.c.l.b16 %v6568_v19  ;;  %v5050_v4 = vunpack.c.l.b16 %v6569_v38 }
 0x156   : > { %v5567_v39 = vsel %vm5298_vm5, %v5566_v50, %v5565_v52  ;;  %v5570_v9 = vrot.slane %v5188_v32, 1  ;;  %v5051_v1 = vunpack.c.l.b16 %v6570_v7  ;;  %v1546_v34 = vmax.f32 %v1454_v53, %v1458_v29  ;;  %v950_v32 = vpop.f32.mrf.mxu0 }
 0x157   : > { %v5569_v30 = vsel %vm5301_vm6, %v5568_v25, %v5567_v39  ;;  %v5052_v31 = vunpack.c.l.b16 %v6571_v10  ;;  %v5326_v33 = vrot.slane %v5049_v49, 4  ;;  %v5328_v59 = vrot.slane %v5050_v4, 3 }
 0x158   : > { %v5571_v46 = vsel %vm5304_vm7, %v5570_v9, %v5569_v30  ;;  %v5330_v6 = vrot.slane %v5051_v1, 2  ;;  %v2266_v35 = vcombine.high %v1546_v34, %v1546_v34  ;;  %v2273_v36 = vrot.slane %v1546_v34, %v7279_v24 }
 0x159   : > { %v5547_v13 = vsel %vm5289_vm2, %v5546_v20, %v7502_v21  ;;  %v5759_v12 = vpack.c.b16 %v5571_v46, %v5571_v46  ;;  %v5327_v53 = vsel %vm5295_vm4, %v5326_v33, %v7515_v27  ;;  %v5332_v29 = vrot.slane %v5052_v31, 1 }
 0x15a   : > { %v5329_v57 = vsel %vm5298_vm5, %v5328_v59, %v5327_v53  ;;  %v2280_v43 = vrot.slane %v2266_v35, %v7279_v24  ;;  %v2281_v48 = vcombine.high %v2273_v36, %v2273_v36  ;;  %v6180_v26 = vrot.slane %v2273_v36, 9 }
 0x15b   : > { %5824 = vst.msk [vmem:[%s7364_s27 + $0x4c] sm:$0xf] %vm5804_vm8, %v5759_v12  ;;  %v5331_v56 = vsel %vm5301_vm6, %v5330_v6, %v5329_v57  ;;  %v943_v21 = vadd.f32 %v7550_v5, %v7525_v45  ;;  %v1199_v20 = vadd.f32 %v7550_v5, %v6956_v51  ;;  %v935_v27 = vadd.f32 %v7550_v5, %v934_v14 }
 0x15c   : > { %v5333_v54 = vsel %vm5304_vm7, %v5332_v29, %v5331_v56  ;;  %v2282_v62 = vcombine.high %v2280_v43, %v2280_v43  ;;  %v6181_v55 = vrot.slane %v2281_v48, 9  ;;  %v6182_v60 = vrot.slane %v2280_v43, 9  ;;  %v6897_v29 = vpop.f32.mrf.mxu0 }
 0x15d   : > { %v5742_v63 = vpack.c.b16 %v5333_v54, %v5333_v54  ;;  %v3897_v0 = vmax.f32 %v2273_v36, %v6180_v26  ;;  %v5549_v3 = vsel %vm5292_vm3, %v5548_v37, %v5547_v13  ;;  %v1399_v44 = vmax.f32 %v943_v21, 0.0 }
 0x15e   : > { %v6183_v28 = vrot.slane %v2282_v62, 9  ;;  %v3898_v45 = vmax.f32 %v2281_v48, %v6181_v55  ;;  %v3899_v8 = vmax.f32 %v2280_v43, %v6182_v60  ;;  %v1463_v11 = vmax.f32 %v1199_v20, 0.0 }
 0x15f   : > { %5807 = vst.msk [vmem:[%s7364_s27 + $0x8] sm:$0xf] %vm5804_vm8, %v5742_v63  ;;  %v6696_v51 = vpack.c.bf16 %v3897_v0, %v3897_v0  ;;  %v1191_v14 = vadd.f32 %v7550_v5, %v1190_v23  ;;  %v7564_v41 = vadd.f32 %v7550_v5, %v6893_v58  ;;  %v1397_v17 = vmax.f32 %v935_v27, 0.0  ;;  %v1206_v58 = vpop.f32.mrf.mxu1 }
 0x160   : > { %v3900_v22 = vmax.f32 %v2282_v62, %v6183_v28  ;;  %v6697_v16 = vpack.c.bf16 %v3898_v45, %v3898_v45  ;;  %v6698_v61 = vpack.c.bf16 %v3899_v8, %v3899_v8  ;;  %v7567_v19 = vadd.f32 %v7550_v5, %v6957_v42 }
 0x161   : > { %v5177_v37 = vunpack.c.l.b16 %v6696_v51  ;;  %v1461_v18 = vmax.f32 %v1191_v14, 0.0  ;;  %v7570_v38 = vadd.f32 %v7550_v5, %v937_v40  ;;  %v1400_v7 = vmax.f32 %v7564_v41, 0.0 }
 0x162   : > { %v6699_v50 = vpack.c.bf16 %v3900_v22, %v3900_v22  ;;  %v5178_v25 = vunpack.c.l.b16 %v6697_v16  ;;  %v5179_v23 = vunpack.c.l.b16 %v6698_v61  ;;  %v7574_v10 = vadd.f32 %v7550_v5, %v1193_v47 }
 0x163   : > { %v5550_v52 = vrot.slane %v5177_v37, 4  ;;  %v959_v49 = vadd.f32 %v7550_v5, %v6896_v15  ;;  %v1215_v4 = vadd.f32 %v7550_v5, %v6960_v2  ;;  %v951_v34 = vadd.f32 %v7550_v5, %v950_v32 }
 0x164   : > { %v5180_v39 = vunpack.c.l.b16 %v6699_v50  ;;  %v5552_v9 = vrot.slane %v5178_v25, 3  ;;  %v5554_v1 = vrot.slane %v5179_v23, 2  ;;  %v1464_v31 = vmax.f32 %v7567_v19, 0.0 }
 0x165   : > { %v5551_v30 = vsel %vm5295_vm4, %v5550_v52, %v5549_v3  ;;  %v1403_v33 = vmax.f32 %v959_v49, 0.0  ;;  %v1467_v59 = vmax.f32 %v1215_v4, 0.0  ;;  %v1401_v6 = vmax.f32 %v951_v34, 0.0 }
 0x166   : > { %v5553_v42 = vsel %vm5298_vm5, %v5552_v9, %v5551_v30  ;;  %v5556_v46 = vrot.slane %v5180_v39, 1  ;;  %v1207_v35 = vadd.f32 %v7550_v5, %v1206_v58  ;;  %v1398_v13 = vmax.f32 %v7570_v38, 0.0 }
 0x167   : > { %v5555_v36 = vsel %vm5301_vm6, %v5554_v1, %v5553_v42  ;;  %v1519_v12 = vmax.f32 %v1399_v44, %v1403_v33  ;;  %v1551_v53 = vmax.f32 %v1463_v11, %v1467_v59  ;;  %v1462_v57 = vmax.f32 %v7574_v10, 0.0 }
 0x168   : > { %v5557_v40 = vsel %vm5304_vm7, %v5556_v46, %v5555_v36  ;;  %v1517_v43 = vmax.f32 %v1397_v17, %v1401_v6  ;;  %v1465_v48 = vmax.f32 %v1207_v35, 0.0  ;;  %v7591_v62 = vadd.f32 %v7550_v5, %v6897_v29 }
 0x169   : > { %v5758_v26 = vpack.c.b16 %v5557_v40, %v5557_v40  ;;  %v1807_v56 = vcombine.high %v1519_v12, %v1519_v12  ;;  %v1814_v21 = vrot.slane %v1519_v12, %v7279_v24  ;;  %v2351_v20 = vcombine.high %v1551_v53, %v1551_v53 }
 0x16a   : > { %v2358_v27 = vrot.slane %v1551_v53, %v7279_v24  ;;  %v1773_v47 = vcombine.high %v1517_v43, %v1517_v43  ;;  %v1780_v54 = vrot.slane %v1517_v43, %v7279_v24  ;;  %v7598_v45 = vmax.f32 %v1461_v18, %v1465_v48  ;;  %v6961_v43 = vpop.f32.mrf.mxu1 }
 0x16b   : > { %5823 = vst.msk [vmem:[%s7364_s27 + $0x48] sm:$0xf] %vm5804_vm8, %v5758_v26  ;;  %v1821_v55 = vrot.slane %v1807_v56, %v7279_v24  ;;  %v1822_v60 = vcombine.high %v1814_v21, %v1814_v21  ;;  %v6072_v63 = vrot.slane %v1814_v21, 9  ;;  %v2365_v0 = vrot.slane %v2351_v20, %v7279_v24 }
 0x16c   : > { %v2366_v3 = vcombine.high %v2358_v27, %v2358_v27  ;;  %v6200_v15 = vrot.slane %v2358_v27, 9  ;;  %v1787_v28 = vrot.slane %v1773_v47, %v7279_v24  ;;  %v1788_v52 = vcombine.high %v1780_v54, %v1780_v54 }
 0x16d   : > { %v1823_v8 = vcombine.high %v1821_v55, %v1821_v55  ;;  %v6073_v44 = vrot.slane %v1822_v60, 9  ;;  %v6074_v51 = vrot.slane %v1821_v55, 9  ;;  %v3789_v11 = vmax.f32 %v1814_v21, %v6072_v63 }
 0x16e   : > { %v2367_v14 = vcombine.high %v2365_v0, %v2365_v0  ;;  %v6201_v2 = vrot.slane %v2366_v3, 9  ;;  %v6202_v22 = vrot.slane %v2365_v0, 9  ;;  %v3917_v16 = vmax.f32 %v2358_v27, %v6200_v15 }
 0x16f   : > { %v6075_v61 = vrot.slane %v1823_v8, 9  ;;  %v3790_v17 = vmax.f32 %v1822_v60, %v6073_v44  ;;  %v3791_v37 = vmax.f32 %v1821_v55, %v6074_v51  ;;  %v6588_v32 = vpack.c.bf16 %v3789_v11, %v3789_v11 }
 0x170   : > { %v6203_v50 = vrot.slane %v2367_v14, 9  ;;  %v3918_v25 = vmax.f32 %v2366_v3, %v6201_v2  ;;  %v3919_v23 = vmax.f32 %v2365_v0, %v6202_v22  ;;  %v6716_v58 = vpack.c.bf16 %v3917_v16, %v3917_v16 }
 0x171   : > { %v3792_v49 = vmax.f32 %v1823_v8, %v6075_v61  ;;  %v6589_v4 = vpack.c.bf16 %v3790_v17, %v3790_v17  ;;  %v6590_v18 = vpack.c.bf16 %v3791_v37, %v3791_v37  ;;  %v5069_v39 = vunpack.c.l.b16 %v6588_v32 }
 0x172   : > { %v3920_v9 = vmax.f32 %v2367_v14, %v6203_v50  ;;  %v6717_v1 = vpack.c.bf16 %v3918_v25, %v3918_v25  ;;  %v6718_v34 = vpack.c.bf16 %v3919_v23, %v3919_v23  ;;  %v1789_v42 = vcombine.high %v1787_v28, %v1787_v28 }
 0x173   : > { %v6591_v30 = vpack.c.bf16 %v3792_v49, %v3792_v49  ;;  %v5070_v33 = vunpack.c.l.b16 %v6589_v4  ;;  %v5071_v59 = vunpack.c.l.b16 %v6590_v18  ;;  %v6064_v36 = vrot.slane %v1780_v54, 9 }
 0x174   : > { %v6719_v46 = vpack.c.bf16 %v3920_v9, %v3920_v9  ;;  %v5198_v6 = vunpack.c.l.b16 %v6717_v1  ;;  %v5199_v35 = vunpack.c.l.b16 %v6718_v34  ;;  %v6065_v40 = vrot.slane %v1788_v52, 9 }
 0x175   : > { %v5072_v12 = vunpack.c.l.b16 %v6591_v30  ;;  %v5362_v53 = vrot.slane %v5070_v33, 7  ;;  %v5364_v29 = vrot.slane %v5071_v59, 6  ;;  %v5197_v48 = vunpack.c.l.b16 %v6716_v58 }
 0x176   : > { %v7600_v26 = vunpack.c.l.b16 %v6719_v46  ;;  %v5586_v56 = vrot.slane %v5198_v6, 7  ;;  %v6066_v21 = vrot.slane %v1787_v28, 9  ;;  %v5588_v27 = vrot.slane %v5199_v35, 6 }
 0x177   : > { %v5363_v20 = vsel %vm5286_vm1, %v5362_v53, %v5069_v39  ;;  %v6067_v47 = vrot.slane %v1789_v42, 9  ;;  %v3781_v55 = vmax.f32 %v1780_v54, %v6064_v36  ;;  %v5366_v60 = vrot.slane %v5072_v12, 5 }
 0x178   : > { %v5587_v63 = vsel %vm5286_vm1, %v5586_v56, %v5197_v48  ;;  %v3782_v0 = vmax.f32 %v1788_v52, %v6065_v40  ;;  %v1218_v3 = vadd.f32 %v7550_v5, %v6961_v43  ;;  %v5365_v15 = vsel %vm5289_vm2, %v5364_v29, %v5363_v20 }
 0x179   : > { %v3783_v8 = vmax.f32 %v1787_v28, %v6066_v21  ;;  %v3784_v44 = vmax.f32 %v1789_v42, %v6067_v47  ;;  %v6580_v51 = vpack.c.bf16 %v3781_v55, %v3781_v55  ;;  %v2317_v14 = vcombine.high %v7598_v45, %v7598_v45 }
 0x17a   : > { %v6581_v11 = vpack.c.bf16 %v3782_v0, %v3782_v0  ;;  %v2324_v2 = vrot.slane %v7598_v45, %v7279_v24  ;;  %v1404_v54 = vmax.f32 %v7591_v62, 0.0  ;;  %v7612_v22 = vsel %vm5289_vm2, %v5588_v27, %v5587_v63 }
 0x17b   : > { %v5590_v16 = vrot.slane %v7600_v26, 5  ;;  %v6582_v61 = vpack.c.bf16 %v3783_v8, %v3783_v8  ;;  %v6583_v17 = vpack.c.bf16 %v3784_v44, %v3784_v44  ;;  %v2331_v28 = vrot.slane %v2317_v14, %v7279_v24 }
 0x17c   : > { %v5062_v37 = vunpack.c.l.b16 %v6581_v11  ;;  %v2332_v32 = vcombine.high %v2324_v2, %v2324_v2  ;;  %v6192_v50 = vrot.slane %v2324_v2, 9  ;;  %v5061_v25 = vunpack.c.l.b16 %v6580_v51 }
 0x17d   : > { %v5063_v23 = vunpack.c.l.b16 %v6582_v61  ;;  %v7616_v52 = vunpack.c.l.b16 %v6583_v17  ;;  %v1520_v45 = vmax.f32 %v1400_v7, %v1404_v54  ;;  %v2333_v62 = vcombine.high %v2331_v28, %v2331_v28  ;;  %v953_v54 = vpop.f32.mrf.mxu0  ;;  %v1209_v61 = vpop.f32.mrf.mxu1 }
 0x17e   : > { %v6193_v49 = vrot.slane %v2332_v32, 9  ;;  %v6194_v4 = vrot.slane %v2331_v28, 9  ;;  %v1468_v18 = vmax.f32 %v1218_v3, 0.0  ;;  %v5348_v58 = vrot.slane %v5062_v37, 7 }
 0x17f   : > { %v3909_v39 = vmax.f32 %v2324_v2, %v6192_v50  ;;  %v1824_v9 = vcombine.high %v1520_v45, %v1520_v45  ;;  %v5367_v1 = vsel %vm5292_vm3, %v5366_v60, %v5365_v15  ;;  %v5350_v34 = vrot.slane %v5063_v23, 6 }
 0x180   : > { %v6195_v30 = vrot.slane %v2333_v62, 9  ;;  %v3910_v33 = vmax.f32 %v2332_v32, %v6193_v49  ;;  %v3911_v59 = vmax.f32 %v2331_v28, %v6194_v4  ;;  %v5352_v42 = vrot.slane %v7616_v52, 5 }
 0x181   : > { %v6708_v46 = vpack.c.bf16 %v3909_v39, %v3909_v39  ;;  %v1831_v6 = vrot.slane %v1520_v45, %v7279_v24  ;;  %v1838_v41 = vrot.slane %v1824_v9, %v7279_v24  ;;  %v1552_v12 = vmax.f32 %v1464_v31, %v1468_v18 }
 0x182   : > { %v3912_v7 = vmax.f32 %v2333_v62, %v6195_v30  ;;  %v6709_v35 = vpack.c.bf16 %v3910_v33, %v3910_v33  ;;  %v6710_v36 = vpack.c.bf16 %v3911_v59, %v3911_v59  ;;  %v5349_v53 = vsel %vm5286_vm1, %v5348_v58, %v5061_v25  ;;  %v6900_v30 = vpop.f32.mrf.mxu0  ;;  %v6964_v33 = vpop.f32.mrf.mxu1 }
 0x183   : > { %v1839_v29 = vcombine.high %v1831_v6, %v1831_v6  ;;  %v1840_v40 = vcombine.high %v1838_v41, %v1838_v41  ;;  %v6076_v43 = vrot.slane %v1831_v6, 9  ;;  %v6078_v20 = vrot.slane %v1838_v41, 9 }
 0x184   : > { %v6711_v48 = vpack.c.bf16 %v3912_v7, %v3912_v7  ;;  %v5190_v56 = vunpack.c.l.b16 %v6709_v35  ;;  %v7627_v21 = vunpack.c.l.b16 %v6710_v36  ;;  %v2368_v60 = vcombine.high %v1552_v12, %v1552_v12 }
 0x185   : > { %v6077_v27 = vrot.slane %v1839_v29, 9  ;;  %v6079_v47 = vrot.slane %v1840_v40, 9  ;;  %v3793_v55 = vmax.f32 %v1831_v6, %v6076_v43  ;;  %v7630_v63 = vsel %vm5289_vm2, %v5350_v34, %v5349_v53 }
 0x186   : > { %v5189_v0 = vunpack.c.l.b16 %v6708_v46  ;;  %v5572_v19 = vrot.slane %v5190_v56, 7  ;;  %v3795_v31 = vmax.f32 %v1838_v41, %v6078_v20  ;;  %v2375_v44 = vrot.slane %v1552_v12, %v7279_v24  ;;  %v966_v20 = vpop.f32.mrf.mxu0 }
 0x187   : > { %v3794_v3 = vmax.f32 %v1839_v29, %v6077_v27  ;;  %v3796_v15 = vmax.f32 %v1840_v40, %v6079_v47  ;;  %v6592_v8 = vpack.c.bf16 %v3793_v55, %v3793_v55  ;;  %v7633_v51 = vunpack.c.l.b16 %v6711_v48  ;;  %v1222_v27 = vpop.f32.mrf.mxu1 }
 0x188   : > { %v5574_v11 = vrot.slane %v7627_v21, 6  ;;  %v6594_v14 = vpack.c.bf16 %v3795_v31, %v3795_v31  ;;  %v2382_v2 = vrot.slane %v2368_v60, %v7279_v24  ;;  %v5573_v17 = vsel %vm5286_vm1, %v5572_v19, %v5189_v0 }
 0x189   : > { %v6593_v37 = vpack.c.bf16 %v3794_v3, %v3794_v3  ;;  %v6595_v28 = vpack.c.bf16 %v3796_v15, %v3796_v15  ;;  %v5073_v32 = vunpack.c.l.b16 %v6592_v8  ;;  %v2383_v25 = vcombine.high %v2375_v44, %v2375_v44 }
 0x18a   : > { %v5075_v50 = vunpack.c.l.b16 %v6594_v14  ;;  %v2384_v23 = vcombine.high %v2382_v2, %v2382_v2  ;;  %v6204_v45 = vrot.slane %v2375_v44, 9  ;;  %v6206_v18 = vrot.slane %v2382_v2, 9 }
 0x18b   : > { %v5074_v62 = vunpack.c.l.b16 %v6593_v37  ;;  %v5076_v49 = vunpack.c.l.b16 %v6595_v28  ;;  %v5368_v4 = vrot.slane %v5073_v32, 4  ;;  %v6205_v39 = vrot.slane %v2383_v25, 9 }
 0x18c   : > { %v5372_v58 = vrot.slane %v5075_v50, 2  ;;  %v6207_v9 = vrot.slane %v2384_v23, 9  ;;  %v3921_v34 = vmax.f32 %v2375_v44, %v6204_v45  ;;  %v3923_v41 = vmax.f32 %v2382_v2, %v6206_v18 }
 0x18d   : > { %v5369_v59 = vsel %vm5295_vm4, %v5368_v4, %v5367_v1  ;;  %v5370_v46 = vrot.slane %v5074_v62, 3  ;;  %v5374_v6 = vrot.slane %v5076_v49, 1  ;;  %v5576_v7 = vrot.slane %v7633_v51, 5 }
 0x18e   : > { %v3922_v35 = vmax.f32 %v2383_v25, %v6205_v39  ;;  %v3924_v36 = vmax.f32 %v2384_v23, %v6207_v9  ;;  %v6720_v12 = vpack.c.bf16 %v3921_v34, %v3921_v34  ;;  %v6722_v29 = vpack.c.bf16 %v3923_v41, %v3923_v41 }
 0x18f   : > { %v5371_v53 = vsel %vm5298_vm5, %v5370_v46, %v5369_v59  ;;  %v5591_v40 = vsel %vm5292_vm3, %v5590_v16, %v7612_v22  ;;  %v954_v43 = vadd.f32 %v7550_v5, %v953_v54  ;;  %v1210_v0 = vadd.f32 %v7550_v5, %v1209_v61  ;;  %v7658_v54 = vpop.f32.mrf.mxu0  ;;  %v7660_v61 = vpop.f32.mrf.mxu1 }
 0x190   : > { %v5373_v1 = vsel %vm5301_vm6, %v5372_v58, %v5371_v53  ;;  %v6721_v48 = vpack.c.bf16 %v3922_v35, %v3922_v35  ;;  %v6723_v56 = vpack.c.bf16 %v3924_v36, %v3924_v36  ;;  %v5201_v21 = vunpack.c.l.b16 %v6720_v12 }
 0x191   : > { %v5375_v47 = vsel %vm5304_vm7, %v5374_v6, %v5373_v1  ;;  %v5203_v55 = vunpack.c.l.b16 %v6722_v29  ;;  %v1402_v60 = vmax.f32 %v954_v43, 0.0  ;;  %v5575_v16 = vsel %vm5289_vm2, %v5574_v11, %v5573_v17  ;;  %v7684_v62 = vpop.f32.mrf.mxu0  ;;  %v7686_v49 = vpop.f32.mrf.mxu1 }
 0x192   : > { %v5745_v19 = vpack.c.b16 %v5375_v47, %v5375_v47  ;;  %v5202_v26 = vunpack.c.l.b16 %v6721_v48  ;;  %v5204_v31 = vunpack.c.l.b16 %v6723_v56  ;;  %v5592_v22 = vrot.slane %v5201_v21, 4 }
 0x193   : > { %v5596_v3 = vrot.slane %v5203_v55, 2  ;;  %v1518_v15 = vmax.f32 %v1398_v13, %v1402_v60  ;;  %v1466_v8 = vmax.f32 %v1210_v0, 0.0  ;;  %v7656_v2 = vadd.f32 %v7550_v5, %v6900_v30  ;;  %v6904_v53 = vpop.f32.mrf.mxu0  ;;  %v6968_v29 = vpop.f32.mrf.mxu1 }
 0x194   : > { %5810 = vst.msk [vmem:[%s7364_s27 + $0x14] sm:$0xf] %vm5804_vm8, %v5745_v19  ;;  %v5593_v44 = vsel %vm5295_vm4, %v5592_v22, %v5591_v40  ;;  %v5594_v51 = vrot.slane %v5202_v26, 3  ;;  %v5598_v14 = vrot.slane %v5204_v31, 1  ;;  %v5353_v38 = vsel %vm5292_vm3, %v5352_v42, %v7630_v63 }
 0x195   : > { %v1790_v37 = vcombine.high %v1518_v15, %v1518_v15  ;;  %v1797_v11 = vrot.slane %v1518_v15, %v7279_v24  ;;  %v1550_v13 = vmax.f32 %v1462_v57, %v1466_v8  ;;  %v7671_v28 = vsel %vm5292_vm3, %v5576_v7, %v5575_v16  ;;  %v982_v16 = vpop.f32.mrf.mxu0 }
 0x196   : > { %v5595_v17 = vsel %vm5298_vm5, %v5594_v51, %v5593_v44  ;;  %v1407_v32 = vmax.f32 %v7656_v2, 0.0  ;;  %v7675_v50 = vadd.f32 %v7550_v5, %v6964_v33  ;;  %v7682_v45 = vadd.f32 %v7550_v5, %v966_v20 }
 0x197   : > { %v5597_v25 = vsel %vm5301_vm6, %v5596_v3, %v5595_v17  ;;  %v1804_v23 = vrot.slane %v1790_v37, %v7279_v24  ;;  %v1805_v52 = vcombine.high %v1797_v11, %v1797_v11  ;;  %v6068_v42 = vrot.slane %v1797_v11, 9  ;;  %v1238_v3 = vpop.f32.mrf.mxu1 }
 0x198   : > { %v5599_v10 = vsel %vm5304_vm7, %v5598_v14, %v5597_v25  ;;  %v2334_v57 = vcombine.high %v1550_v13, %v1550_v13  ;;  %v2341_v63 = vrot.slane %v1550_v13, %v7279_v24  ;;  %v7692_v41 = vadd.f32 %v7550_v5, %v1222_v27 }
 0x199   : > { %v5761_v4 = vpack.c.b16 %v5599_v10, %v5599_v10  ;;  %v1806_v18 = vcombine.high %v1804_v23, %v1804_v23  ;;  %v6069_v58 = vrot.slane %v1805_v52, 9  ;;  %v6070_v39 = vrot.slane %v1804_v23, 9 }
 0x19a   : > { %v3785_v9 = vmax.f32 %v1797_v11, %v6068_v42  ;;  %v2348_v34 = vrot.slane %v2334_v57, %v7279_v24  ;;  %v2349_v30 = vcombine.high %v2341_v63, %v2341_v63  ;;  %v6196_v33 = vrot.slane %v2341_v63, 9 }
 0x19b   : > { %5826 = vst.msk [vmem:[%s7364_s27 + $0x54] sm:$0xf] %vm5804_vm8, %v5761_v4  ;;  %v6071_v59 = vrot.slane %v1806_v18, 9  ;;  %v3786_v46 = vmax.f32 %v1805_v52, %v6069_v58  ;;  %v3787_v6 = vmax.f32 %v1804_v23, %v6070_v39  ;;  %v1471_v52 = vmax.f32 %v7675_v50, 0.0  ;;  %v6905_v4 = vpop.f32.mrf.mxu0 }
 0x19c   : > { %v6584_v7 = vpack.c.bf16 %v3785_v9, %v3785_v9  ;;  %v2350_v35 = vcombine.high %v2348_v34, %v2348_v34  ;;  %v6197_v36 = vrot.slane %v2349_v30, 9  ;;  %v6198_v12 = vrot.slane %v2348_v34, 9 }
 0x19d   : > { %v3788_v40 = vmax.f32 %v1806_v18, %v6071_v59  ;;  %v6585_v43 = vpack.c.bf16 %v3786_v46, %v3786_v46  ;;  %v6586_v1 = vpack.c.bf16 %v3787_v6, %v3787_v6  ;;  %v3913_v48 = vmax.f32 %v2341_v63, %v6196_v33  ;;  %v6969_v18 = vpop.f32.mrf.mxu1 }
 0x19e   : > { %v5065_v56 = vunpack.c.l.b16 %v6584_v7  ;;  %v6199_v21 = vrot.slane %v2350_v35, 9  ;;  %v3914_v20 = vmax.f32 %v2349_v30, %v6197_v36  ;;  %v3915_v47 = vmax.f32 %v2348_v34, %v6198_v12 }
 0x19f   : > { %v6587_v55 = vpack.c.bf16 %v3788_v40, %v3788_v40  ;;  %v5066_v60 = vunpack.c.l.b16 %v6585_v43  ;;  %v5067_v0 = vunpack.c.l.b16 %v6586_v1  ;;  %v6712_v19 = vpack.c.bf16 %v3913_v48, %v3913_v48 }
 0x1a0   : > { %v5354_v27 = vrot.slane %v5065_v56, 4  ;;  %v3916_v26 = vmax.f32 %v2350_v35, %v6199_v21  ;;  %v6713_v31 = vpack.c.bf16 %v3914_v20, %v3914_v20  ;;  %v6714_v22 = vpack.c.bf16 %v3915_v47, %v3915_v47  ;;  %v1241_v35 = vpop.f32.mrf.mxu1 }
 0x1a1   : > { %v5068_v15 = vunpack.c.l.b16 %v6587_v55  ;;  %v5356_v8 = vrot.slane %v5066_v60, 3  ;;  %v5358_v44 = vrot.slane %v5067_v0, 2  ;;  %v5193_v51 = vunpack.c.l.b16 %v6712_v19 }
 0x1a2   : > { %v5355_v14 = vsel %vm5295_vm4, %v5354_v27, %v5353_v38  ;;  %v6715_v37 = vpack.c.bf16 %v3916_v26, %v3916_v26  ;;  %v5194_v11 = vunpack.c.l.b16 %v6713_v31  ;;  %v5195_v13 = vunpack.c.l.b16 %v6714_v22 }
 0x1a3   : > { %v5357_v17 = vsel %vm5298_vm5, %v5356_v8, %v5355_v14  ;;  %v5360_v25 = vrot.slane %v5068_v15, 1  ;;  %v5578_v23 = vrot.slane %v5193_v51, 4  ;;  %v7703_v39 = vadd.f32 %v7550_v5, %v7658_v54 }
 0x1a4   : > { %v5359_v42 = vsel %vm5301_vm6, %v5358_v44, %v5357_v17  ;;  %v5196_v10 = vunpack.c.l.b16 %v6715_v37  ;;  %v5580_v57 = vrot.slane %v5194_v11, 3  ;;  %v5582_v63 = vrot.slane %v5195_v13, 2 }
 0x1a5   : > { %v5361_v58 = vsel %vm5304_vm7, %v5360_v25, %v5359_v42  ;;  %v5579_v38 = vsel %vm5295_vm4, %v5578_v23, %v7671_v28  ;;  %v7707_v50 = vadd.f32 %v7550_v5, %v7660_v61  ;;  %v1405_v33 = vmax.f32 %v7682_v45, 0.0 }
 0x1a6   : > { %v5744_v9 = vpack.c.b16 %v5361_v58, %v5361_v58  ;;  %v5581_v34 = vsel %vm5298_vm5, %v5580_v57, %v5579_v38  ;;  %v5584_v30 = vrot.slane %v5196_v10, 1  ;;  %v1469_v46 = vmax.f32 %v7692_v41, 0.0  ;;  %v985_v41 = vpop.f32.mrf.mxu0 }
 0x1a7   : > { %v5583_v59 = vsel %vm5301_vm6, %v5582_v63, %v5581_v34  ;;  %v1408_v28 = vmax.f32 %v7703_v39, 0.0  ;;  %v7716_v54 = vadd.f32 %v7550_v5, %v7684_v62  ;;  %v7723_v6 = vadd.f32 %v7550_v5, %v7686_v49 }
 0x1a8   : > { %5809 = vst.msk [vmem:[%s7364_s27 + $0x10] sm:$0xf] %vm5804_vm8, %v5744_v9  ;;  %v5585_v61 = vsel %vm5304_vm7, %v5584_v30, %v5583_v59  ;;  %v991_v45 = vadd.f32 %v7550_v5, %v6904_v53  ;;  %v1247_v7 = vadd.f32 %v7550_v5, %v6968_v29  ;;  %v1472_v12 = vmax.f32 %v7707_v50, 0.0 }
 0x1a9   : > { %v5760_v36 = vpack.c.b16 %v5585_v61, %v5585_v61  ;;  %v983_v62 = vadd.f32 %v7550_v5, %v982_v16  ;;  %v1239_v40 = vadd.f32 %v7550_v5, %v1238_v3  ;;  %v7731_v48 = vadd.f32 %v7550_v5, %v6905_v4 }
 0x1aa   : > { %v1411_v43 = vmax.f32 %v991_v45, 0.0  ;;  %v1475_v1 = vmax.f32 %v1247_v7, 0.0  ;;  %v7734_v49 = vadd.f32 %v7550_v5, %v6969_v18  ;;  %v7739_v56 = vadd.f32 %v7550_v5, %v985_v41 }
 0x1ab   : > { %5825 = vst.msk [vmem:[%s7364_s27 + $0x50] sm:$0xf] %vm5804_vm8, %v5760_v36  ;;  %v1409_v53 = vmax.f32 %v983_v62, 0.0  ;;  %v1473_v29 = vmax.f32 %v1239_v40, 0.0  ;;  %v7742_v21 = vadd.f32 %v7550_v5, %v1241_v35  ;;  %v1406_v20 = vmax.f32 %v7716_v54, 0.0 }
 0x1ac   : > { %v1470_v47 = vmax.f32 %v7723_v6, 0.0  ;;  %v1523_v55 = vmax.f32 %v1407_v32, %v1411_v43  ;;  %v1555_v60 = vmax.f32 %v1471_v52, %v1475_v1  ;;  %v1412_v27 = vmax.f32 %v7731_v48, 0.0 }
 0x1ad   : > { %v1521_v0 = vmax.f32 %v1405_v33, %v1409_v53  ;;  %v7748_v19 = vmax.f32 %v1469_v46, %v1473_v29  ;;  %v1476_v26 = vmax.f32 %v7734_v49, 0.0  ;;  %v1410_v2 = vmax.f32 %v7739_v56, 0.0 }
 0x1ae   : > { %v1875_v31 = vcombine.high %v1523_v55, %v1523_v55  ;;  %v1882_v22 = vrot.slane %v1523_v55, %v7279_v24  ;;  %v2419_v5 = vcombine.high %v1555_v60, %v1555_v60  ;;  %v2426_v16 = vrot.slane %v1555_v60, %v7279_v24 }
 0x1af   : > { %v1841_v3 = vcombine.high %v1521_v0, %v1521_v0  ;;  %v1848_v15 = vrot.slane %v1521_v0, %v7279_v24  ;;  %v1474_v32 = vmax.f32 %v7742_v21, 0.0  ;;  %v2385_v17 = vcombine.high %v7748_v19, %v7748_v19 }
 0x1b0   : > { %v1889_v8 = vrot.slane %v1875_v31, %v7279_v24  ;;  %v1890_v44 = vcombine.high %v1882_v22, %v1882_v22  ;;  %v6088_v51 = vrot.slane %v1882_v22, 9  ;;  %v2433_v14 = vrot.slane %v2419_v5, %v7279_v24 }
 0x1b1   : > { %v2434_v37 = vcombine.high %v2426_v16, %v2426_v16  ;;  %v6216_v11 = vrot.slane %v2426_v16, 9  ;;  %v1855_v13 = vrot.slane %v1841_v3, %v7279_v24  ;;  %v1856_v59 = vcombine.high %v1848_v15, %v1848_v15 }
 0x1b2   : > { %v1891_v25 = vcombine.high %v1889_v8, %v1889_v8  ;;  %v6089_v23 = vrot.slane %v1890_v44, 9  ;;  %v6090_v52 = vrot.slane %v1889_v8, 9  ;;  %v3805_v42 = vmax.f32 %v1882_v22, %v6088_v51 }
 0x1b3   : > { %v2435_v10 = vcombine.high %v2433_v14, %v2433_v14  ;;  %v6217_v57 = vrot.slane %v2434_v37, 9  ;;  %v6218_v63 = vrot.slane %v2433_v14, 9  ;;  %v3933_v4 = vmax.f32 %v2426_v16, %v6216_v11 }
 0x1b4   : > { %v6091_v18 = vrot.slane %v1891_v25, 9  ;;  %v3806_v58 = vmax.f32 %v1890_v44, %v6089_v23  ;;  %v3807_v38 = vmax.f32 %v1889_v8, %v6090_v52  ;;  %v6604_v9 = vpack.c.bf16 %v3805_v42, %v3805_v42 }
 0x1b5   : > { %v6219_v34 = vrot.slane %v2435_v10, 9  ;;  %v3934_v30 = vmax.f32 %v2434_v37, %v6217_v57  ;;  %v3935_v33 = vmax.f32 %v2433_v14, %v6218_v63  ;;  %v6732_v7 = vpack.c.bf16 %v3933_v4, %v3933_v4 }
 0x1b6   : > { %v3808_v46 = vmax.f32 %v1891_v25, %v6091_v18  ;;  %v6605_v61 = vpack.c.bf16 %v3806_v58, %v3806_v58  ;;  %v6606_v45 = vpack.c.bf16 %v3807_v38, %v3807_v38  ;;  %v5085_v41 = vunpack.c.l.b16 %v6604_v9 }
 0x1b7   : > { %v3936_v35 = vmax.f32 %v2435_v10, %v6219_v34  ;;  %v6733_v36 = vpack.c.bf16 %v3934_v30, %v3934_v30  ;;  %v6734_v62 = vpack.c.bf16 %v3935_v33, %v3935_v33  ;;  %v1857_v53 = vcombine.high %v1855_v13, %v1855_v13 }
 0x1b8   : > { %v6607_v40 = vpack.c.bf16 %v3808_v46, %v3808_v46  ;;  %v5086_v43 = vunpack.c.l.b16 %v6605_v61  ;;  %v5087_v1 = vunpack.c.l.b16 %v6606_v45  ;;  %v6080_v0 = vrot.slane %v1848_v15, 9 }
 0x1b9   : > { %v6735_v29 = vpack.c.bf16 %v3936_v35, %v3936_v35  ;;  %v5214_v55 = vunpack.c.l.b16 %v6733_v36  ;;  %v5215_v60 = vunpack.c.l.b16 %v6734_v62  ;;  %v6081_v16 = vrot.slane %v1856_v59, 9 }
 0x1ba   : > { %v7762_v31 = vunpack.c.l.b16 %v6607_v40  ;;  %v5390_v22 = vrot.slane %v5086_v43, 7  ;;  %v5392_v5 = vrot.slane %v5087_v1, 6  ;;  %v5213_v3 = vunpack.c.l.b16 %v6732_v7 }
 0x1bb   : > { %v5614_v8 = vrot.slane %v5214_v55, 7  ;;  %v6082_v44 = vrot.slane %v1855_v13, 9  ;;  %v2392_v51 = vrot.slane %v7748_v19, %v7279_v24  ;;  %v7767_v37 = vunpack.c.l.b16 %v6735_v29 }
 0x1bc   : > { %v5391_v14 = vsel %vm5286_vm1, %v5390_v22, %v5085_v41  ;;  %v6083_v11 = vrot.slane %v1857_v53, 9  ;;  %v3797_v25 = vmax.f32 %v1848_v15, %v6080_v0  ;;  %v5394_v52 = vrot.slane %v7762_v31, 5 }
 0x1bd   : > { %v5393_v23 = vsel %vm5289_vm2, %v5392_v5, %v5391_v14  ;;  %v5616_v42 = vrot.slane %v5215_v60, 6  ;;  %v3798_v10 = vmax.f32 %v1856_v59, %v6081_v16  ;;  %v5615_v57 = vsel %vm5286_vm1, %v5614_v8, %v5213_v3 }
 0x1be   : > { %v3799_v63 = vmax.f32 %v1855_v13, %v6082_v44  ;;  %v3800_v4 = vmax.f32 %v1857_v53, %v6083_v11  ;;  %v6596_v18 = vpack.c.bf16 %v3797_v25, %v3797_v25  ;;  %v2399_v19 = vrot.slane %v2385_v17, %v7279_v24 }
 0x1bf   : > { %v6597_v58 = vpack.c.bf16 %v3798_v10, %v3798_v10  ;;  %v2400_v38 = vcombine.high %v2392_v51, %v2392_v51  ;;  %v6208_v9 = vrot.slane %v2392_v51, 9  ;;  %v1524_v15 = vmax.f32 %v1408_v28, %v1412_v27 }
 0x1c0   : > { %v6598_v34 = vpack.c.bf16 %v3799_v63, %v3799_v63  ;;  %v6599_v30 = vpack.c.bf16 %v3800_v4, %v3800_v4  ;;  %v5077_v33 = vunpack.c.l.b16 %v6596_v18  ;;  %v2401_v59 = vcombine.high %v2399_v19, %v2399_v19 }
 0x1c1   : > { %v5078_v46 = vunpack.c.l.b16 %v6597_v58  ;;  %v6209_v61 = vrot.slane %v2400_v38, 9  ;;  %v6210_v45 = vrot.slane %v2399_v19, 9  ;;  %v3925_v41 = vmax.f32 %v2392_v51, %v6208_v9 }
 0x1c2   : > { %v5079_v13 = vunpack.c.l.b16 %v6598_v34  ;;  %v5080_v7 = vunpack.c.l.b16 %v6599_v30  ;;  %v1892_v35 = vcombine.high %v1524_v15, %v1524_v15  ;;  %v6211_v17 = vrot.slane %v2401_v59, 9 }
 0x1c3   : > { %v5376_v36 = vrot.slane %v5078_v46, 7  ;;  %v3926_v62 = vmax.f32 %v2400_v38, %v6209_v61  ;;  %v3927_v40 = vmax.f32 %v2399_v19, %v6210_v45  ;;  %v5618_v43 = vrot.slane %v7767_v37, 5 }
 0x1c4   : > { %v5378_v1 = vrot.slane %v5079_v13, 6  ;;  %v6724_v53 = vpack.c.bf16 %v3925_v41, %v3925_v41  ;;  %v1899_v48 = vrot.slane %v1524_v15, %v7279_v24  ;;  %v3928_v28 = vmax.f32 %v2401_v59, %v6211_v17 }
 0x1c5   : > { %v5377_v39 = vsel %vm5286_vm1, %v5376_v36, %v5077_v33  ;;  %v6725_v27 = vpack.c.bf16 %v3926_v62, %v3926_v62  ;;  %v6726_v29 = vpack.c.bf16 %v3927_v40, %v3927_v40  ;;  %v5617_v55 = vsel %vm5289_vm2, %v5616_v42, %v5615_v57 }
 0x1c6   : > { %v5380_v60 = vrot.slane %v5080_v7, 5  ;;  %v1906_v0 = vrot.slane %v1892_v35, %v7279_v24  ;;  %v1907_v31 = vcombine.high %v1899_v48, %v1899_v48  ;;  %v6727_v22 = vpack.c.bf16 %v3928_v28, %v3928_v28 }
 0x1c7   : > { %v5206_v5 = vunpack.c.l.b16 %v6725_v27  ;;  %v7782_v16 = vunpack.c.l.b16 %v6726_v29  ;;  %v6092_v3 = vrot.slane %v1899_v48, 9  ;;  %v5379_v8 = vsel %vm5289_vm2, %v5378_v1, %v5377_v39  ;;  %v7809_v1 = vpop.f32.mrf.mxu0 }
 0x1c8   : > { %v1908_v44 = vcombine.high %v1906_v0, %v1906_v0  ;;  %v6093_v51 = vrot.slane %v1907_v31, 9  ;;  %v6094_v14 = vrot.slane %v1906_v0, 9  ;;  %v5205_v37 = vunpack.c.l.b16 %v6724_v53  ;;  %v7811_v53 = vpop.f32.mrf.mxu1 }
 0x1c9   : > { %v5600_v11 = vrot.slane %v5206_v5, 7  ;;  %v3809_v25 = vmax.f32 %v1899_v48, %v6092_v3  ;;  %v5395_v10 = vsel %vm5292_vm3, %v5394_v52, %v5393_v23  ;;  %v1556_v4 = vmax.f32 %v1472_v12, %v1476_v26 }
 0x1ca   : > { %v6095_v42 = vrot.slane %v1908_v44, 9  ;;  %v3810_v57 = vmax.f32 %v1907_v31, %v6093_v51  ;;  %v3811_v63 = vmax.f32 %v1906_v0, %v6094_v14  ;;  %v7790_v18 = vunpack.c.l.b16 %v6727_v22 }
 0x1cb   : > { %v7793_v58 = vsel %vm5286_vm1, %v5600_v11, %v5205_v37  ;;  %v5602_v19 = vrot.slane %v7782_v16, 6  ;;  %v6608_v38 = vpack.c.bf16 %v3809_v25, %v3809_v25  ;;  %v5619_v23 = vsel %vm5292_vm3, %v5618_v43, %v5617_v55  ;;  %v7816_v37 = vpop.f32.mrf.mxu0  ;;  %v7818_v11 = vpop.f32.mrf.mxu1  ;;  %v7846_v16 = vld [vmem:[%s8448_s2] ss:$0 sm:$0xff] }
 0x1cc   : > { %v3812_v9 = vmax.f32 %v1908_v44, %v6095_v42  ;;  %v6609_v34 = vpack.c.bf16 %v3810_v57, %v3810_v57  ;;  %v6610_v30 = vpack.c.bf16 %v3811_v63, %v3811_v63  ;;  %v2436_v33 = vcombine.high %v1556_v4, %v1556_v4 }
 0x1cd   : > { %v5089_v52 = vunpack.c.l.b16 %v6608_v38  ;;  %v2443_v49 = vrot.slane %v1556_v4, %v7279_v24  ;;  %v1522_v50 = vmax.f32 %v1406_v20, %v1410_v2  ;;  %v7803_v46 = vsel %vm5292_vm3, %v5380_v60, %v5379_v8 }
 0x1ce   : > { %v6611_v12 = vpack.c.bf16 %v3812_v9, %v3812_v9  ;;  %v5090_v26 = vunpack.c.l.b16 %v6609_v34  ;;  %v5091_v15 = vunpack.c.l.b16 %v6610_v30  ;;  %v2450_v61 = vrot.slane %v2436_v33, %v7279_v24 }
 0x1cf   : > { %v5396_v59 = vrot.slane %v5089_v52, 4  ;;  %v2451_v45 = vcombine.high %v2443_v49, %v2443_v49  ;;  %v6220_v13 = vrot.slane %v2443_v49, 9  ;;  %v1858_v36 = vcombine.high %v1522_v50, %v1522_v50 }
 0x1d0   : > { %v5092_v7 = vunpack.c.l.b16 %v6611_v12  ;;  %v5398_v41 = vrot.slane %v5090_v26, 3  ;;  %v5400_v35 = vrot.slane %v5091_v15, 2  ;;  %v2452_v17 = vcombine.high %v2450_v61, %v2450_v61  ;;  %v6909_v15 = vpop.f32.mrf.mxu0 }
 0x1d1   : > { %v5397_v56 = vsel %vm5295_vm4, %v5396_v59, %v5395_v10  ;;  %v6221_v54 = vrot.slane %v2451_v45, 9  ;;  %v6222_v20 = vrot.slane %v2450_v61, 9  ;;  %v3937_v40 = vmax.f32 %v2443_v49, %v6220_v13  ;;  %v6973_v59 = vpop.f32.mrf.mxu1 }
 0x1d2   : > { %v5399_v2 = vsel %vm5298_vm5, %v5398_v41, %v5397_v56  ;;  %v5402_v62 = vrot.slane %v5092_v7, 1  ;;  %v1865_v43 = vrot.slane %v1522_v50, %v7279_v24  ;;  %v6223_v39 = vrot.slane %v2452_v17, 9  ;;  %v1001_v21 = vpop.f32.mrf.mxu0 }
 0x1d3   : > { %v5401_v48 = vsel %vm5301_vm6, %v5400_v35, %v5399_v2  ;;  %v3938_v28 = vmax.f32 %v2451_v45, %v6221_v54  ;;  %v3939_v27 = vmax.f32 %v2450_v61, %v6222_v20  ;;  %v6736_v55 = vpack.c.bf16 %v3937_v40, %v3937_v40 }
 0x1d4   : > { %v5403_v29 = vsel %vm5304_vm7, %v5402_v62, %v5401_v48  ;;  %v1872_v60 = vrot.slane %v1858_v36, %v7279_v24  ;;  %v1873_v0 = vcombine.high %v1865_v43, %v1865_v43  ;;  %v3940_v22 = vmax.f32 %v2452_v17, %v6223_v39  ;;  %v1257_v48 = vpop.f32.mrf.mxu1 }
 0x1d5   : > { %v5747_v31 = vpack.c.b16 %v5403_v29, %v5403_v29  ;;  %v6737_v5 = vpack.c.bf16 %v3938_v28, %v3938_v28  ;;  %v6738_v3 = vpack.c.bf16 %v3939_v27, %v3939_v27  ;;  %v5217_v8 = vunpack.c.l.b16 %v6736_v55 }
 0x1d6   : > { %v1874_v44 = vcombine.high %v1872_v60, %v1872_v60  ;;  %v6084_v51 = vrot.slane %v1865_v43, 9  ;;  %v6085_v14 = vrot.slane %v1873_v0, 9  ;;  %v6739_v25 = vpack.c.bf16 %v3940_v22, %v3940_v22 }
 0x1d7   : > { %5812 = vst.msk [vmem:[%s7364_s27 + $0x1c] sm:$0xf] %vm5804_vm8, %v5747_v31  ;;  %v5218_v10 = vunpack.c.l.b16 %v6737_v5  ;;  %v5219_v42 = vunpack.c.l.b16 %v6738_v3  ;;  %v6086_v57 = vrot.slane %v1872_v60, 9  ;;  %v5620_v63 = vrot.slane %v5217_v8, 4 }
 0x1d8   : > { %v6087_v4 = vrot.slane %v1874_v44, 9  ;;  %v3801_v38 = vmax.f32 %v1865_v43, %v6084_v51  ;;  %v3802_v9 = vmax.f32 %v1873_v0, %v6085_v14  ;;  %v5220_v34 = vunpack.c.l.b16 %v6739_v25 }
 0x1d9   : > { %v5622_v30 = vrot.slane %v5218_v10, 3  ;;  %v5624_v52 = vrot.slane %v5219_v42, 2  ;;  %v3803_v33 = vmax.f32 %v1872_v60, %v6086_v57  ;;  %v5621_v49 = vsel %vm5295_vm4, %v5620_v63, %v5619_v23 }
 0x1da   : > { %v3804_v50 = vmax.f32 %v1874_v44, %v6087_v4  ;;  %v6600_v12 = vpack.c.bf16 %v3801_v38, %v3801_v38  ;;  %v6601_v26 = vpack.c.bf16 %v3802_v9, %v3802_v9  ;;  %v5626_v45 = vrot.slane %v5220_v34, 1 }
 0x1db   : > { %v5623_v61 = vsel %vm5298_vm5, %v5622_v30, %v5621_v49  ;;  %v6602_v13 = vpack.c.bf16 %v3803_v33, %v3803_v33  ;;  %v1554_v7 = vmax.f32 %v1470_v47, %v1474_v32  ;;  %v5603_v28 = vsel %vm5289_vm2, %v5602_v19, %v7793_v58  ;;  %v6912_v19 = vpop.f32.mrf.mxu0 }
 0x1dc   : > { %v5625_v41 = vsel %vm5301_vm6, %v5624_v52, %v5623_v61  ;;  %v6603_v35 = vpack.c.bf16 %v3804_v50, %v3804_v50  ;;  %v5081_v36 = vunpack.c.l.b16 %v6600_v12  ;;  %v5082_v56 = vunpack.c.l.b16 %v6601_v26 }
 0x1dd   : > { %v5627_v23 = vsel %vm5304_vm7, %v5626_v45, %v5625_v41  ;;  %v5083_v17 = vunpack.c.l.b16 %v6602_v13  ;;  %v2402_v54 = vcombine.high %v1554_v7, %v1554_v7  ;;  %v2409_v20 = vrot.slane %v1554_v7, %v7279_v24  ;;  %v1014_v52 = vpop.f32.mrf.mxu0 }
 0x1de   : > { %v5763_v2 = vpack.c.b16 %v5627_v23, %v5627_v23  ;;  %v5084_v62 = vunpack.c.l.b16 %v6603_v35  ;;  %v5382_v40 = vrot.slane %v5081_v36, 4  ;;  %v5384_v43 = vrot.slane %v5082_v56, 3 }
 0x1df   : > { %v5386_v6 = vrot.slane %v5083_v17, 2  ;;  %v2416_v47 = vrot.slane %v2402_v54, %v7279_v24  ;;  %v2417_v32 = vcombine.high %v2409_v20, %v2409_v20  ;;  %v6212_v39 = vrot.slane %v2409_v20, 9  ;;  %v6913_v23 = vpop.f32.mrf.mxu0 }
 0x1e0   : > { %v5604_v27 = vrot.slane %v7790_v18, 5  ;;  %5828 = vst.msk [vmem:[%s7364_s27 + $0x5c] sm:$0xf] %vm5804_vm8, %v5763_v2  ;;  %v5383_v29 = vsel %vm5295_vm4, %v5382_v40, %v7803_v46  ;;  %v5388_v55 = vrot.slane %v5084_v62, 1  ;;  %v1007_v18 = vadd.f32 %v7846_v16, %v7809_v1  ;;  %v6976_v46 = vpop.f32.mrf.mxu1 }
 0x1e1   : > { %v5385_v60 = vsel %vm5298_vm5, %v5384_v43, %v5383_v29  ;;  %v2418_v0 = vcombine.high %v2416_v47, %v2416_v47  ;;  %v6213_v31 = vrot.slane %v2417_v32, 9  ;;  %v6214_v22 = vrot.slane %v2416_v47, 9 }
 0x1e2   : > { %v5387_v5 = vsel %vm5301_vm6, %v5386_v6, %v5385_v60  ;;  %v3929_v3 = vmax.f32 %v2409_v20, %v6212_v39  ;;  %v1263_v58 = vadd.f32 %v7846_v16, %v7811_v53  ;;  %v5605_v42 = vsel %vm5292_vm3, %v5604_v27, %v5603_v28  ;;  %v1270_v33 = vpop.f32.mrf.mxu1  ;;  %v1017_v60 = vpop.f32.mrf.mxu0 }
 0x1e3   : > { %v5389_v8 = vsel %vm5304_vm7, %v5388_v55, %v5387_v5  ;;  %v6215_v44 = vrot.slane %v2418_v0, 9  ;;  %v3930_v51 = vmax.f32 %v2417_v32, %v6213_v31  ;;  %v3931_v14 = vmax.f32 %v2416_v47, %v6214_v22 }
 0x1e4   : > { %v5746_v25 = vpack.c.b16 %v5389_v8, %v5389_v8  ;;  %v6728_v10 = vpack.c.bf16 %v3929_v3, %v3929_v3  ;;  %v999_v57 = vadd.f32 %v7846_v16, %v7816_v37  ;;  %v7858_v53 = vadd.f32 %v7846_v16, %v7818_v11  ;;  %v6977_v17 = vpop.f32.mrf.mxu1 }
 0x1e5   : > { %v3932_v63 = vmax.f32 %v2418_v0, %v6215_v44  ;;  %v6729_v1 = vpack.c.bf16 %v3930_v51, %v3930_v51  ;;  %v6730_v4 = vpack.c.bf16 %v3931_v14, %v3931_v14  ;;  %v1415_v9 = vmax.f32 %v1007_v18, 0.0 }
 0x1e6   : > { %5811 = vst.msk [vmem:[%s7364_s27 + $0x18] sm:$0xf] %vm5804_vm8, %v5746_v25  ;;  %v5209_v38 = vunpack.c.l.b16 %v6728_v10  ;;  %v7863_v34 = vadd.f32 %v7846_v16, %v6909_v15  ;;  %v7866_v30 = vadd.f32 %v7846_v16, %v6973_v59  ;;  %v1479_v12 = vmax.f32 %v1263_v58, 0.0 }
 0x1e7   : > { %v6731_v37 = vpack.c.bf16 %v3932_v63, %v3932_v63  ;;  %v5210_v49 = vunpack.c.l.b16 %v6729_v1  ;;  %v5211_v50 = vunpack.c.l.b16 %v6730_v4  ;;  %v1413_v61 = vmax.f32 %v999_v57, 0.0 }
 0x1e8   : > { %v5606_v26 = vrot.slane %v5209_v38, 4  ;;  %v1477_v11 = vmax.f32 %v7858_v53, 0.0  ;;  %v1416_v45 = vmax.f32 %v7863_v34, 0.0  ;;  %v1480_v15 = vmax.f32 %v7866_v30, 0.0 }
 0x1e9   : > { %v5212_v13 = vunpack.c.l.b16 %v6731_v37  ;;  %v5608_v7 = vrot.slane %v5210_v49, 3  ;;  %v5610_v41 = vrot.slane %v5211_v50, 2  ;;  %v7873_v35 = vadd.f32 %v7846_v16, %v1001_v21 }
 0x1ea   : > { %v5607_v59 = vsel %vm5295_vm4, %v5606_v26, %v5605_v42  ;;  %v1023_v36 = vadd.f32 %v7846_v16, %v6912_v19  ;;  %v1279_v56 = vadd.f32 %v7846_v16, %v6976_v46  ;;  %v7879_v2 = vadd.f32 %v7846_v16, %v1257_v48 }
 0x1eb   : > { %v5609_v54 = vsel %vm5298_vm5, %v5608_v7, %v5607_v59  ;;  %v5612_v20 = vrot.slane %v5212_v13, 1  ;;  %v1015_v62 = vadd.f32 %v7846_v16, %v1014_v52  ;;  %v1271_v6 = vadd.f32 %v7846_v16, %v1270_v33 }
 0x1ec   : > { %v5611_v40 = vsel %vm5301_vm6, %v5610_v41, %v5609_v54  ;;  %v1419_v43 = vmax.f32 %v1023_v36, 0.0  ;;  %v1483_v21 = vmax.f32 %v1279_v56, 0.0  ;;  %v7886_v39 = vadd.f32 %v7846_v16, %v6913_v23 }
 0x1ed   : > { %v5613_v47 = vsel %vm5304_vm7, %v5612_v20, %v5611_v40  ;;  %v1417_v32 = vmax.f32 %v1015_v62, 0.0  ;;  %v7889_v28 = vadd.f32 %v7846_v16, %v6977_v17  ;;  %v1414_v27 = vmax.f32 %v7873_v35, 0.0 }
 0x1ee   : > { %v5762_v48 = vpack.c.b16 %v5613_v47, %v5613_v47  ;;  %v1527_v29 = vmax.f32 %v1415_v9, %v1419_v43  ;;  %v1559_v55 = vmax.f32 %v1479_v12, %v1483_v21  ;;  %v1478_v0 = vmax.f32 %v7879_v2, 0.0 }
 0x1ef   : > { %v1525_v31 = vmax.f32 %v1413_v61, %v1417_v32  ;;  %v1481_v22 = vmax.f32 %v1271_v6, 0.0  ;;  %v1420_v5 = vmax.f32 %v7886_v39, 0.0  ;;  %v1484_v44 = vmax.f32 %v7889_v28, 0.0 }
 0x1f0   : > { %5827 = vst.msk [vmem:[%s7364_s27 + $0x58] sm:$0xf] %vm5804_vm8, %v5762_v48  ;;  %v1943_v3 = vcombine.high %v1527_v29, %v1527_v29  ;;  %v1950_v18 = vrot.slane %v1527_v29, %v7279_v24  ;;  %v2487_v58 = vcombine.high %v1559_v55, %v1559_v55  ;;  %v2494_v19 = vrot.slane %v1559_v55, %v7279_v24 }
 0x1f1   : > { %v1909_v46 = vcombine.high %v1525_v31, %v1525_v31  ;;  %v1916_v8 = vrot.slane %v1525_v31, %v7279_v24  ;;  %v7901_v51 = vadd.f32 %v7846_v16, %v1017_v60  ;;  %v7906_v4 = vmax.f32 %v1477_v11, %v1481_v22 }
 0x1f2   : > { %v1957_v14 = vrot.slane %v1943_v3, %v7279_v24  ;;  %v1958_v25 = vcombine.high %v1950_v18, %v1950_v18  ;;  %v6104_v10 = vrot.slane %v1950_v18, 9  ;;  %v2501_v42 = vrot.slane %v2487_v58, %v7279_v24 }
 0x1f3   : > { %v2502_v57 = vcombine.high %v2494_v19, %v2494_v19  ;;  %v6232_v63 = vrot.slane %v2494_v19, 9  ;;  %v1923_v1 = vrot.slane %v1909_v46, %v7279_v24  ;;  %v1924_v36 = vcombine.high %v1916_v8, %v1916_v8 }
 0x1f4   : > { %v1959_v53 = vcombine.high %v1957_v14, %v1957_v14  ;;  %v6105_v38 = vrot.slane %v1958_v25, 9  ;;  %v6106_v9 = vrot.slane %v1957_v14, 9  ;;  %v3821_v52 = vmax.f32 %v1950_v18, %v6104_v10 }
 0x1f5   : > { %v2503_v33 = vcombine.high %v2501_v42, %v2501_v42  ;;  %v6233_v37 = vrot.slane %v2502_v57, 9  ;;  %v6234_v49 = vrot.slane %v2501_v42, 9  ;;  %v3949_v50 = vmax.f32 %v2494_v19, %v6232_v63 }
 0x1f6   : > { %v6107_v12 = vrot.slane %v1959_v53, 9  ;;  %v3822_v26 = vmax.f32 %v1958_v25, %v6105_v38  ;;  %v3823_v61 = vmax.f32 %v1957_v14, %v6106_v9  ;;  %v6620_v13 = vpack.c.bf16 %v3821_v52, %v3821_v52 }
 0x1f7   : > { %v6235_v7 = vrot.slane %v2503_v33, 9  ;;  %v3950_v41 = vmax.f32 %v2502_v57, %v6233_v37  ;;  %v3951_v59 = vmax.f32 %v2501_v42, %v6234_v49  ;;  %v6748_v17 = vpack.c.bf16 %v3949_v50, %v3949_v50 }
 0x1f8   : > { %v3824_v56 = vmax.f32 %v1959_v53, %v6107_v12  ;;  %v6621_v23 = vpack.c.bf16 %v3822_v26, %v3822_v26  ;;  %v6622_v11 = vpack.c.bf16 %v3823_v61, %v3823_v61  ;;  %v5101_v54 = vunpack.c.l.b16 %v6620_v13 }
 0x1f9   : > { %v3952_v20 = vmax.f32 %v2503_v33, %v6235_v7  ;;  %v6749_v62 = vpack.c.bf16 %v3950_v41, %v3950_v41  ;;  %v6750_v40 = vpack.c.bf16 %v3951_v59, %v3951_v59  ;;  %v1925_v47 = vcombine.high %v1923_v1, %v1923_v1 }
 0x1fa   : > { %v6623_v43 = vpack.c.bf16 %v3824_v56, %v3824_v56  ;;  %v5102_v21 = vunpack.c.l.b16 %v6621_v23  ;;  %v5103_v6 = vunpack.c.l.b16 %v6622_v11  ;;  %v6096_v29 = vrot.slane %v1916_v8, 9 }
 0x1fb   : > { %v6751_v32 = vpack.c.bf16 %v3952_v20, %v3952_v20  ;;  %v5230_v39 = vunpack.c.l.b16 %v6749_v62  ;;  %v5231_v48 = vunpack.c.l.b16 %v6750_v40  ;;  %v6097_v22 = vrot.slane %v1924_v36, 9 }
 0x1fc   : > { %v7908_v55 = vunpack.c.l.b16 %v6623_v43  ;;  %v5418_v60 = vrot.slane %v5102_v21, 7  ;;  %v5420_v31 = vrot.slane %v5103_v6, 6  ;;  %v6098_v58 = vrot.slane %v1923_v1, 9 }
 0x1fd   : > { %v7910_v3 = vunpack.c.l.b16 %v6751_v32  ;;  %v5642_v18 = vrot.slane %v5230_v39, 7  ;;  %v1528_v19 = vmax.f32 %v1416_v45, %v1420_v5  ;;  %v5229_v14 = vunpack.c.l.b16 %v6748_v17 }
 0x1fe   : > { %v5419_v46 = vsel %vm5286_vm1, %v5418_v60, %v5101_v54  ;;  %v6099_v25 = vrot.slane %v1925_v47, 9  ;;  %v3813_v10 = vmax.f32 %v1916_v8, %v6096_v29  ;;  %v5422_v57 = vrot.slane %v7908_v55, 5 }
 0x1ff   : > { %v7916_v42 = vsel %vm5289_vm2, %v5420_v31, %v5419_v46  ;;  %v5644_v63 = vrot.slane %v5231_v48, 6  ;;  %v3814_v53 = vmax.f32 %v1924_v36, %v6097_v22  ;;  %v5643_v38 = vsel %vm5286_vm1, %v5642_v18, %v5229_v14 }
 0x200   : > { %v5646_v9 = vrot.slane %v7910_v3, 5  ;;  %v3815_v52 = vmax.f32 %v1923_v1, %v6098_v58  ;;  %v3816_v33 = vmax.f32 %v1925_v47, %v6099_v25  ;;  %v2453_v45 = vcombine.high %v7906_v4, %v7906_v4 }
 0x201   : > { %v6613_v34 = vpack.c.bf16 %v3814_v53, %v3814_v53  ;;  %v2460_v5 = vrot.slane %v7906_v4, %v7279_v24  ;;  %v1960_v8 = vcombine.high %v1528_v19, %v1528_v19  ;;  %v6612_v37 = vpack.c.bf16 %v3813_v10, %v3813_v10 }
 0x202   : > { %v6614_v49 = vpack.c.bf16 %v3815_v52, %v3815_v52  ;;  %v6615_v50 = vpack.c.bf16 %v3816_v33, %v3816_v33  ;;  %v1967_v12 = vrot.slane %v1528_v19, %v7279_v24  ;;  %v2467_v61 = vrot.slane %v2453_v45, %v7279_v24 }
 0x203   : > { %v5094_v26 = vunpack.c.l.b16 %v6613_v34  ;;  %v2468_v13 = vcombine.high %v2460_v5, %v2460_v5  ;;  %v6224_v7 = vrot.slane %v2460_v5, 9  ;;  %v5645_v1 = vsel %vm5289_vm2, %v5644_v63, %v5643_v38 }
 0x204   : > { %v5095_v41 = vunpack.c.l.b16 %v6614_v49  ;;  %v1974_v59 = vrot.slane %v1960_v8, %v7279_v24  ;;  %v1975_v36 = vcombine.high %v1967_v12, %v1967_v12  ;;  %v2469_v23 = vcombine.high %v2467_v61, %v2467_v61 }
 0x205   : > { %v5404_v56 = vrot.slane %v5094_v26, 7  ;;  %v6225_v4 = vrot.slane %v2468_v13, 9  ;;  %v6226_v11 = vrot.slane %v2467_v61, 9  ;;  %v5093_v17 = vunpack.c.l.b16 %v6612_v37 }
 0x206   : > { %v5096_v54 = vunpack.c.l.b16 %v6615_v50  ;;  %v3941_v20 = vmax.f32 %v2460_v5, %v6224_v7  ;;  %v1976_v62 = vcombine.high %v1974_v59, %v1974_v59  ;;  %v5406_v40 = vrot.slane %v5095_v41, 6  ;;  %v1273_v41 = vpop.f32.mrf.mxu1 }
 0x207   : > { %v6227_v43 = vrot.slane %v2469_v23, 9  ;;  %v3942_v21 = vmax.f32 %v2468_v13, %v6225_v4  ;;  %v3943_v6 = vmax.f32 %v2467_v61, %v6226_v11  ;;  %v5405_v47 = vsel %vm5286_vm1, %v5404_v56, %v5093_v17 }
 0x208   : > { %v6740_v32 = vpack.c.bf16 %v3941_v20, %v3941_v20  ;;  %v6108_v39 = vrot.slane %v1967_v12, 9  ;;  %v6109_v48 = vrot.slane %v1975_v36, 9  ;;  %v6110_v22 = vrot.slane %v1974_v59, 9 }
 0x209   : > { %v3944_v29 = vmax.f32 %v2469_v23, %v6227_v43  ;;  %v6741_v60 = vpack.c.bf16 %v3942_v21, %v3942_v21  ;;  %v6742_v31 = vpack.c.bf16 %v3943_v6, %v3943_v6  ;;  %v5408_v18 = vrot.slane %v5096_v54, 5  ;;  %v7964_v6 = vpop.f32.mrf.mxu0 }
 0x20a   : > { %v6111_v58 = vrot.slane %v1976_v62, 9  ;;  %v3825_v19 = vmax.f32 %v1967_v12, %v6108_v39  ;;  %v3826_v46 = vmax.f32 %v1975_v36, %v6109_v48  ;;  %v3827_v63 = vmax.f32 %v1974_v59, %v6110_v22 }
 0x20b   : > { %v6743_v14 = vpack.c.bf16 %v3944_v29, %v3944_v29  ;;  %v5222_v25 = vunpack.c.l.b16 %v6741_v60  ;;  %v7930_v10 = vunpack.c.l.b16 %v6742_v31  ;;  %v5407_v53 = vsel %vm5289_vm2, %v5406_v40, %v5405_v47  ;;  %v7966_v47 = vpop.f32.mrf.mxu1 }
 0x20c   : > { %v3828_v38 = vmax.f32 %v1976_v62, %v6111_v58  ;;  %v6624_v52 = vpack.c.bf16 %v3825_v19, %v3825_v19  ;;  %v6625_v33 = vpack.c.bf16 %v3826_v46, %v3826_v46  ;;  %v5221_v34 = vunpack.c.l.b16 %v6740_v32 }
 0x20d   : > { %v7933_v45 = vunpack.c.l.b16 %v6743_v14  ;;  %v5628_v5 = vrot.slane %v5222_v25, 7  ;;  %v6626_v8 = vpack.c.bf16 %v3827_v63, %v3827_v63  ;;  %v1560_v12 = vmax.f32 %v1480_v15, %v1484_v44 }
 0x20e   : > { %v6627_v37 = vpack.c.bf16 %v3828_v38, %v3828_v38  ;;  %v5105_v49 = vunpack.c.l.b16 %v6624_v52  ;;  %v5106_v50 = vunpack.c.l.b16 %v6625_v33  ;;  %v5630_v61 = vrot.slane %v7930_v10, 6  ;;  %v7976_v38 = vpop.f32.mrf.mxu1 }
 0x20f   : > { %v7940_v26 = vsel %vm5286_vm1, %v5628_v5, %v5221_v34  ;;  %v5107_v13 = vunpack.c.l.b16 %v6626_v8  ;;  %v5423_v7 = vsel %vm5292_vm3, %v5422_v57, %v7916_v42  ;;  %v5632_v59 = vrot.slane %v7933_v45, 5 }
 0x210   : > { %v5108_v36 = vunpack.c.l.b16 %v6627_v37  ;;  %v5424_v56 = vrot.slane %v5105_v49, 4  ;;  %v5426_v28 = vrot.slane %v5106_v50, 3  ;;  %v2504_v30 = vcombine.high %v1560_v12, %v1560_v12 }
 0x211   : > { %v5428_v23 = vrot.slane %v5107_v13, 2  ;;  %v2511_v15 = vrot.slane %v1560_v12, %v7279_v24  ;;  %v1418_v44 = vmax.f32 %v7901_v51, 0.0  ;;  %v5647_v55 = vsel %vm5292_vm3, %v5646_v9, %v5645_v1 }
 0x212   : > { %v5425_v4 = vsel %vm5295_vm4, %v5424_v56, %v5423_v7  ;;  %v5430_v11 = vrot.slane %v5108_v36, 1  ;;  %v1274_v42 = vadd.f32 %v7846_v16, %v1273_v41  ;;  %v2518_v17 = vrot.slane %v2504_v30, %v7279_v24 }
 0x213   : > { %v5427_v57 = vsel %vm5298_vm5, %v5426_v28, %v5425_v4  ;;  %v2519_v54 = vcombine.high %v2511_v15, %v2511_v15  ;;  %v6236_v20 = vrot.slane %v2511_v15, 9  ;;  %v1526_v51 = vmax.f32 %v1414_v27, %v1418_v44 }
 0x214   : > { %v5429_v62 = vsel %vm5301_vm6, %v5428_v23, %v5427_v57  ;;  %v7961_v40 = vsel %vm5292_vm3, %v5408_v18, %v5407_v53  ;;  %v1482_v3 = vmax.f32 %v1274_v42, 0.0  ;;  %v2520_v1 = vcombine.high %v2518_v17, %v2518_v17  ;;  %v7974_v53 = vpop.f32.mrf.mxu0  ;;  %v6981_v23 = vpop.f32.mrf.mxu1 }
 0x215   : > { %v5431_v9 = vsel %vm5304_vm7, %v5430_v11, %v5429_v62  ;;  %v6237_v43 = vrot.slane %v2519_v54, 9  ;;  %v6238_v21 = vrot.slane %v2518_v17, 9  ;;  %v3953_v39 = vmax.f32 %v2511_v15, %v6236_v20 }
 0x216   : > { %v5749_v32 = vpack.c.b16 %v5431_v9, %v5431_v9  ;;  %v1926_v48 = vcombine.high %v1526_v51, %v1526_v51  ;;  %v1933_v35 = vrot.slane %v1526_v51, %v7279_v24  ;;  %v6239_v27 = vrot.slane %v2520_v1, 9  ;;  %v6917_v28 = vpop.f32.mrf.mxu0 }
 0x217   : > { %v3954_v29 = vmax.f32 %v2519_v54, %v6237_v43  ;;  %v3955_v60 = vmax.f32 %v2518_v17, %v6238_v21  ;;  %v1558_v31 = vmax.f32 %v1478_v0, %v1482_v3  ;;  %v6752_v22 = vpack.c.bf16 %v3953_v39, %v3953_v39  ;;  %v1289_v21 = vpop.f32.mrf.mxu1 }
 0x218   : > { %5814 = vst.msk [vmem:[%s7364_s27 + $0x24] sm:$0xf] %vm5804_vm8, %v5749_v32  ;;  %v1940_v18 = vrot.slane %v1926_v48, %v7279_v24  ;;  %v1941_v58 = vcombine.high %v1933_v35, %v1933_v35  ;;  %v6100_v19 = vrot.slane %v1933_v35, 9  ;;  %v3956_v46 = vmax.f32 %v2520_v1, %v6239_v27  ;;  %v1033_v43 = vpop.f32.mrf.mxu0 }
 0x219   : > { %v6753_v14 = vpack.c.bf16 %v3954_v29, %v3954_v29  ;;  %v6754_v25 = vpack.c.bf16 %v3955_v60, %v3955_v60  ;;  %v2470_v63 = vcombine.high %v1558_v31, %v1558_v31  ;;  %v5233_v52 = vunpack.c.l.b16 %v6752_v22 }
 0x21a   : > { %v1942_v33 = vcombine.high %v1940_v18, %v1940_v18  ;;  %v6101_v34 = vrot.slane %v1941_v58, 9  ;;  %v6102_v2 = vrot.slane %v1940_v18, 9  ;;  %v6755_v0 = vpack.c.bf16 %v3956_v46, %v3956_v46 }
 0x21b   : > { %v5234_v5 = vunpack.c.l.b16 %v6753_v14  ;;  %v5235_v8 = vunpack.c.l.b16 %v6754_v25  ;;  %v3817_v37 = vmax.f32 %v1933_v35, %v6100_v19  ;;  %v5648_v49 = vrot.slane %v5233_v52, 4  ;;  %v6984_v52 = vpop.f32.mrf.mxu1 }
 0x21c   : > { %v6103_v50 = vrot.slane %v1942_v33, 9  ;;  %v3818_v12 = vmax.f32 %v1941_v58, %v6101_v34  ;;  %v3819_v13 = vmax.f32 %v1940_v18, %v6102_v2  ;;  %v5236_v7 = vunpack.c.l.b16 %v6755_v0 }
 0x21d   : > { %v5650_v41 = vrot.slane %v5234_v5, 3  ;;  %v5652_v36 = vrot.slane %v5235_v8, 2  ;;  %v6616_v56 = vpack.c.bf16 %v3817_v37, %v3817_v37  ;;  %v5649_v30 = vsel %vm5295_vm4, %v5648_v49, %v5647_v55 }
 0x21e   : > { %v3820_v15 = vmax.f32 %v1942_v33, %v6103_v50  ;;  %v6617_v44 = vpack.c.bf16 %v3818_v12, %v3818_v12  ;;  %v6618_v4 = vpack.c.bf16 %v3819_v13, %v3819_v13  ;;  %v5654_v42 = vrot.slane %v5236_v7, 1 }
 0x21f   : > { %v5651_v11 = vsel %vm5298_vm5, %v5650_v41, %v5649_v30  ;;  %v5097_v57 = vunpack.c.l.b16 %v6616_v56  ;;  %v2477_v17 = vrot.slane %v1558_v31, %v7279_v24  ;;  %v2484_v55 = vrot.slane %v2470_v63, %v7279_v24  ;;  %v6920_v63 = vpop.f32.mrf.mxu0  ;;  %v1302_v41 = vpop.f32.mrf.mxu1 }
 0x220   : > { %v5653_v54 = vsel %vm5301_vm6, %v5652_v36, %v5651_v11  ;;  %v6619_v20 = vpack.c.bf16 %v3820_v15, %v3820_v15  ;;  %v5098_v62 = vunpack.c.l.b16 %v6617_v44  ;;  %v5099_v51 = vunpack.c.l.b16 %v6618_v4 }
 0x221   : > { %v5655_v3 = vsel %vm5304_vm7, %v5654_v42, %v5653_v54  ;;  %v5410_v9 = vrot.slane %v5097_v57, 4  ;;  %v2485_v1 = vcombine.high %v2477_v17, %v2477_v17  ;;  %v2486_v29 = vcombine.high %v2484_v55, %v2484_v55  ;;  %v1046_v7 = vpop.f32.mrf.mxu0 }
 0x222   : > { %v5765_v32 = vpack.c.b16 %v5655_v3, %v5655_v3  ;;  %v5100_v39 = vunpack.c.l.b16 %v6619_v20  ;;  %v5412_v48 = vrot.slane %v5098_v62, 3  ;;  %v5414_v35 = vrot.slane %v5099_v51, 2  ;;  %v6985_v20 = vpop.f32.mrf.mxu1 }
 0x223   : > { %v5411_v27 = vsel %vm5295_vm4, %v5410_v9, %v7961_v40  ;;  %v6228_v60 = vrot.slane %v2477_v17, 9  ;;  %v6229_v31 = vrot.slane %v2485_v1, 9  ;;  %v5631_v22 = vsel %vm5289_vm2, %v5630_v61, %v7940_v26  ;;  %v6921_v54 = vpop.f32.mrf.mxu0 }
 0x224   : > { %5830 = vst.msk [vmem:[%s7364_s27 + $0x64] sm:$0xf] %vm5804_vm8, %v5765_v32  ;;  %v5413_v18 = vsel %vm5298_vm5, %v5412_v48, %v5411_v27  ;;  %v5416_v58 = vrot.slane %v5100_v39, 1  ;;  %v6230_v19 = vrot.slane %v2484_v55, 9  ;;  %v6231_v14 = vrot.slane %v2486_v29, 9 }
 0x225   : > { %v5415_v46 = vsel %vm5301_vm6, %v5414_v35, %v5413_v18  ;;  %v3945_v25 = vmax.f32 %v2477_v17, %v6228_v60  ;;  %v3946_v40 = vmax.f32 %v2485_v1, %v6229_v31  ;;  %v1039_v10 = vadd.f32 %v7846_v16, %v7964_v6 }
 0x226   : > { %v5417_v33 = vsel %vm5304_vm7, %v5416_v58, %v5415_v46  ;;  %v3947_v34 = vmax.f32 %v2484_v55, %v6230_v19  ;;  %v1295_v26 = vadd.f32 %v7846_v16, %v7966_v47  ;;  %v3948_v2 = vmax.f32 %v2486_v29, %v6231_v14 }
 0x227   : > { %v5748_v61 = vpack.c.b16 %v5417_v33, %v5417_v33  ;;  %v6744_v0 = vpack.c.bf16 %v3945_v25, %v3945_v25  ;;  %v6745_v5 = vpack.c.bf16 %v3946_v40, %v3946_v40  ;;  %v5633_v37 = vsel %vm5292_vm3, %v5632_v59, %v5631_v22  ;;  %v1049_v22 = vpop.f32.mrf.mxu0 }
 0x228   : > { %v6746_v8 = vpack.c.bf16 %v3947_v34, %v3947_v34  ;;  %v1031_v49 = vadd.f32 %v7846_v16, %v7974_v53  ;;  %v8006_v50 = vadd.f32 %v7846_v16, %v7976_v38  ;;  %v6747_v6 = vpack.c.bf16 %v3948_v2, %v3948_v2 }
 0x229   : > { %5813 = vst.msk [vmem:[%s7364_s27 + $0x20] sm:$0xf] %vm5804_vm8, %v5748_v61  ;;  %v5225_v47 = vunpack.c.l.b16 %v6744_v0  ;;  %v5226_v12 = vunpack.c.l.b16 %v6745_v5  ;;  %v8011_v13 = vadd.f32 %v7846_v16, %v6917_v28  ;;  %v1423_v36 = vmax.f32 %v1039_v10, 0.0 }
 0x22a   : > { %v5227_v45 = vunpack.c.l.b16 %v6746_v8  ;;  %v1487_v59 = vmax.f32 %v1295_v26, 0.0  ;;  %v8014_v56 = vadd.f32 %v7846_v16, %v6981_v23  ;;  %v5228_v53 = vunpack.c.l.b16 %v6747_v6 }
 0x22b   : > { %v5634_v30 = vrot.slane %v5225_v47, 4  ;;  %v5636_v38 = vrot.slane %v5226_v12, 3  ;;  %v1421_v15 = vmax.f32 %v1031_v49, 0.0  ;;  %v1485_v4 = vmax.f32 %v8006_v50, 0.0 }
 0x22c   : > { %v5638_v44 = vrot.slane %v5227_v45, 2  ;;  %v1424_v11 = vmax.f32 %v8011_v13, 0.0  ;;  %v8019_v28 = vadd.f32 %v7846_v16, %v1033_v43  ;;  %v5640_v57 = vrot.slane %v5228_v53, 1 }
 0x22d   : > { %v5635_v42 = vsel %vm5295_vm4, %v5634_v30, %v5633_v37  ;;  %v1055_v17 = vadd.f32 %v7846_v16, %v6920_v63  ;;  %v1311_v23 = vadd.f32 %v7846_v16, %v6984_v52  ;;  %v1488_v51 = vmax.f32 %v8014_v56, 0.0 }
 0x22e   : > { %v5637_v62 = vsel %vm5298_vm5, %v5636_v38, %v5635_v42  ;;  %v8027_v3 = vadd.f32 %v7846_v16, %v1289_v21  ;;  %v1047_v9 = vadd.f32 %v7846_v16, %v1046_v7  ;;  %v1303_v32 = vadd.f32 %v7846_v16, %v1302_v41 }
 0x22f   : > { %v5639_v55 = vsel %vm5301_vm6, %v5638_v44, %v5637_v62  ;;  %v1427_v1 = vmax.f32 %v1055_v17, 0.0  ;;  %v1491_v43 = vmax.f32 %v1311_v23, 0.0  ;;  %v8034_v35 = vadd.f32 %v7846_v16, %v6921_v54 }
 0x230   : > { %v5641_v39 = vsel %vm5304_vm7, %v5640_v57, %v5639_v55  ;;  %v1425_v48 = vmax.f32 %v1047_v9, 0.0  ;;  %v8037_v27 = vadd.f32 %v7846_v16, %v6985_v20  ;;  %v1422_v29 = vmax.f32 %v8019_v28, 0.0 }
 0x231   : > { %v5764_v21 = vpack.c.b16 %v5641_v39, %v5641_v39  ;;  %v1531_v60 = vmax.f32 %v1423_v36, %v1427_v1  ;;  %v1563_v31 = vmax.f32 %v1487_v59, %v1491_v43  ;;  %v1486_v18 = vmax.f32 %v8027_v3, 0.0 }
 0x232   : > { %v1529_v58 = vmax.f32 %v1421_v15, %v1425_v48  ;;  %v1489_v19 = vmax.f32 %v1303_v32, 0.0  ;;  %v1428_v46 = vmax.f32 %v8034_v35, 0.0  ;;  %v1492_v34 = vmax.f32 %v8037_v27, 0.0 }
 0x233   : > { %5829 = vst.msk [vmem:[%s7364_s27 + $0x60] sm:$0xf] %vm5804_vm8, %v5764_v21  ;;  %v2011_v14 = vcombine.high %v1531_v60, %v1531_v60  ;;  %v2018_v25 = vrot.slane %v1531_v60, %v7279_v24  ;;  %v2555_v40 = vcombine.high %v1563_v31, %v1563_v31  ;;  %v2562_v63 = vrot.slane %v1563_v31, %v7279_v24 }
 0x234   : > { %v1977_v52 = vcombine.high %v1529_v58, %v1529_v58  ;;  %v1984_v33 = vrot.slane %v1529_v58, %v7279_v24  ;;  %v8049_v10 = vadd.f32 %v7846_v16, %v1049_v22  ;;  %v8054_v49 = vmax.f32 %v1485_v4, %v1489_v19 }
 0x235   : > { %v2025_v26 = vrot.slane %v2011_v14, %v7279_v24  ;;  %v2026_v61 = vcombine.high %v2018_v25, %v2018_v25  ;;  %v6120_v2 = vrot.slane %v2018_v25, 9  ;;  %v2569_v0 = vrot.slane %v2555_v40, %v7279_v24 }
 0x236   : > { %v2570_v5 = vcombine.high %v2562_v63, %v2562_v63  ;;  %v6248_v8 = vrot.slane %v2562_v63, 9  ;;  %v1991_v37 = vrot.slane %v1977_v52, %v7279_v24  ;;  %v1992_v57 = vcombine.high %v1984_v33, %v1984_v33 }
 0x237   : > { %v2027_v50 = vcombine.high %v2025_v26, %v2025_v26  ;;  %v6121_v6 = vrot.slane %v2026_v61, 9  ;;  %v6122_v47 = vrot.slane %v2025_v26, 9  ;;  %v3837_v12 = vmax.f32 %v2018_v25, %v6120_v2 }
 0x238   : > { %v2571_v7 = vcombine.high %v2569_v0, %v2569_v0  ;;  %v6249_v41 = vrot.slane %v2570_v5, 9  ;;  %v6250_v45 = vrot.slane %v2569_v0, 9  ;;  %v3965_v36 = vmax.f32 %v2562_v63, %v6248_v8 }
 0x239   : > { %v6123_v59 = vrot.slane %v2027_v50, 9  ;;  %v3838_v53 = vmax.f32 %v2026_v61, %v6121_v6  ;;  %v3839_v30 = vmax.f32 %v2025_v26, %v6122_v47  ;;  %v6636_v38 = vpack.c.bf16 %v3837_v12, %v3837_v12 }
 0x23a   : > { %v6251_v15 = vrot.slane %v2571_v7, 9  ;;  %v3966_v44 = vmax.f32 %v2570_v5, %v6249_v41  ;;  %v3967_v42 = vmax.f32 %v2569_v0, %v6250_v45  ;;  %v6764_v54 = vpack.c.bf16 %v3965_v36, %v3965_v36 }
 0x23b   : > { %v3840_v17 = vmax.f32 %v2027_v50, %v6123_v59  ;;  %v6637_v23 = vpack.c.bf16 %v3838_v53, %v3838_v53  ;;  %v6638_v4 = vpack.c.bf16 %v3839_v30, %v3839_v30  ;;  %v5117_v20 = vunpack.c.l.b16 %v6636_v38 }
 0x23c   : > { %v3968_v62 = vmax.f32 %v2571_v7, %v6251_v15  ;;  %v6765_v9 = vpack.c.bf16 %v3966_v44, %v3966_v44  ;;  %v6766_v55 = vpack.c.bf16 %v3967_v42, %v3967_v42  ;;  %v1993_v39 = vcombine.high %v1991_v37, %v1991_v37 }
 0x23d   : > { %v6639_v1 = vpack.c.bf16 %v3840_v17, %v3840_v17  ;;  %v5118_v43 = vunpack.c.l.b16 %v6637_v23  ;;  %v5119_v32 = vunpack.c.l.b16 %v6638_v4  ;;  %v6112_v60 = vrot.slane %v1984_v33, 9 }
 0x23e   : > { %v6767_v48 = vpack.c.bf16 %v3968_v62, %v3968_v62  ;;  %v5246_v35 = vunpack.c.l.b16 %v6765_v9  ;;  %v5247_v21 = vunpack.c.l.b16 %v6766_v55  ;;  %v6113_v19 = vrot.slane %v1992_v57, 9 }
 0x23f   : > { %v8056_v31 = vunpack.c.l.b16 %v6639_v1  ;;  %v5446_v22 = vrot.slane %v5118_v43, 7  ;;  %v5448_v58 = vrot.slane %v5119_v32, 6  ;;  %v6114_v40 = vrot.slane %v1991_v37, 9 }
 0x240   : > { %v8058_v14 = vunpack.c.l.b16 %v6767_v48  ;;  %v5670_v25 = vrot.slane %v5246_v35, 7  ;;  %v1532_v63 = vmax.f32 %v1424_v11, %v1428_v46  ;;  %v5245_v26 = vunpack.c.l.b16 %v6764_v54 }
 0x241   : > { %v5447_v52 = vsel %vm5286_vm1, %v5446_v22, %v5117_v20  ;;  %v6115_v61 = vrot.slane %v1993_v39, 9  ;;  %v3829_v2 = vmax.f32 %v1984_v33, %v6112_v60  ;;  %v5450_v5 = vrot.slane %v8056_v31, 5 }
 0x242   : > { %v8064_v0 = vsel %vm5289_vm2, %v5448_v58, %v5447_v52  ;;  %v5672_v8 = vrot.slane %v5247_v21, 6  ;;  %v3830_v50 = vmax.f32 %v1992_v57, %v6113_v19  ;;  %v5671_v6 = vsel %vm5286_vm1, %v5670_v25, %v5245_v26 }
 0x243   : > { %v5674_v47 = vrot.slane %v8058_v14, 5  ;;  %v3831_v12 = vmax.f32 %v1991_v37, %v6114_v40  ;;  %v3832_v7 = vmax.f32 %v1993_v39, %v6115_v61  ;;  %v2521_v11 = vcombine.high %v8054_v49, %v8054_v49 }
 0x244   : > { %v6629_v13 = vpack.c.bf16 %v3830_v50, %v3830_v50  ;;  %v2528_v46 = vrot.slane %v8054_v49, %v7279_v24  ;;  %v2028_v33 = vcombine.high %v1532_v63, %v1532_v63  ;;  %v6628_v41 = vpack.c.bf16 %v3829_v2, %v3829_v2 }
 0x245   : > { %v6630_v45 = vpack.c.bf16 %v3831_v12, %v3831_v12  ;;  %v6631_v36 = vpack.c.bf16 %v3832_v7, %v3832_v7  ;;  %v2035_v59 = vrot.slane %v1532_v63, %v7279_v24  ;;  %v2535_v30 = vrot.slane %v2521_v11, %v7279_v24 }
 0x246   : > { %v5110_v53 = vunpack.c.l.b16 %v6629_v13  ;;  %v2536_v38 = vcombine.high %v2528_v46, %v2528_v46  ;;  %v6240_v15 = vrot.slane %v2528_v46, 9  ;;  %v5673_v37 = vsel %vm5289_vm2, %v5672_v8, %v5671_v6 }
 0x247   : > { %v5111_v44 = vunpack.c.l.b16 %v6630_v45  ;;  %v2042_v42 = vrot.slane %v2028_v33, %v7279_v24  ;;  %v2043_v57 = vcombine.high %v2035_v59, %v2035_v59  ;;  %v2537_v23 = vcombine.high %v2535_v30, %v2535_v30 }
 0x248   : > { %v5432_v17 = vrot.slane %v5110_v53, 7  ;;  %v6241_v49 = vrot.slane %v2536_v38, 9  ;;  %v6242_v4 = vrot.slane %v2535_v30, 9  ;;  %v5109_v54 = vunpack.c.l.b16 %v6628_v41 }
 0x249   : > { %v5112_v20 = vunpack.c.l.b16 %v6631_v36  ;;  %v3957_v62 = vmax.f32 %v2528_v46, %v6240_v15  ;;  %v2044_v9 = vcombine.high %v2042_v42, %v2042_v42  ;;  %v5434_v55 = vrot.slane %v5111_v44, 6  ;;  %v1305_v44 = vpop.f32.mrf.mxu1 }
 0x24a   : > { %v6243_v1 = vrot.slane %v2537_v23, 9  ;;  %v3958_v43 = vmax.f32 %v2536_v38, %v6241_v49  ;;  %v3959_v32 = vmax.f32 %v2535_v30, %v6242_v4  ;;  %v5433_v39 = vsel %vm5286_vm1, %v5432_v17, %v5109_v54 }
 0x24b   : > { %v6756_v48 = vpack.c.bf16 %v3957_v62, %v3957_v62  ;;  %v6124_v35 = vrot.slane %v2035_v59, 9  ;;  %v6125_v21 = vrot.slane %v2043_v57, 9  ;;  %v6126_v19 = vrot.slane %v2042_v42, 9 }
 0x24c   : > { %v3960_v60 = vmax.f32 %v2537_v23, %v6243_v1  ;;  %v6757_v22 = vpack.c.bf16 %v3958_v43, %v3958_v43  ;;  %v6758_v58 = vpack.c.bf16 %v3959_v32, %v3959_v32  ;;  %v5436_v25 = vrot.slane %v5112_v20, 5  ;;  %v8112_v43 = vpop.f32.mrf.mxu0  ;;  %v8114_v32 = vpop.f32.mrf.mxu1 }
 0x24d   : > { %v6127_v40 = vrot.slane %v2044_v9, 9  ;;  %v3841_v63 = vmax.f32 %v2035_v59, %v6124_v35  ;;  %v3842_v52 = vmax.f32 %v2043_v57, %v6125_v21  ;;  %v3843_v8 = vmax.f32 %v2042_v42, %v6126_v19 }
 0x24e   : > { %v6759_v26 = vpack.c.bf16 %v3960_v60, %v3960_v60  ;;  %v5238_v61 = vunpack.c.l.b16 %v6757_v22  ;;  %v8078_v2 = vunpack.c.l.b16 %v6758_v58  ;;  %v5435_v50 = vsel %vm5289_vm2, %v5434_v55, %v5433_v39 }
 0x24f   : > { %v3844_v6 = vmax.f32 %v2044_v9, %v6127_v40  ;;  %v6640_v12 = vpack.c.bf16 %v3841_v63, %v3841_v63  ;;  %v6641_v7 = vpack.c.bf16 %v3842_v52, %v3842_v52  ;;  %v5237_v13 = vunpack.c.l.b16 %v6756_v48 }
 0x250   : > { %v8081_v11 = vunpack.c.l.b16 %v6759_v26  ;;  %v5656_v46 = vrot.slane %v5238_v61, 7  ;;  %v6642_v33 = vpack.c.bf16 %v3843_v8, %v3843_v8  ;;  %v1564_v59 = vmax.f32 %v1488_v51, %v1492_v34  ;;  %v8122_v8 = vpop.f32.mrf.mxu0 }
 0x251   : > { %v6643_v41 = vpack.c.bf16 %v3844_v6, %v3844_v6  ;;  %v5121_v45 = vunpack.c.l.b16 %v6640_v12  ;;  %v5122_v36 = vunpack.c.l.b16 %v6641_v7  ;;  %v5658_v30 = vrot.slane %v8078_v2, 6  ;;  %v8146_v2 = vld [vmem:[%s8448_s2] ss:$0 sm:$0xff] }
 0x252   : > { %v8088_v53 = vsel %vm5286_vm1, %v5656_v46, %v5237_v13  ;;  %v5123_v38 = vunpack.c.l.b16 %v6642_v33  ;;  %v5451_v15 = vsel %vm5292_vm3, %v5450_v5, %v8064_v0  ;;  %v5660_v42 = vrot.slane %v8081_v11, 5 }
 0x253   : > { %v5124_v57 = vunpack.c.l.b16 %v6643_v41  ;;  %v5452_v17 = vrot.slane %v5121_v45, 4  ;;  %v5454_v27 = vrot.slane %v5122_v36, 3  ;;  %v2572_v56 = vcombine.high %v1564_v59, %v1564_v59 }
 0x254   : > { %v5456_v23 = vrot.slane %v5123_v38, 2  ;;  %v2579_v51 = vrot.slane %v1564_v59, %v7279_v24  ;;  %v1426_v34 = vmax.f32 %v8049_v10, 0.0  ;;  %v5675_v31 = vsel %vm5292_vm3, %v5674_v47, %v5673_v37 }
 0x255   : > { %v5453_v49 = vsel %vm5295_vm4, %v5452_v17, %v5451_v15  ;;  %v5458_v4 = vrot.slane %v5124_v57, 1  ;;  %v1306_v0 = vadd.f32 %v7846_v16, %v1305_v44  ;;  %v2586_v54 = vrot.slane %v2572_v56, %v7279_v24  ;;  %v6925_v17 = vpop.f32.mrf.mxu0 }
 0x256   : > { %v5455_v5 = vsel %vm5298_vm5, %v5454_v27, %v5453_v49  ;;  %v2587_v20 = vcombine.high %v2579_v51, %v2579_v51  ;;  %v6252_v62 = vrot.slane %v2579_v51, 9  ;;  %v1530_v10 = vmax.f32 %v1422_v29, %v1426_v34 }
 0x257   : > { %v5457_v9 = vsel %vm5301_vm6, %v5456_v23, %v5455_v5  ;;  %v8109_v55 = vsel %vm5292_vm3, %v5436_v25, %v5435_v50  ;;  %v1490_v14 = vmax.f32 %v1306_v0, 0.0  ;;  %v2588_v37 = vcombine.high %v2586_v54, %v2586_v54  ;;  %v8124_v50 = vpop.f32.mrf.mxu1 }
 0x258   : > { %v5459_v47 = vsel %vm5304_vm7, %v5458_v4, %v5457_v9  ;;  %v6253_v16 = vrot.slane %v2587_v20, 9  ;;  %v6254_v1 = vrot.slane %v2586_v54, 9  ;;  %v3969_v48 = vmax.f32 %v2579_v51, %v6252_v62 }
 0x259   : > { %v5751_v39 = vpack.c.b16 %v5459_v47, %v5459_v47  ;;  %v1994_v35 = vcombine.high %v1530_v10, %v1530_v10  ;;  %v2001_v28 = vrot.slane %v1530_v10, %v7279_v24  ;;  %v6255_v29 = vrot.slane %v2588_v37, 9  ;;  %v6989_v27 = vpop.f32.mrf.mxu1 }
 0x25a   : > { %v3970_v21 = vmax.f32 %v2587_v20, %v6253_v16  ;;  %v3971_v60 = vmax.f32 %v2586_v54, %v6254_v1  ;;  %v1562_v22 = vmax.f32 %v1486_v18, %v1490_v14  ;;  %v6768_v58 = vpack.c.bf16 %v3969_v48, %v3969_v48 }
 0x25b   : > { %5816 = vst.msk [vmem:[%s7364_s27 + $0x2c] sm:$0xf] %vm5804_vm8, %v5751_v39  ;;  %v2008_v19 = vrot.slane %v1994_v35, %v7279_v24  ;;  %v2009_v25 = vcombine.high %v2001_v28, %v2001_v28  ;;  %v6116_v40 = vrot.slane %v2001_v28, 9  ;;  %v3972_v63 = vmax.f32 %v2588_v37, %v6255_v29  ;;  %v1065_v37 = vpop.f32.mrf.mxu0  ;;  %v1321_v16 = vpop.f32.mrf.mxu1 }
 0x25c   : > { %v6769_v52 = vpack.c.bf16 %v3970_v21, %v3970_v21  ;;  %v6770_v26 = vpack.c.bf16 %v3971_v60, %v3971_v60  ;;  %v2538_v61 = vcombine.high %v1562_v22, %v1562_v22  ;;  %v5249_v6 = vunpack.c.l.b16 %v6768_v58 }
 0x25d   : > { %v2010_v12 = vcombine.high %v2008_v19, %v2008_v19  ;;  %v6117_v7 = vrot.slane %v2009_v25, 9  ;;  %v6118_v3 = vrot.slane %v2008_v19, 9  ;;  %v6771_v18 = vpack.c.bf16 %v3972_v63, %v3972_v63 }
 0x25e   : > { %v5250_v13 = vunpack.c.l.b16 %v6769_v52  ;;  %v5251_v46 = vunpack.c.l.b16 %v6770_v26  ;;  %v3833_v33 = vmax.f32 %v2001_v28, %v6116_v40  ;;  %v5676_v41 = vrot.slane %v5249_v6, 4 }
 0x25f   : > { %v6119_v45 = vrot.slane %v2010_v12, 9  ;;  %v3834_v36 = vmax.f32 %v2009_v25, %v6117_v7  ;;  %v3835_v59 = vmax.f32 %v2008_v19, %v6118_v3  ;;  %v5252_v38 = vunpack.c.l.b16 %v6771_v18 }
 0x260   : > { %v5678_v15 = vrot.slane %v5250_v13, 3  ;;  %v5680_v44 = vrot.slane %v5251_v46, 2  ;;  %v6632_v57 = vpack.c.bf16 %v3833_v33, %v3833_v33  ;;  %v5677_v23 = vsel %vm5295_vm4, %v5676_v41, %v5675_v31 }
 0x261   : > { %v3836_v56 = vmax.f32 %v2010_v12, %v6119_v45  ;;  %v6633_v51 = vpack.c.bf16 %v3834_v36, %v3834_v36  ;;  %v6634_v34 = vpack.c.bf16 %v3835_v59, %v3835_v59  ;;  %v5682_v4 = vrot.slane %v5252_v38, 1 }
 0x262   : > { %v5679_v49 = vsel %vm5298_vm5, %v5678_v15, %v5677_v23  ;;  %v5113_v0 = vunpack.c.l.b16 %v6632_v57  ;;  %v2545_v5 = vrot.slane %v1562_v22, %v7279_v24  ;;  %v2552_v31 = vrot.slane %v2538_v61, %v7279_v24  ;;  %v6992_v61 = vpop.f32.mrf.mxu1 }
 0x263   : > { %v5681_v54 = vsel %vm5301_vm6, %v5680_v44, %v5679_v49  ;;  %v6635_v20 = vpack.c.bf16 %v3836_v56, %v3836_v56  ;;  %v5114_v62 = vunpack.c.l.b16 %v6633_v51  ;;  %v5115_v9 = vunpack.c.l.b16 %v6634_v34 }
 0x264   : > { %v5683_v10 = vsel %vm5304_vm7, %v5682_v4, %v5681_v54  ;;  %v5438_v14 = vrot.slane %v5113_v0, 4  ;;  %v2553_v47 = vcombine.high %v2545_v5, %v2545_v5  ;;  %v2554_v29 = vcombine.high %v2552_v31, %v2552_v31  ;;  %v1334_v15 = vpop.f32.mrf.mxu1 }
 0x265   : > { %v5767_v1 = vpack.c.b16 %v5683_v10, %v5683_v10  ;;  %v5116_v39 = vunpack.c.l.b16 %v6635_v20  ;;  %v5440_v48 = vrot.slane %v5114_v62, 3  ;;  %v5442_v35 = vrot.slane %v5115_v9, 2 }
 0x266   : > { %v5439_v28 = vsel %vm5295_vm4, %v5438_v14, %v8109_v55  ;;  %v6244_v21 = vrot.slane %v2545_v5, 9  ;;  %v6245_v60 = vrot.slane %v2553_v47, 9  ;;  %v5659_v22 = vsel %vm5289_vm2, %v5658_v30, %v8088_v53  ;;  %v6928_v55 = vpop.f32.mrf.mxu0  ;;  %v6993_v20 = vpop.f32.mrf.mxu1 }
 0x267   : > { %5832 = vst.msk [vmem:[%s7364_s27 + $0x6c] sm:$0xf] %vm5804_vm8, %v5767_v1  ;;  %v5441_v58 = vsel %vm5298_vm5, %v5440_v48, %v5439_v28  ;;  %v5444_v19 = vrot.slane %v5116_v39, 1  ;;  %v6246_v25 = vrot.slane %v2552_v31, 9  ;;  %v6247_v63 = vrot.slane %v2554_v29, 9 }
 0x268   : > { %v5443_v40 = vsel %vm5301_vm6, %v5442_v35, %v5441_v58  ;;  %v3961_v52 = vmax.f32 %v2545_v5, %v6244_v21  ;;  %v3962_v26 = vmax.f32 %v2553_v47, %v6245_v60  ;;  %v1071_v53 = vadd.f32 %v8146_v2, %v8112_v43  ;;  %v1078_v38 = vpop.f32.mrf.mxu0 }
 0x269   : > { %v5445_v6 = vsel %vm5304_vm7, %v5444_v19, %v5443_v40  ;;  %v3963_v12 = vmax.f32 %v2552_v31, %v6246_v25  ;;  %v1327_v30 = vadd.f32 %v8146_v2, %v8114_v32  ;;  %v3964_v3 = vmax.f32 %v2554_v29, %v6247_v63 }
 0x26a   : > { %v5750_v7 = vpack.c.b16 %v5445_v6, %v5445_v6  ;;  %v6760_v18 = vpack.c.bf16 %v3961_v52, %v3961_v52  ;;  %v6761_v13 = vpack.c.bf16 %v3962_v26, %v3962_v26  ;;  %v5661_v33 = vsel %vm5292_vm3, %v5660_v42, %v5659_v22  ;;  %v6929_v54 = vpop.f32.mrf.mxu0 }
 0x26b   : > { %v6762_v46 = vpack.c.bf16 %v3963_v12, %v3963_v12  ;;  %v1063_v41 = vadd.f32 %v8146_v2, %v8122_v8  ;;  %v8159_v45 = vadd.f32 %v8146_v2, %v8124_v50  ;;  %v6763_v43 = vpack.c.bf16 %v3964_v3, %v3964_v3 }
 0x26c   : > { %5815 = vst.msk [vmem:[%s7364_s27 + $0x28] sm:$0xf] %vm5804_vm8, %v5750_v7  ;;  %v5241_v32 = vunpack.c.l.b16 %v6760_v18  ;;  %v5242_v36 = vunpack.c.l.b16 %v6761_v13  ;;  %v8164_v59 = vadd.f32 %v8146_v2, %v6925_v17  ;;  %v1431_v44 = vmax.f32 %v1071_v53, 0.0  ;;  %v1081_v22 = vpop.f32.mrf.mxu0 }
 0x26d   : > { %v5243_v11 = vunpack.c.l.b16 %v6762_v46  ;;  %v1495_v42 = vmax.f32 %v1327_v30, 0.0  ;;  %v8167_v57 = vadd.f32 %v8146_v2, %v6989_v27  ;;  %v5244_v8 = vunpack.c.l.b16 %v6763_v43 }
 0x26e   : > { %v5662_v23 = vrot.slane %v5241_v32, 4  ;;  %v5664_v50 = vrot.slane %v5242_v36, 3  ;;  %v1429_v56 = vmax.f32 %v1063_v41, 0.0  ;;  %v1493_v34 = vmax.f32 %v8159_v45, 0.0 }
 0x26f   : > { %v5666_v51 = vrot.slane %v5243_v11, 2  ;;  %v1432_v49 = vmax.f32 %v8164_v59, 0.0  ;;  %v8172_v17 = vadd.f32 %v8146_v2, %v1065_v37  ;;  %v5668_v0 = vrot.slane %v5244_v8, 1 }
 0x270   : > { %v5663_v4 = vsel %vm5295_vm4, %v5662_v23, %v5661_v33  ;;  %v1087_v5 = vadd.f32 %v8146_v2, %v6928_v55  ;;  %v1343_v27 = vadd.f32 %v8146_v2, %v6992_v61  ;;  %v1496_v9 = vmax.f32 %v8167_v57, 0.0 }
 0x271   : > { %v5665_v62 = vsel %vm5298_vm5, %v5664_v50, %v5663_v4  ;;  %v8180_v10 = vadd.f32 %v8146_v2, %v1321_v16  ;;  %v1079_v14 = vadd.f32 %v8146_v2, %v1078_v38  ;;  %v1335_v1 = vadd.f32 %v8146_v2, %v1334_v15 }
 0x272   : > { %v5667_v31 = vsel %vm5301_vm6, %v5666_v51, %v5665_v62  ;;  %v1435_v47 = vmax.f32 %v1087_v5, 0.0  ;;  %v1499_v37 = vmax.f32 %v1343_v27, 0.0  ;;  %v8187_v35 = vadd.f32 %v8146_v2, %v6929_v54 }
 0x273   : > { %v5669_v39 = vsel %vm5304_vm7, %v5668_v0, %v5667_v31  ;;  %v1433_v48 = vmax.f32 %v1079_v14, 0.0  ;;  %v8190_v28 = vadd.f32 %v8146_v2, %v6993_v20  ;;  %v1430_v29 = vmax.f32 %v8172_v17, 0.0 }
 0x274   : > { %v5766_v16 = vpack.c.b16 %v5669_v39, %v5669_v39  ;;  %v1535_v21 = vmax.f32 %v1431_v44, %v1435_v47  ;;  %v1567_v60 = vmax.f32 %v1495_v42, %v1499_v37  ;;  %v1494_v58 = vmax.f32 %v8180_v10, 0.0 }
 0x275   : > { %v1533_v19 = vmax.f32 %v1429_v56, %v1433_v48  ;;  %v1497_v25 = vmax.f32 %v1335_v1, 0.0  ;;  %v1436_v40 = vmax.f32 %v8187_v35, 0.0  ;;  %v1500_v12 = vmax.f32 %v8190_v28, 0.0 }
 0x276   : > { %5831 = vst.msk [vmem:[%s7364_s27 + $0x68] sm:$0xf] %vm5804_vm8, %v5766_v16  ;;  %v2079_v63 = vcombine.high %v1535_v21, %v1535_v21  ;;  %v2086_v52 = vrot.slane %v1535_v21, %v7279_v24  ;;  %v2623_v26 = vcombine.high %v1567_v60, %v1567_v60  ;;  %v2630_v55 = vrot.slane %v1567_v60, %v7279_v24 }
 0x277   : > { %v2045_v61 = vcombine.high %v1533_v19, %v1533_v19  ;;  %v2052_v6 = vrot.slane %v1533_v19, %v7279_v24  ;;  %v8202_v53 = vadd.f32 %v8146_v2, %v1081_v22  ;;  %v8207_v41 = vmax.f32 %v1493_v34, %v1497_v25 }
 0x278   : > { %v2093_v30 = vrot.slane %v2079_v63, %v7279_v24  ;;  %v2094_v7 = vcombine.high %v2086_v52, %v2086_v52  ;;  %v6136_v3 = vrot.slane %v2086_v52, 9  ;;  %v2637_v18 = vrot.slane %v2623_v26, %v7279_v24 }
 0x279   : > { %v2638_v13 = vcombine.high %v2630_v55, %v2630_v55  ;;  %v6264_v46 = vrot.slane %v2630_v55, 9  ;;  %v2059_v33 = vrot.slane %v2045_v61, %v7279_v24  ;;  %v2060_v0 = vcombine.high %v2052_v6, %v2052_v6 }
 0x27a   : > { %v2095_v45 = vcombine.high %v2093_v30, %v2093_v30  ;;  %v6137_v43 = vrot.slane %v2094_v7, 9  ;;  %v6138_v32 = vrot.slane %v2093_v30, 9  ;;  %v3853_v36 = vmax.f32 %v2086_v52, %v6136_v3 }
 0x27b   : > { %v2639_v38 = vcombine.high %v2637_v18, %v2637_v18  ;;  %v6265_v15 = vrot.slane %v2638_v13, 9  ;;  %v6266_v11 = vrot.slane %v2637_v18, 9  ;;  %v3981_v44 = vmax.f32 %v2630_v55, %v6264_v46 }
 0x27c   : > { %v6139_v42 = vrot.slane %v2095_v45, 9  ;;  %v3854_v8 = vmax.f32 %v2094_v7, %v6137_v43  ;;  %v3855_v23 = vmax.f32 %v2093_v30, %v6138_v32  ;;  %v6652_v50 = vpack.c.bf16 %v3853_v36, %v3853_v36 }
 0x27d   : > { %v6267_v56 = vrot.slane %v2639_v38, 9  ;;  %v3982_v51 = vmax.f32 %v2638_v13, %v6265_v15  ;;  %v3983_v4 = vmax.f32 %v2637_v18, %v6266_v11  ;;  %v6780_v54 = vpack.c.bf16 %v3981_v44, %v3981_v44 }
 0x27e   : > { %v3856_v5 = vmax.f32 %v2095_v45, %v6139_v42  ;;  %v6653_v27 = vpack.c.bf16 %v3854_v8, %v3854_v8  ;;  %v6654_v34 = vpack.c.bf16 %v3855_v23, %v3855_v23  ;;  %v5133_v20 = vunpack.c.l.b16 %v6652_v50 }
 0x27f   : > { %v3984_v62 = vmax.f32 %v2639_v38, %v6267_v56  ;;  %v6781_v14 = vpack.c.bf16 %v3982_v51, %v3982_v51  ;;  %v6782_v31 = vpack.c.bf16 %v3983_v4, %v3983_v4  ;;  %v2061_v39 = vcombine.high %v2059_v33, %v2059_v33 }
 0x280   : > { %v6655_v47 = vpack.c.bf16 %v3856_v5, %v3856_v5  ;;  %v5134_v37 = vunpack.c.l.b16 %v6653_v27  ;;  %v5135_v1 = vunpack.c.l.b16 %v6654_v34  ;;  %v6128_v21 = vrot.slane %v2052_v6, 9 }
 0x281   : > { %v6783_v48 = vpack.c.bf16 %v3984_v62, %v3984_v62  ;;  %v5262_v35 = vunpack.c.l.b16 %v6781_v14  ;;  %v5263_v16 = vunpack.c.l.b16 %v6782_v31  ;;  %v6129_v25 = vrot.slane %v2060_v0, 9 }
 0x282   : > { %v8209_v60 = vunpack.c.l.b16 %v6655_v47  ;;  %v5474_v22 = vrot.slane %v5134_v37, 7  ;;  %v5476_v19 = vrot.slane %v5135_v1, 6  ;;  %v6130_v26 = vrot.slane %v2059_v33, 9 }
 0x283   : > { %v8211_v63 = vunpack.c.l.b16 %v6783_v48  ;;  %v5698_v52 = vrot.slane %v5262_v35, 7  ;;  %v1536_v55 = vmax.f32 %v1432_v49, %v1436_v40  ;;  %v5261_v30 = vunpack.c.l.b16 %v6780_v54 }
 0x284   : > { %v5475_v61 = vsel %vm5286_vm1, %v5474_v22, %v5133_v20  ;;  %v6131_v7 = vrot.slane %v2061_v39, 9  ;;  %v3845_v3 = vmax.f32 %v2052_v6, %v6128_v21  ;;  %v5478_v13 = vrot.slane %v8209_v60, 5 }
 0x285   : > { %v8217_v18 = vsel %vm5289_vm2, %v5476_v19, %v5475_v61  ;;  %v5700_v46 = vrot.slane %v5263_v16, 6  ;;  %v3846_v45 = vmax.f32 %v2060_v0, %v6129_v25  ;;  %v5699_v43 = vsel %vm5286_vm1, %v5698_v52, %v5261_v30 }
 0x286   : > { %v5702_v32 = vrot.slane %v8211_v63, 5  ;;  %v3847_v36 = vmax.f32 %v2059_v33, %v6130_v26  ;;  %v3848_v38 = vmax.f32 %v2061_v39, %v6131_v7  ;;  %v2589_v49 = vcombine.high %v8207_v41, %v8207_v41 }
 0x287   : > { %v6645_v59 = vpack.c.bf16 %v3846_v45, %v3846_v45  ;;  %v2596_v40 = vrot.slane %v8207_v41, %v7279_v24  ;;  %v2096_v6 = vcombine.high %v1536_v55, %v1536_v55  ;;  %v6644_v15 = vpack.c.bf16 %v3845_v3, %v3845_v3 }
 0x288   : > { %v6646_v11 = vpack.c.bf16 %v3847_v36, %v3847_v36  ;;  %v6647_v44 = vpack.c.bf16 %v3848_v38, %v3848_v38  ;;  %v2103_v42 = vrot.slane %v1536_v55, %v7279_v24  ;;  %v2603_v23 = vrot.slane %v2589_v49, %v7279_v24 }
 0x289   : > { %v5126_v8 = vunpack.c.l.b16 %v6645_v59  ;;  %v2604_v50 = vcombine.high %v2596_v40, %v2596_v40  ;;  %v6256_v56 = vrot.slane %v2596_v40, 9  ;;  %v5701_v33 = vsel %vm5289_vm2, %v5700_v46, %v5699_v43 }
 0x28a   : > { %v5127_v51 = vunpack.c.l.b16 %v6646_v11  ;;  %v2110_v4 = vrot.slane %v2096_v6, %v7279_v24  ;;  %v2111_v0 = vcombine.high %v2103_v42, %v2103_v42  ;;  %v2605_v27 = vcombine.high %v2603_v23, %v2603_v23 }
 0x28b   : > { %v5460_v5 = vrot.slane %v5126_v8, 7  ;;  %v6257_v41 = vrot.slane %v2604_v50, 9  ;;  %v6258_v34 = vrot.slane %v2603_v23, 9  ;;  %v5125_v54 = vunpack.c.l.b16 %v6644_v15 }
 0x28c   : > { %v5128_v20 = vunpack.c.l.b16 %v6647_v44  ;;  %v3973_v62 = vmax.f32 %v2596_v40, %v6256_v56  ;;  %v2112_v14 = vcombine.high %v2110_v4, %v2110_v4  ;;  %v5462_v31 = vrot.slane %v5127_v51, 6  ;;  %v1337_v51 = vpop.f32.mrf.mxu1 }
 0x28d   : > { %v6259_v47 = vrot.slane %v2605_v27, 9  ;;  %v3974_v37 = vmax.f32 %v2604_v50, %v6257_v41  ;;  %v3975_v1 = vmax.f32 %v2603_v23, %v6258_v34  ;;  %v5461_v39 = vsel %vm5286_vm1, %v5460_v5, %v5125_v54 }
 0x28e   : > { %v6772_v48 = vpack.c.bf16 %v3973_v62, %v3973_v62  ;;  %v6140_v35 = vrot.slane %v2103_v42, 9  ;;  %v6141_v16 = vrot.slane %v2111_v0, 9  ;;  %v6142_v25 = vrot.slane %v2110_v4, 9 }
 0x28f   : > { %v3976_v21 = vmax.f32 %v2605_v27, %v6259_v47  ;;  %v6773_v22 = vpack.c.bf16 %v3974_v37, %v3974_v37  ;;  %v6774_v19 = vpack.c.bf16 %v3975_v1, %v3975_v1  ;;  %v5464_v52 = vrot.slane %v5128_v20, 5  ;;  %v8265_v1 = vpop.f32.mrf.mxu0 }
 0x290   : > { %v6143_v26 = vrot.slane %v2112_v14, 9  ;;  %v3857_v55 = vmax.f32 %v2103_v42, %v6140_v35  ;;  %v3858_v61 = vmax.f32 %v2111_v0, %v6141_v16  ;;  %v3859_v46 = vmax.f32 %v2110_v4, %v6142_v25 }
 0x291   : > { %v6775_v30 = vpack.c.bf16 %v3976_v21, %v3976_v21  ;;  %v5254_v7 = vunpack.c.l.b16 %v6773_v22  ;;  %v8231_v3 = vunpack.c.l.b16 %v6774_v19  ;;  %v5463_v45 = vsel %vm5289_vm2, %v5462_v31, %v5461_v39  ;;  %v8267_v39 = vpop.f32.mrf.mxu1 }
 0x292   : > { %v3860_v43 = vmax.f32 %v2112_v14, %v6143_v26  ;;  %v6656_v36 = vpack.c.bf16 %v3857_v55, %v3857_v55  ;;  %v6657_v38 = vpack.c.bf16 %v3858_v61, %v3858_v61  ;;  %v5253_v59 = vunpack.c.l.b16 %v6772_v48 }
 0x293   : > { %v8234_v49 = vunpack.c.l.b16 %v6775_v30  ;;  %v5684_v40 = vrot.slane %v5254_v7, 7  ;;  %v6658_v6 = vpack.c.bf16 %v3859_v46, %v3859_v46  ;;  %v1568_v42 = vmax.f32 %v1496_v9, %v1500_v12 }
 0x294   : > { %v6659_v15 = vpack.c.bf16 %v3860_v43, %v3860_v43  ;;  %v5137_v11 = vunpack.c.l.b16 %v6656_v36  ;;  %v5138_v44 = vunpack.c.l.b16 %v6657_v38  ;;  %v5686_v23 = vrot.slane %v8231_v3, 6  ;;  %v8277_v43 = vpop.f32.mrf.mxu1 }
 0x295   : > { %v8241_v8 = vsel %vm5286_vm1, %v5684_v40, %v5253_v59  ;;  %v5139_v50 = vunpack.c.l.b16 %v6658_v6  ;;  %v5479_v56 = vsel %vm5292_vm3, %v5478_v13, %v8217_v18  ;;  %v5688_v4 = vrot.slane %v8234_v49, 5 }
 0x296   : > { %v5140_v0 = vunpack.c.l.b16 %v6659_v15  ;;  %v5480_v5 = vrot.slane %v5137_v11, 4  ;;  %v5482_v28 = vrot.slane %v5138_v44, 3  ;;  %v2640_v57 = vcombine.high %v1568_v42, %v1568_v42 }
 0x297   : > { %v5484_v27 = vrot.slane %v5139_v50, 2  ;;  %v2647_v9 = vrot.slane %v1568_v42, %v7279_v24  ;;  %v1434_v12 = vmax.f32 %v8202_v53, 0.0  ;;  %v5703_v60 = vsel %vm5292_vm3, %v5702_v32, %v5701_v33 }
 0x298   : > { %v5481_v41 = vsel %vm5295_vm4, %v5480_v5, %v5479_v56  ;;  %v5486_v34 = vrot.slane %v5140_v0, 1  ;;  %v1338_v18 = vadd.f32 %v8146_v2, %v1337_v51  ;;  %v2654_v54 = vrot.slane %v2640_v57, %v7279_v24 }
 0x299   : > { %v5483_v13 = vsel %vm5298_vm5, %v5482_v28, %v5481_v41  ;;  %v2655_v20 = vcombine.high %v2647_v9, %v2647_v9  ;;  %v6268_v62 = vrot.slane %v2647_v9, 9  ;;  %v1534_v53 = vmax.f32 %v1430_v29, %v1434_v12 }
 0x29a   : > { %v5485_v14 = vsel %vm5301_vm6, %v5484_v27, %v5483_v13  ;;  %v8262_v31 = vsel %vm5292_vm3, %v5464_v52, %v5463_v45  ;;  %v1498_v63 = vmax.f32 %v1338_v18, 0.0  ;;  %v2656_v33 = vcombine.high %v2654_v54, %v2654_v54  ;;  %v8275_v45 = vpop.f32.mrf.mxu0  ;;  %v8279_v27 = vpop.f32.mrf.mxu1 }
 0x29b   : > { %v5487_v32 = vsel %vm5304_vm7, %v5486_v34, %v5485_v14  ;;  %v6269_v47 = vrot.slane %v2655_v20, 9  ;;  %v6270_v37 = vrot.slane %v2654_v54, 9  ;;  %v3985_v35 = vmax.f32 %v2647_v9, %v6268_v62 }
 0x29c   : > { %v5753_v48 = vpack.c.b16 %v5487_v32, %v5487_v32  ;;  %v2062_v16 = vcombine.high %v1534_v53, %v1534_v53  ;;  %v2069_v17 = vrot.slane %v1534_v53, %v7279_v24  ;;  %v6271_v29 = vrot.slane %v2656_v33, 9  ;;  %v6933_v28 = vpop.f32.mrf.mxu0 }
 0x29d   : > { %v3986_v21 = vmax.f32 %v2655_v20, %v6269_v47  ;;  %v3987_v22 = vmax.f32 %v2654_v54, %v6270_v37  ;;  %v1566_v19 = vmax.f32 %v1494_v58, %v1498_v63  ;;  %v6784_v25 = vpack.c.bf16 %v3985_v35, %v3985_v35  ;;  %v1353_v37 = vpop.f32.mrf.mxu1 }
 0x29e   : > { %5818 = vst.msk [vmem:[%s7364_s27 + $0x34] sm:$0xf] %vm5804_vm8, %v5753_v48  ;;  %v2076_v52 = vrot.slane %v2062_v16, %v7279_v24  ;;  %v2077_v26 = vcombine.high %v2069_v17, %v2069_v17  ;;  %v6132_v55 = vrot.slane %v2069_v17, 9  ;;  %v3988_v61 = vmax.f32 %v2656_v33, %v6271_v29  ;;  %v1097_v47 = vpop.f32.mrf.mxu0 }
 0x29f   : > { %v6785_v30 = vpack.c.bf16 %v3986_v21, %v3986_v21  ;;  %v6786_v7 = vpack.c.bf16 %v3987_v22, %v3987_v22  ;;  %v2606_v46 = vcombine.high %v1566_v19, %v1566_v19  ;;  %v5265_v36 = vunpack.c.l.b16 %v6784_v25 }
 0x2a0   : > { %v2078_v38 = vcombine.high %v2076_v52, %v2076_v52  ;;  %v6133_v59 = vrot.slane %v2077_v26, 9  ;;  %v6134_v10 = vrot.slane %v2076_v52, 9  ;;  %v6787_v58 = vpack.c.bf16 %v3988_v61, %v3988_v61 }
 0x2a1   : > { %v5266_v40 = vunpack.c.l.b16 %v6785_v30  ;;  %v5267_v6 = vunpack.c.l.b16 %v6786_v7  ;;  %v3849_v15 = vmax.f32 %v2069_v17, %v6132_v55  ;;  %v5704_v11 = vrot.slane %v5265_v36, 4  ;;  %v7000_v36 = vpop.f32.mrf.mxu1 }
 0x2a2   : > { %v6135_v44 = vrot.slane %v2078_v38, 9  ;;  %v3850_v42 = vmax.f32 %v2077_v26, %v6133_v59  ;;  %v3851_v50 = vmax.f32 %v2076_v52, %v6134_v10  ;;  %v5268_v56 = vunpack.c.l.b16 %v6787_v58 }
 0x2a3   : > { %v5706_v51 = vrot.slane %v5266_v40, 3  ;;  %v5708_v0 = vrot.slane %v5267_v6, 2  ;;  %v6648_v5 = vpack.c.bf16 %v3849_v15, %v3849_v15  ;;  %v5705_v57 = vsel %vm5295_vm4, %v5704_v11, %v5703_v60 }
 0x2a4   : > { %v3852_v9 = vmax.f32 %v2078_v38, %v6135_v44  ;;  %v6649_v12 = vpack.c.bf16 %v3850_v42, %v3850_v42  ;;  %v6650_v41 = vpack.c.bf16 %v3851_v50, %v3851_v50  ;;  %v5710_v18 = vrot.slane %v5268_v56, 1  ;;  %v1366_v56 = vpop.f32.mrf.mxu1 }
 0x2a5   : > { %v5707_v34 = vsel %vm5298_vm5, %v5706_v51, %v5705_v57  ;;  %v5129_v13 = vunpack.c.l.b16 %v6648_v5  ;;  %v2613_v54 = vrot.slane %v1566_v19, %v7279_v24  ;;  %v2620_v60 = vrot.slane %v2606_v46, %v7279_v24  ;;  %v6936_v46 = vpop.f32.mrf.mxu0 }
 0x2a6   : > { %v5709_v20 = vsel %vm5301_vm6, %v5708_v0, %v5707_v34  ;;  %v6651_v62 = vpack.c.bf16 %v3852_v9, %v3852_v9  ;;  %v5130_v14 = vunpack.c.l.b16 %v6649_v12  ;;  %v5131_v53 = vunpack.c.l.b16 %v6650_v41 }
 0x2a7   : > { %v5711_v63 = vsel %vm5304_vm7, %v5710_v18, %v5709_v20  ;;  %v5466_v32 = vrot.slane %v5129_v13, 4  ;;  %v2621_v33 = vcombine.high %v2613_v54, %v2613_v54  ;;  %v2622_v21 = vcombine.high %v2620_v60, %v2620_v60 }
 0x2a8   : > { %v5769_v48 = vpack.c.b16 %v5711_v63, %v5711_v63  ;;  %v5132_v35 = vunpack.c.l.b16 %v6651_v62  ;;  %v5468_v16 = vrot.slane %v5130_v14, 3  ;;  %v5470_v17 = vrot.slane %v5131_v53, 2  ;;  %v7001_v62 = vpop.f32.mrf.mxu1 }
 0x2a9   : > { %v5467_v29 = vsel %vm5295_vm4, %v5466_v32, %v8262_v31  ;;  %v6260_v22 = vrot.slane %v2613_v54, 9  ;;  %v6261_v19 = vrot.slane %v2621_v33, 9  ;;  %v5687_v25 = vsel %vm5289_vm2, %v5686_v23, %v8241_v8 }
 0x2aa   : > { %5834 = vst.msk [vmem:[%s7364_s27 + $0x74] sm:$0xf] %vm5804_vm8, %v5769_v48  ;;  %v5469_v52 = vsel %vm5298_vm5, %v5468_v16, %v5467_v29  ;;  %v5472_v26 = vrot.slane %v5132_v35, 1  ;;  %v6262_v55 = vrot.slane %v2620_v60, 9  ;;  %v6263_v30 = vrot.slane %v2622_v21, 9 }
 0x2ab   : > { %v5471_v61 = vsel %vm5301_vm6, %v5470_v17, %v5469_v52  ;;  %v3977_v7 = vmax.f32 %v2613_v54, %v6260_v22  ;;  %v3978_v31 = vmax.f32 %v2621_v33, %v6261_v19  ;;  %v1103_v3 = vadd.f32 %v8146_v2, %v8265_v1 }
 0x2ac   : > { %v5473_v38 = vsel %vm5304_vm7, %v5472_v26, %v5471_v61  ;;  %v3979_v59 = vmax.f32 %v2620_v60, %v6262_v55  ;;  %v1359_v8 = vadd.f32 %v8146_v2, %v8267_v39  ;;  %v3980_v10 = vmax.f32 %v2622_v21, %v6263_v30  ;;  %v1110_v39 = vpop.f32.mrf.mxu0 }
 0x2ad   : > { %v5752_v23 = vpack.c.b16 %v5473_v38, %v5473_v38  ;;  %v6776_v58 = vpack.c.bf16 %v3977_v7, %v3977_v7  ;;  %v6777_v40 = vpack.c.bf16 %v3978_v31, %v3978_v31  ;;  %v1095_v15 = vadd.f32 %v8146_v2, %v8275_v45 }
 0x2ae   : > { %v6778_v6 = vpack.c.bf16 %v3979_v59, %v3979_v59  ;;  %v8306_v11 = vadd.f32 %v8146_v2, %v8277_v43  ;;  %v6779_v44 = vpack.c.bf16 %v3980_v10, %v3980_v10  ;;  %v8311_v50 = vadd.f32 %v8146_v2, %v6933_v28  ;;  %v6937_v20 = vpop.f32.mrf.mxu0 }
 0x2af   : > { %5817 = vst.msk [vmem:[%s7364_s27 + $0x30] sm:$0xf] %vm5804_vm8, %v5752_v23  ;;  %v5257_v42 = vunpack.c.l.b16 %v6776_v58  ;;  %v5258_v1 = vunpack.c.l.b16 %v6777_v40  ;;  %v5689_v0 = vsel %vm5292_vm3, %v5688_v4, %v5687_v25  ;;  %v1439_v45 = vmax.f32 %v1103_v3, 0.0 }
 0x2b0   : > { %v5259_v51 = vunpack.c.l.b16 %v6778_v6  ;;  %v1503_v5 = vmax.f32 %v1359_v8, 0.0  ;;  %v5260_v57 = vunpack.c.l.b16 %v6779_v44  ;;  %v1437_v12 = vmax.f32 %v1095_v15, 0.0  ;;  %v1113_v19 = vpop.f32.mrf.mxu0 }
 0x2b1   : > { %v5690_v43 = vrot.slane %v5257_v42, 4  ;;  %v5692_v9 = vrot.slane %v5258_v1, 3  ;;  %v1501_v34 = vmax.f32 %v8306_v11, 0.0  ;;  %v1440_v18 = vmax.f32 %v8311_v50, 0.0 }
 0x2b2   : > { %v5694_v41 = vrot.slane %v5259_v51, 2  ;;  %v8320_v28 = vadd.f32 %v8146_v2, %v8279_v27  ;;  %v5696_v49 = vrot.slane %v5260_v57, 1  ;;  %v1119_v4 = vadd.f32 %v8146_v2, %v6936_v46 }
 0x2b3   : > { %v5691_v13 = vsel %vm5295_vm4, %v5690_v43, %v5689_v0  ;;  %v1375_v54 = vadd.f32 %v8146_v2, %v7000_v36  ;;  %v8327_v53 = vadd.f32 %v8146_v2, %v1097_v47  ;;  %v8330_v63 = vadd.f32 %v8146_v2, %v1353_v37 }
 0x2b4   : > { %v5693_v14 = vsel %vm5298_vm5, %v5692_v9, %v5691_v13  ;;  %v1111_v27 = vadd.f32 %v8146_v2, %v1110_v39  ;;  %v1443_v60 = vmax.f32 %v1119_v4, 0.0  ;;  %v8335_v48 = vadd.f32 %v8146_v2, %v1366_v56 }
 0x2b5   : > { %v5695_v32 = vsel %vm5301_vm6, %v5694_v41, %v5693_v14  ;;  %v1507_v33 = vmax.f32 %v1375_v54, 0.0  ;;  %v8339_v17 = vadd.f32 %v8146_v2, %v6937_v20  ;;  %v8342_v47 = vadd.f32 %v8146_v2, %v7001_v62 }
 0x2b6   : > { %v5697_v35 = vsel %vm5304_vm7, %v5696_v49, %v5695_v32  ;;  %v1441_v16 = vmax.f32 %v1111_v27, 0.0  ;;  %v1504_v29 = vmax.f32 %v8320_v28, 0.0  ;;  %v1539_v21 = vmax.f32 %v1439_v45, %v1443_v60 }
 0x2b7   : > { %v5768_v37 = vpack.c.b16 %v5697_v35, %v5697_v35  ;;  %v1571_v22 = vmax.f32 %v1503_v5, %v1507_v33  ;;  %v1438_v25 = vmax.f32 %v8327_v53, 0.0  ;;  %v1502_v52 = vmax.f32 %v8330_v63, 0.0 }
 0x2b8   : > { %v1537_v26 = vmax.f32 %v1437_v12, %v1441_v16  ;;  %v1505_v55 = vmax.f32 %v8335_v48, 0.0  ;;  %v2147_v61 = vcombine.high %v1539_v21, %v1539_v21  ;;  %v2154_v30 = vrot.slane %v1539_v21, %v7279_v24 }
 0x2b9   : > { %5833 = vst.msk [vmem:[%s7364_s27 + $0x70] sm:$0xf] %vm5804_vm8, %v5768_v37  ;;  %v2691_v7 = vcombine.high %v1571_v22, %v1571_v22  ;;  %v2698_v31 = vrot.slane %v1571_v22, %v7279_v24  ;;  %v1444_v36 = vmax.f32 %v8339_v17, 0.0  ;;  %v1508_v38 = vmax.f32 %v8342_v47, 0.0 }
 0x2ba   : > { %v2113_v46 = vcombine.high %v1537_v26, %v1537_v26  ;;  %v8355_v59 = vadd.f32 %v8146_v2, %v1113_v19  ;;  %v2161_v3 = vrot.slane %v2147_v61, %v7279_v24  ;;  %v2162_v8 = vcombine.high %v2154_v30, %v2154_v30 }
 0x2bb   : > { %v6152_v23 = vrot.slane %v2154_v30, 9  ;;  %v2705_v10 = vrot.slane %v2691_v7, %v7279_v24  ;;  %v2706_v58 = vcombine.high %v2698_v31, %v2698_v31  ;;  %v6280_v40 = vrot.slane %v2698_v31, 9 }
 0x2bc   : > { %v2120_v6 = vrot.slane %v1537_v26, %v7279_v24  ;;  %v2127_v15 = vrot.slane %v2113_v46, %v7279_v24  ;;  %v2163_v44 = vcombine.high %v2161_v3, %v2161_v3  ;;  %v6153_v42 = vrot.slane %v2162_v8, 9 }
 0x2bd   : > { %v6154_v1 = vrot.slane %v2161_v3, 9  ;;  %v3869_v39 = vmax.f32 %v2154_v30, %v6152_v23  ;;  %v2707_v56 = vcombine.high %v2705_v10, %v2705_v10  ;;  %v6281_v51 = vrot.slane %v2706_v58, 9 }
 0x2be   : > { %v6282_v0 = vrot.slane %v2705_v10, 9  ;;  %v3997_v45 = vmax.f32 %v2698_v31, %v6280_v40  ;;  %v6155_v5 = vrot.slane %v2163_v44, 9  ;;  %v3870_v57 = vmax.f32 %v2162_v8, %v6153_v42 }
 0x2bf   : > { %v3871_v43 = vmax.f32 %v2161_v3, %v6154_v1  ;;  %v6668_v9 = vpack.c.bf16 %v3869_v39, %v3869_v39  ;;  %v6283_v12 = vrot.slane %v2707_v56, 9  ;;  %v3998_v41 = vmax.f32 %v2706_v58, %v6281_v51 }
 0x2c0   : > { %v3999_v13 = vmax.f32 %v2705_v10, %v6282_v0  ;;  %v2128_v49 = vcombine.high %v2120_v6, %v2120_v6  ;;  %v3872_v4 = vmax.f32 %v2163_v44, %v6155_v5  ;;  %v6669_v54 = vpack.c.bf16 %v3870_v57, %v3870_v57 }
 0x2c1   : > { %v6670_v20 = vpack.c.bf16 %v3871_v43, %v3871_v43  ;;  %v6796_v62 = vpack.c.bf16 %v3997_v45, %v3997_v45  ;;  %v5149_v14 = vunpack.c.l.b16 %v6668_v9  ;;  %v4000_v27 = vmax.f32 %v2707_v56, %v6283_v12 }
 0x2c2   : > { %v6797_v32 = vpack.c.bf16 %v3998_v41, %v3998_v41  ;;  %v6798_v60 = vpack.c.bf16 %v3999_v13, %v3999_v13  ;;  %v6671_v33 = vpack.c.bf16 %v3872_v4, %v3872_v4  ;;  %v5150_v48 = vunpack.c.l.b16 %v6669_v54 }
 0x2c3   : > { %v5151_v35 = vunpack.c.l.b16 %v6670_v20  ;;  %v2129_v16 = vcombine.high %v2127_v15, %v2127_v15  ;;  %v6799_v17 = vpack.c.bf16 %v4000_v27, %v4000_v27  ;;  %v6144_v22 = vrot.slane %v2120_v6, 9 }
 0x2c4   : > { %v5278_v37 = vunpack.c.l.b16 %v6797_v32  ;;  %v5279_v21 = vunpack.c.l.b16 %v6798_v60  ;;  %v8361_v19 = vunpack.c.l.b16 %v6671_v33  ;;  %v5502_v26 = vrot.slane %v5150_v48, 7 }
 0x2c5   : > { %v5504_v61 = vrot.slane %v5151_v35, 6  ;;  %v6145_v30 = vrot.slane %v2128_v49, 9  ;;  %v6146_v31 = vrot.slane %v2127_v15, 9  ;;  %v1569_v46 = vmax.f32 %v1501_v34, %v1505_v55 }
 0x2c6   : > { %v5726_v7 = vrot.slane %v5278_v37, 7  ;;  %v1540_v3 = vmax.f32 %v1440_v18, %v1444_v36  ;;  %v5503_v8 = vsel %vm5286_vm1, %v5502_v26, %v5149_v14  ;;  %v5277_v23 = vunpack.c.l.b16 %v6796_v62 }
 0x2c7   : > { %v6147_v10 = vrot.slane %v2129_v16, 9  ;;  %v3861_v58 = vmax.f32 %v2120_v6, %v6144_v22  ;;  %v5506_v40 = vrot.slane %v8361_v19, 5  ;;  %v8369_v44 = vunpack.c.l.b16 %v6799_v17 }
 0x2c8   : > { %v5728_v42 = vrot.slane %v5279_v21, 6  ;;  %v3862_v1 = vmax.f32 %v2128_v49, %v6145_v30  ;;  %v8372_v39 = vsel %vm5289_vm2, %v5504_v61, %v5503_v8  ;;  %v5727_v11 = vsel %vm5286_vm1, %v5726_v7, %v5277_v23 }
 0x2c9   : > { %v3863_v34 = vmax.f32 %v2127_v15, %v6146_v31  ;;  %v3864_v55 = vmax.f32 %v2129_v16, %v6147_v10  ;;  %v2657_v18 = vcombine.high %v1569_v46, %v1569_v46  ;;  %v2664_v36 = vrot.slane %v1569_v46, %v7279_v24 }
 0x2ca   : > { %v6661_v50 = vpack.c.bf16 %v3862_v1, %v3862_v1  ;;  %v2164_v56 = vcombine.high %v1540_v3, %v1540_v3  ;;  %v6660_v51 = vpack.c.bf16 %v3861_v58, %v3861_v58  ;;  %v2171_v45 = vrot.slane %v1540_v3, %v7279_v24 }
 0x2cb   : > { %v6662_v6 = vpack.c.bf16 %v3863_v34, %v3863_v34  ;;  %v6663_v0 = vpack.c.bf16 %v3864_v55, %v3864_v55  ;;  %v2671_v57 = vrot.slane %v2657_v18, %v7279_v24  ;;  %v2672_v43 = vcombine.high %v2664_v36, %v2664_v36 }
 0x2cc   : > { %v5142_v5 = vunpack.c.l.b16 %v6661_v50  ;;  %v6272_v9 = vrot.slane %v2664_v36, 9  ;;  %v5730_v12 = vrot.slane %v8369_v44, 5  ;;  %v2178_v15 = vrot.slane %v2164_v56, %v7279_v24 }
 0x2cd   : > { %v5143_v41 = vunpack.c.l.b16 %v6662_v6  ;;  %v2179_v13 = vcombine.high %v2171_v45, %v2171_v45  ;;  %v5729_v49 = vsel %vm5289_vm2, %v5728_v42, %v5727_v11  ;;  %v2673_v4 = vcombine.high %v2671_v57, %v2671_v57 }
 0x2ce   : > { %v6273_v54 = vrot.slane %v2672_v43, 9  ;;  %v6274_v20 = vrot.slane %v2671_v57, 9  ;;  %v5141_v62 = vunpack.c.l.b16 %v6660_v51  ;;  %v5488_v14 = vrot.slane %v5142_v5, 7 }
 0x2cf   : > { %v3989_v27 = vmax.f32 %v2664_v36, %v6272_v9  ;;  %v2180_v32 = vcombine.high %v2178_v15, %v2178_v15  ;;  %v5144_v60 = vunpack.c.l.b16 %v6663_v0  ;;  %v6275_v33 = vrot.slane %v2673_v4, 9 }
 0x2d0   : > { %v3990_v48 = vmax.f32 %v2672_v43, %v6273_v54  ;;  %v3991_v35 = vmax.f32 %v2671_v57, %v6274_v20  ;;  %v5490_v16 = vrot.slane %v5143_v41, 6  ;;  %v6156_v37 = vrot.slane %v2171_v45, 9  ;;  %v1369_v43 = vpop.f32.mrf.mxu1 }
 0x2d1   : > { %v6788_v17 = vpack.c.bf16 %v3989_v27, %v3989_v27  ;;  %v6157_v21 = vrot.slane %v2179_v13, 9  ;;  %v3992_v22 = vmax.f32 %v2673_v4, %v6275_v33  ;;  %v6158_v30 = vrot.slane %v2178_v15, 9 }
 0x2d2   : > { %v6789_v26 = vpack.c.bf16 %v3990_v48, %v3990_v48  ;;  %v6790_v61 = vpack.c.bf16 %v3991_v35, %v3991_v35  ;;  %v5489_v7 = vsel %vm5286_vm1, %v5488_v14, %v5141_v62  ;;  %v6159_v31 = vrot.slane %v2180_v32, 9 }
 0x2d3   : > { %v3873_v46 = vmax.f32 %v2171_v45, %v6156_v37  ;;  %v3874_v3 = vmax.f32 %v2179_v13, %v6157_v21  ;;  %v6791_v8 = vpack.c.bf16 %v3992_v22, %v3992_v22  ;;  %v3875_v58 = vmax.f32 %v2178_v15, %v6158_v30 }
 0x2d4   : > { %v5270_v23 = vunpack.c.l.b16 %v6789_v26  ;;  %v8382_v10 = vunpack.c.l.b16 %v6790_v61  ;;  %v5492_v44 = vrot.slane %v5144_v60, 5  ;;  %v3876_v42 = vmax.f32 %v2180_v32, %v6159_v31 }
 0x2d5   : > { %v6672_v1 = vpack.c.bf16 %v3873_v46, %v3873_v46  ;;  %v6673_v11 = vpack.c.bf16 %v3874_v3, %v3874_v3  ;;  %v5491_v34 = vsel %vm5289_vm2, %v5490_v16, %v5489_v7  ;;  %v5269_v55 = vunpack.c.l.b16 %v6788_v17 }
 0x2d6   : > { %v5712_v50 = vrot.slane %v5270_v23, 7  ;;  %v6674_v18 = vpack.c.bf16 %v3875_v58, %v3875_v58  ;;  %v6675_v36 = vpack.c.bf16 %v3876_v42, %v3876_v42  ;;  %v1572_v6 = vmax.f32 %v1504_v29, %v1508_v38 }
 0x2d7   : > { %v5153_v56 = vunpack.c.l.b16 %v6672_v1  ;;  %v5154_v51 = vunpack.c.l.b16 %v6673_v11  ;;  %v8389_v0 = vunpack.c.l.b16 %v6791_v8  ;;  %v5714_v45 = vrot.slane %v8382_v10, 6 }
 0x2d8   : > { %v5155_v5 = vunpack.c.l.b16 %v6674_v18  ;;  %v5507_v57 = vsel %vm5292_vm3, %v5506_v40, %v8372_v39  ;;  %v8397_v9 = vsel %vm5286_vm1, %v5712_v50, %v5269_v55  ;;  %v5156_v41 = vunpack.c.l.b16 %v6675_v36 }
 0x2d9   : > { %v5508_v15 = vrot.slane %v5153_v56, 4  ;;  %v5510_v47 = vrot.slane %v5154_v51, 3  ;;  %v2708_v28 = vcombine.high %v1572_v6, %v1572_v6  ;;  %v2715_v29 = vrot.slane %v1572_v6, %v7279_v24 }
 0x2da   : > { %v5512_v13 = vrot.slane %v5155_v5, 2  ;;  %v1442_v38 = vmax.f32 %v8355_v59, 0.0  ;;  %v5514_v54 = vrot.slane %v5156_v41, 1  ;;  %v5731_v19 = vsel %vm5292_vm3, %v5730_v12, %v5729_v49 }
 0x2db   : > { %v5509_v4 = vsel %vm5295_vm4, %v5508_v15, %v5507_v57  ;;  %v1370_v40 = vadd.f32 %v8146_v2, %v1369_v43  ;;  %v2722_v20 = vrot.slane %v2708_v28, %v7279_v24  ;;  %v2723_v62 = vcombine.high %v2715_v29, %v2715_v29 }
 0x2dc   : > { %v5511_v39 = vsel %vm5298_vm5, %v5510_v47, %v5509_v4  ;;  %v6284_v14 = vrot.slane %v2715_v29, 9  ;;  %v1538_v32 = vmax.f32 %v1438_v25, %v1442_v38  ;;  %v5493_v59 = vsel %vm5292_vm3, %v5492_v44, %v5491_v34 }
 0x2dd   : > { %v5513_v27 = vsel %vm5301_vm6, %v5512_v13, %v5511_v39  ;;  %v1506_v60 = vmax.f32 %v1370_v40, 0.0  ;;  %v2724_v12 = vcombine.high %v2722_v20, %v2722_v20  ;;  %v6285_v49 = vrot.slane %v2723_v62, 9 }
 0x2de   : > { %v5515_v33 = vsel %vm5304_vm7, %v5514_v54, %v5513_v27  ;;  %v6286_v2 = vrot.slane %v2722_v20, 9  ;;  %v4001_v35 = vmax.f32 %v2715_v29, %v6284_v14  ;;  %v2130_v16 = vcombine.high %v1538_v32, %v1538_v32 }
 0x2df   : > { %v5755_v48 = vpack.c.b16 %v5515_v33, %v5515_v33  ;;  %v2137_v17 = vrot.slane %v1538_v32, %v7279_v24  ;;  %v6287_v37 = vrot.slane %v2724_v12, 9  ;;  %v4002_v21 = vmax.f32 %v2723_v62, %v6285_v49 }
 0x2e0   : > { %v4003_v22 = vmax.f32 %v2722_v20, %v6286_v2  ;;  %v1570_v53 = vmax.f32 %v1502_v52, %v1506_v60  ;;  %v6800_v25 = vpack.c.bf16 %v4001_v35, %v4001_v35  ;;  %v2144_v26 = vrot.slane %v2130_v16, %v7279_v24 }
 0x2e1   : > { %5820 = vst.msk [vmem:[%s7364_s27 + $0x3c] sm:$0xf] %vm5804_vm8, %v5755_v48  ;;  %v2145_v61 = vcombine.high %v2137_v17, %v2137_v17  ;;  %v6148_v30 = vrot.slane %v2137_v17, 9  ;;  %v4004_v7 = vmax.f32 %v2724_v12, %v6287_v37  ;;  %v6801_v31 = vpack.c.bf16 %v4002_v21, %v4002_v21 }
 0x2e2   : > { %v6802_v46 = vpack.c.bf16 %v4003_v22, %v4003_v22  ;;  %v2674_v3 = vcombine.high %v1570_v53, %v1570_v53  ;;  %v5281_v8 = vunpack.c.l.b16 %v6800_v25  ;;  %v2146_v23 = vcombine.high %v2144_v26, %v2144_v26 }
 0x2e3   : > { %v6149_v58 = vrot.slane %v2145_v61, 9  ;;  %v6150_v44 = vrot.slane %v2144_v26, 9  ;;  %v6803_v42 = vpack.c.bf16 %v4004_v7, %v4004_v7  ;;  %v5282_v1 = vunpack.c.l.b16 %v6801_v31 }
 0x2e4   : > { %v5283_v11 = vunpack.c.l.b16 %v6802_v46  ;;  %v3865_v63 = vmax.f32 %v2137_v17, %v6148_v30  ;;  %v5732_v52 = vrot.slane %v5281_v8, 4  ;;  %v6151_v34 = vrot.slane %v2146_v23, 9 }
 0x2e5   : > { %v3866_v55 = vmax.f32 %v2145_v61, %v6149_v58  ;;  %v3867_v50 = vmax.f32 %v2144_v26, %v6150_v44  ;;  %v5284_v18 = vunpack.c.l.b16 %v6803_v42  ;;  %v5734_v36 = vrot.slane %v5282_v1, 3 }
 0x2e6   : > { %v5736_v56 = vrot.slane %v5283_v11, 2  ;;  %v6664_v51 = vpack.c.bf16 %v3865_v63, %v3865_v63  ;;  %v5733_v6 = vsel %vm5295_vm4, %v5732_v52, %v5731_v19  ;;  %v3868_v5 = vmax.f32 %v2146_v23, %v6151_v34 }
 0x2e7   : > { %v6665_v57 = vpack.c.bf16 %v3866_v55, %v3866_v55  ;;  %v6666_v43 = vpack.c.bf16 %v3867_v50, %v3867_v50  ;;  %v5735_v41 = vsel %vm5298_vm5, %v5734_v36, %v5733_v6  ;;  %v5738_v15 = vrot.slane %v5284_v18, 1 }
 0x2e8   : > { %v5145_v47 = vunpack.c.l.b16 %v6664_v51  ;;  %v2681_v13 = vrot.slane %v1570_v53, %v7279_v24  ;;  %v5737_v28 = vsel %vm5301_vm6, %v5736_v56, %v5735_v41  ;;  %v6667_v29 = vpack.c.bf16 %v3868_v5, %v3868_v5 }
 0x2e9   : > { %v5146_v38 = vunpack.c.l.b16 %v6665_v57  ;;  %v5147_v4 = vunpack.c.l.b16 %v6666_v43  ;;  %v5739_v54 = vsel %vm5304_vm7, %v5738_v15, %v5737_v28  ;;  %v2688_v19 = vrot.slane %v2674_v3, %v7279_v24 }
 0x2ea   : > { %v5494_v40 = vrot.slane %v5145_v47, 4  ;;  %v2689_v39 = vcombine.high %v2681_v13, %v2681_v13  ;;  %v5771_v20 = vpack.c.b16 %v5739_v54, %v5739_v54  ;;  %v5148_v62 = vunpack.c.l.b16 %v6667_v29 }
 0x2eb   : > { %v5496_v14 = vrot.slane %v5146_v38, 3  ;;  %v5498_v27 = vrot.slane %v5147_v4, 2  ;;  %v2690_v60 = vcombine.high %v2688_v19, %v2688_v19  ;;  %v6276_v33 = vrot.slane %v2681_v13, 9 }
 0x2ec   : > { %v5495_v32 = vsel %vm5295_vm4, %v5494_v40, %v5493_v59  ;;  %v6277_v12 = vrot.slane %v2689_v39, 9  ;;  %5836 = vst.msk [vmem:[%s7364_s27 + $0x7c] sm:$0xf] %vm5804_vm8, %v5771_v20  ;;  %v5500_v2 = vrot.slane %v5148_v62, 1  ;;  %v6278_v48 = vrot.slane %v2688_v19, 9 }
 0x2ed   : > { %v5497_v49 = vsel %vm5298_vm5, %v5496_v14, %v5495_v32  ;;  %v6279_v24 = vrot.slane %v2690_v60, 9  ;;  %v3993_v16 = vmax.f32 %v2681_v13, %v6276_v33  ;;  %v5715_v59 = vsel %vm5289_vm2, %v5714_v45, %v8397_v9 }
 0x2ee   : > { %v5499_v35 = vsel %vm5301_vm6, %v5498_v27, %v5497_v49  ;;  %v3994_v17 = vmax.f32 %v2689_v39, %v6277_v12  ;;  %v5716_v37 = vrot.slane %v8389_v0, 5  ;;  %v3995_v22 = vmax.f32 %v2688_v19, %v6278_v48 }
 0x2ef   : > { %v5501_v21 = vsel %vm5304_vm7, %v5500_v2, %v5499_v35  ;;  %v3996_v25 = vmax.f32 %v2690_v60, %v6279_v24  ;;  %v6792_v26 = vpack.c.bf16 %v3993_v16, %v3993_v16 }
 0x2f0   : > { %v5754_v53 = vpack.c.b16 %v5501_v21, %v5501_v21  ;;  %v6793_v61 = vpack.c.bf16 %v3994_v17, %v3994_v17  ;;  %v6794_v30 = vpack.c.bf16 %v3995_v22, %v3995_v22  ;;  %v5717_v10 = vsel %vm5292_vm3, %v5716_v37, %v5715_v59 }
 0x2f1   : > { %v6795_v7 = vpack.c.bf16 %v3996_v25, %v3996_v25  ;;  %v5273_v31 = vunpack.c.l.b16 %v6792_v26 }
 0x2f2   : > { %5819 = vst.msk [vmem:[%s7364_s27 + $0x38] sm:$0xf] %vm5804_vm8, %v5754_v53  ;;  %v5274_v46 = vunpack.c.l.b16 %v6793_v61  ;;  %v5275_v3 = vunpack.c.l.b16 %v6794_v30 }
 0x2f3   : > { %v5276_v45 = vunpack.c.l.b16 %v6795_v7  ;;  %v5718_v9 = vrot.slane %v5273_v31, 4 }
 0x2f4   : > { %v5720_v0 = vrot.slane %v5274_v46, 3  ;;  %v5722_v8 = vrot.slane %v5275_v3, 2 }
 0x2f5   : > { %v5719_v23 = vsel %vm5295_vm4, %v5718_v9, %v5717_v10  ;;  %v5724_v58 = vrot.slane %v5276_v45, 1 }
 0x2f6   : > { %v5721_v44 = vsel %vm5298_vm5, %v5720_v0, %v5719_v23 }
 0x2f7   : > { %v5723_v42 = vsel %vm5301_vm6, %v5722_v8, %v5721_v44 }
 0x2f8   : > { %v5725_v1 = vsel %vm5304_vm7, %v5724_v58, %v5723_v42 }
 0x2f9   : > { %v5770_v11 = vpack.c.b16 %v5725_v1, %v5725_v1 }
 0x2fb   : > { %5835 = vst.msk [vmem:[%s7364_s27 + $0x78] sm:$0xf] %vm5804_vm8, %v5770_v11 }
 0x2fc PF: > { %s13_s12 = sadd.s32 1, %s7090_s12  }
 0x2fd   : > { %p10_p4 = scmp.ge.s32.totalorder %s13_s12, 4  }
 0x2ff   :  { %12 = sbr.rel (!%p10_p4) target bundleno = 1 (0x1), region = 62 }

// kernel: simple_cnn_forward.5
= control target key start
LH: loop header
LB: loop body
LE: loop exit
PB: predicated region body
PF: predicated region fallthrough
CT: control target
= control target key end

     0   :  { %v553_v28 = vlaneseq  ;;  %v4022_v36 = vmov 1966171168   ;;  %s4915_s0 = inlined_call_operand.vmem [shape: bf16[2,4096], index: 0, kind: input, shape index: {}]   ;;  %s4916_s1 = inlined_call_operand.vmem [shape: bf16[4096,128], index: 1, kind: input, shape index: {}]   ;;  %s4917_s2 = inlined_call_operand.vmem [shape: f32[1,128], index: 2, kind: input, shape index: {}]   ;;  %s4918_s3 = inlined_call_operand.vmem [shape: bf16[128,128], index: 3, kind: input, shape index: {}]   ;;  %s4919_s4 = inlined_call_operand.vmem [shape: f32[1,128], index: 4, kind: input, shape index: {}]   ;;  %s4920_s5 = inlined_call_operand.hbm [shape: f32[2,128], index: 5, kind: output, shape index: {}]  }
   0x1   :  { %v3732_v0 = vld [vmem:[%s4916_s1 + $0x78] sm:$0xff]   ;;  %v3736_v4 = vld [vmem:[%s4916_s1 + $0x70] sm:$0xff]   ;;  %v3740_v8 = vld [vmem:[%s4916_s1 + $0x68] sm:$0xff]   ;;  %v551_v37 = vunpack.c.l.s4 %v4022_v36 }
   0x2   :  { %v3733_v1 = vld [vmem:[%s4916_s1 + $0xf8] sm:$0xff]   ;;  %3347 = vmatprep.subr.bf16.mxu0 %v3732_v0  ;;  %v3737_v5 = vld [vmem:[%s4916_s1 + $0xf0] sm:$0xff]   ;;  %v3741_v9 = vld [vmem:[%s4916_s1 + $0xe8] sm:$0xff]   ;;  %v554_v33 = vshrl.u32 %v553_v28, 7 }
   0x3   :  { %v3734_v2 = vld [vmem:[%s4916_s1 + $0x38] sm:$0xff]   ;;  %3369 = vmatprep.subr.bf16.mxu1 %v3733_v1  ;;  %v3738_v6 = vld [vmem:[%s4916_s1 + $0x30] sm:$0xff]   ;;  %v3742_v10 = vld [vmem:[%s4916_s1 + $0x28] sm:$0xff]   ;;  %v552_v40 = vunpack.c.0.s8 %v551_v37 }
   0x4   :  { %v3735_v3 = vld [vmem:[%s4916_s1 + $0xb8] sm:$0xff]   ;;  %3348 = vmatpush3.bf16.msra.mxu0 %v3734_v2  ;;  %v3739_v7 = vld [vmem:[%s4916_s1 + $0xb0] sm:$0xff]   ;;  %v3743_v11 = vld [vmem:[%s4916_s1 + $0xa8] sm:$0xff]  }
   0x5   :  { %3370 = vmatpush3.bf16.msra.mxu1 %v3735_v3  ;;  %3349 = vmatprep.subr.bf16.mxu0 %v3736_v4  ;;  %v3744_v12 = vld [vmem:[%s4916_s1 + $0x60] sm:$0xff]   ;;  %v3748_v16 = vld [vmem:[%s4916_s1 + $0x58] sm:$0xff]   ;;  %v3752_v20 = vld [vmem:[%s4916_s1 + $0x50] sm:$0xff]   ;;  %v4161_v41 = vsub.s32 %v552_v40, %v554_v33 }
   0x6   :  { %3371 = vmatprep.subr.bf16.mxu1 %v3737_v5  ;;  %v3745_v13 = vld [vmem:[%s4916_s1 + $0xe0] sm:$0xff]   ;;  %v3749_v17 = vld [vmem:[%s4916_s1 + $0xd8] sm:$0xff]   ;;  %v3753_v21 = vld [vmem:[%s4916_s1 + $0xd0] sm:$0xff]  }
   0x7   :  { %v3746_v14 = vld [vmem:[%s4916_s1 + $0x20] sm:$0xff]   ;;  %v3750_v18 = vld [vmem:[%s4916_s1 + $0x18] sm:$0xff]   ;;  %v3754_v22 = vld [vmem:[%s4916_s1 + $0x10] sm:$0xff]  }
   0x8   :  { %3350 = vmatpush3.bf16.msra.mxu0 %v3738_v6  ;;  %v3747_v15 = vld [vmem:[%s4916_s1 + $0xa0] sm:$0xff]   ;;  %v3751_v19 = vld [vmem:[%s4916_s1 + $0x98] sm:$0xff]   ;;  %v3755_v23 = vld [vmem:[%s4916_s1 + $0x90] sm:$0xff]  }
   0x9   :  { %3372 = vmatpush3.bf16.msra.mxu1 %v3739_v7  ;;  %3351 = vmatprep.subr.bf16.mxu0 %v3740_v8  ;;  %v3756_v24 = vld [vmem:[%s4916_s1 + $0x48] sm:$0xff]   ;;  %v3760_v29 = vld [vmem:[%s4916_s1 + $0x40] sm:$0xff]   ;;  %v3765_v35 = vld [vmem:[%s4916_s1 + $0x178] sm:$0xff]  }
   0xa   :  { %3373 = vmatprep.subr.bf16.mxu1 %v3741_v9  ;;  %v3757_v25 = vld [vmem:[%s4916_s1 + $0xc8] sm:$0xff]   ;;  %v3761_v30 = vld [vmem:[%s4916_s1 + $0xc0] sm:$0xff]   ;;  %v3766_v38 = vld [vmem:[%s4916_s1 + $0x1f8] sm:$0xff]  }
   0xb   :  { %v3758_v26 = vld [vmem:[%s4916_s1 + $0x8] sm:$0xff]   ;;  %v3762_v31 = vld [vmem:[%s4916_s1] sm:$0xff]   ;;  %v3767_v47 = vld [vmem:[%s4916_s1 + $0x138] sm:$0xff]  }
   0xc   :  { %3352 = vmatpush3.bf16.msra.mxu0 %v3742_v10  ;;  %v3759_v27 = vld [vmem:[%s4916_s1 + $0x88] sm:$0xff]   ;;  %v3763_v32 = vld [vmem:[%s4916_s1 + $0x80] sm:$0xff]   ;;  %v3768_v49 = vld [vmem:[%s4916_s1 + $0x1b8] sm:$0xff]  }
   0xd   :  { %3374 = vmatpush3.bf16.msra.mxu1 %v3743_v11  ;;  %3353 = vmatprep.subr.bf16.mxu0 %v3744_v12  ;;  %v22_v34 = vld [vmem:[%s4915_s0] sm:$0xff]  ;;  %v3769_v52 = vld [vmem:[%s4916_s1 + $0x170] sm:$0xff]   ;;  %v3773_v58 = vld [vmem:[%s4916_s1 + $0x168] sm:$0xff]  }
   0xe   :  { %3375 = vmatprep.subr.bf16.mxu1 %v3745_v13  ;;  %v549_v39 = vcombine.high %v22_v34, %v22_v34  ;;  %v556_v42 = vrot.slane %v22_v34, %v4161_v41  ;;  %v3770_v54 = vld [vmem:[%s4916_s1 + $0x1f0] sm:$0xff]   ;;  %v3774_v59 = vld [vmem:[%s4916_s1 + $0x1e8] sm:$0xff]   ;;  %v3777_v62 = vld [vmem:[%s4916_s1 + $0x160] sm:$0xff]  }
   0xf   :  { %v3771_v55 = vld [vmem:[%s4916_s1 + $0x130] sm:$0xff]   ;;  %v3775_v60 = vld [vmem:[%s4916_s1 + $0x128] sm:$0xff]   ;;  %v3778_v63 = vld [vmem:[%s4916_s1 + $0x1e0] sm:$0xff]  }
  0x10   :  { %3354 = vmatpush3.bf16.msra.mxu0 %v3746_v14  ;;  %v4165_v43 = vrot.slane %v549_v39, %v4161_v41  ;;  %v564_v44 = vcombine.high %v556_v42, %v556_v42  ;;  %v572_v45 = vrot.slane %v556_v42, %v4161_v41  ;;  %v3772_v57 = vld [vmem:[%s4916_s1 + $0x1b0] sm:$0xff]   ;;  %v3776_v61 = vld [vmem:[%s4916_s1 + $0x1a8] sm:$0xff]   ;;  %v3779_v0 = vld [vmem:[%s4916_s1 + $0x120] sm:$0xff]  }
  0x11   :  { %3376 = vmatpush3.bf16.msra.mxu1 %v3747_v15  ;;  %3355 = vmatprep.subr.bf16.mxu0 %v3748_v16  ;;  %v3780_v1 = vld [vmem:[%s4916_s1 + $0x1a0] sm:$0xff]   ;;  %v3781_v2 = vld [vmem:[%s4916_s1 + $0x158] sm:$0xff]   ;;  %v3785_v6 = vld [vmem:[%s4916_s1 + $0x150] sm:$0xff]  }
  0x12   :  { %3377 = vmatprep.subr.bf16.mxu1 %v3749_v17  ;;  %v565_v46 = vcombine.high %v4165_v43, %v4165_v43  ;;  %v586_v48 = vrot.slane %v564_v44, %v4161_v41  ;;  %v594_v51 = vcombine.high %v572_v45, %v572_v45  ;;  %v3782_v3 = vld [vmem:[%s4916_s1 + $0x1d8] sm:$0xff]   ;;  %v3786_v7 = vld [vmem:[%s4916_s1 + $0x1d0] sm:$0xff]   ;;  %v3789_v10 = vld [vmem:[%s4916_s1 + $0x148] sm:$0xff]  }
  0x13   :  { %v3783_v4 = vld [vmem:[%s4916_s1 + $0x118] sm:$0xff]   ;;  %v3787_v8 = vld [vmem:[%s4916_s1 + $0x110] sm:$0xff]   ;;  %v3790_v11 = vld [vmem:[%s4916_s1 + $0x1c8] sm:$0xff]  }
  0x14   :  { %3356 = vmatpush3.bf16.msra.mxu0 %v3750_v18  ;;  %v593_v50 = vrot.slane %v565_v46, %v4161_v41  ;;  %2345 = vmatprep.mubr.bf16.mxu0 %v586_v48  ;;  %v596_v53 = vcombine.high %v586_v48, %v586_v48  ;;  %v3784_v5 = vld [vmem:[%s4916_s1 + $0x198] sm:$0xff]   ;;  %v3788_v9 = vld [vmem:[%s4916_s1 + $0x190] sm:$0xff]   ;;  %v3791_v12 = vld [vmem:[%s4916_s1 + $0x108] sm:$0xff]   ;;  %v579_v18 = vrot.slane %v4165_v43, %v4161_v41 }
  0x15   :  { %3378 = vmatpush3.bf16.msra.mxu1 %v3751_v19  ;;  %3357 = vmatprep.subr.bf16.mxu0 %v3752_v20  ;;  %v3792_v13 = vld [vmem:[%s4916_s1 + $0x188] sm:$0xff]   ;;  %v3793_v14 = vld [vmem:[%s4916_s1 + $0x140] sm:$0xff]   ;;  %v3797_v19 = vld [vmem:[%s4916_s1 + $0x278] sm:$0xff]  }
  0x16   :  { %3379 = vmatprep.subr.bf16.mxu1 %v3753_v21  ;;  %v597_v56 = vcombine.high %v593_v50, %v593_v50  ;;  %2385 = vmatprep.mubr.bf16.mxu1 %v596_v53  ;;  %v3794_v15 = vld [vmem:[%s4916_s1 + $0x1c0] sm:$0xff]   ;;  %v3798_v20 = vld [vmem:[%s4916_s1 + $0x2f8] sm:$0xff]   ;;  %v3805_v28 = vld [vmem:[%s4916_s1 + $0x268] sm:$0xff]  }
  0x17   :  { %v3795_v16 = vld [vmem:[%s4916_s1 + $0x100] sm:$0xff]   ;;  %v3799_v21 = vld [vmem:[%s4916_s1 + $0x238] sm:$0xff]   ;;  %v3817_v40 = vld [vmem:[%s4916_s1 + $0x250] sm:$0xff]  }
  0x18   :  { %3358 = vmatpush3.bf16.msra.mxu0 %v3754_v22  ;;  %v3796_v17 = vld [vmem:[%s4916_s1 + $0x180] sm:$0xff]   ;;  %v3800_v22 = vld [vmem:[%s4916_s1 + $0x2b8] sm:$0xff]   ;;  %v3818_v42 = vld [vmem:[%s4916_s1 + $0x2d0] sm:$0xff]  }
  0x19   :  { %3380 = vmatpush3.bf16.msra.mxu1 %v3755_v23  ;;  %3359 = vmatprep.subr.bf16.mxu0 %v3756_v24  ;;  %v595_v23 = vcombine.high %v579_v18, %v579_v18  ;;  %v3801_v24 = vld [vmem:[%s4916_s1 + $0x270] sm:$0xff]   ;;  %v3810_v33 = vld [vmem:[%s4916_s1 + $0x2e0] sm:$0xff]   ;;  %v3813_v36 = vld [vmem:[%s4916_s1 + $0x258] sm:$0xff]  }
  0x1a   :  { %3381 = vmatprep.subr.bf16.mxu1 %v3757_v25  ;;  %v3802_v25 = vld [vmem:[%s4916_s1 + $0x2f0] sm:$0xff]   ;;  %v3811_v34 = vld [vmem:[%s4916_s1 + $0x220] sm:$0xff]   ;;  %v3814_v37 = vld [vmem:[%s4916_s1 + $0x2d8] sm:$0xff]  }
  0x1b   :  { %v3816_v39 = vld [vmem:[%s4916_s1 + $0x298] sm:$0xff]   ;;  %v3819_v43 = vld [vmem:[%s4916_s1 + $0x210] sm:$0xff]   ;;  %v23_v46 = vld [vmem:[%s4915_s0 + $0x8] sm:$0xff] }
  0x1c   :  { %3360 = vmatpush3.bf16.msra.mxu0 %v3758_v26  ;;  %v3803_v26 = vld [vmem:[%s4916_s1 + $0x230] sm:$0xff]   ;;  %v605_v48 = vrot.slane %v23_v46, %v4161_v41 }
  0x1d   :  { %3382 = vmatpush3.bf16.msra.mxu1 %v3759_v27  ;;  %3361 = vmatprep.subr.bf16.mxu0 %v3760_v29  ;;  %v3804_v27 = vld [vmem:[%s4916_s1 + $0x2b0] sm:$0xff]   ;;  %v3806_v29 = vld [vmem:[%s4916_s1 + $0x2e8] sm:$0xff]  }
  0x1e   :  { %3383 = vmatprep.subr.bf16.mxu1 %v3761_v30  ;;  %v3807_v30 = vld [vmem:[%s4916_s1 + $0x228] sm:$0xff]   ;;  %v3820_v44 = vld [vmem:[%s4916_s1 + $0x290] sm:$0xff]  }
  0x20   :  { %3362 = vmatpush3.bf16.msra.mxu0 %v3762_v31  ;;  %v3808_v31 = vld [vmem:[%s4916_s1 + $0x2a8] sm:$0xff]  }
  0x21   :  { %3384 = vmatpush3.bf16.msra.mxu1 %v3763_v32  ;;  %3391 = vmatprep.subr.bf16.mxu0 %v3765_v35  ;;  %v3809_v32 = vld [vmem:[%s4916_s1 + $0x260] sm:$0xff]  }
  0x22   :  { %3413 = vmatprep.subr.bf16.mxu1 %v3766_v38  ;;  %v3812_v35 = vld [vmem:[%s4916_s1 + $0x2a0] sm:$0xff]   ;;  %v3815_v38 = vld [vmem:[%s4916_s1 + $0x218] sm:$0xff]  }
  0x23   :  { %2346 = vmatmul.mubr.bf16.vlgmr.msra.gmra.mxu0 %v572_v45  ;;  %v3821_v45 = vld [vmem:[%s4916_s1 + $0x248] sm:$0xff]  }
  0x24   :  { %3392 = vmatpush3.bf16.msra.mxu0 %v3767_v47  ;;  %2386 = vmatmul.mubr.bf16.vlgmr.msra.gmra.mxu1 %v594_v51  ;;  %v3822_v47 = vld [vmem:[%s4916_s1 + $0x2c8] sm:$0xff]  }
  0x25   :  { %3393 = vmatprep.subr.bf16.mxu0 %v3769_v52  ;;  %3414 = vmatpush3.bf16.msra.mxu1 %v3768_v49  ;;  %v598_v49 = vcombine.high %v23_v46, %v23_v46  ;;  %v3824_v51 = vld [vmem:[%s4916_s1 + $0x288] sm:$0xff]   ;;  %v613_v52 = vcombine.high %v605_v48, %v605_v48 }
  0x26   :  { %2425 = vmatprep.mubr.bf16.mxu0 %v593_v50  ;;  %3415 = vmatprep.subr.bf16.mxu1 %v3770_v54  ;;  %v3823_v50 = vld [vmem:[%s4916_s1 + $0x208] sm:$0xff]   ;;  %v3825_v54 = vld [vmem:[%s4916_s1 + $0x240] sm:$0xff]  }
  0x27   :  { %2465 = vmatprep.mubr.bf16.mxu1 %v597_v56  ;;  %v4353_v53 = vrot.slane %v598_v49, %v4161_v41  ;;  %v635_v56 = vrot.slane %v613_v52, %v4161_v41  ;;  %v3872_v46 = vld [vmem:[%s4916_s1 + $0x428] sm:$0xff]   ;;  %v3875_v49 = vld [vmem:[%s4916_s1 + $0x4e0] sm:$0xff]   ;;  %v3878_v52 = vld [vmem:[%s4916_s1 + $0x458] sm:$0xff]  }
  0x28   :  { %3394 = vmatpush3.bf16.msra.mxu0 %v3771_v55  ;;  %v3826_v55 = vld [vmem:[%s4916_s1 + $0x2c0] sm:$0xff]  }
  0x29   :  { %3395 = vmatprep.subr.bf16.mxu0 %v3773_v58  ;;  %3416 = vmatpush3.bf16.msra.mxu1 %v3772_v57  ;;  %v614_v57 = vcombine.high %v4353_v53, %v4353_v53  ;;  %v3827_v58 = vld [vmem:[%s4916_s1 + $0x200] sm:$0xff]  }
  0x2a   :  { %3417 = vmatprep.subr.bf16.mxu1 %v3774_v59  ;;  %v3828_v59 = vld [vmem:[%s4916_s1 + $0x280] sm:$0xff]  }
  0x2c   :  { %3396 = vmatpush3.bf16.msra.mxu0 %v3775_v60  ;;  %v645_v60 = vcombine.high %v635_v56, %v635_v56 }
  0x2d   :  { %3397 = vmatprep.subr.bf16.mxu0 %v3777_v62  ;;  %3418 = vmatpush3.bf16.msra.mxu1 %v3776_v61  ;;  %v621_v61 = vrot.slane %v605_v48, %v4161_v41  ;;  %v3829_v62 = vld [vmem:[%s4916_s1 + $0x378] sm:$0xff]   ;;  %v3874_v48 = vld [vmem:[%s4916_s1 + $0x460] sm:$0xff]  }
  0x2e   :  { %3419 = vmatprep.subr.bf16.mxu1 %v3778_v63  ;;  %v3830_v63 = vld [vmem:[%s4916_s1 + $0x3f8] sm:$0xff]  }
  0x30   :  { %3398 = vmatpush3.bf16.msra.mxu0 %v3779_v0  ;;  %v642_v0 = vrot.slane %v614_v57, %v4161_v41  ;;  %v3883_v57 = vld [vmem:[%s4916_s1 + $0x4d0] sm:$0xff]  }
  0x31   :  { %3399 = vmatprep.subr.bf16.mxu0 %v3781_v2  ;;  %3420 = vmatpush3.bf16.msra.mxu1 %v3780_v1  ;;  %v3831_v1 = vld [vmem:[%s4916_s1 + $0x338] sm:$0xff]  }
  0x32   :  { %3421 = vmatprep.subr.bf16.mxu1 %v3782_v3  ;;  %v3832_v2 = vld [vmem:[%s4916_s1 + $0x3b8] sm:$0xff]   ;;  %v643_v3 = vcombine.high %v621_v61, %v621_v61 }
  0x34   :  { %3400 = vmatpush3.bf16.msra.mxu0 %v3783_v4  ;;  %v3833_v4 = vld [vmem:[%s4916_s1 + $0x370] sm:$0xff]  }
  0x35   :  { %3401 = vmatprep.subr.bf16.mxu0 %v3785_v6  ;;  %3422 = vmatpush3.bf16.msra.mxu1 %v3784_v5  ;;  %v3834_v5 = vld [vmem:[%s4916_s1 + $0x3f0] sm:$0xff]   ;;  %v646_v6 = vcombine.high %v642_v0, %v642_v0 }
  0x36   :  { %3423 = vmatprep.subr.bf16.mxu1 %v3786_v7  ;;  %v3835_v7 = vld [vmem:[%s4916_s1 + $0x330] sm:$0xff]  }
  0x38   :  { %3402 = vmatpush3.bf16.msra.mxu0 %v3787_v8  ;;  %v3836_v8 = vld [vmem:[%s4916_s1 + $0x3b0] sm:$0xff]  }
  0x39   :  { %3403 = vmatprep.subr.bf16.mxu0 %v3789_v10  ;;  %3424 = vmatpush3.bf16.msra.mxu1 %v3788_v9  ;;  %v3837_v9 = vld [vmem:[%s4916_s1 + $0x368] sm:$0xff]  }
  0x3a   :  { %3425 = vmatprep.subr.bf16.mxu1 %v3790_v11  ;;  %v3838_v10 = vld [vmem:[%s4916_s1 + $0x3e8] sm:$0xff]  }
  0x3b   :  { %v3839_v11 = vld [vmem:[%s4916_s1 + $0x328] sm:$0xff]  }
  0x3c   :  { %3404 = vmatpush3.bf16.msra.mxu0 %v3791_v12  ;;  %v3840_v12 = vld [vmem:[%s4916_s1 + $0x3a8] sm:$0xff]  }
  0x3d   :  { %3405 = vmatprep.subr.bf16.mxu0 %v3793_v14  ;;  %3426 = vmatpush3.bf16.msra.mxu1 %v3792_v13  ;;  %v3841_v13 = vld [vmem:[%s4916_s1 + $0x360] sm:$0xff]  }
  0x3e   :  { %3427 = vmatprep.subr.bf16.mxu1 %v3794_v15  ;;  %v3842_v14 = vld [vmem:[%s4916_s1 + $0x3e0] sm:$0xff]  }
  0x3f   :  { %v3843_v15 = vld [vmem:[%s4916_s1 + $0x320] sm:$0xff]  }
  0x40   :  { %3406 = vmatpush3.bf16.msra.mxu0 %v3795_v16  ;;  %v3844_v16 = vld [vmem:[%s4916_s1 + $0x3a0] sm:$0xff]  }
  0x41   :  { %3435 = vmatprep.subr.bf16.mxu0 %v3797_v19  ;;  %3428 = vmatpush3.bf16.msra.mxu1 %v3796_v17  ;;  %v3845_v17 = vld [vmem:[%s4916_s1 + $0x358] sm:$0xff]  }
  0x42   :  { %3457 = vmatprep.subr.bf16.mxu1 %v3798_v20  ;;  %v3847_v19 = vld [vmem:[%s4916_s1 + $0x318] sm:$0xff]  }
  0x43   :  { %2426 = vmatmul.mubr.bf16.vlgmr.msra.gmra.mxu0 %v579_v18  ;;  %v3846_v18 = vld [vmem:[%s4916_s1 + $0x3d8] sm:$0xff]  }
  0x44   :  { %3436 = vmatpush3.bf16.msra.mxu0 %v3799_v21  ;;  %2466 = vmatmul.mubr.bf16.vlgmr.msra.gmra.mxu1 %v595_v23  ;;  %v3848_v20 = vld [vmem:[%s4916_s1 + $0x398] sm:$0xff]   ;;  %v3849_v21 = vld [vmem:[%s4916_s1 + $0x350] sm:$0xff]  }
  0x45   :  { %3437 = vmatprep.subr.bf16.mxu0 %v3801_v24  ;;  %3458 = vmatpush3.bf16.msra.mxu1 %v3800_v22  ;;  %v3850_v22 = vld [vmem:[%s4916_s1 + $0x3d0] sm:$0xff]  }
  0x46   :  { %3459 = vmatprep.subr.bf16.mxu1 %v3802_v25  ;;  %2505 = vmatprep.mubr.bf16.mxu0 %v635_v56  ;;  %v3851_v23 = vld [vmem:[%s4916_s1 + $0x310] sm:$0xff]   ;;  %v3853_v25 = vld [vmem:[%s4916_s1 + $0x348] sm:$0xff]  }
  0x47   :  { %2545 = vmatprep.mubr.bf16.mxu1 %v645_v60  ;;  %v3852_v24 = vld [vmem:[%s4916_s1 + $0x390] sm:$0xff]   ;;  %v3886_v60 = vld [vmem:[%s4916_s1 + $0x448] sm:$0xff]  }
  0x48   :  { %3438 = vmatpush3.bf16.msra.mxu0 %v3803_v26  ;;  %v3854_v26 = vld [vmem:[%s4916_s1 + $0x3c8] sm:$0xff]   ;;  %v3882_v56 = vld [vmem:[%s4916_s1 + $0x450] sm:$0xff]  }
  0x49   :  { %3439 = vmatprep.subr.bf16.mxu0 %v3805_v28  ;;  %3460 = vmatpush3.bf16.msra.mxu1 %v3804_v27  ;;  %v3855_v27 = vld [vmem:[%s4916_s1 + $0x308] sm:$0xff]  }
  0x4a   :  { %3461 = vmatprep.subr.bf16.mxu1 %v3806_v29  ;;  %v3856_v28 = vld [vmem:[%s4916_s1 + $0x388] sm:$0xff]   ;;  %v3857_v29 = vld [vmem:[%s4916_s1 + $0x340] sm:$0xff]  }
  0x4c   :  { %3440 = vmatpush3.bf16.msra.mxu0 %v3807_v30  ;;  %v3858_v30 = vld [vmem:[%s4916_s1 + $0x3c0] sm:$0xff]  }
  0x4d   :  { %3441 = vmatprep.subr.bf16.mxu0 %v3809_v32  ;;  %3462 = vmatpush3.bf16.msra.mxu1 %v3808_v31  ;;  %v3859_v31 = vld [vmem:[%s4916_s1 + $0x300] sm:$0xff]  }
  0x4e   :  { %3463 = vmatprep.subr.bf16.mxu1 %v3810_v33  ;;  %v3860_v32 = vld [vmem:[%s4916_s1 + $0x380] sm:$0xff]   ;;  %v628_v33 = vrot.slane %v4353_v53, %v4161_v41  ;;  %v3879_v53 = vld [vmem:[%s4916_s1 + $0x4d8] sm:$0xff]  }
  0x50   :  { %3442 = vmatpush3.bf16.msra.mxu0 %v3811_v34  ;;  %v3862_v34 = vld [vmem:[%s4916_s1 + $0x478] sm:$0xff]  }
  0x51   :  { %3443 = vmatprep.subr.bf16.mxu0 %v3813_v36  ;;  %3464 = vmatpush3.bf16.msra.mxu1 %v3812_v35  ;;  %v3863_v35 = vld [vmem:[%s4916_s1 + $0x4f8] sm:$0xff]  }
  0x52   :  { %3465 = vmatprep.subr.bf16.mxu1 %v3814_v37  ;;  %v3864_v36 = vld [vmem:[%s4916_s1 + $0x438] sm:$0xff]  }
  0x53   :  { %v3865_v37 = vld [vmem:[%s4916_s1 + $0x4b8] sm:$0xff]  }
  0x54   :  { %3444 = vmatpush3.bf16.msra.mxu0 %v3815_v38  ;;  %v644_v38 = vcombine.high %v628_v33, %v628_v33 }
  0x55   :  { %3445 = vmatprep.subr.bf16.mxu0 %v3817_v40  ;;  %3466 = vmatpush3.bf16.msra.mxu1 %v3816_v39  ;;  %v3866_v39 = vld [vmem:[%s4916_s1 + $0x470] sm:$0xff]  }
  0x56   :  { %3467 = vmatprep.subr.bf16.mxu1 %v3818_v42  ;;  %v3867_v40 = vld [vmem:[%s4916_s1 + $0x4f0] sm:$0xff]  }
  0x57   :  { %v3868_v42 = vld [vmem:[%s4916_s1 + $0x430] sm:$0xff]  }
  0x58   :  { %3446 = vmatpush3.bf16.msra.mxu0 %v3819_v43  ;;  %v3869_v43 = vld [vmem:[%s4916_s1 + $0x4b0] sm:$0xff]  }
  0x59   :  { %3447 = vmatprep.subr.bf16.mxu0 %v3821_v45  ;;  %3468 = vmatpush3.bf16.msra.mxu1 %v3820_v44  ;;  %v3870_v44 = vld [vmem:[%s4916_s1 + $0x468] sm:$0xff]  }
  0x5a   :  { %3469 = vmatprep.subr.bf16.mxu1 %v3822_v47  ;;  %v3871_v45 = vld [vmem:[%s4916_s1 + $0x4e8] sm:$0xff]  }
  0x5b   :  { %v3873_v47 = vld [vmem:[%s4916_s1 + $0x4a8] sm:$0xff]  }
  0x5c   :  { %3448 = vmatpush3.bf16.msra.mxu0 %v3823_v50  ;;  %v3876_v50 = vld [vmem:[%s4916_s1 + $0x420] sm:$0xff]  }
  0x5d   :  { %3449 = vmatprep.subr.bf16.mxu0 %v3825_v54  ;;  %3470 = vmatpush3.bf16.msra.mxu1 %v3824_v51  ;;  %v3877_v51 = vld [vmem:[%s4916_s1 + $0x4a0] sm:$0xff]   ;;  %v3880_v54 = vld [vmem:[%s4916_s1 + $0x418] sm:$0xff]  }
  0x5e   :  { %3471 = vmatprep.subr.bf16.mxu1 %v3826_v55  ;;  %v3881_v55 = vld [vmem:[%s4916_s1 + $0x498] sm:$0xff]  }
  0x60   :  { %3450 = vmatpush3.bf16.msra.mxu0 %v3827_v58  ;;  %v3884_v58 = vld [vmem:[%s4916_s1 + $0x410] sm:$0xff]  }
  0x61   :  { %3479 = vmatprep.subr.bf16.mxu0 %v3829_v62  ;;  %3472 = vmatpush3.bf16.msra.mxu1 %v3828_v59  ;;  %v3885_v59 = vld [vmem:[%s4916_s1 + $0x490] sm:$0xff]   ;;  %v3887_v62 = vld [vmem:[%s4916_s1 + $0x4c8] sm:$0xff]  }
  0x62   :  { %3501 = vmatprep.subr.bf16.mxu1 %v3830_v63 }
  0x63   :  { %2506 = vmatmul.mubr.bf16.vlgmr.msra.gmra.mxu0 %v621_v61  ;;  %v24_v61 = vld [vmem:[%s4915_s0 + $0x10] sm:$0xff] }
  0x64   :  { %3480 = vmatpush3.bf16.msra.mxu0 %v3831_v1  ;;  %2585 = vmatprep.mubr.bf16.mxu0 %v642_v0  ;;  %v654_v63 = vrot.slane %v24_v61, %v4161_v41  ;;  %v647_v0 = vcombine.high %v24_v61, %v24_v61  ;;  %v3888_v1 = vld [vmem:[%s4916_s1 + $0x408] sm:$0xff]  }
  0x65   :  { %2546 = vmatmul.mubr.bf16.vlgmr.msra.gmra.mxu1 %v643_v3  ;;  %3481 = vmatprep.subr.bf16.mxu0 %v3833_v4  ;;  %v3937_v61 = vld [vmem:[%s4916_s1 + $0x628] sm:$0xff]  }
  0x66   :  { %3502 = vmatpush3.bf16.msra.mxu1 %v3832_v2  ;;  %2625 = vmatprep.mubr.bf16.mxu1 %v646_v6  ;;  %v3889_v2 = vld [vmem:[%s4916_s1 + $0x488] sm:$0xff]   ;;  %v662_v3 = vcombine.high %v654_v63, %v654_v63  ;;  %v4559_v4 = vrot.slane %v647_v0, %v4161_v41  ;;  %v3891_v6 = vld [vmem:[%s4916_s1 + $0x4c0] sm:$0xff]  }
  0x67   :  { %3503 = vmatprep.subr.bf16.mxu1 %v3834_v5  ;;  %v3890_v5 = vld [vmem:[%s4916_s1 + $0x440] sm:$0xff]  }
  0x68   :  { %3482 = vmatpush3.bf16.msra.mxu0 %v3835_v7  ;;  %v684_v7 = vrot.slane %v662_v3, %v4161_v41  ;;  %v3940_v0 = vld [vmem:[%s4916_s1 + $0x6e0] sm:$0xff]   ;;  %v3943_v3 = vld [vmem:[%s4916_s1 + $0x658] sm:$0xff]  }
  0x69   :  { %3483 = vmatprep.subr.bf16.mxu0 %v3837_v9  ;;  %v3892_v9 = vld [vmem:[%s4916_s1 + $0x400] sm:$0xff]  }
  0x6a   :  { %3504 = vmatpush3.bf16.msra.mxu1 %v3836_v8  ;;  %v663_v8 = vcombine.high %v4559_v4, %v4559_v4 }
  0x6b   :  { %3505 = vmatprep.subr.bf16.mxu1 %v3838_v10  ;;  %v3893_v10 = vld [vmem:[%s4916_s1 + $0x480] sm:$0xff]  }
  0x6c   :  { %3484 = vmatpush3.bf16.msra.mxu0 %v3839_v11  ;;  %v694_v11 = vcombine.high %v684_v7, %v684_v7 }
  0x6d   :  { %3485 = vmatprep.subr.bf16.mxu0 %v3841_v13  ;;  %v3894_v13 = vld [vmem:[%s4916_s1 + $0x578] sm:$0xff]  }
  0x6e   :  { %3506 = vmatpush3.bf16.msra.mxu1 %v3840_v12  ;;  %v670_v12 = vrot.slane %v654_v63, %v4161_v41  ;;  %v3939_v63 = vld [vmem:[%s4916_s1 + $0x660] sm:$0xff]  }
  0x6f   :  { %3507 = vmatprep.subr.bf16.mxu1 %v3842_v14  ;;  %v3895_v14 = vld [vmem:[%s4916_s1 + $0x5f8] sm:$0xff]  }
  0x70   :  { %3486 = vmatpush3.bf16.msra.mxu0 %v3843_v15  ;;  %v691_v15 = vrot.slane %v663_v8, %v4161_v41  ;;  %v3948_v8 = vld [vmem:[%s4916_s1 + $0x6d0] sm:$0xff]  }
  0x71   :  { %3487 = vmatprep.subr.bf16.mxu0 %v3845_v17  ;;  %v3897_v17 = vld [vmem:[%s4916_s1 + $0x5b8] sm:$0xff]  }
  0x72   :  { %3508 = vmatpush3.bf16.msra.mxu1 %v3844_v16  ;;  %v3896_v16 = vld [vmem:[%s4916_s1 + $0x538] sm:$0xff]  }
  0x73   :  { %3509 = vmatprep.subr.bf16.mxu1 %v3846_v18  ;;  %v692_v18 = vcombine.high %v670_v12, %v670_v12 }
  0x74   :  { %3488 = vmatpush3.bf16.msra.mxu0 %v3847_v19  ;;  %v3898_v19 = vld [vmem:[%s4916_s1 + $0x570] sm:$0xff]  }
  0x75   :  { %3489 = vmatprep.subr.bf16.mxu0 %v3849_v21  ;;  %v695_v21 = vcombine.high %v691_v15, %v691_v15 }
  0x76   :  { %3510 = vmatpush3.bf16.msra.mxu1 %v3848_v20  ;;  %v3899_v20 = vld [vmem:[%s4916_s1 + $0x5f0] sm:$0xff]  }
  0x77   :  { %3511 = vmatprep.subr.bf16.mxu1 %v3850_v22  ;;  %v3900_v22 = vld [vmem:[%s4916_s1 + $0x530] sm:$0xff]  }
  0x78   :  { %3490 = vmatpush3.bf16.msra.mxu0 %v3851_v23  ;;  %v3901_v23 = vld [vmem:[%s4916_s1 + $0x5b0] sm:$0xff]  }
  0x79   :  { %3491 = vmatprep.subr.bf16.mxu0 %v3853_v25  ;;  %v3903_v25 = vld [vmem:[%s4916_s1 + $0x5e8] sm:$0xff]  }
  0x7a   :  { %3512 = vmatpush3.bf16.msra.mxu1 %v3852_v24  ;;  %v3902_v24 = vld [vmem:[%s4916_s1 + $0x568] sm:$0xff]  }
  0x7b   :  { %3513 = vmatprep.subr.bf16.mxu1 %v3854_v26  ;;  %v3904_v26 = vld [vmem:[%s4916_s1 + $0x528] sm:$0xff]  }
  0x7c   :  { %3492 = vmatpush3.bf16.msra.mxu0 %v3855_v27  ;;  %v3905_v27 = vld [vmem:[%s4916_s1 + $0x5a8] sm:$0xff]  }
  0x7d   :  { %3493 = vmatprep.subr.bf16.mxu0 %v3857_v29  ;;  %v3907_v29 = vld [vmem:[%s4916_s1 + $0x5e0] sm:$0xff]  }
  0x7e   :  { %3514 = vmatpush3.bf16.msra.mxu1 %v3856_v28  ;;  %v3906_v28 = vld [vmem:[%s4916_s1 + $0x560] sm:$0xff]  }
  0x7f   :  { %3515 = vmatprep.subr.bf16.mxu1 %v3858_v30  ;;  %v3908_v30 = vld [vmem:[%s4916_s1 + $0x520] sm:$0xff]  }
  0x80   :  { %3494 = vmatpush3.bf16.msra.mxu0 %v3859_v31  ;;  %v3909_v31 = vld [vmem:[%s4916_s1 + $0x5a0] sm:$0xff]  }
  0x81   :  { %3523 = vmatprep.subr.bf16.mxu0 %v3862_v34  ;;  %v3912_v34 = vld [vmem:[%s4916_s1 + $0x518] sm:$0xff]  }
  0x82   :  { %3516 = vmatpush3.bf16.msra.mxu1 %v3860_v32  ;;  %v3910_v32 = vld [vmem:[%s4916_s1 + $0x558] sm:$0xff]  }
  0x83   :  { %2586 = vmatmul.mubr.bf16.vlgmr.msra.gmra.mxu0 %v628_v33  ;;  %3545 = vmatprep.subr.bf16.mxu1 %v3863_v35  ;;  %v3911_v33 = vld [vmem:[%s4916_s1 + $0x5d8] sm:$0xff]  }
  0x84   :  { %3524 = vmatpush3.bf16.msra.mxu0 %v3864_v36  ;;  %2665 = vmatprep.mubr.bf16.mxu0 %v684_v7  ;;  %v3913_v35 = vld [vmem:[%s4916_s1 + $0x598] sm:$0xff]   ;;  %v3914_v36 = vld [vmem:[%s4916_s1 + $0x550] sm:$0xff]  }
  0x85   :  { %2626 = vmatmul.mubr.bf16.vlgmr.msra.gmra.mxu1 %v644_v38  ;;  %3525 = vmatprep.subr.bf16.mxu0 %v3866_v39  ;;  %v3916_v38 = vld [vmem:[%s4916_s1 + $0x510] sm:$0xff]  }
  0x86   :  { %3546 = vmatpush3.bf16.msra.mxu1 %v3865_v37  ;;  %2705 = vmatprep.mubr.bf16.mxu1 %v694_v11  ;;  %v3915_v37 = vld [vmem:[%s4916_s1 + $0x5d0] sm:$0xff]   ;;  %v3951_v11 = vld [vmem:[%s4916_s1 + $0x648] sm:$0xff]  }
  0x87   :  { %3547 = vmatprep.subr.bf16.mxu1 %v3867_v40  ;;  %v3917_v39 = vld [vmem:[%s4916_s1 + $0x590] sm:$0xff]   ;;  %v3918_v40 = vld [vmem:[%s4916_s1 + $0x548] sm:$0xff]  }
  0x88   :  { %3526 = vmatpush3.bf16.msra.mxu0 %v3868_v42  ;;  %v3919_v42 = vld [vmem:[%s4916_s1 + $0x5c8] sm:$0xff]   ;;  %v3947_v7 = vld [vmem:[%s4916_s1 + $0x650] sm:$0xff]  }
  0x89   :  { %3527 = vmatprep.subr.bf16.mxu0 %v3870_v44  ;;  %v3921_v44 = vld [vmem:[%s4916_s1 + $0x588] sm:$0xff]  }
  0x8a   :  { %3548 = vmatpush3.bf16.msra.mxu1 %v3869_v43  ;;  %v3920_v43 = vld [vmem:[%s4916_s1 + $0x508] sm:$0xff]  }
  0x8b   :  { %3549 = vmatprep.subr.bf16.mxu1 %v3871_v45  ;;  %v3922_v45 = vld [vmem:[%s4916_s1 + $0x540] sm:$0xff]  }
  0x8c   :  { %3528 = vmatpush3.bf16.msra.mxu0 %v3872_v46  ;;  %v3923_v46 = vld [vmem:[%s4916_s1 + $0x5c0] sm:$0xff]  }
  0x8d   :  { %3529 = vmatprep.subr.bf16.mxu0 %v3874_v48  ;;  %v3925_v48 = vld [vmem:[%s4916_s1 + $0x580] sm:$0xff]  }
  0x8e   :  { %3550 = vmatpush3.bf16.msra.mxu1 %v3873_v47  ;;  %v3924_v47 = vld [vmem:[%s4916_s1 + $0x500] sm:$0xff]  }
  0x8f   :  { %3551 = vmatprep.subr.bf16.mxu1 %v3875_v49  ;;  %v677_v49 = vrot.slane %v4559_v4, %v4161_v41  ;;  %v3944_v4 = vld [vmem:[%s4916_s1 + $0x6d8] sm:$0xff]  }
  0x90   :  { %3530 = vmatpush3.bf16.msra.mxu0 %v3876_v50  ;;  %v3927_v50 = vld [vmem:[%s4916_s1 + $0x678] sm:$0xff]  }
  0x91   :  { %3531 = vmatprep.subr.bf16.mxu0 %v3878_v52  ;;  %v3929_v52 = vld [vmem:[%s4916_s1 + $0x638] sm:$0xff]  }
  0x92   :  { %3552 = vmatpush3.bf16.msra.mxu1 %v3877_v51  ;;  %v3928_v51 = vld [vmem:[%s4916_s1 + $0x6f8] sm:$0xff]  }
  0x93   :  { %3553 = vmatprep.subr.bf16.mxu1 %v3879_v53  ;;  %v3930_v53 = vld [vmem:[%s4916_s1 + $0x6b8] sm:$0xff]  }
  0x94   :  { %3532 = vmatpush3.bf16.msra.mxu0 %v3880_v54  ;;  %v693_v54 = vcombine.high %v677_v49, %v677_v49 }
  0x95   :  { %3533 = vmatprep.subr.bf16.mxu0 %v3882_v56  ;;  %v3932_v56 = vld [vmem:[%s4916_s1 + $0x6f0] sm:$0xff]  }
  0x96   :  { %3554 = vmatpush3.bf16.msra.mxu1 %v3881_v55  ;;  %v3931_v55 = vld [vmem:[%s4916_s1 + $0x670] sm:$0xff]  }
  0x97   :  { %3555 = vmatprep.subr.bf16.mxu1 %v3883_v57  ;;  %v3933_v57 = vld [vmem:[%s4916_s1 + $0x630] sm:$0xff]  }
  0x98   :  { %3534 = vmatpush3.bf16.msra.mxu0 %v3884_v58  ;;  %v3934_v58 = vld [vmem:[%s4916_s1 + $0x6b0] sm:$0xff]  }
  0x99   :  { %3535 = vmatprep.subr.bf16.mxu0 %v3886_v60  ;;  %v3936_v60 = vld [vmem:[%s4916_s1 + $0x6e8] sm:$0xff]  }
  0x9a   :  { %3556 = vmatpush3.bf16.msra.mxu1 %v3885_v59  ;;  %v3935_v59 = vld [vmem:[%s4916_s1 + $0x668] sm:$0xff]  }
  0x9b   :  { %3557 = vmatprep.subr.bf16.mxu1 %v3887_v62  ;;  %v3938_v62 = vld [vmem:[%s4916_s1 + $0x6a8] sm:$0xff]  }
  0x9c   :  { %3536 = vmatpush3.bf16.msra.mxu0 %v3888_v1  ;;  %v3941_v1 = vld [vmem:[%s4916_s1 + $0x620] sm:$0xff]  }
  0x9d   :  { %3537 = vmatprep.subr.bf16.mxu0 %v3890_v5  ;;  %v3945_v5 = vld [vmem:[%s4916_s1 + $0x618] sm:$0xff]  }
  0x9e   :  { %3558 = vmatpush3.bf16.msra.mxu1 %v3889_v2  ;;  %v3942_v2 = vld [vmem:[%s4916_s1 + $0x6a0] sm:$0xff]  }
  0x9f   :  { %3559 = vmatprep.subr.bf16.mxu1 %v3891_v6  ;;  %v3946_v6 = vld [vmem:[%s4916_s1 + $0x698] sm:$0xff]  }
  0xa0   :  { %3538 = vmatpush3.bf16.msra.mxu0 %v3892_v9  ;;  %v3949_v9 = vld [vmem:[%s4916_s1 + $0x610] sm:$0xff]  }
  0xa1   :  { %3567 = vmatprep.subr.bf16.mxu0 %v3894_v13  ;;  %v3952_v13 = vld [vmem:[%s4916_s1 + $0x6c8] sm:$0xff]  }
  0xa2   :  { %3560 = vmatpush3.bf16.msra.mxu1 %v3893_v10  ;;  %v3950_v10 = vld [vmem:[%s4916_s1 + $0x690] sm:$0xff]  }
  0xa3   :  { %2666 = vmatmul.mubr.bf16.vlgmr.msra.gmra.mxu0 %v670_v12  ;;  %3589 = vmatprep.subr.bf16.mxu1 %v3895_v14  ;;  %v25_v12 = vld [vmem:[%s4915_s0 + $0x18] sm:$0xff] }
  0xa4   :  { %3568 = vmatpush3.bf16.msra.mxu0 %v3896_v16  ;;  %2745 = vmatprep.mubr.bf16.mxu0 %v691_v15  ;;  %v703_v14 = vrot.slane %v25_v12, %v4161_v41  ;;  %v696_v15 = vcombine.high %v25_v12, %v25_v12  ;;  %v3953_v16 = vld [vmem:[%s4916_s1 + $0x608] sm:$0xff]  }
  0xa5   :  { %2706 = vmatmul.mubr.bf16.vlgmr.msra.gmra.mxu1 %v692_v18  ;;  %3569 = vmatprep.subr.bf16.mxu0 %v3898_v19 }
  0xa6   :  { %3590 = vmatpush3.bf16.msra.mxu1 %v3897_v17  ;;  %2785 = vmatprep.mubr.bf16.mxu1 %v695_v21  ;;  %v3955_v17 = vld [vmem:[%s4916_s1 + $0x640] sm:$0xff]   ;;  %v711_v18 = vcombine.high %v703_v14, %v703_v14  ;;  %v4765_v19 = vrot.slane %v696_v15, %v4161_v41 }
  0xa7   :  { %3591 = vmatprep.subr.bf16.mxu1 %v3899_v20  ;;  %v3954_v20 = vld [vmem:[%s4916_s1 + $0x688] sm:$0xff]   ;;  %v3956_v21 = vld [vmem:[%s4916_s1 + $0x6c0] sm:$0xff]  }
  0xa8   :  { %3570 = vmatpush3.bf16.msra.mxu0 %v3900_v22  ;;  %v3957_v22 = vld [vmem:[%s4916_s1 + $0x600] sm:$0xff]  }
  0xa9   :  { %3571 = vmatprep.subr.bf16.mxu0 %v3902_v24  ;;  %v712_v24 = vcombine.high %v4765_v19, %v4765_v19 }
  0xaa   :  { %3592 = vmatpush3.bf16.msra.mxu1 %v3901_v23  ;;  %v733_v23 = vrot.slane %v711_v18, %v4161_v41 }
  0xab   :  { %3593 = vmatprep.subr.bf16.mxu1 %v3903_v25  ;;  %v3958_v25 = vld [vmem:[%s4916_s1 + $0x680] sm:$0xff]  }
  0xac   :  { %3572 = vmatpush3.bf16.msra.mxu0 %v3904_v26  ;;  %v743_v26 = vcombine.high %v733_v23, %v733_v23 }
  0xad   :  { %3573 = vmatprep.subr.bf16.mxu0 %v3906_v28  ;;  %v3959_v28 = vld [vmem:[%s4916_s1 + $0x778] sm:$0xff]  }
  0xae   :  { %3594 = vmatpush3.bf16.msra.mxu1 %v3905_v27  ;;  %v719_v27 = vrot.slane %v703_v14, %v4161_v41 }
  0xaf   :  { %3595 = vmatprep.subr.bf16.mxu1 %v3907_v29  ;;  %v3960_v29 = vld [vmem:[%s4916_s1 + $0x7f8] sm:$0xff]  }
  0xb0   :  { %3574 = vmatpush3.bf16.msra.mxu0 %v3908_v30  ;;  %v740_v30 = vrot.slane %v712_v24, %v4161_v41 }
  0xb1   :  { %3575 = vmatprep.subr.bf16.mxu0 %v3910_v32  ;;  %v3962_v32 = vld [vmem:[%s4916_s1 + $0x7b8] sm:$0xff]  }
  0xb2   :  { %3596 = vmatpush3.bf16.msra.mxu1 %v3909_v31  ;;  %v3961_v31 = vld [vmem:[%s4916_s1 + $0x738] sm:$0xff]  }
  0xb3   :  { %3597 = vmatprep.subr.bf16.mxu1 %v3911_v33  ;;  %v741_v33 = vcombine.high %v719_v27, %v719_v27 }
  0xb4   :  { %3576 = vmatpush3.bf16.msra.mxu0 %v3912_v34  ;;  %v3963_v34 = vld [vmem:[%s4916_s1 + $0x770] sm:$0xff]  }
  0xb5   :  { %3577 = vmatprep.subr.bf16.mxu0 %v3914_v36  ;;  %v744_v36 = vcombine.high %v740_v30, %v740_v30 }
  0xb6   :  { %3598 = vmatpush3.bf16.msra.mxu1 %v3913_v35  ;;  %v3964_v35 = vld [vmem:[%s4916_s1 + $0x7f0] sm:$0xff]  }
  0xb7   :  { %3599 = vmatprep.subr.bf16.mxu1 %v3915_v37 }
  0xb8   :  { %3578 = vmatpush3.bf16.msra.mxu0 %v3916_v38  ;;  %v3081_v38 = vld [vmem:[%s4917_s2] ss:$0 sm:$0xff] }
  0xb9   :  { %3579 = vmatprep.subr.bf16.mxu0 %v3918_v40  ;;  %v3966_v40 = vld [vmem:[%s4916_s1 + $0x7b0] sm:$0xff]  }
  0xba   :  { %3600 = vmatpush3.bf16.msra.mxu1 %v3917_v39  ;;  %v3965_v39 = vld [vmem:[%s4916_s1 + $0x730] sm:$0xff]  }
  0xbb   :  { %3601 = vmatprep.subr.bf16.mxu1 %v3919_v42 }
  0xbc   :  { %3580 = vmatpush3.bf16.msra.mxu0 %v3920_v43 }
  0xbd   :  { %3581 = vmatprep.subr.bf16.mxu0 %v3922_v45 }
  0xbe   :  { %3602 = vmatpush3.bf16.msra.mxu1 %v3921_v44  ;;  %v3967_v44 = vld [vmem:[%s4916_s1 + $0x768] sm:$0xff]  }
  0xbf   :  { %3603 = vmatprep.subr.bf16.mxu1 %v3923_v46  ;;  %v3968_v46 = vld [vmem:[%s4916_s1 + $0x7e8] sm:$0xff]  }
  0xc0   :  { %3582 = vmatpush3.bf16.msra.mxu0 %v3924_v47 }
  0xc1   :  { %3611 = vmatprep.subr.bf16.mxu0 %v3927_v50 }
  0xc2   :  { %3604 = vmatpush3.bf16.msra.mxu1 %v3925_v48 }
  0xc3   :  { %2746 = vmatmul.mubr.bf16.vlgmr.msra.gmra.mxu0 %v677_v49  ;;  %3633 = vmatprep.subr.bf16.mxu1 %v3928_v51  ;;  %v3969_v49 = vld [vmem:[%s4916_s1 + $0x728] sm:$0xff]  }
  0xc4   :  { %3612 = vmatpush3.bf16.msra.mxu0 %v3929_v52  ;;  %2825 = vmatprep.mubr.bf16.mxu0 %v733_v23  ;;  %v3970_v52 = vld [vmem:[%s4916_s1 + $0x7a8] sm:$0xff]  }
  0xc5   :  { %2786 = vmatmul.mubr.bf16.vlgmr.msra.gmra.mxu1 %v693_v54  ;;  %3613 = vmatprep.subr.bf16.mxu0 %v3931_v55  ;;  %v3971_v55 = vld [vmem:[%s4916_s1 + $0x760] sm:$0xff]  }
  0xc6   :  { %3634 = vmatpush3.bf16.msra.mxu1 %v3930_v53  ;;  %2865 = vmatprep.mubr.bf16.mxu1 %v743_v26 }
  0xc7   :  { %3635 = vmatprep.subr.bf16.mxu1 %v3932_v56 }
  0xc8   :  { %3614 = vmatpush3.bf16.msra.mxu0 %v3933_v57  ;;  %v3972_v57 = vld [vmem:[%s4916_s1 + $0x7e0] sm:$0xff]  }
  0xc9   :  { %3615 = vmatprep.subr.bf16.mxu0 %v3935_v59  ;;  %v3973_v59 = vld [vmem:[%s4916_s1 + $0x720] sm:$0xff]  }
  0xca   :  { %3636 = vmatpush3.bf16.msra.mxu1 %v3934_v58 }
  0xcb   :  { %3637 = vmatprep.subr.bf16.mxu1 %v3936_v60  ;;  %v3974_v60 = vld [vmem:[%s4916_s1 + $0x7a0] sm:$0xff]  }
  0xcc   :  { %3616 = vmatpush3.bf16.msra.mxu0 %v3937_v61  ;;  %v3975_v61 = vld [vmem:[%s4916_s1 + $0x758] sm:$0xff]  }
  0xcd   :  { %3617 = vmatprep.subr.bf16.mxu0 %v3939_v63  ;;  %v3977_v63 = vld [vmem:[%s4916_s1 + $0x718] sm:$0xff]  }
  0xce   :  { %3638 = vmatpush3.bf16.msra.mxu1 %v3938_v62  ;;  %v3976_v62 = vld [vmem:[%s4916_s1 + $0x7d8] sm:$0xff]  }
  0xcf   :  { %3639 = vmatprep.subr.bf16.mxu1 %v3940_v0  ;;  %v3978_v0 = vld [vmem:[%s4916_s1 + $0x798] sm:$0xff]  }
  0xd0   :  { %3618 = vmatpush3.bf16.msra.mxu0 %v3941_v1  ;;  %v3979_v1 = vld [vmem:[%s4916_s1 + $0x750] sm:$0xff]  }
  0xd1   :  { %3619 = vmatprep.subr.bf16.mxu0 %v3943_v3  ;;  %v3981_v3 = vld [vmem:[%s4916_s1 + $0x710] sm:$0xff]  }
  0xd2   :  { %3640 = vmatpush3.bf16.msra.mxu1 %v3942_v2  ;;  %v3980_v2 = vld [vmem:[%s4916_s1 + $0x7d0] sm:$0xff]  }
  0xd3   :  { %3641 = vmatprep.subr.bf16.mxu1 %v3944_v4  ;;  %v3982_v4 = vld [vmem:[%s4916_s1 + $0x790] sm:$0xff]  }
  0xd4   :  { %3620 = vmatpush3.bf16.msra.mxu0 %v3945_v5  ;;  %v3983_v5 = vld [vmem:[%s4916_s1 + $0x748] sm:$0xff]  }
  0xd5   :  { %3621 = vmatprep.subr.bf16.mxu0 %v3947_v7  ;;  %v3985_v7 = vld [vmem:[%s4916_s1 + $0x708] sm:$0xff]  }
  0xd6   :  { %3642 = vmatpush3.bf16.msra.mxu1 %v3946_v6  ;;  %v3984_v6 = vld [vmem:[%s4916_s1 + $0x7c8] sm:$0xff]  }
  0xd7   :  { %3643 = vmatprep.subr.bf16.mxu1 %v3948_v8  ;;  %v3987_v8 = vld [vmem:[%s4916_s1 + $0x740] sm:$0xff]  }
  0xd8   :  { %3622 = vmatpush3.bf16.msra.mxu0 %v3949_v9  ;;  %v3986_v9 = vld [vmem:[%s4916_s1 + $0x788] sm:$0xff]  }
  0xd9   :  { %3623 = vmatprep.subr.bf16.mxu0 %v3951_v11  ;;  %v3989_v11 = vld [vmem:[%s4916_s1 + $0x700] sm:$0xff]  }
  0xda   :  { %3644 = vmatpush3.bf16.msra.mxu1 %v3950_v10  ;;  %v3988_v10 = vld [vmem:[%s4916_s1 + $0x7c0] sm:$0xff]  }
  0xdb   :  { %3645 = vmatprep.subr.bf16.mxu1 %v3952_v13 }
  0xdc   :  { %3624 = vmatpush3.bf16.msra.mxu0 %v3953_v16 }
  0xdd   :  { %3625 = vmatprep.subr.bf16.mxu0 %v3955_v17 }
  0xde   :  { %3646 = vmatpush3.bf16.msra.mxu1 %v3954_v20 }
  0xdf   :  { %3647 = vmatprep.subr.bf16.mxu1 %v3956_v21 }
  0xe0   :  { %3626 = vmatpush3.bf16.msra.mxu0 %v3957_v22 }
  0xe1   :  { %3655 = vmatprep.subr.bf16.mxu0 %v3959_v28 }
  0xe2   :  { %3648 = vmatpush3.bf16.msra.mxu1 %v3958_v25 }
  0xe3   :  { %v3363_v37 = vpop.f32.mrf.mxu0  ;;  %2826 = vmatmul.mubr.bf16.vlgmr.msra.gmra.mxu0 %v719_v27  ;;  %3677 = vmatprep.subr.bf16.mxu1 %v3960_v29 }
  0xe4   :  { %3656 = vmatpush3.bf16.msra.mxu0 %v3961_v31  ;;  %2905 = vmatprep.mubr.bf16.mxu0 %v740_v30  ;;  %v3385_v42 = vpop.f32.mrf.mxu1 }
  0xe5   :  { %2866 = vmatmul.mubr.bf16.vlgmr.msra.gmra.mxu1 %v741_v33  ;;  %v3364_v43 = vpop.f32.mrf.mxu0  ;;  %3657 = vmatprep.subr.bf16.mxu0 %v3963_v34 }
  0xe6   :  { %3678 = vmatpush3.bf16.msra.mxu1 %v3962_v32  ;;  %v3365_v45 = vadd.f32 %v3364_v43, %v3363_v37  ;;  %2945 = vmatprep.mubr.bf16.mxu1 %v744_v36  ;;  %v3386_v47 = vpop.f32.mrf.mxu1 }
  0xe7   :  { %v3366_v48 = vpop.f32.mrf.mxu0  ;;  %3679 = vmatprep.subr.bf16.mxu1 %v3964_v35  ;;  %v3387_v51 = vadd.f32 %v3386_v47, %v3385_v42 }
  0xe8   :  { %v2348_v50 = vadd.f32 %v3365_v45, %v3081_v38  ;;  %3658 = vmatpush3.bf16.msra.mxu0 %v3965_v39  ;;  %v3388_v53 = vpop.f32.mrf.mxu1 }
  0xe9   :  { %v3367_v54 = vpop.f32.mrf.mxu0  ;;  %3659 = vmatprep.subr.bf16.mxu0 %v3967_v44 }
  0xea   :  { %v2388_v56 = vadd.f32 %v3387_v51, %v2348_v50  ;;  %3680 = vmatpush3.bf16.msra.mxu1 %v3966_v40  ;;  %v3389_v58 = vpop.f32.mrf.mxu1 }
  0xeb   :  { %3681 = vmatprep.subr.bf16.mxu1 %v3968_v46 }
  0xec   :  { %3660 = vmatpush3.bf16.msra.mxu0 %v3969_v49 }
  0xed   :  { %3661 = vmatprep.subr.bf16.mxu0 %v3971_v55 }
  0xee   :  { %3682 = vmatpush3.bf16.msra.mxu1 %v3970_v52 }
  0xef   :  { %3683 = vmatprep.subr.bf16.mxu1 %v3972_v57 }
  0xf0   :  { %3662 = vmatpush3.bf16.msra.mxu0 %v3973_v59 }
  0xf1   :  { %3663 = vmatprep.subr.bf16.mxu0 %v3975_v61 }
  0xf2   :  { %3684 = vmatpush3.bf16.msra.mxu1 %v3974_v60 }
  0xf3   :  { %3685 = vmatprep.subr.bf16.mxu1 %v3976_v62 }
  0xf4   :  { %3664 = vmatpush3.bf16.msra.mxu0 %v3977_v63 }
  0xf5   :  { %3665 = vmatprep.subr.bf16.mxu0 %v3979_v1 }
  0xf6   :  { %3686 = vmatpush3.bf16.msra.mxu1 %v3978_v0 }
  0xf7   :  { %3687 = vmatprep.subr.bf16.mxu1 %v3980_v2 }
  0xf8   :  { %3666 = vmatpush3.bf16.msra.mxu0 %v3981_v3 }
  0xf9   :  { %3667 = vmatprep.subr.bf16.mxu0 %v3983_v5 }
  0xfa   :  { %3688 = vmatpush3.bf16.msra.mxu1 %v3982_v4 }
  0xfb   :  { %3689 = vmatprep.subr.bf16.mxu1 %v3984_v6 }
  0xfc   :  { %3668 = vmatpush3.bf16.msra.mxu0 %v3985_v7 }
  0xfd   :  { %10 = vsyncpa [#allocation3], 0  ;;  %3669 = vmatprep.subr.bf16.mxu0 %v3987_v8  ;;  %v726_v12 = vrot.slane %v4765_v19, %v4161_v41  ;;  %v3990_v13 = vld [vmem:[%s4916_s1 + $0x780] sm:$0xff]   ;;  %v3992_v38 = vld [vmem:[%s4918_s3 + $0x38] sm:$0xff]   ;;  %v4023_v39 = vmov 0.0   ;;  %vm4024_vm0 = vmmov 0  }
  0xfe   :  { %3690 = vmatpush3.bf16.msra.mxu1 %v3986_v9  ;;  %v3993_v40 = vld [vmem:[%s4918_s3 + $0x30] sm:$0xff]   ;;  %v3994_v42 = vld [vmem:[%s4918_s3 + $0x28] sm:$0xff]   ;;  %v3995_v43 = vld [vmem:[%s4918_s3 + $0x20] sm:$0xff]   ;;  %s4025_s24 = smov [#allocation2]  }
  0xff   :  { %3691 = vmatprep.subr.bf16.mxu1 %v3988_v10  ;;  %v742_v14 = vcombine.high %v726_v12, %v726_v12  ;;  %v3996_v44 = vld [vmem:[%s4918_s3 + $0x18] sm:$0xff]   ;;  %v3997_v48 = vld [vmem:[%s4918_s3 + $0x10] sm:$0xff]   ;;  %v3999_v59 = vld [vmem:[%s4918_s3] sm:$0xff]   ;;  %s3073_s25 = sshll.u32 %s4025_s24, 4  ;;  %s3074_s25 = int_to_ptr.vmem [resolvable:$true] %s3073_s25 }
 0x100   :  { %3670 = vmatpush3.bf16.msra.mxu0 %v3989_v11  ;;  %s4000_s26 = scalar_lea.vmem %s3074_s25, 32  ;;  %p4005_p1 = scmp.lt.s32.totalorder %s3074_s25, %s3074_s25 }
 0x101   :  { %3708 = vmatprep.subr.bf16.mxu0 %v4023_v39  ;;  %p4001_p0 = scmp.ne.s32.totalorder %s3074_s25, %s4000_s26  ;;  %p4006_p2 = scmp.lt.s32.totalorder %s4000_s26, %s4000_s26 }
 0x102   :  { %3692 = vmatpush3.bf16.msra.mxu1 %v3990_v13 }
 0x103   :  { %v3407_v15 = vpop.f32.mrf.mxu0  ;;  %2906 = vmatmul.mubr.bf16.vlgmr.msra.gmra.mxu0 %v726_v12  ;;  %p4007_p3 = por %p4006_p2, %p4005_p1 }
 0x104   :  { %v3429_v16 = vpop.f32.mrf.mxu1  ;;  %3709 = vmatpush3.bf16.msra.mxu0 %v3992_v38  ;;  %3724 = vmatprep.mubr.msk.bf16.mxu0 %vm4024_vm0, %v4023_v39 }
 0x105   :  { %2946 = vmatmul.mubr.bf16.vlgmr.msra.gmra.mxu1 %v742_v14  ;;  %v3408_v17 = vpop.f32.mrf.mxu0  ;;  %3710 = vmatprep.subr.bf16.mxu0 %v4023_v39  ;;  %p4008_p4 = pnand %p4007_p3, %p4001_p0 }
 0x106   :  { %v3409_v18 = vadd.f32 %v3408_v17, %v3407_v15  ;;  %v3430_v20 = vpop.f32.mrf.mxu1 }
 0x107   :  { %v3410_v21 = vpop.f32.mrf.mxu0  ;;  %v3431_v23 = vadd.f32 %v3430_v20, %v3429_v16 }
 0x108   :  { %v2428_v22 = vadd.f32 %v3409_v18, %v2388_v56  ;;  %v3432_v41 = vpop.f32.mrf.mxu1  ;;  %3711 = vmatpush3.bf16.msra.mxu0 %v3993_v40  ;;  %v3998_v56 = vld [vmem:[%s4918_s3 + $0x8] sm:$0xff]  }
 0x109   :  { %v3411_v19 = vpop.f32.mrf.mxu0  ;;  %3712 = vmatprep.subr.bf16.mxu0 %v4023_v39 }
 0x10a   :  { %v2468_v24 = vadd.f32 %v3431_v23, %v2428_v22  ;;  %v3433_v25 = vpop.f32.mrf.mxu1 }
 0x10c   :  { %3713 = vmatpush3.bf16.msra.mxu0 %v3994_v42 }
 0x10d   :  { %3714 = vmatprep.subr.bf16.mxu0 %v4023_v39 }
 0x110   :  { %3715 = vmatpush3.bf16.msra.mxu0 %v3995_v43 }
 0x111   :  { %3716 = vmatprep.subr.bf16.mxu0 %v4023_v39 }
 0x114   :  { %3717 = vmatpush3.bf16.msra.mxu0 %v3996_v44 }
 0x115   :  { %3718 = vmatprep.subr.bf16.mxu0 %v4023_v39 }
 0x118   :  { %3719 = vmatpush3.bf16.msra.mxu0 %v3997_v48 }
 0x119   :  { %3720 = vmatprep.subr.bf16.mxu0 %v4023_v39 }
 0x11c   :  { %3721 = vmatpush3.bf16.msra.mxu0 %v3998_v56 }
 0x11d   :  { %3722 = vmatprep.subr.bf16.mxu0 %v4023_v39 }
 0x120   :  { %3723 = vmatpush3.bf16.msra.mxu0 %v3999_v59 }
 0x123   :  { %v3451_v26 = vpop.f32.mrf.mxu0 }
 0x125   :  { %v3473_v27 = vpop.f32.mrf.mxu1  ;;  %v3452_v28 = vpop.f32.mrf.mxu0 }
 0x126   :  { %v3453_v29 = vadd.f32 %v3452_v28, %v3451_v26 }
 0x127   :  { %v3474_v30 = vpop.f32.mrf.mxu1  ;;  %v3454_v31 = vpop.f32.mrf.mxu0 }
 0x128   :  { %v2508_v32 = vadd.f32 %v3453_v29, %v2468_v24  ;;  %v3475_v33 = vadd.f32 %v3474_v30, %v3473_v27 }
 0x129   :  { %v3476_v34 = vpop.f32.mrf.mxu1  ;;  %v3455_v35 = vpop.f32.mrf.mxu0 }
 0x12a   :  { %v2548_v36 = vadd.f32 %v3475_v33, %v2508_v32 }
 0x12b   :  { %v3477_v37 = vpop.f32.mrf.mxu1 }
 0x143   :  { %v3495_v45 = vpop.f32.mrf.mxu0 }
 0x145   :  { %v3517_v46 = vpop.f32.mrf.mxu1  ;;  %v3496_v47 = vpop.f32.mrf.mxu0 }
 0x146   :  { %v3497_v49 = vadd.f32 %v3496_v47, %v3495_v45 }
 0x147   :  { %v3518_v50 = vpop.f32.mrf.mxu1  ;;  %v3498_v51 = vpop.f32.mrf.mxu0 }
 0x148   :  { %v2588_v52 = vadd.f32 %v3497_v49, %v2548_v36  ;;  %v3519_v53 = vadd.f32 %v3518_v50, %v3517_v46  ;;  %v3338_v46 = vld [vmem:[%s4919_s4] ss:$0 sm:$0xff] }
 0x149   :  { %v3520_v54 = vpop.f32.mrf.mxu1  ;;  %v3499_v55 = vpop.f32.mrf.mxu0 }
 0x14a   :  { %v2628_v57 = vadd.f32 %v3519_v53, %v2588_v52 }
 0x14b   :  { %v3521_v58 = vpop.f32.mrf.mxu1 }
 0x163   :  { %v3539_v60 = vpop.f32.mrf.mxu0 }
 0x165   :  { %v3561_v61 = vpop.f32.mrf.mxu1  ;;  %v3540_v62 = vpop.f32.mrf.mxu0 }
 0x166   :  { %v3541_v63 = vadd.f32 %v3540_v62, %v3539_v60 }
 0x167   :  { %v3562_v0 = vpop.f32.mrf.mxu1  ;;  %v3542_v1 = vpop.f32.mrf.mxu0 }
 0x168   :  { %v2668_v2 = vadd.f32 %v3541_v63, %v2628_v57  ;;  %v3563_v3 = vadd.f32 %v3562_v0, %v3561_v61 }
 0x169   :  { %v3564_v4 = vpop.f32.mrf.mxu1  ;;  %v3543_v5 = vpop.f32.mrf.mxu0 }
 0x16a   :  { %v2708_v6 = vadd.f32 %v3563_v3, %v2668_v2 }
 0x16b   :  { %v3565_v7 = vpop.f32.mrf.mxu1 }
 0x183   :  { %v3583_v8 = vpop.f32.mrf.mxu0 }
 0x185   :  { %v3605_v9 = vpop.f32.mrf.mxu1  ;;  %v3584_v10 = vpop.f32.mrf.mxu0 }
 0x186   :  { %v3585_v19 = vadd.f32 %v3584_v10, %v3583_v8 }
 0x187   :  { %v3606_v11 = vpop.f32.mrf.mxu1  ;;  %v3586_v12 = vpop.f32.mrf.mxu0 }
 0x188   :  { %v2748_v24 = vadd.f32 %v3585_v19, %v2708_v6  ;;  %v3607_v25 = vadd.f32 %v3606_v11, %v3605_v9 }
 0x189   :  { %v3608_v13 = vpop.f32.mrf.mxu1  ;;  %v3587_v14 = vpop.f32.mrf.mxu0 }
 0x18a   :  { %v2788_v27 = vadd.f32 %v3607_v25, %v2748_v24 }
 0x18b   :  { %v3609_v15 = vpop.f32.mrf.mxu1 }
 0x1a3   :  { %v3627_v16 = vpop.f32.mrf.mxu0 }
 0x1a5   :  { %v3649_v17 = vpop.f32.mrf.mxu1  ;;  %v3628_v18 = vpop.f32.mrf.mxu0 }
 0x1a6   :  { %v3629_v26 = vadd.f32 %v3628_v18, %v3627_v16 }
 0x1a7   :  { %v3650_v20 = vpop.f32.mrf.mxu1  ;;  %v3630_v21 = vpop.f32.mrf.mxu0 }
 0x1a8   :  { %v2828_v28 = vadd.f32 %v3629_v26, %v2788_v27  ;;  %v3651_v29 = vadd.f32 %v3650_v20, %v3649_v17 }
 0x1a9   :  { %v3652_v22 = vpop.f32.mrf.mxu1  ;;  %v3631_v23 = vpop.f32.mrf.mxu0 }
 0x1aa   :  { %v2868_v33 = vadd.f32 %v3651_v29, %v2828_v28 }
 0x1ab   :  { %v3653_v41 = vpop.f32.mrf.mxu1 }
 0x1c3   :  { %v3671_v30 = vpop.f32.mrf.mxu0 }
 0x1c5   :  { %v3693_v31 = vpop.f32.mrf.mxu1  ;;  %v3672_v32 = vpop.f32.mrf.mxu0 }
 0x1c6   :  { %v3673_v34 = vadd.f32 %v3672_v32, %v3671_v30 }
 0x1c7   :  { %v3694_v35 = vpop.f32.mrf.mxu1  ;;  %v3674_v36 = vpop.f32.mrf.mxu0 }
 0x1c8   :  { %v2908_v37 = vadd.f32 %v3673_v34, %v2868_v33  ;;  %v3695_v38 = vadd.f32 %v3694_v35, %v3693_v31 }
 0x1c9   :  { %v3696_v39 = vpop.f32.mrf.mxu1  ;;  %v3675_v40 = vpop.f32.mrf.mxu0 }
 0x1ca   :  { %v2948_v42 = vadd.f32 %v3695_v38, %v2908_v37 }
 0x1cb   :  { %v3697_v43 = vpop.f32.mrf.mxu1 }
 0x1cc   :  { %v2953_v44 = vmax.f32 %v2948_v42, 0.0 }
 0x1ce   :  { %v2954_v45 = vpack.c.bf16 %v2953_v44, %v2953_v44 }
 0x1d0   :  { %3725 = vmatmul.mubr.bf16.vlgmr.msra.gmra.mxu0 %v2954_v45 }
 0x290   :  { %v3060_v47 = vpop.f32.mrf.mxu0 }
 0x291   :  { %v3061_v48 = vadd.f32 %v3338_v46, %v3060_v47 }
 0x292   :  { %v3726_v49 = vpop.f32.mrf.mxu0 }
 0x293   :  { %3066 = vst [vmem:[#allocation2] sm:$0x3] %v3061_v48 }
 0x294   :  { %v3063_v50 = vpop.f32.mrf.mxu0 }
 0x295   :  { %4011 = shalt.err (!%p4008_p4)
}
 0x296   :  { %3076 = dma.vmem_to_hbm [thread:$0]  %s3074_s25, 32, %s4920_s5, [#allocation3]   ;;  %v3727_v51 = vpop.f32.mrf.mxu0 }
 0x297   :  { %4020 = dma.done.wait [#allocation3], 32  }
 0x298   :  { %4021 = vsyncadd [#allocation3], 4294967264 }
 0x299   :  { %3080 = vsyncpa [#allocation3], 1 }

// kernel: simple_cnn_forward.4
= control target key start
LH: loop header
LB: loop body
LE: loop exit
PB: predicated region body
PF: predicated region fallthrough
CT: control target
= control target key end

     0   :  { %s6425_s12 = smov 0   ;;  %s9077_s0 = inlined_call_operand.vmem [shape: bf16[2,16,16,32], index: 0, kind: input, shape index: {}]   ;;  %s9078_s1 = inlined_call_operand.vmem [shape: bf16[288,64], index: 1, kind: input, shape index: {}]   ;;  %s9079_s2 = inlined_call_operand.vmem [shape: f32[1,64], index: 2, kind: input, shape index: {}]   ;;  %s9080_s3 = inlined_call_operand.vmem [shape: bf16[2,8,512], index: 3, kind: output, shape index: {}]  }
   0x1 LB: > { %s5791_s13 = sadd.s32 4294967295, %s6398_s12   ;;  %p5795_p0 = scmp.ge.s32.totalorder %s6398_s12, 1  ;;  %s6398_s12 = sphi %s6425_s12, %s13_s12  }
   0x2   : > { %p137_p1 = scmp.lt.s32.totalorder %s6398_s12, 3 }
   0x4   : > { %p138_p2 = pnand %p5795_p0, %p137_p1 }
   0x6   : > { %141 = sbr.rel (%p138_p2) target bundleno = 943 (0x3af), region = 32 }
   0xb   : > { %vm172_vm0 = vcmask 257024   ;;  %p161_p3 = scmp.lt.s32.totalorder %s5791_s13, 1  ;;  %v6400_v0 = vmov 0   ;;  %vm175_vm1 = vcmask 253952   ;;  %vm182_vm2 = vsmask.f32 256 }
   0xc   : > { %173 = vst.msk [vmem:[#allocation2] sm:$0xf] %vm172_vm0, %v6400_v0  ;;  %174 = vst.msk [vmem:[#allocation2 + $0x4] sm:$0xf] %vm172_vm0, %v6400_v0  ;;  %v190_v2 = vld [vmem:[#allocation2 + $0x18] sm:$0x1] }
   0xd   : > { %178 = vst.msk [vmem:[#allocation2 + $0xcc] sm:$0xf] %vm172_vm0, %v6400_v0  ;;  %179 = vst.msk [vmem:[#allocation2 + $0xd0] sm:$0xf] %vm172_vm0, %v6400_v0  ;;  %s9117_s13 = smov (!%p161_p3, %s5791_s13), 1  ;;  %vm1487_vm5 = vcmask 1042432  }
   0xe   : > { %176 = vst.msk [vmem:[#allocation2 + $0x8] sm:$0x1] %vm175_vm1, %v6400_v0  ;;  %vm6440_vm3 = vmand %vm175_vm1, %vm182_vm2  ;;  %v187_v4 = vld [vmem:[#allocation2 + $0xc] sm:$0x1]  ;;  %vm238_vm4 = vsmask.f32 7938 }
   0xf   : > { %180 = vst.msk [vmem:[#allocation2 + $0xd4] sm:$0x1] %vm175_vm1, %v6400_v0  ;;  %v191_v3 = vsel %vm6440_vm3, 0, %v190_v2  ;;  %s6061_s14 = sshll.u32 %s9117_s13, 7  ;;  %v188_v5 = vsel %vm6440_vm3, 0, %v187_v4  ;;  %vm1488_vm6 = vcmask 1046532   ;;  %vm6464_vm8 = vmand %vm175_vm1, %vm238_vm4 }
  0x10   : > { %192 = vst [vmem:[#allocation2 + $0x18] sm:$0x1] %v191_v3  ;;  %v223_v6 = vld [vmem:[#allocation2 + $0x9c] sm:$0x1]  ;;  %s6455_s17 = scalar_lea.vmem %s9077_s0, %s6061_s14  ;;  %vm326_vm7 = vsmask.f32 4368  ;;  %vm6471_vm9 = vmor %vm1487_vm5, %vm1488_vm6 }
  0x11   : > { %189 = vst [vmem:[#allocation2 + $0xc] sm:$0x1] %v188_v5  ;;  %v224_v7 = vsel %vm6440_vm3, 0, %v223_v6  ;;  %v296_v8 = vld [vmem:[%s6455_s17 + $0x8] sm:$0xf]  ;;  %vm6481_vm10 = vmand %vm172_vm0, %vm238_vm4  ;;  %s6401_s18 = smov 64  }
  0x12   : > { %v297_v9 = vld [vmem:[%s6455_s17 + $0xc] sm:$0xf]  ;;  %v294_v10 = vld [vmem:[%s6455_s17] sm:$0xf]  ;;  %225 = vst [vmem:[#allocation2 + $0x9c] sm:$0x1] %v224_v7  ;;  %vm6489_vm11 = vmor %vm182_vm2, %vm326_vm7 }
  0x13   : > { %v346_v12 = vshrl.u32 %v296_v8, 16  ;;  %v349_v13 = vshll.u32 %v296_v8, 16  ;;  %v354_v14 = vshrl.u32 %v297_v9, 16  ;;  %v357_v15 = vshll.u32 %v297_v9, 16  ;;  %v295_v16 = vld [vmem:[%s6455_s17 + $0x4] sm:$0xf] }
  0x14   : > { %v1391_v17 = vld [vmem:[#allocation2] sm:$0xe]  ;;  %v1392_v18 = vld [vmem:[#allocation2 + $0x4] sm:$0xf]  ;;  %v329_v20 = vshrl.u32 %v294_v10, 16  ;;  %v332_v21 = vshll.u32 %v294_v10, 16 }
  0x15   : > { %v5800_v22 = vrot.slane %v1391_v17, 9  ;;  %v1492_v23 = vrot.slane %v1392_v18, 5  ;;  %v240_v24 = vld [vmem:[#allocation2 + $0x8] sm:$0x1]  ;;  %v348_v25 = vrot.slane %v346_v12, 7  ;;  %v6475_v26 = vrot.slane %v354_v14, 7 }
  0x16   : > { %v241_v27 = vsel %vm6464_vm8, 0, %v240_v24  ;;  %v331_v29 = vrot.slane %v329_v20, 7  ;;  %v337_v30 = vshrl.u32 %v295_v16, 16  ;;  %v828_v31 = vld [vmem:[#allocation2 + $0x4] sm:$0xf]  ;;  %v340_v37 = vshll.u32 %v295_v16, 16 }
  0x17   : > { %v1493_v32 = vsel %vm6471_vm9, %v5800_v22, %v1492_v23  ;;  %242 = vst [vmem:[#allocation2 + $0x8] sm:$0x1] %v241_v27  ;;  %v351_v33 = vor.u32 %v349_v13, %v348_v25  ;;  %v658_v34 = vld [vmem:[#allocation2 + $0x18] sm:$0xf]  ;;  %v352_v36 = vrot.slane %v348_v25, 4  ;;  %v359_v39 = vor.u32 %v357_v15, %v6475_v26  ;;  %s6402_s23 = smov 96  }
  0x18   : > { %v318_v38 = vld [vmem:[%s6455_s17 + $0x60] sm:$0xf]  ;;  %1602 = vrot.lane.b32.xlu0 %v1493_v32, %s6401_s18  ;;  %v334_v40 = vor.u32 %v332_v21, %v331_v29  ;;  %v651_v41 = vld [vmem:[#allocation2 + $0xc] sm:$0xf]  ;;  %v335_v42 = vrot.slane %v331_v29, 4  ;;  %v6498_v45 = vrot.slane %v337_v30, 7 }
  0x19   : > { %v243_v43 = vld [vmem:[#allocation2 + $0x14] sm:$0x1]  ;;  %v659_v44 = vsel %vm6481_vm10, %v351_v33, %v658_v34  ;;  %vm875_vm12 = vsmask.f32 3328  ;;  %vm876_vm13 = vsmask.f32 7440  ;;  %v360_v49 = vsel %vm6489_vm11, %v352_v36, %v359_v39 }
  0x1a   : > { %v888_v46 = vshll.u32 %v828_v31, 16  ;;  %v892_v47 = vshrl.u32 %v828_v31, 16  ;;  %v319_v48 = vld [vmem:[%s6455_s17 + $0x64] sm:$0xf]  ;;  %660 = vst [vmem:[#allocation2 + $0x18] sm:$0xf] %v659_v44  ;;  %v652_v50 = vsel %vm6481_vm10, %v334_v40, %v651_v41  ;;  %v342_v56 = vor.u32 %v340_v37, %v6498_v45  ;;  %vm6548_vm14 = vmor %vm875_vm12, %vm876_vm13 }
  0x1b   : > { %v533_v51 = vshrl.u32 %v318_v38, 16  ;;  %v536_v52 = vshll.u32 %v318_v38, 16  ;;  %v184_v53 = vld [vmem:[#allocation2] sm:$0x1]  ;;  %v279_v54 = vld [vmem:[#allocation2 + $0xa4] sm:$0x1] }
  0x1c   : > { %v1494_v55 = vrot.slane %v1492_v23, 4  ;;  %661 = vst.msk [vmem:[#allocation2 + $0x1c] sm:$0xf] %vm172_vm0, %v360_v49  ;;  %653 = vst [vmem:[#allocation2 + $0xc] sm:$0xf] %v652_v50  ;;  %v6507_v57 = vrot.slane %v888_v46, 5  ;;  %v343_v3 = vsel %vm6489_vm11, %v335_v42, %v342_v56 }
  0x1d   : > { %v894_v58 = vrot.slane %v892_v47, 4  ;;  %v735_v59 = vld [vmem:[#allocation2 + $0x9c] sm:$0xf]  ;;  %v535_v61 = vrot.slane %v533_v51, 7  ;;  %v541_v62 = vshrl.u32 %v319_v48, 16  ;;  %v544_v63 = vshll.u32 %v319_v48, 16 }
  0x1e   : > { %v6322_v60 = vld [vmem:[%s9078_s1 + $0x78] sm:$0xff]   ;;  %v244_v0 = vsel %vm6464_vm8, 0, %v243_v43  ;;  %v246_v2 = vld [vmem:[#allocation2 + $0x20] sm:$0x1]  ;;  %v185_v5 = vsel %vm6440_vm3, 0, %v184_v53  ;;  %v280_v6 = vsel %vm6464_vm8, 0, %v279_v54 }
  0x1f   : > { %v895_v4 = vor.u32 %v894_v58, %v6507_v57  ;;  %245 = vst [vmem:[#allocation2 + $0x14] sm:$0x1] %v244_v0  ;;  %v220_v7 = vld [vmem:[#allocation2 + $0x90] sm:$0x1]  ;;  %v6522_v8 = vld [vmem:[%s6455_s17 + $0x58] sm:$0xf]  ;;  %6127 = vmatprep.subr.bf16.mxu0 %v6322_v60  ;;  %6293 = vmatprep.subr.bf16.mxu1 %v6322_v60  ;;  %v538_v12 = vor.u32 %v536_v52, %v535_v61 }
  0x20   : > { %v1393_v9 = vld [vmem:[#allocation2 + $0x8] sm:$0x1]  ;;  %654 = vst.msk [vmem:[#allocation2 + $0x10] sm:$0xf] %vm172_vm0, %v343_v3  ;;  %v539_v13 = vrot.slane %v535_v61, 4  ;;  %v543_v14 = vrot.slane %v541_v62, 7 }
  0x21   : > { %v829_v10 = vld [vmem:[#allocation2 + $0x8] sm:$0x1]  ;;  %186 = vst [vmem:[#allocation2] sm:$0x1] %v185_v5  ;;  %281 = vst [vmem:[#allocation2 + $0xa4] sm:$0x1] %v280_v6  ;;  %v736_v22 = vsel %vm6481_vm10, %v538_v12, %v735_v59 }
  0x22   : > { %v1495_v15 = vrot.slane %v1393_v9, 5  ;;  %v344_v16 = vrot.slane %v6498_v45, 4  ;;  %v898_v17 = vshll.u32 %v829_v10, 16  ;;  %v247_v18 = vsel %vm6464_vm8, 0, %v246_v2  ;;  %v2757_v25 = vld [vmem:[#allocation2 + $0x18] sm:$0xf] }
  0x23   : > { %v6528_v20 = vrot.slane %v895_v4, 4  ;;  %v546_v21 = vor.u32 %v544_v63, %v543_v14  ;;  %248 = vst [vmem:[#allocation2 + $0x20] sm:$0x1] %v247_v18  ;;  %v221_v23 = vsel %vm6440_vm3, 0, %v220_v7  ;;  %737 = vst [vmem:[#allocation2 + $0x9c] sm:$0xf] %v736_v22  ;;  %2821 = vrot.lane.b32.xlu0 %v2757_v25, %s6401_s18 }
  0x24   : > { %v1496_v24 = vsel %vm6471_vm9, %v1494_v55, %v1495_v15  ;;  %v548_v27 = vrot.slane %v543_v14, 4  ;;  %v2949_v29 = vld [vmem:[#allocation2 + $0x18] sm:$0xf]  ;;  %222 = vst [vmem:[#allocation2 + $0x90] sm:$0x1] %v221_v23  ;;  %v516_v30 = vshrl.u32 %v6522_v8, 16 }
  0x25   : > { %1604 = vrot.lane.b32.xlu1 %v1496_v24, %s6401_s18  ;;  %v2758_v31 = vld [vmem:[#allocation2 + $0x1c] sm:$0xf]  ;;  %v1731_v32 = vld [vmem:[#allocation2 + $0xc] sm:$0xf]  ;;  %v547_v34 = vsel %vm6489_vm11, %v539_v13, %v546_v21  ;;  %v900_v36 = vrot.slane %v898_v17, 5  ;;  %v2998_v38 = vshrl.u32 %v2949_v29, 16 }
  0x26   : > { %v2420_v33 = vld [vmem:[#allocation2 + $0xc] sm:$0xe]  ;;  %738 = vst.msk [vmem:[#allocation2 + $0xa0] sm:$0xf] %vm172_vm0, %v547_v34  ;;  %v2950_v37 = vld [vmem:[#allocation2 + $0x1c] sm:$0xf] }
  0x27   : > { %v3001_v39 = vshll.u32 %v2949_v29, 16  ;;  %v6323_v40 = vld [vmem:[%s9078_s1 + $0x38] sm:$0xff]   ;;  %v361_v41 = vrot.slane %v6475_v26, 4  ;;  %v5816_v43 = vrot.slane %v2420_v33, 9  ;;  %v655_v44 = vld [vmem:[#allocation2 + $0x14] sm:$0x1]  ;;  %1795 = vrot.lane.b32.xlu0 %v1731_v32, %s6402_s23  ;;  %v901_v59 = vsel %vm6548_vm14, %v6528_v20, %v900_v36 }
  0x28   : > { %v3007_v45 = vshll.u32 %v2950_v37, 16  ;;  %v3011_v46 = vshrl.u32 %v2950_v37, 16  ;;  %v2421_v47 = vld [vmem:[#allocation2 + $0x10] sm:$0xf]  ;;  %v656_v48 = vsel %vm6440_vm3, %v344_v16, %v655_v44  ;;  %v827_v49 = vld [vmem:[#allocation2] sm:$0xf]  ;;  %6128 = vmatpush3.bf16.msra.mxu0 %v6323_v40  ;;  %6301 = vmatpush3.bf16.msra.mxu1 %v6323_v40 }
  0x29   : > { %v6555_v50 = vld [vmem:[%s6455_s17 + $0x5c] sm:$0xf]  ;;  %v6557_v51 = vrot.slane %v516_v30, 7  ;;  %v519_v26 = vshll.u32 %v6522_v8, 16  ;;  %2823 = vrot.lane.b32.xlu1 %v2758_v31, %s6401_s18  ;;  %v2518_v52 = vrot.slane %v2421_v47, 5  ;;  %v879_v53 = vshrl.u32 %v827_v49, 16 }
  0x2a   : > { %657 = vst [vmem:[#allocation2 + $0x14] sm:$0x1] %v656_v48  ;;  %v882_v54 = vshll.u32 %v827_v49, 16  ;;  %v739_v55 = vld [vmem:[#allocation2 + $0xa4] sm:$0x1]  ;;  %v3000_v56 = vrot.slane %v2998_v38, 4 }
  0x2b   : > { %v1732_v58 = vld [vmem:[#allocation2 + $0x10] sm:$0xf]  ;;  %v740_v60 = vsel %vm6440_vm3, %v548_v27, %v739_v55  ;;  %v3003_v61 = vrot.slane %v3001_v39, 5  ;;  %v662_v62 = vld [vmem:[#allocation2 + $0x20] sm:$0x1]  ;;  %v881_v3 = vrot.slane %v879_v53, 4  ;;  %v2519_v14 = vsel %vm6471_vm9, %v5816_v43, %v2518_v52 }
  0x2c   : > { %v276_v63 = vld [vmem:[#allocation2 + $0x98] sm:$0x1]  ;;  %v6324_v0 = vld [vmem:[%s9078_s1 + $0x70] sm:$0xff]   ;;  %v2456_v2 = vld [vmem:[#allocation2 + $0x9c] sm:$0xe]  ;;  %v884_v4 = vrot.slane %v882_v54, 5  ;;  %v663_v9 = vsel %vm6440_vm3, %v361_v41, %v662_v62  ;;  %v521_v17 = vor.u32 %v519_v26, %v6557_v51 }
  0x2d   : > { %741 = vst [vmem:[#allocation2 + $0xa4] sm:$0x1] %v740_v60  ;;  %v6570_v5 = vrot.slane %v3007_v45, 5  ;;  %v6325_v6 = vld [vmem:[%s9078_s1 + $0x30] sm:$0xff]   ;;  %v5828_v7 = vrot.slane %v2456_v2, 9  ;;  %v3004_v8 = vor.u32 %v3003_v61, %v3000_v56  ;;  %v6577_v10 = vrot.slane %v3011_v46, 4  ;;  %6129 = vmatprep.subr.bf16.mxu0 %v6324_v0  ;;  %6294 = vmatprep.subr.bf16.mxu1 %v6324_v0 }
  0x2e   : > { %v728_v12 = vld [vmem:[#allocation2 + $0x90] sm:$0xf]  ;;  %v6326_v13 = vld [vmem:[%s9078_s1 + $0x68] sm:$0xff]   ;;  %1797 = vrot.lane.b32.xlu1 %v1732_v58, %s6402_s23  ;;  %s6403_s30 = smov 32   ;;  %v2457_v15 = vld [vmem:[#allocation2 + $0xa0] sm:$0xf]  ;;  %v885_v16 = vor.u32 %v884_v4, %v881_v3  ;;  %6130 = vmatpush3.bf16.msra.mxu0 %v6325_v6 }
  0x2f   : > { %1264 = vrot.lane.b32.xlu0 %v901_v59, %s6403_s30  ;;  %664 = vst [vmem:[#allocation2 + $0x20] sm:$0x1] %v663_v9  ;;  %v524_v18 = vshrl.u32 %v6555_v50, 16  ;;  %v226_v20 = vld [vmem:[#allocation2 + $0xa8] sm:$0x1]  ;;  %v2602_v21 = vrot.slane %v2457_v15, 5  ;;  %6302 = vmatpush3.bf16.msra.mxu1 %v6325_v6  ;;  %v729_v30 = vsel %vm6481_vm10, %v521_v17, %v728_v12  ;;  %v3014_v38 = vor.u32 %v6577_v10, %v6570_v5 }
  0x30   : > { %v2520_v22 = vrot.slane %v2518_v52, 4  ;;  %v522_v23 = vrot.slane %v6557_v51, 4  ;;  %v527_v24 = vshll.u32 %v6555_v50, 16  ;;  %v320_v25 = vld [vmem:[%s6455_s17 + $0x68] sm:$0xf]  ;;  %v886_v27 = vrot.slane %v885_v16, 4  ;;  %6131 = vmatprep.subr.bf16.mxu0 %v6326_v13  ;;  %6295 = vmatprep.subr.bf16.mxu1 %v6326_v13 }
  0x31   : > { %v526_v29 = vrot.slane %v524_v18, 7  ;;  %v277_v31 = vsel %vm6464_vm8, 0, %v276_v63  ;;  %v321_v32 = vld [vmem:[%s6455_s17 + $0x6c] sm:$0xf]  ;;  %v2603_v34 = vsel %vm6471_vm9, %v5828_v7, %v2602_v21  ;;  %v2422_v36 = vld [vmem:[#allocation2 + $0x14] sm:$0x1] }
  0x32   : > { %v6327_v33 = vld [vmem:[%s9078_s1 + $0x28] sm:$0xff]   ;;  %v3005_v37 = vrot.slane %v3004_v8, 4  ;;  %730 = vst [vmem:[#allocation2 + $0x90] sm:$0xf] %v729_v30  ;;  %278 = vst [vmem:[#allocation2 + $0x98] sm:$0x1] %v277_v31  ;;  %2628 = vrot.lane.b32.xlu1 %v2519_v14, %s6403_s30  ;;  %v891_v41 = vsel %vm6548_vm14, %v886_v27, %v6507_v57 }
  0x33   : > { %v227_v39 = vsel %vm6440_vm3, 0, %v226_v20  ;;  %2676 = vrot.lane.b32.xlu0 %v2603_v34, %s6403_s30  ;;  %v2521_v40 = vrot.slane %v2422_v36, 5  ;;  %v2604_v43 = vrot.slane %v2602_v21, 4  ;;  %v529_v44 = vor.u32 %v527_v24, %v526_v29  ;;  %v830_v45 = vld [vmem:[#allocation2 + $0xc] sm:$0xf]  ;;  %6132 = vmatpush3.bf16.msra.mxu0 %v6327_v33  ;;  %v6328_v61 = vld [vmem:[%s9078_s1 + $0x60] sm:$0xff]  }
  0x34   : > { %228 = vst [vmem:[#allocation2 + $0xa8] sm:$0x1] %v227_v39  ;;  %v2458_v46 = vld [vmem:[#allocation2 + $0xa4] sm:$0x1]  ;;  %v550_v47 = vshrl.u32 %v320_v25, 16  ;;  %v553_v48 = vshll.u32 %v320_v25, 16  ;;  %6303 = vmatpush3.bf16.msra.mxu1 %v6327_v33  ;;  %v3010_v56 = vsel %vm6548_vm14, %v3005_v37, %v6570_v5  ;;  %6133 = vmatprep.subr.bf16.mxu0 %v6328_v61 }
  0x35   : > { %v558_v49 = vshrl.u32 %v321_v32, 16  ;;  %v561_v50 = vshll.u32 %v321_v32, 16  ;;  %v2522_v51 = vsel %vm6471_vm9, %v2520_v22, %v2521_v40  ;;  %v2605_v26 = vrot.slane %v2458_v46, 5  ;;  %6296 = vmatprep.subr.bf16.mxu1 %v6328_v61  ;;  %v6329_v14 = vld [vmem:[%s9078_s1 + $0x20] sm:$0xff]   ;;  %v831_v20 = vld [vmem:[#allocation2 + $0x10] sm:$0xf] }
  0x36   : > { %v530_v52 = vsel %vm6489_vm11, %v522_v23, %v529_v44  ;;  %v2951_v53 = vld [vmem:[#allocation2 + $0x20] sm:$0x1]  ;;  %v531_v57 = vrot.slane %v526_v29, 4  ;;  %v552_v54 = vrot.slane %v550_v47, 7  ;;  %2630 = vrot.lane.b32.xlu1 %v2522_v51, %s6403_s30  ;;  %v3015_v58 = vrot.slane %v3014_v38, 4  ;;  %v6330_v30 = vld [vmem:[%s9078_s1 + $0x58] sm:$0xff]  }
  0x37   : > { %731 = vst.msk [vmem:[#allocation2 + $0x94] sm:$0xf] %vm172_vm0, %v530_v52  ;;  %v6615_v55 = vrot.slane %v558_v49, 7  ;;  %1262 = vrot.lane.b32.xlu0 %v891_v41, %s6403_s30  ;;  %v3017_v59 = vshll.u32 %v2951_v53, 16  ;;  %v903_v60 = vshrl.u32 %v830_v45, 16  ;;  %v2606_v62 = vsel %vm6471_vm9, %v2604_v43, %v2605_v26  ;;  %6134 = vmatpush3.bf16.msra.mxu0 %v6329_v14  ;;  %v6331_v39 = vld [vmem:[%s9078_s1 + $0x18] sm:$0xff]  }
  0x38   : > { %v555_v63 = vor.u32 %v553_v48, %v552_v54  ;;  %v556_v0 = vrot.slane %v552_v54, 4  ;;  %v906_v7 = vshll.u32 %v830_v45, 16  ;;  %6304 = vmatpush3.bf16.msra.mxu1 %v6329_v14  ;;  %v912_v32 = vshll.u32 %v831_v20, 16  ;;  %6135 = vmatprep.subr.bf16.mxu0 %v6330_v30  ;;  %v832_v46 = vld [vmem:[#allocation2 + $0x14] sm:$0x1]  ;;  %s6062_s10 = sshll.u32 %s9117_s13, 4 }
  0x39   : > { %v563_v2 = vor.u32 %v561_v50, %v6615_v55  ;;  %v3019_v3 = vrot.slane %v3017_v59, 5  ;;  %v863_v4 = vld [vmem:[#allocation2 + $0x90] sm:$0xf]  ;;  %v732_v6 = vld [vmem:[#allocation2 + $0x98] sm:$0x1]  ;;  %v905_v23 = vrot.slane %v903_v60, 4  ;;  %6297 = vmatprep.subr.bf16.mxu1 %v6330_v30  ;;  %s9013_s14 = scalar_lea.vmem %s9080_s3, %s6062_s10 }
  0x3a   : > { %v1167_v5 = vshrl.u32 %v863_v4, 16  ;;  %v1170_v8 = vshll.u32 %v863_v4, 16  ;;  %v733_v9 = vsel %vm6440_vm3, %v531_v57, %v732_v6  ;;  %2678 = vrot.lane.b32.xlu1 %v2606_v62, %s6403_s30  ;;  %v1427_v18 = vld [vmem:[#allocation2 + $0x90] sm:$0xe]  ;;  %v908_v29 = vrot.slane %v906_v7, 5  ;;  %v6334_v4 = vld [vmem:[%s9078_s1 + $0x48] sm:$0xff]  }
  0x3b   : > { %v742_v10 = vld [vmem:[#allocation2 + $0xa8] sm:$0xf]  ;;  %v564_v12 = vsel %vm6489_vm11, %v556_v0, %v563_v2  ;;  %3381 = vrot.lane.b32.xlu0 %v3010_v56, %s6402_s23  ;;  %734 = vst [vmem:[#allocation2 + $0x98] sm:$0x1] %v733_v9  ;;  %v3020_v15 = vsel %vm6548_vm14, %v3015_v58, %v3019_v3  ;;  %v5812_v31 = vrot.slane %v1427_v18, 9  ;;  %v916_v33 = vshrl.u32 %v831_v20, 16  ;;  %6136 = vmatpush3.bf16.msra.mxu0 %v6331_v39 }
  0x3c   : > { %v743_v13 = vsel %vm6481_vm10, %v555_v63, %v742_v10  ;;  %745 = vst.msk [vmem:[#allocation2 + $0xac] sm:$0xf] %vm172_vm0, %v564_v12  ;;  %v1169_v16 = vrot.slane %v1167_v5, 4  ;;  %v1172_v17 = vrot.slane %v1170_v8, 5  ;;  %v909_v45 = vor.u32 %v908_v29, %v905_v23  ;;  %6305 = vmatpush3.bf16.msra.mxu1 %v6331_v39  ;;  %v282_v48 = vld [vmem:[#allocation2 + $0xb0] sm:$0x1] }
  0x3d   : > { %744 = vst [vmem:[#allocation2 + $0xa8] sm:$0xf] %v743_v13  ;;  %v193_v49 = vld [vmem:[#allocation2 + $0x24] sm:$0x1]  ;;  %v6654_v26 = vrot.slane %v912_v32, 5  ;;  %v918_v52 = vrot.slane %v916_v33, 4 }
  0x3e   : > { %v864_v21 = vld [vmem:[#allocation2 + $0x94] sm:$0xf]  ;;  %v1173_v24 = vor.u32 %v1172_v17, %v1169_v16  ;;  %3383 = vrot.lane.b32.xlu1 %v3020_v15, %s6402_s23  ;;  %v298_v53 = vld [vmem:[%s6455_s17 + $0x10] sm:$0xf]  ;;  %v910_v60 = vrot.slane %v909_v45, 4  ;;  %v283_v61 = vsel %vm6464_vm8, 0, %v282_v48 }
  0x3f   : > { %v1428_v22 = vld [vmem:[#allocation2 + $0x94] sm:$0xf]  ;;  %v1176_v25 = vshll.u32 %v864_v21, 16  ;;  %v1180_v27 = vshrl.u32 %v864_v21, 16  ;;  %v922_v2 = vshll.u32 %v832_v46, 16  ;;  %v919_v7 = vor.u32 %v918_v52, %v6654_v26  ;;  %v6335_v10 = vld [vmem:[%s9078_s1 + $0x8] sm:$0xff]  }
  0x40   : > { %v1174_v34 = vrot.slane %v1173_v24, 4  ;;  %v1576_v38 = vrot.slane %v1428_v22, 5  ;;  %v6332_v59 = vld [vmem:[%s9078_s1 + $0x50] sm:$0xff]   ;;  %284 = vst [vmem:[#allocation2 + $0xb0] sm:$0x1] %v283_v61  ;;  %v194_v9 = vsel %vm6440_vm3, 0, %v193_v49  ;;  %v915_v20 = vsel %vm6548_vm14, %v910_v60, %v6654_v26 }
  0x41   : > { %v1178_v36 = vrot.slane %v1176_v25, 5  ;;  %v1182_v37 = vrot.slane %v1180_v27, 4  ;;  %v299_v62 = vld [vmem:[%s6455_s17 + $0x14] sm:$0xf]  ;;  %v249_v3 = vld [vmem:[#allocation2 + $0x2c] sm:$0x1]  ;;  %6137 = vmatprep.subr.bf16.mxu0 %v6332_v59  ;;  %6298 = vmatprep.subr.bf16.mxu1 %v6332_v59 }
  0x42   : > { %v865_v41 = vld [vmem:[#allocation2 + $0x98] sm:$0x1]  ;;  %v1577_v51 = vsel %vm6471_vm9, %v5812_v31, %v1576_v38  ;;  %v1578_v54 = vrot.slane %v1576_v38, 4  ;;  %v6333_v63 = vld [vmem:[%s9078_s1 + $0x10] sm:$0xff]   ;;  %195 = vst [vmem:[#allocation2 + $0x24] sm:$0x1] %v194_v9 }
  0x43   : > { %v1179_v40 = vsel %vm6548_vm14, %v1174_v34, %v1178_v36  ;;  %v1183_v43 = vor.u32 %v1182_v37, %v1178_v36  ;;  %v1429_v44 = vld [vmem:[#allocation2 + $0x98] sm:$0x1]  ;;  %v1186_v47 = vshll.u32 %v865_v41, 16  ;;  %6138 = vmatpush3.bf16.msra.mxu0 %v6333_v63  ;;  %v2986_v13 = vld [vmem:[#allocation2 + $0xac] sm:$0xf]  ;;  %v363_v14 = vshrl.u32 %v298_v53, 16  ;;  %6306 = vmatpush3.bf16.msra.mxu1 %v6333_v63 }
  0x44   : > { %1310 = vrot.lane.b32.xlu0 %v1179_v40, %s6403_s30  ;;  %v1579_v56 = vrot.slane %v1429_v44, 5  ;;  %v2985_v58 = vld [vmem:[#allocation2 + $0xa8] sm:$0xf]  ;;  %v366_v15 = vshll.u32 %v298_v53, 16  ;;  %v371_v16 = vshrl.u32 %v299_v62, 16  ;;  %6139 = vmatprep.subr.bf16.mxu0 %v6334_v4  ;;  %v6336_v17 = vld [vmem:[%s9078_s1 + $0x40] sm:$0xff]  }
  0x45   : > { %v1184_v50 = vrot.slane %v1183_v43, 4  ;;  %v1188_v57 = vrot.slane %v1186_v47, 5  ;;  %v2781_v6 = vld [vmem:[#allocation2 + $0xa8] sm:$0xf]  ;;  %v3286_v5 = vshrl.u32 %v2985_v58, 16  ;;  %v3289_v8 = vshll.u32 %v2985_v58, 16  ;;  %6299 = vmatprep.subr.bf16.mxu1 %v6334_v4 }
  0x46   : > { %v1580_v12 = vsel %vm6471_vm9, %v1578_v54, %v1579_v56  ;;  %v565_v18 = vrot.slane %v6615_v55, 4  ;;  %v2423_v21 = vld [vmem:[#allocation2 + $0x18] sm:$0xe]  ;;  %v374_v22 = vshll.u32 %v299_v62, 16  ;;  %v924_v23 = vrot.slane %v922_v2, 5  ;;  %v6337_v33 = vld [vmem:[%s9078_s1] sm:$0xff]  }
  0x47   : > { %v1189_v0 = vsel %vm6548_vm14, %v1184_v50, %v1188_v57  ;;  %v2424_v24 = vld [vmem:[#allocation2 + $0x1c] sm:$0xf]  ;;  %v365_v25 = vrot.slane %v363_v14, 7  ;;  %v373_v27 = vrot.slane %v371_v16, 7  ;;  %v250_v29 = vsel %vm6464_vm8, 0, %v249_v3  ;;  %6140 = vmatpush3.bf16.msra.mxu0 %v6335_v10  ;;  %6307 = vmatpush3.bf16.msra.mxu1 %v6335_v10 }
  0x48   : > { %1650 = vrot.lane.b32.xlu0 %v1577_v51, %s6401_s18  ;;  %1312 = vrot.lane.b32.xlu1 %v1189_v0, %s6403_s30  ;;  %v920_v55 = vrot.slane %v919_v7, 4  ;;  %v3288_v30 = vrot.slane %v3286_v5, 4  ;;  %v3291_v31 = vrot.slane %v3289_v8, 5  ;;  %v3295_v32 = vshll.u32 %v2986_v13, 16  ;;  %251 = vst [vmem:[#allocation2 + $0x2c] sm:$0x1] %v250_v29 }
  0x49   : > { %v2782_v34 = vld [vmem:[#allocation2 + $0xac] sm:$0xf]  ;;  %v3299_v36 = vshrl.u32 %v2986_v13, 16  ;;  %v368_v37 = vor.u32 %v366_v15, %v365_v25  ;;  %v369_v38 = vrot.slane %v365_v25, 4  ;;  %v376_v39 = vor.u32 %v374_v22, %v373_v27  ;;  %6141 = vmatprep.subr.bf16.mxu0 %v6336_v17  ;;  %v746_v40 = vld [vmem:[#allocation2 + $0xb0] sm:$0x1]  ;;  %6300 = vmatprep.subr.bf16.mxu1 %v6336_v17 }
  0x4a   : > { %v1755_v41 = vld [vmem:[#allocation2 + $0x9c] sm:$0xf]  ;;  %v5817_v43 = vrot.slane %v2423_v21, 9  ;;  %v2525_v44 = vrot.slane %v2424_v24, 5  ;;  %v2425_v45 = vld [vmem:[#allocation2 + $0x20] sm:$0x1]  ;;  %v747_v46 = vsel %vm6440_vm3, %v565_v18, %v746_v40  ;;  %v3292_v48 = vor.u32 %v3291_v31, %v3288_v30 }
  0x4b   : > { %v377_v47 = vsel %vm6489_vm11, %v369_v38, %v376_v39  ;;  %748 = vst [vmem:[#allocation2 + $0xb0] sm:$0x1] %v747_v46  ;;  %v665_v49 = vld [vmem:[#allocation2 + $0x24] sm:$0xf]  ;;  %v378_v50 = vrot.slane %v373_v27, 4  ;;  %6142 = vmatpush3.bf16.msra.mxu0 %v6337_v33  ;;  %v925_v26 = vsel %vm6548_vm14, %v920_v55, %v924_v23  ;;  %v3297_v52 = vrot.slane %v3295_v32, 5  ;;  %6308 = vmatpush3.bf16.msra.mxu1 %v6337_v33 }
  0x4c   : > { %2869 = vrot.lane.b32.xlu0 %v2781_v6, %s6401_s18  ;;  %1652 = vrot.lane.b32.xlu1 %v1580_v12, %s6401_s18  ;;  %668 = vst.msk [vmem:[#allocation2 + $0x28] sm:$0xf] %vm172_vm0, %v377_v47  ;;  %v229_v51 = vld [vmem:[#allocation2 + $0xb4] sm:$0x1]  ;;  %v3301_v53 = vrot.slane %v3299_v36, 4  ;;  %v666_v57 = vsel %vm6481_vm10, %v368_v37, %v665_v49  ;;  %v2526_v59 = vsel %vm6471_vm9, %v5817_v43, %v2525_v44  ;;  %v2528_v60 = vrot.slane %v2425_v45, 5 }
  0x4d   : > { %v322_v54 = vld [vmem:[%s6455_s17 + $0x70] sm:$0xf]  ;;  %v1394_v56 = vld [vmem:[#allocation2 + $0xc] sm:$0xe]  ;;  %667 = vst [vmem:[#allocation2 + $0x24] sm:$0xf] %v666_v57 }
  0x4e   : > { %v1395_v58 = vld [vmem:[#allocation2 + $0x10] sm:$0xf]  ;;  %v230_v62 = vsel %vm6440_vm3, 0, %v229_v51  ;;  %v2527_v63 = vrot.slane %v2525_v44, 4  ;;  %v3293_v0 = vrot.slane %v3292_v48, 4  ;;  %v567_v3 = vshrl.u32 %v322_v54, 16 }
  0x4f   : > { %v669_v61 = vld [vmem:[#allocation2 + $0x2c] sm:$0x1]  ;;  %231 = vst [vmem:[#allocation2 + $0xb4] sm:$0x1] %v230_v62  ;;  %v323_v4 = vld [vmem:[%s6455_s17 + $0x74] sm:$0xf]  ;;  %v3302_v7 = vor.u32 %v3301_v53, %v3297_v52 }
  0x50   : > { %1266 = vrot.lane.b32.xlu0 %v915_v20, %s6403_s30  ;;  %2871 = vrot.lane.b32.xlu1 %v2782_v34, %s6401_s18  ;;  %v670_v2 = vsel %vm6440_vm3, %v378_v50, %v669_v61  ;;  %v1756_v6 = vld [vmem:[#allocation2 + $0xa0] sm:$0xf]  ;;  %v5801_v5 = vrot.slane %v1394_v56, 9  ;;  %v1499_v8 = vrot.slane %v1395_v58, 5  ;;  %v570_v9 = vshll.u32 %v322_v54, 16 }
  0x51   : > { %671 = vst [vmem:[#allocation2 + $0x2c] sm:$0x1] %v670_v2  ;;  %v569_v10 = vrot.slane %v567_v3, 7  ;;  %v866_v13 = vld [vmem:[#allocation2 + $0x9c] sm:$0xf]  ;;  %v575_v14 = vshrl.u32 %v323_v4, 16  ;;  %v3298_v15 = vsel %vm6548_vm14, %v3293_v0, %v3297_v52  ;;  %v2529_v20 = vsel %vm6471_vm9, %v2527_v63, %v2528_v60 }
  0x52   : > { %v2987_v12 = vld [vmem:[#allocation2 + $0xb0] sm:$0x1]  ;;  %v3303_v21 = vrot.slane %v3302_v7, 4  ;;  %v1500_v22 = vsel %vm6471_vm9, %v5801_v5, %v1499_v8  ;;  %v1396_v23 = vld [vmem:[#allocation2 + $0x14] sm:$0x1]  ;;  %v578_v25 = vshll.u32 %v323_v4, 16 }
  0x53   : > { %v3305_v16 = vshll.u32 %v2987_v12, 16  ;;  %v2953_v17 = vld [vmem:[#allocation2 + $0x28] sm:$0xf]  ;;  %v572_v18 = vor.u32 %v570_v9, %v569_v10  ;;  %v867_v30 = vld [vmem:[#allocation2 + $0xa0] sm:$0xf]  ;;  %v1191_v31 = vshrl.u32 %v866_v13, 16 }
  0x54   : > { %1843 = vrot.lane.b32.xlu0 %v1755_v41, %s6402_s23  ;;  %1268 = vrot.lane.b32.xlu1 %v925_v26, %s6403_s30  ;;  %v2952_v24 = vld [vmem:[#allocation2 + $0x24] sm:$0xf]  ;;  %v3031_v32 = vshll.u32 %v2953_v17, 16  ;;  %v1194_v33 = vshll.u32 %v866_v13, 16  ;;  %v573_v36 = vrot.slane %v569_v10, 4  ;;  %v6725_v37 = vrot.slane %v575_v14, 7 }
  0x55   : > { %v3307_v27 = vrot.slane %v3305_v16, 5  ;;  %v3022_v29 = vshrl.u32 %v2952_v24, 16  ;;  %v3025_v55 = vshll.u32 %v2952_v24, 16  ;;  %v3035_v40 = vshrl.u32 %v2953_v17, 16  ;;  %v2759_v26 = vld [vmem:[#allocation2 + $0x24] sm:$0xf] }
  0x56   : > { %v749_v34 = vld [vmem:[#allocation2 + $0xb4] sm:$0xf]  ;;  %v1501_v44 = vrot.slane %v1499_v8, 4  ;;  %v1502_v45 = vrot.slane %v1396_v23, 5  ;;  %v580_v46 = vor.u32 %v578_v25, %v6725_v37  ;;  %v1200_v47 = vshll.u32 %v867_v30, 16 }
  0x57   : > { %v3024_v38 = vrot.slane %v3022_v29, 4  ;;  %v3027_v39 = vrot.slane %v3025_v55, 5  ;;  %v750_v41 = vsel %vm6481_vm10, %v572_v18, %v749_v34  ;;  %v3308_v43 = vsel %vm6548_vm14, %v3303_v21, %v3307_v27  ;;  %v285_v54 = vld [vmem:[#allocation2 + $0xbc] sm:$0x1]  ;;  %v868_v58 = vld [vmem:[#allocation2 + $0xa4] sm:$0x1] }
  0x58   : > { %2632 = vrot.lane.b32.xlu0 %v2526_v59, %s6403_s30  ;;  %1845 = vrot.lane.b32.xlu1 %v1756_v6, %s6402_s23  ;;  %751 = vst [vmem:[#allocation2 + $0xb4] sm:$0xf] %v750_v41  ;;  %v1193_v48 = vrot.slane %v1191_v31, 4  ;;  %v1196_v49 = vrot.slane %v1194_v33, 5  ;;  %v1204_v50 = vshrl.u32 %v867_v30, 16  ;;  %v581_v51 = vsel %vm6489_vm11, %v573_v36, %v580_v46 }
  0x59   : > { %v3028_v52 = vor.u32 %v3027_v39, %v3024_v38  ;;  %v3033_v53 = vrot.slane %v3031_v32, 5  ;;  %v3037_v57 = vrot.slane %v3035_v40, 4  ;;  %752 = vst.msk [vmem:[#allocation2 + $0xb8] sm:$0xf] %vm172_vm0, %v581_v51  ;;  %v1503_v56 = vsel %vm6471_vm9, %v1501_v44, %v1502_v45  ;;  %v1733_v59 = vld [vmem:[#allocation2 + $0x18] sm:$0xf] }
  0x5a   : > { %v2954_v60 = vld [vmem:[#allocation2 + $0x2c] sm:$0x1]  ;;  %v6740_v61 = vrot.slane %v1200_v47, 5  ;;  %v6742_v62 = vld [vmem:[#allocation2 + $0xa8] sm:$0xe]  ;;  %v1197_v63 = vor.u32 %v1196_v49, %v1193_v48  ;;  %v1206_v0 = vrot.slane %v1204_v50, 4 }
  0x5b   : > { %v286_v2 = vsel %vm6464_vm8, 0, %v285_v54  ;;  %v196_v3 = vld [vmem:[#allocation2 + $0x30] sm:$0x1]  ;;  %v3029_v4 = vrot.slane %v3028_v52, 4  ;;  %v3038_v6 = vor.u32 %v3037_v57, %v3033_v53  ;;  %v6748_v7 = vld [vmem:[#allocation2 + $0xac] sm:$0xf] }
  0x5c   : > { %3429 = vrot.lane.b32.xlu0 %v3298_v15, %s6402_s23  ;;  %2634 = vrot.lane.b32.xlu1 %v2529_v20, %s6403_s30  ;;  %287 = vst [vmem:[#allocation2 + $0xbc] sm:$0x1] %v286_v2  ;;  %v300_v5 = vld [vmem:[%s6455_s17 + $0x18] sm:$0xf]  ;;  %v2760_v8 = vld [vmem:[#allocation2 + $0x28] sm:$0xf]  ;;  %v1207_v17 = vor.u32 %v1206_v0, %v6740_v61 }
  0x5d   : > { %v3041_v9 = vshll.u32 %v2954_v60, 16  ;;  %v833_v10 = vld [vmem:[#allocation2 + $0x18] sm:$0xf]  ;;  %v1210_v12 = vshll.u32 %v868_v58, 16  ;;  %v197_v13 = vsel %vm6440_vm3, 0, %v196_v3  ;;  %v1198_v16 = vrot.slane %v1197_v63, 4 }
  0x5e   : > { %v301_v14 = vld [vmem:[%s6455_s17 + $0x1c] sm:$0xf]  ;;  %v5829_v18 = vrot.slane %v6742_v62, 9  ;;  %v2609_v20 = vrot.slane %v6748_v7, 5  ;;  %198 = vst [vmem:[#allocation2 + $0x30] sm:$0x1] %v197_v13 }
  0x5f   : > { %v1734_v15 = vld [vmem:[#allocation2 + $0x1c] sm:$0xf]  ;;  %v252_v21 = vld [vmem:[#allocation2 + $0x38] sm:$0x1]  ;;  %v3039_v23 = vrot.slane %v3038_v6, 4  ;;  %v582_v25 = vrot.slane %v6725_v37, 4  ;;  %v1203_v39 = vsel %vm6548_vm14, %v1198_v16, %v6740_v61 }
  0x60   : > { %1606 = vrot.lane.b32.xlu0 %v1500_v22, %s6401_s18  ;;  %3431 = vrot.lane.b32.xlu1 %v3308_v43, %s6402_s23  ;;  %v3034_v22 = vsel %vm6548_vm14, %v3029_v4, %v3033_v53  ;;  %v6761_v24 = vld [vmem:[#allocation2 + $0x9c] sm:$0xe]  ;;  %v380_v27 = vshrl.u32 %v300_v5, 16  ;;  %v3043_v29 = vrot.slane %v3041_v9, 5  ;;  %v6764_v55 = vld [vmem:[#allocation2 + $0xa0] sm:$0xf]  ;;  %v2610_v63 = vsel %vm6471_vm9, %v5829_v18, %v2609_v20 }
  0x61   : > { %v383_v30 = vshll.u32 %v300_v5, 16  ;;  %v388_v31 = vshrl.u32 %v301_v14, 16  ;;  %v391_v32 = vshll.u32 %v301_v14, 16  ;;  %v1212_v33 = vrot.slane %v1210_v12, 5  ;;  %v834_v40 = vld [vmem:[#allocation2 + $0x1c] sm:$0xf] }
  0x62   : > { %v927_v34 = vshrl.u32 %v833_v10, 16  ;;  %v382_v36 = vrot.slane %v380_v27, 7  ;;  %v253_v38 = vsel %vm6464_vm8, 0, %v252_v21  ;;  %v5813_v37 = vrot.slane %v6761_v24, 9  ;;  %v2461_v50 = vld [vmem:[#allocation2 + $0xb0] sm:$0x1] }
  0x63   : > { %v930_v41 = vshll.u32 %v833_v10, 16  ;;  %v753_v43 = vld [vmem:[#allocation2 + $0xbc] sm:$0x1]  ;;  %v390_v44 = vrot.slane %v388_v31, 7  ;;  %254 = vst [vmem:[#allocation2 + $0x38] sm:$0x1] %v253_v38  ;;  %v3044_v49 = vsel %vm6548_vm14, %v3039_v23, %v3043_v29 }
  0x64   : > { %2825 = vrot.lane.b32.xlu0 %v2759_v26, %s6401_s18  ;;  %1608 = vrot.lane.b32.xlu1 %v1503_v56, %s6401_s18  ;;  %v1208_v45 = vrot.slane %v1207_v17, 4  ;;  %v754_v46 = vsel %vm6440_vm3, %v582_v25, %v753_v43  ;;  %v385_v47 = vor.u32 %v383_v30, %v382_v36  ;;  %v386_v48 = vrot.slane %v382_v36, 4  ;;  %v764_v26 = vld [vmem:[#allocation2 + $0x4] sm:$0xf]  ;;  %v2988_v57 = vld [vmem:[#allocation2 + $0xb4] sm:$0xf] }
  0x65   : > { %755 = vst [vmem:[#allocation2 + $0xbc] sm:$0x1] %v754_v46  ;;  %v393_v51 = vor.u32 %v391_v32, %v390_v44  ;;  %v1583_v52 = vrot.slane %v6764_v55, 5  ;;  %v929_v53 = vrot.slane %v927_v34, 4  ;;  %v672_v54 = vld [vmem:[#allocation2 + $0x30] sm:$0xf] }
  0x66   : > { %796 = vst.msk [vmem:[#allocation3 + $0xc] sm:$0xf] %vm172_vm0, %v764_v26  ;;  %v1432_v56 = vld [vmem:[#allocation2 + $0xa4] sm:$0x1]  ;;  %v932_v58 = vrot.slane %v930_v41, 5  ;;  %v673_v60 = vsel %vm6481_vm10, %v385_v47, %v672_v54  ;;  %v395_v62 = vrot.slane %v390_v44, 4  ;;  %v1213_v4 = vsel %vm6548_vm14, %v1208_v45, %v1212_v33 }
  0x67   : > { %v394_v61 = vsel %vm6489_vm11, %v386_v48, %v393_v51  ;;  %v2611_v0 = vrot.slane %v2609_v20, 4  ;;  %v936_v2 = vshll.u32 %v834_v40, 16  ;;  %v940_v3 = vshrl.u32 %v834_v40, 16  ;;  %674 = vst [vmem:[#allocation2 + $0x30] sm:$0xf] %v673_v60 }
  0x68   : > { %1799 = vrot.lane.b32.xlu0 %v1733_v59, %s6402_s23  ;;  %2827 = vrot.lane.b32.xlu1 %v2760_v8, %s6401_s18  ;;  %v835_v59 = vld [vmem:[#allocation2 + $0x20] sm:$0x1]  ;;  %675 = vst.msk [vmem:[#allocation2 + $0x34] sm:$0xf] %vm172_vm0, %v394_v61  ;;  %v2612_v6 = vrot.slane %v2461_v50, 5  ;;  %v3310_v7 = vshrl.u32 %v2988_v57, 16  ;;  %v933_v13 = vor.u32 %v932_v58, %v929_v53  ;;  %v1584_v20 = vsel %vm6471_vm9, %v5813_v37, %v1583_v52 }
  0x69   : > { %v3313_v5 = vshll.u32 %v2988_v57, 16  ;;  %v1585_v8 = vrot.slane %v1583_v52, 4  ;;  %v1586_v9 = vrot.slane %v1432_v56, 5  ;;  %v6791_v12 = vld [vmem:[#allocation2 + $0x10] sm:$0xf]  ;;  %v946_v14 = vshll.u32 %v835_v59, 16 }
  0x6a   : > { %v676_v10 = vld [vmem:[#allocation2 + $0x38] sm:$0x1]  ;;  %v6796_v16 = vld [vmem:[#allocation2 + $0x28] sm:$0xf]  ;;  %v1924_v18 = vld [vmem:[#allocation2 + $0xc] sm:$0xf]  ;;  %v2613_v25 = vsel %vm6471_vm9, %v2611_v0, %v2612_v6 }
  0x6b   : > { %v677_v17 = vsel %vm6440_vm3, %v395_v62, %v676_v10  ;;  %v938_v21 = vrot.slane %v936_v2, 5  ;;  %v6803_v23 = vld [vmem:[#allocation2 + $0x2c] sm:$0x1]  ;;  %v2989_v24 = vld [vmem:[#allocation2 + $0xb8] sm:$0xf]  ;;  %v3312_v27 = vrot.slane %v3310_v7, 4  ;;  %v1587_v30 = vsel %vm6471_vm9, %v1585_v8, %v1586_v9 }
  0x6c   : > { %3385 = vrot.lane.b32.xlu0 %v3034_v22, %s6402_s23  ;;  %1801 = vrot.lane.b32.xlu1 %v1734_v15, %s6402_s23  ;;  %v6794_v15 = vld [vmem:[#allocation2 + $0x24] sm:$0xe]  ;;  %v942_v22 = vrot.slane %v940_v3, 4  ;;  %678 = vst [vmem:[#allocation2 + $0x38] sm:$0x1] %v677_v17  ;;  %v3315_v29 = vrot.slane %v3313_v5, 5 }
  0x6d   : > { %v1982_v55 = vshll.u32 %v6791_v12, 16  ;;  %v1973_v31 = vshrl.u32 %v1924_v18, 16  ;;  %v1976_v32 = vshll.u32 %v1924_v18, 16  ;;  %v1960_v33 = vld [vmem:[#allocation2 + $0x9c] sm:$0xf]  ;;  %v934_v34 = vrot.slane %v933_v13, 4 }
  0x6e   : > { %v6811_v36 = vrot.slane %v946_v14, 5  ;;  %v2532_v38 = vrot.slane %v6796_v16, 5  ;;  %v2261_v37 = vshrl.u32 %v1960_v33, 16  ;;  %v2783_v40 = vld [vmem:[#allocation2 + $0xb4] sm:$0xf]  ;;  %v943_v41 = vor.u32 %v942_v22, %v938_v21 }
  0x6f   : > { %v5818_v43 = vrot.slane %v6794_v15, 9  ;;  %v6818_v44 = vld [vmem:[#allocation2 + $0x1c] sm:$0xf]  ;;  %v1975_v45 = vrot.slane %v1973_v31, 4  ;;  %v1978_v46 = vrot.slane %v1976_v32, 5  ;;  %v2535_v47 = vrot.slane %v6803_v23, 5 }
  0x70   : > { %1314 = vrot.lane.b32.xlu0 %v1203_v39, %s6403_s30  ;;  %3387 = vrot.lane.b32.xlu1 %v3044_v49, %s6402_s23  ;;  %v6814_v39 = vld [vmem:[#allocation2 + $0x18] sm:$0xe]  ;;  %v3316_v48 = vor.u32 %v3315_v29, %v3312_v27  ;;  %v3319_v49 = vshll.u32 %v2989_v24, 16  ;;  %v3323_v50 = vshrl.u32 %v2989_v24, 16  ;;  %v6821_v51 = vld [vmem:[#allocation2 + $0xa0] sm:$0xf]  ;;  %v939_v58 = vsel %vm6548_vm14, %v934_v34, %v938_v21 }
  0x71   : > { %v6823_v26 = vld [vmem:[#allocation2 + $0xa8] sm:$0xf]  ;;  %v1984_v52 = vrot.slane %v1982_v55, 5  ;;  %v1979_v53 = vor.u32 %v1978_v46, %v1975_v45  ;;  %v2263_v57 = vrot.slane %v2261_v37, 4  ;;  %v2264_v54 = vshll.u32 %v1960_v33, 16 }
  0x72   : > { %v2784_v56 = vld [vmem:[#allocation2 + $0xb8] sm:$0xf]  ;;  %v6830_v59 = vrot.slane %v2532_v38, 4  ;;  %v5802_v60 = vrot.slane %v6814_v39, 9  ;;  %v2270_v61 = vshll.u32 %v6821_v51, 16  ;;  %v944_v62 = vrot.slane %v943_v41, 4 }
  0x73   : > { %v1980_v0 = vrot.slane %v1979_v53, 4  ;;  %v2266_v2 = vrot.slane %v2264_v54, 5  ;;  %v232_v3 = vld [vmem:[#allocation2 + $0xc0] sm:$0x1]  ;;  %v6838_v6 = vrot.slane %v3319_v49, 5  ;;  %v3325_v7 = vrot.slane %v3323_v50, 4 }
  0x74   : > { %2680 = vrot.lane.b32.xlu0 %v2610_v63, %s6403_s30  ;;  %1316 = vrot.lane.b32.xlu1 %v1213_v4, %s6403_s30  ;;  %v1986_v63 = vshrl.u32 %v6791_v12, 16  ;;  %v6836_v4 = vrot.slane %v3316_v48, 4  ;;  %v1506_v5 = vrot.slane %v6818_v44, 5  ;;  %v324_v8 = vld [vmem:[%s6455_s17 + $0x78] sm:$0xf]  ;;  %v1215_v10 = vshrl.u32 %v6823_v26, 16 }
  0x75   : > { %v1757_v9 = vld [vmem:[#allocation2 + $0xa8] sm:$0xf]  ;;  %v1985_v13 = vsel %vm6548_vm14, %v1980_v0, %v1984_v52  ;;  %v2267_v14 = vor.u32 %v2266_v2, %v2263_v57  ;;  %v6845_v17 = vrot.slane %v2270_v61, 5  ;;  %v2990_v12 = vld [vmem:[#allocation2 + $0xbc] sm:$0x1]  ;;  %v233_v18 = vsel %vm6440_vm3, 0, %v232_v3 }
  0x76   : > { %2388 = vst.msk [vmem:[#allocation3 + $0x4] sm:$0xf] %vm172_vm0, %v1985_v13  ;;  %v1926_v21 = vld [vmem:[#allocation2 + $0x14] sm:$0x1]  ;;  %v2274_v24 = vshrl.u32 %v6821_v51, 16  ;;  %v1988_v27 = vrot.slane %v1986_v63, 4  ;;  %v949_v29 = vsel %vm6548_vm14, %v944_v62, %v6811_v36  ;;  %v3326_v32 = vor.u32 %v3325_v7, %v6838_v6 }
  0x77   : > { %v2268_v22 = vrot.slane %v2267_v14, 4  ;;  %234 = vst [vmem:[#allocation2 + $0xc0] sm:$0x1] %v233_v18  ;;  %v763_v31 = vld [vmem:[#allocation2] sm:$0xf]  ;;  %v3329_v33 = vshll.u32 %v2990_v12, 16  ;;  %v2533_v48 = vsel %vm6471_vm9, %v5818_v43, %v2532_v38  ;;  %v3322_v16 = vsel %vm6548_vm14, %v6836_v4, %v6838_v6 }
  0x78   : > { %1654 = vrot.lane.b32.xlu0 %v1584_v20, %s6401_s18  ;;  %2682 = vrot.lane.b32.xlu1 %v2613_v25, %s6403_s30  ;;  %v584_v20 = vshrl.u32 %v324_v8, 16  ;;  %v587_v25 = vshll.u32 %v324_v8, 16  ;;  %v1989_v37 = vor.u32 %v1988_v27, %v1984_v52  ;;  %795 = vst.msk [vmem:[#allocation3] sm:$0xf] %vm172_vm0, %v763_v31  ;;  %v1758_v41 = vld [vmem:[#allocation2 + $0xac] sm:$0xf]  ;;  %v2536_v13 = vsel %vm6471_vm9, %v6830_v59, %v2535_v47 }
  0x79   : > { %v2273_v34 = vsel %vm6548_vm14, %v2268_v22, %v6845_v17  ;;  %v2955_v45 = vld [vmem:[#allocation2 + $0x30] sm:$0xf]  ;;  %v2956_v49 = vld [vmem:[#allocation2 + $0x34] sm:$0xf]  ;;  %v1218_v53 = vshll.u32 %v6823_v26, 16  ;;  %v3327_v15 = vrot.slane %v3326_v32, 4  ;;  %v1507_v18 = vsel %vm6471_vm9, %v5802_v60, %v1506_v5 }
  0x7a   : > { %v586_v55 = vrot.slane %v584_v20, 7  ;;  %2412 = vst.msk [vmem:[#allocation3 + $0x124] sm:$0xf] %vm172_vm0, %v2273_v34  ;;  %v1990_v51 = vrot.slane %v1989_v37, 4  ;;  %v1399_v61 = vld [vmem:[#allocation2 + $0x20] sm:$0x1] }
  0x7b   : > { %v3331_v62 = vrot.slane %v3329_v33, 5  ;;  %v3046_v63 = vshrl.u32 %v2955_v45, 16  ;;  %v3049_v4 = vshll.u32 %v2955_v45, 16  ;;  %v3055_v6 = vshll.u32 %v2956_v49, 16  ;;  %v870_v7 = vld [vmem:[#allocation2 + $0xac] sm:$0xf] }
  0x7c   : > { %2873 = vrot.lane.b32.xlu0 %v2783_v40, %s6401_s18  ;;  %1656 = vrot.lane.b32.xlu1 %v1587_v30, %s6401_s18  ;;  %v1992_v30 = vshll.u32 %v1926_v21, 16  ;;  %v325_v40 = vld [vmem:[%s6455_s17 + $0x7c] sm:$0xf]  ;;  %v589_v50 = vor.u32 %v587_v25, %v586_v55  ;;  %v590_v57 = vrot.slane %v586_v55, 4  ;;  %v3059_v14 = vshrl.u32 %v2956_v49, 16 }
  0x7d   : > { %v592_v46 = vshrl.u32 %v325_v40, 16  ;;  %v595_v52 = vshll.u32 %v325_v40, 16  ;;  %v1509_v20 = vrot.slane %v1399_v61, 5  ;;  %v1508_v23 = vrot.slane %v1506_v5, 4  ;;  %v787_v22 = vld [vmem:[#allocation2 + $0x90] sm:$0xf] }
  0x7e   : > { %v1994_v36 = vrot.slane %v1992_v30, 5  ;;  %v756_v0 = vld [vmem:[#allocation2 + $0xc0] sm:$0xf]  ;;  %v1217_v47 = vrot.slane %v1215_v10, 4  ;;  %v1220_v59 = vrot.slane %v1218_v53, 5  ;;  %v3048_v39 = vrot.slane %v3046_v63, 4 }
  0x7f   : > { %v6872_v54 = vrot.slane %v592_v46, 7  ;;  %v757_v8 = vsel %vm6481_vm10, %v589_v50, %v756_v0  ;;  %v3051_v60 = vrot.slane %v3049_v4, 5  ;;  %v1228_v25 = vshrl.u32 %v870_v7, 16  ;;  %v871_v27 = vld [vmem:[#allocation2 + $0xb0] sm:$0x1] }
  0x80   : > { %1270 = vrot.lane.b32.xlu0 %v939_v58, %s6403_s30  ;;  %2875 = vrot.lane.b32.xlu1 %v2784_v56, %s6401_s18  ;;  %v1962_v56 = vld [vmem:[#allocation2 + $0xa4] sm:$0x1]  ;;  %v2276_v58 = vrot.slane %v2274_v24, 4  ;;  %v1995_v38 = vsel %vm6548_vm14, %v1990_v51, %v1994_v36  ;;  %758 = vst [vmem:[#allocation2 + $0xc0] sm:$0xf] %v757_v8  ;;  %v1224_v24 = vshll.u32 %v870_v7, 16  ;;  %v3332_v44 = vsel %vm6548_vm14, %v3327_v15, %v3331_v62 }
  0x81   : > { %v2280_v43 = vshll.u32 %v1962_v56, 16  ;;  %2389 = vst.msk [vmem:[#allocation3 + $0x10] sm:$0xf] %vm172_vm0, %v1995_v38  ;;  %v597_v2 = vor.u32 %v595_v52, %v6872_v54  ;;  %819 = vst.msk [vmem:[#allocation3 + $0x120] sm:$0xf] %vm172_vm0, %v787_v22  ;;  %v6913_v26 = vrot.slane %v3055_v6, 5  ;;  %v3052_v30 = vor.u32 %v3051_v60, %v3048_v39 }
  0x82   : > { %v2277_v3 = vor.u32 %v2276_v58, %v6845_v17  ;;  %v3061_v5 = vrot.slane %v3059_v14, 4  ;;  %v788_v10 = vld [vmem:[#allocation2 + $0x94] sm:$0xf]  ;;  %v2761_v55 = vld [vmem:[#allocation2 + $0x30] sm:$0xf]  ;;  %v1221_v31 = vor.u32 %v1220_v59, %v1217_v47  ;;  %v1510_v34 = vsel %vm6471_vm9, %v1508_v23, %v1509_v20 }
  0x83   : > { %v598_v17 = vsel %vm6489_vm11, %v590_v57, %v597_v2  ;;  %820 = vst.msk [vmem:[#allocation3 + $0x12c] sm:$0xf] %vm172_vm0, %v788_v10  ;;  %v2462_v32 = vld [vmem:[#allocation2 + $0xb4] sm:$0xe]  ;;  %v2463_v33 = vld [vmem:[#allocation2 + $0xb8] sm:$0xf] }
  0x84   : > { %1847 = vrot.lane.b32.xlu0 %v1757_v9, %s6402_s23  ;;  %1272 = vrot.lane.b32.xlu1 %v949_v29, %s6403_s30  ;;  %v2282_v9 = vrot.slane %v2280_v43, 5  ;;  %v2278_v12 = vrot.slane %v2277_v3, 4  ;;  %759 = vst.msk [vmem:[#allocation2 + $0xc4] sm:$0xf] %vm172_vm0, %v598_v17  ;;  %v2957_v29 = vld [vmem:[#allocation2 + $0x38] sm:$0x1]  ;;  %v3062_v36 = vor.u32 %v3061_v5, %v6913_v26 }
  0x85   : > { %v6920_v37 = vrot.slane %v1224_v24, 5  ;;  %v1230_v40 = vrot.slane %v1228_v25, 4  ;;  %v1735_v45 = vld [vmem:[#allocation2 + $0x24] sm:$0xf]  ;;  %v3065_v46 = vshll.u32 %v2957_v29, 16  ;;  %v5830_v50 = vrot.slane %v2462_v32, 9 }
  0x86   : > { %v2283_v21 = vsel %vm6548_vm14, %v2278_v12, %v2282_v9  ;;  %v2616_v51 = vrot.slane %v2463_v33, 5  ;;  %v288_v52 = vld [vmem:[#allocation2 + $0xc8] sm:$0x1]  ;;  %v3053_v53 = vrot.slane %v3052_v30, 4  ;;  %v6929_v57 = vrot.slane %v1221_v31, 4 }
  0x87   : > { %2413 = vst.msk [vmem:[#allocation3 + $0x130] sm:$0xf] %vm172_vm0, %v2283_v21  ;;  %v6931_v56 = vld [vmem:[#allocation2 + $0xac] sm:$0xf]  ;;  %v289_v58 = vsel %vm6464_vm8, 0, %v288_v52  ;;  %v1231_v15 = vor.u32 %v1230_v40, %v6920_v37  ;;  %v6938_v43 = vrot.slane %v3062_v36, 4 }
  0x88   : > { %2636 = vrot.lane.b32.xlu0 %v2533_v48, %s6403_s30  ;;  %1849 = vrot.lane.b32.xlu1 %v1758_v41, %s6402_s23  ;;  %v1234_v41 = vshll.u32 %v871_v27, 16  ;;  %v6923_v48 = vld [vmem:[#allocation2 + $0xa8] sm:$0xe]  ;;  %290 = vst [vmem:[#allocation2 + $0xc8] sm:$0x1] %v289_v58  ;;  %v6940_v62 = vrot.slane %v3065_v46, 5  ;;  %v6948_v3 = vsel %vm6471_vm9, %v5830_v50, %v2616_v51  ;;  %v3058_v9 = vsel %vm6548_vm14, %v3053_v53, %v6913_v26 }
  0x89   : > { %v765_v38 = vld [vmem:[#allocation2 + $0xc] sm:$0xf]  ;;  %v6942_v63 = vld [vmem:[#allocation2 + $0xbc] sm:$0x1]  ;;  %v1736_v2 = vld [vmem:[#allocation2 + $0x28] sm:$0xf] }
  0x8a   : > { %v6926_v49 = vpop.permute.xlu0 %1602  ;;  %v6936_v61 = vrot.slane %v1234_v41, 5  ;;  %797 = vst.msk [vmem:[#allocation3 + $0x18] sm:$0xf] %vm172_vm0, %v765_v38  ;;  %v199_v0 = vld [vmem:[#allocation2 + $0x3c] sm:$0x1]  ;;  %vm1358_vm15 = vcmask 519424   ;;  %v3068_v60 = vsel %vm6548_vm14, %v6938_v43, %v6940_v62 }
  0x8b   : > { %v6950_v4 = vrot.slane %v2616_v51, 4  ;;  %v5814_v6 = vrot.slane %v6923_v48, 9  ;;  %v200_v7 = vsel %vm6440_vm3, 0, %v199_v0  ;;  %v302_v8 = vld [vmem:[%s6455_s17 + $0x20] sm:$0xf]  ;;  %vm1698_vm1 = vcmask 781824  }
  0x8c   : > { %3433 = vrot.lane.b32.xlu0 %v3322_v16, %s6402_s23  ;;  %2638 = vrot.lane.b32.xlu1 %v2536_v13, %s6403_s30  ;;  %v2762_v16 = vld [vmem:[#allocation2 + $0x34] sm:$0xf]  ;;  %v1227_v13 = vsel %vm6548_vm14, %v6929_v57, %v6920_v37  ;;  %v1590_v14 = vrot.slane %v6931_v56, 5  ;;  %v836_v17 = vld [vmem:[#allocation2 + $0x24] sm:$0xf]  ;;  %v397_v12 = vshrl.u32 %v302_v8, 16 }
  0x8d   : > { %201 = vst [vmem:[#allocation2 + $0x3c] sm:$0x1] %v200_v7  ;;  %v6969_v47 = vrot.slane %v1231_v15, 4  ;;  %vm1891_vm2 = vcmask 1044224   ;;  %v2619_v59 = vrot.slane %v6942_v63, 5  ;;  %v599_v21 = vrot.slane %v6872_v54, 4 }
  0x8e   : > { %v400_v22 = vshll.u32 %v302_v8, 16  ;;  %v303_v39 = vld [vmem:[%s6455_s17 + $0x24] sm:$0xf]  ;;  %v6979_v24 = vld [vmem:[#allocation2 + $0x28] sm:$0xf]  ;;  %v399_v25 = vrot.slane %v397_v12, 7 }
  0x8f   : > { %v405_v27 = vshrl.u32 %v303_v39, 16  ;;  %v1927_v26 = vld [vmem:[#allocation2 + $0x18] sm:$0xf]  ;;  %v951_v5 = vshrl.u32 %v836_v17, 16  ;;  %v954_v10 = vshll.u32 %v836_v17, 16  ;;  %v1237_v51 = vsel %vm6548_vm14, %v6969_v47, %v6936_v61 }
  0x90   : > { %1610 = vrot.lane.b32.xlu0 %v1507_v18, %s6401_s18  ;;  %3435 = vrot.lane.b32.xlu1 %v3332_v44, %s6402_s23  ;;  %v766_v18 = vld [vmem:[#allocation2 + $0x10] sm:$0xf]  ;;  %v408_v44 = vshll.u32 %v303_v39, 16  ;;  %v1928_v54 = vld [vmem:[#allocation2 + $0x1c] sm:$0xf]  ;;  %v1997_v29 = vshrl.u32 %v1927_v26, 16  ;;  %v402_v31 = vor.u32 %v400_v22, %v399_v25  ;;  %v2620_v48 = vsel %vm6471_vm9, %v6950_v4, %v2619_v59 }
  0x91   : > { %798 = vst.msk [vmem:[#allocation3 + $0x24] sm:$0xf] %vm172_vm0, %v766_v18  ;;  %v760_v30 = vld [vmem:[#allocation2 + $0xc8] sm:$0x1]  ;;  %v403_v32 = vrot.slane %v399_v25, 4  ;;  %v6983_v33 = vrot.slane %v405_v27, 7 }
  0x92   : > { %v761_v41 = vsel %vm6440_vm3, %v599_v21, %v760_v30  ;;  %v2010_v46 = vshrl.u32 %v1928_v54, 16  ;;  %v1929_v50 = vld [vmem:[#allocation2 + $0x20] sm:$0x1]  ;;  %v255_v58 = vld [vmem:[#allocation2 + $0x44] sm:$0x1]  ;;  %v953_v0 = vrot.slane %v951_v5, 4  ;;  %v1591_v21 = vsel %vm6471_vm9, %v5814_v6, %v1590_v14 }
  0x93   : > { %762 = vst [vmem:[#allocation2 + $0xc8] sm:$0x1] %v761_v41  ;;  %v410_v52 = vor.u32 %v408_v44, %v6983_v33  ;;  %v2016_v57 = vshll.u32 %v1929_v50, 16  ;;  %v256_v62 = vsel %vm6464_vm8, 0, %v255_v58  ;;  %v956_v61 = vrot.slane %v954_v10, 5 }
  0x94   : > { %2829 = vrot.lane.b32.xlu0 %v2761_v55, %s6401_s18  ;;  %1612 = vrot.lane.b32.xlu1 %v1510_v34, %s6401_s18  ;;  %v2000_v55 = vshll.u32 %v1927_v26, 16  ;;  %v2006_v34 = vshll.u32 %v1928_v54, 16  ;;  %v679_v15 = vld [vmem:[#allocation2 + $0x3c] sm:$0xf]  ;;  %v2012_v43 = vrot.slane %v2010_v46, 4  ;;  %v964_v17 = vshrl.u32 %v6979_v24, 16 }
  0x95   : > { %v6967_v23 = vpop.permute.xlu0 %2821  ;;  %v411_v7 = vsel %vm6489_vm11, %v403_v32, %v410_v52  ;;  %257 = vst [vmem:[#allocation2 + $0x44] sm:$0x1] %v256_v62  ;;  %v2018_v47 = vrot.slane %v2016_v57, 5  ;;  %v412_v25 = vrot.slane %v6983_v33, 4  ;;  %v838_v26 = vld [vmem:[#allocation2 + $0x2c] sm:$0x1] }
  0x96   : > { %v2002_v36 = vrot.slane %v2000_v55, 5  ;;  %v2008_v53 = vrot.slane %v2006_v34, 5  ;;  %682 = vst.msk [vmem:[#allocation2 + $0x40] sm:$0xf] %vm172_vm0, %v411_v7  ;;  %v966_v5 = vrot.slane %v964_v17, 4  ;;  %v970_v30 = vshll.u32 %v838_v26, 16 }
  0x97   : > { %v6965_v20 = vpop.permute.xlu1 %1604  ;;  %v235_v63 = vld [vmem:[#allocation2 + $0xcc] sm:$0x1]  ;;  %v789_v57 = vld [vmem:[#allocation2 + $0x9c] sm:$0xf]  ;;  %v2786_v58 = vld [vmem:[#allocation2 + $0xc4] sm:$0xf] }
  0x98   : > { %1803 = vrot.lane.b32.xlu0 %v1735_v45, %s6402_s23  ;;  %2831 = vrot.lane.b32.xlu1 %v2762_v16, %s6401_s18  ;;  %v1999_v45 = vrot.slane %v1997_v29, 4  ;;  %v960_v16 = vshll.u32 %v6979_v24, 16  ;;  %v2013_v18 = vor.u32 %v2012_v43, %v2008_v53  ;;  %v2991_v24 = vld [vmem:[#allocation2 + $0xc0] sm:$0xf]  ;;  %v972_v52 = vrot.slane %v970_v30, 5 }
  0x99   : > { %v6987_v40 = vpop.permute.xlu0 %1795  ;;  %v3334_v4 = vshrl.u32 %v2991_v24, 16  ;;  %v3337_v59 = vshll.u32 %v2991_v24, 16  ;;  %v2785_v29 = vld [vmem:[#allocation2 + $0xc0] sm:$0xf]  ;;  %821 = vst.msk [vmem:[#allocation3 + $0x138] sm:$0xf] %vm172_vm0, %v789_v57 }
  0x9a   : > { %v2003_v38 = vor.u32 %v2002_v36, %v1999_v45  ;;  %v2014_v39 = vrot.slane %v2013_v18, 4  ;;  %v962_v44 = vrot.slane %v960_v16, 5  ;;  %v2430_v36 = vld [vmem:[#allocation2 + $0x34] sm:$0xf]  ;;  %v1760_v24 = vld [vmem:[#allocation2 + $0xb8] sm:$0xf] }
  0x9b   : > { %v6985_v37 = vpop.permute.xlu1 %2823  ;;  %v3336_v46 = vrot.slane %v3334_v4, 4  ;;  %v3339_v50 = vrot.slane %v3337_v59, 5  ;;  %v1759_v7 = vld [vmem:[#allocation2 + $0xb4] sm:$0xf]  ;;  %v7085_v30 = vld [vmem:[#allocation2 + $0xb8] sm:$0xf] }
  0x9c   : > { %3389 = vrot.lane.b32.xlu0 %v3058_v9, %s6402_s23  ;;  %1805 = vrot.lane.b32.xlu1 %v1736_v2, %s6402_s23  ;;  %v680_v2 = vsel %vm6481_vm10, %v402_v31, %v679_v15  ;;  %v2004_v12 = vrot.slane %v2003_v38, 4  ;;  %v2019_v56 = vsel %vm6548_vm14, %v2014_v39, %v2018_v47  ;;  %v683_v10 = vld [vmem:[#allocation2 + $0x44] sm:$0x1]  ;;  %v967_v34 = vor.u32 %v966_v5, %v962_v44  ;;  %v1400_v47 = vld [vmem:[#allocation2 + $0x24] sm:$0xe] }
  0x9d   : > { %681 = vst [vmem:[#allocation2 + $0x3c] sm:$0xf] %v680_v2  ;;  %2391 = vst.msk [vmem:[#allocation3 + $0x28] sm:$0xf] %vm172_vm0, %v2019_v56  ;;  %v684_v31 = vsel %vm6440_vm3, %v412_v25, %v683_v10  ;;  %v2539_v38 = vrot.slane %v2430_v36, 5  ;;  %vm5363_vm4 = vcmask 1042434  }
  0x9e   : > { %v2009_v22 = vsel %vm6548_vm14, %v2004_v12, %v2008_v53  ;;  %685 = vst [vmem:[#allocation2 + $0x44] sm:$0x1] %v684_v31  ;;  %v2429_v53 = vld [vmem:[#allocation2 + $0x30] sm:$0xe]  ;;  %v1963_v2 = vld [vmem:[#allocation2 + $0xa8] sm:$0xf] }
  0x9f   : > { %2390 = vst.msk [vmem:[#allocation3 + $0x1c] sm:$0xf] %vm172_vm0, %v2009_v22  ;;  %v5819_v62 = vrot.slane %v2429_v53, 9  ;;  %v2541_v12 = vrot.slane %v2539_v38, 4  ;;  %v2993_v22 = vld [vmem:[#allocation2 + $0xc8] sm:$0x1] }
  0xa0   : > { %1318 = vrot.lane.b32.xlu0 %v1227_v13, %s6403_s30  ;;  %3391 = vrot.lane.b32.xlu1 %v3068_v60, %s6402_s23  ;;  %v1798_v8 = vpop.permute.xlu1 %1797  ;;  %v1435_v13 = vld [vmem:[#allocation2 + $0xb0] sm:$0x1]  ;;  %v3353_v10 = vshll.u32 %v2993_v22, 16  ;;  %v291_v53 = vld [vmem:[#allocation2 + $0xd4] sm:$0x1]  ;;  %vm5366_vm5 = vcmask 1043459  }
  0xa1   : > { %v1265_v9 = vpop.permute.xlu0 %1264  ;;  %v1593_v60 = vrot.slane %v1435_v13, 5  ;;  %v2540_v25 = vsel %vm6471_vm9, %v5819_v62, %v2539_v38  ;;  %vm5369_vm6 = vcmask 1044484   ;;  %vm5372_vm7 = vcmask 1045509  }
  0xa2   : > { %1360 = vst.msk [vmem:[#allocation3 + $0xc] sm:$0xf] %vm1358_vm15, %v1265_v9  ;;  %v1964_v9 = vld [vmem:[#allocation2 + $0xac] sm:$0xf] }
  0xa3   : > { %1700 = vst.msk [vmem:[#allocation3 + $0xc] sm:$0xf] %vm1698_vm1, %v6965_v20  ;;  %v957_v20 = vor.u32 %v956_v61, %v953_v0  ;;  %v3340_v0 = vor.u32 %v3339_v50, %v3336_v46  ;;  %v7064_v61 = vld [vmem:[#allocation2 + $0x28] sm:$0xf] }
  0xa4   : > { %2684 = vrot.lane.b32.xlu0 %v6948_v3, %s6403_s30  ;;  %1320 = vrot.lane.b32.xlu1 %v1237_v51, %s6403_s30  ;;  %1893 = vst.msk [vmem:[#allocation3 + $0xc] sm:$0xf] %vm1891_vm2, %v1798_v8  ;;  %v1592_v3 = vrot.slane %v1590_v14, 4  ;;  %v2629_v6 = vpop.permute.xlu1 %2628  ;;  %v2992_v14 = vld [vmem:[#allocation2 + $0xc4] sm:$0xf]  ;;  %v1513_v39 = vrot.slane %v7064_v61, 5 }
  0xa5   : > { %v2677_v27 = vpop.permute.xlu0 %2676  ;;  %2724 = vst.msk [vmem:[#allocation3 + $0x4] sm:$0xf] %vm1358_vm15, %v2629_v6  ;;  %v958_v55 = vrot.slane %v957_v20, 4  ;;  %v3343_v41 = vshll.u32 %v2992_v14, 16  ;;  %v3347_v45 = vshrl.u32 %v2992_v14, 16  ;;  %v2294_v20 = vshll.u32 %v1964_v9, 16 }
  0xa6   : > { %2748 = vst.msk [vmem:[#allocation3 + $0x124] sm:$0xf] %vm1358_vm15, %v2677_v27  ;;  %v1594_v54 = vsel %vm6471_vm9, %v1592_v3, %v1593_v60  ;;  %v2431_v8 = vld [vmem:[#allocation2 + $0x38] sm:$0x1]  ;;  %v2285_v3 = vshrl.u32 %v1963_v2, 16  ;;  %v2288_v60 = vshll.u32 %v1963_v2, 16 }
  0xa7   : > { %2917 = vst.msk [vmem:[#allocation3 + $0x4] sm:$0xf] %vm1698_vm1, %v6967_v23  ;;  %v236_v23 = vsel %vm6440_vm3, 0, %v235_v63  ;;  %v963_v51 = vsel %vm6548_vm14, %v958_v55, %v962_v44  ;;  %v7058_v43 = vrot.slane %v3343_v41, 5  ;;  %v2958_v6 = vld [vmem:[#allocation2 + $0x3c] sm:$0xf] }
  0xa8   : > { %1658 = vrot.lane.b32.xlu0 %v1591_v21, %s6401_s18  ;;  %2686 = vrot.lane.b32.xlu1 %v2620_v48, %s6403_s30  ;;  %v2631_v32 = vpop.permute.xlu1 %2630  ;;  %237 = vst [vmem:[#allocation2 + $0xcc] sm:$0x1] %v236_v23  ;;  %v7071_v21 = vld [vmem:[#allocation2 + $0x2c] sm:$0x1]  ;;  %v3341_v48 = vrot.slane %v3340_v0, 4  ;;  %v2298_v44 = vshrl.u32 %v1964_v9, 16 }
  0xa9   : > { %v1263_v33 = vpop.permute.xlu0 %1262  ;;  %2725 = vst.msk [vmem:[#allocation3 + $0x10] sm:$0xf] %vm1358_vm15, %v2631_v32  ;;  %v7078_v27 = vld [vmem:[#allocation2 + $0xb4] sm:$0xf]  ;;  %v2542_v26 = vrot.slane %v2431_v8, 5  ;;  %v2287_v5 = vrot.slane %v2285_v3, 4 }
  0xaa   : > { %1359 = vst.msk [vmem:[#allocation3] sm:$0xf] %vm1358_vm15, %v1263_v33  ;;  %v2290_v56 = vrot.slane %v2288_v60, 5  ;;  %v2296_v14 = vrot.slane %v2294_v20, 5  ;;  %v1965_v63 = vld [vmem:[#allocation2 + $0xb0] sm:$0x1] }
  0xab   : > { %2918 = vst.msk [vmem:[#allocation3 + $0x10] sm:$0xf] %vm1698_vm1, %v6985_v37  ;;  %1699 = vst.msk [vmem:[#allocation3] sm:$0xf] %vm1698_vm1, %v6926_v49  ;;  %v968_v37 = vrot.slane %v967_v34, 4  ;;  %v3349_v49 = vrot.slane %v3347_v45, 4  ;;  %v3346_v34 = vsel %vm6548_vm14, %v3341_v48, %v7058_v43 }
  0xac   : > { %2877 = vrot.lane.b32.xlu0 %v2785_v29, %s6401_s18  ;;  %1660 = vrot.lane.b32.xlu1 %v1594_v54, %s6401_s18  ;;  %1892 = vst.msk [vmem:[#allocation3] sm:$0xf] %vm1891_vm2, %v6987_v40  ;;  %v2679_v16 = vpop.permute.xlu1 %2678  ;;  %v790_v40 = vld [vmem:[#allocation2 + $0xa0] sm:$0xf]  ;;  %v5803_v54 = vrot.slane %v1400_v47, 9  ;;  %v1516_v29 = vrot.slane %v7071_v21, 5  ;;  %v2291_v31 = vor.u32 %v2290_v56, %v2287_v5 }
  0xad   : > { %v3382_v15 = vpop.permute.xlu0 %3381  ;;  %2749 = vst.msk [vmem:[#allocation3 + $0x130] sm:$0xf] %vm1358_vm15, %v2679_v16  ;;  %v973_v13 = vsel %vm6548_vm14, %v968_v37, %v972_v52  ;;  %v3350_v18 = vor.u32 %v3349_v49, %v7058_v43  ;;  %v1515_v55 = vrot.slane %v1513_v39, 4  ;;  %v2300_v32 = vrot.slane %v2298_v44, 4  ;;  %v2959_v41 = vld [vmem:[#allocation2 + $0x40] sm:$0xf] }
  0xae   : > { %3477 = vst.msk [vmem:[#allocation3 + $0x4] sm:$0xf] %vm1891_vm2, %v3382_v15  ;;  %v2304_v33 = vshll.u32 %v1965_v63, 16  ;;  %v3070_v45 = vshrl.u32 %v2958_v6, 16  ;;  %v1239_v23 = vshrl.u32 %v7078_v27, 16  ;;  %v1242_v36 = vshll.u32 %v7078_v27, 16 }
  0xaf   : > { %822 = vst.msk [vmem:[#allocation3 + $0x144] sm:$0xf] %vm172_vm0, %v790_v40  ;;  %v7081_v59 = vrot.slane %v3350_v18, 4  ;;  %v3073_v46 = vshll.u32 %v2958_v6, 16  ;;  %v2292_v50 = vrot.slane %v2291_v31, 4  ;;  %v3355_v16 = vrot.slane %v3353_v10, 5 }
  0xb0   : > { %1274 = vrot.lane.b32.xlu0 %v963_v51, %s6403_s30  ;;  %2879 = vrot.lane.b32.xlu1 %v2786_v58, %s6401_s18  ;;  %v3384_v17 = vpop.permute.xlu1 %3383  ;;  %v2301_v51 = vor.u32 %v2300_v32, %v2296_v14  ;;  %v2306_v52 = vrot.slane %v2304_v33, 5  ;;  %v2543_v58 = vsel %vm6471_vm9, %v2541_v12, %v2542_v26  ;;  %v3079_v43 = vshll.u32 %v2959_v41, 16  ;;  %v202_v12 = vld [vmem:[#allocation2 + $0x48] sm:$0x1]  ;;  %v768_v60 = vld [vmem:[#allocation2 + $0x1c] sm:$0xf] }
  0xb1   : > { %3478 = vst.msk [vmem:[#allocation3 + $0x10] sm:$0xf] %vm1891_vm2, %v3384_v17  ;;  %v1248_v49 = vshll.u32 %v7085_v30, 16  ;;  %v2297_v40 = vsel %vm6548_vm14, %v2292_v50, %v2296_v14  ;;  %v1514_v0 = vsel %vm6471_vm9, %v5803_v54, %v1513_v39  ;;  %v3083_v61 = vshrl.u32 %v2959_v41, 16  ;;  %v304_v18 = vld [vmem:[%s6455_s17 + $0x28] sm:$0xf] }
  0xb2   : > { %v2302_v62 = vrot.slane %v2301_v51, 4  ;;  %2414 = vst.msk [vmem:[#allocation3 + $0x13c] sm:$0xf] %vm172_vm0, %v2297_v40  ;;  %v292_v2 = vsel %vm6464_vm8, 0, %v291_v53  ;;  %v1517_v8 = vsel %vm6471_vm9, %v1515_v55, %v1516_v29  ;;  %v3072_v9 = vrot.slane %v3070_v45, 4 }
  0xb3   : > { %v6338_v15 = vld [vmem:[#allocation3] ss:$12 sps:$4 sm:$0xff]   ;;  %293 = vst [vmem:[#allocation2 + $0xd4] sm:$0x1] %v292_v2  ;;  %v3356_v21 = vsel %vm6548_vm14, %v7081_v59, %v3355_v16  ;;  %v7117_v22 = vrot.slane %v1239_v23, 4  ;;  %v7119_v39 = vrot.slane %v1242_v36, 5 }
  0xb4   : > { %1851 = vrot.lane.b32.xlu0 %v1759_v7, %s6402_s23  ;;  %1276 = vrot.lane.b32.xlu1 %v973_v13, %s6403_s30  ;;  %v767_v7 = vld [vmem:[#allocation2 + $0x18] sm:$0xf]  ;;  %v3075_v13 = vrot.slane %v3073_v46, 5  ;;  %v2307_v17 = vsel %vm6548_vm14, %v2302_v62, %v2306_v52  ;;  %v1252_v3 = vshrl.u32 %v7085_v30, 16  ;;  %v7126_v48 = vrot.slane %v1248_v49, 5 }
  0xb5   : > { %799 = vst.msk [vmem:[#allocation3 + $0x30] sm:$0xf] %vm172_vm0, %v767_v7  ;;  %2415 = vst.msk [vmem:[#allocation3 + $0x148] sm:$0xf] %vm172_vm0, %v2307_v17  ;;  %v203_v6 = vsel %vm6440_vm3, 0, %v202_v12  ;;  %v414_v27 = vshrl.u32 %v304_v18, 16  ;;  %v1245_v45 = vor.u32 %v7119_v39, %v7117_v22 }
  0xb6   : > { %v1311_v4 = vpop.permute.xlu0 %1310  ;;  %800 = vst.msk [vmem:[#allocation3 + $0x3c] sm:$0xf] %vm172_vm0, %v768_v60  ;;  %v305_v44 = vld [vmem:[%s6455_s17 + $0x2c] sm:$0xf]  ;;  %v7134_v26 = vrot.slane %v3083_v61, 4  ;;  %v417_v5 = vshll.u32 %v304_v18, 16 }
  0xb7   : > { %1383 = vst.msk [vmem:[#allocation3 + $0x120] sm:$0xf] %vm1358_vm15, %v1311_v4  ;;  %204 = vst [vmem:[#allocation2 + $0x48] sm:$0x1] %v203_v6  ;;  %v422_v56 = vshrl.u32 %v305_v44, 16  ;;  %v425_v14 = vshll.u32 %v305_v44, 16  ;;  %v3076_v4 = vor.u32 %v3075_v13, %v3072_v9 }
  0xb8   : > { %2640 = vrot.lane.b32.xlu0 %v2540_v25, %s6403_s30  ;;  %1853 = vrot.lane.b32.xlu1 %v1760_v24, %s6402_s23  ;;  %v6340_v37 = vld [vmem:[#allocation3 + $0x4] ss:$12 sps:$4 sm:$0xff]   ;;  %v7124_v25 = vrot.slane %v3079_v43, 5  ;;  %v1930_v63 = vld [vmem:[#allocation2 + $0x24] sm:$0xf]  ;;  %v416_v59 = vrot.slane %v414_v27, 7 }
  0xb9   : > { %4317 = vmatprep.mubr.bf16.mxu0 %v6340_v37  ;;  %v2763_v24 = vld [vmem:[#allocation2 + $0x3c] sm:$0xf]  ;;  %v1931_v10 = vld [vmem:[#allocation2 + $0x28] sm:$0xf]  ;;  %v2021_v54 = vshrl.u32 %v1930_v63, 16  ;;  %v2024_v29 = vshll.u32 %v1930_v63, 16 }
  0xba   : > { %v1651_v57 = vpop.permute.xlu0 %1650  ;;  %v1313_v38 = vpop.permute.xlu1 %1312  ;;  %4318 = vmatmul.mubr.bf16.vlgmr.msra.gmra.mxu0 %v6338_v15  ;;  %v2960_v30 = vld [vmem:[#allocation2 + $0x44] sm:$0x1]  ;;  %v7137_v31 = vrot.slane %v1252_v3, 4  ;;  %v7139_v32 = vrot.slane %v422_v56, 7  ;;  %v2030_v33 = vshll.u32 %v1931_v10, 16  ;;  %v420_v23 = vrot.slane %v416_v59, 4 }
  0xbb   : > { %1723 = vst.msk [vmem:[#allocation3 + $0x120] sm:$0xf] %vm1698_vm1, %v1651_v57  ;;  %v2023_v36 = vrot.slane %v2021_v54, 4  ;;  %v2026_v46 = vrot.slane %v2024_v29, 5  ;;  %v1932_v50 = vld [vmem:[#allocation2 + $0x2c] sm:$0x1]  ;;  %v419_v52 = vor.u32 %v417_v5, %v416_v59  ;;  %v3086_v15 = vor.u32 %v7134_v26, %v7124_v25 }
  0xbc   : > { %1384 = vst.msk [vmem:[#allocation3 + $0x12c] sm:$0xf] %vm1358_vm15, %v1313_v38  ;;  %3437 = vrot.lane.b32.xlu0 %v3346_v34, %s6402_s23  ;;  %2642 = vrot.lane.b32.xlu1 %v2543_v58, %s6403_s30  ;;  %v2034_v34 = vshrl.u32 %v1931_v10, 16  ;;  %v1737_v51 = vld [vmem:[#allocation2 + $0x30] sm:$0xf]  ;;  %v427_v53 = vor.u32 %v425_v14, %v7139_v32  ;;  %v2032_v57 = vrot.slane %v2030_v33, 5 }
  0xbd   : > { %v3077_v16 = vrot.slane %v3076_v4, 4  ;;  %v874_v37 = vld [vmem:[#allocation2 + $0xbc] sm:$0x1]  ;;  %v2027_v38 = vor.u32 %v2026_v46, %v2023_v36  ;;  %v2040_v43 = vshll.u32 %v1932_v50, 16  ;;  %v258_v49 = vld [vmem:[#allocation2 + $0x50] sm:$0x1] }
  0xbe   : > { %v2870_v47 = vpop.permute.xlu0 %2869  ;;  %v1653_v20 = vpop.permute.xlu1 %1652  ;;  %v2036_v58 = vrot.slane %v2034_v34, 4  ;;  %v2764_v62 = vld [vmem:[#allocation2 + $0x40] sm:$0xf]  ;;  %v428_v61 = vsel %vm6489_vm11, %v420_v23, %v427_v53  ;;  %v259_v7 = vsel %vm6464_vm8, 0, %v258_v49  ;;  %v686_v13 = vld [vmem:[#allocation2 + $0x48] sm:$0xf] }
  0xbf   : > { %2941 = vst.msk [vmem:[#allocation3 + $0x124] sm:$0xf] %vm1698_vm1, %v2870_v47  ;;  %1724 = vst.msk [vmem:[#allocation3 + $0x12c] sm:$0xf] %vm1698_vm1, %v1653_v20  ;;  %v2028_v17 = vrot.slane %v2027_v38, 4  ;;  %v2042_v12 = vrot.slane %v2040_v43, 5  ;;  %v687_v39 = vsel %vm6481_vm10, %v419_v52, %v686_v13  ;;  %v3082_v60 = vsel %vm6548_vm14, %v3077_v16, %v7124_v25 }
  0xc0   : > { %1614 = vrot.lane.b32.xlu0 %v1514_v0, %s6401_s18  ;;  %3439 = vrot.lane.b32.xlu1 %v3356_v21, %s6402_s23  ;;  %v3089_v0 = vshll.u32 %v2960_v30, 16  ;;  %v2037_v2 = vor.u32 %v2036_v58, %v2032_v57  ;;  %689 = vst.msk [vmem:[#allocation2 + $0x4c] sm:$0xf] %vm172_vm0, %v428_v61  ;;  %260 = vst [vmem:[#allocation2 + $0x50] sm:$0x1] %v259_v7  ;;  %v1258_v47 = vshll.u32 %v874_v37, 16 }
  0xc1   : > { %v1738_v18 = vld [vmem:[#allocation2 + $0x34] sm:$0xf]  ;;  %v7160_v21 = vld [vmem:[#allocation2 + $0xc4] sm:$0xf]  ;;  %v839_v22 = vld [vmem:[#allocation2 + $0x30] sm:$0xf]  ;;  %v2033_v44 = vsel %vm6548_vm14, %v2028_v17, %v2032_v57 }
  0xc2   : > { %v1267_v55 = vpop.permute.xlu0 %1266  ;;  %v2872_v41 = vpop.permute.xlu1 %2871  ;;  %v2038_v3 = vrot.slane %v2037_v2, 4  ;;  %v1246_v20 = vrot.slane %v1245_v45, 4  ;;  %v7170_v6 = vld [vmem:[#allocation2 + $0xb4] sm:$0xe]  ;;  %v7172_v27 = vld [vmem:[#allocation2 + $0xb8] sm:$0xf] }
  0xc3   : > { %1361 = vst.msk [vmem:[#allocation3 + $0x18] sm:$0xf] %vm1358_vm15, %v1267_v55  ;;  %688 = vst [vmem:[#allocation2 + $0x48] sm:$0xf] %v687_v39  ;;  %v3087_v5 = vrot.slane %v3086_v15, 4  ;;  %v3091_v56 = vrot.slane %v3089_v0, 5 }
  0xc4   : > { %2942 = vst.msk [vmem:[#allocation3 + $0x130] sm:$0xf] %vm1698_vm1, %v2872_v41  ;;  %2833 = vrot.lane.b32.xlu0 %v2763_v24, %s6401_s18  ;;  %1616 = vrot.lane.b32.xlu1 %v1517_v8, %s6401_s18  ;;  %v7155_v8 = vld [vmem:[#allocation2 + $0xc0] sm:$0xe]  ;;  %v1255_v24 = vor.u32 %v7137_v31, %v7126_v48  ;;  %v840_v14 = vld [vmem:[#allocation2 + $0x34] sm:$0xf]  ;;  %v2043_v25 = vsel %vm6548_vm14, %v2038_v3, %v2042_v12 }
  0xc5   : > { %2392 = vst.msk [vmem:[#allocation3 + $0x34] sm:$0xf] %vm172_vm0, %v2033_v44  ;;  %v205_v63 = vld [vmem:[#allocation2 + $0x54] sm:$0x1]  ;;  %v2623_v59 = vrot.slane %v7160_v21, 5  ;;  %v975_v10 = vshrl.u32 %v839_v22, 16 }
  0xc6   : > { %v1844_v40 = vpop.permute.xlu0 %1843  ;;  %v1269_v9 = vpop.permute.xlu1 %1268  ;;  %v978_v54 = vshll.u32 %v839_v22, 16  ;;  %v429_v29 = vrot.slane %v7139_v32, 4  ;;  %2393 = vst.msk [vmem:[#allocation3 + $0x40] sm:$0xf] %vm172_vm0, %v2043_v25  ;;  %v306_v55 = vld [vmem:[%s6455_s17 + $0x30] sm:$0xf]  ;;  %v1251_v32 = vsel %vm6548_vm14, %v1246_v20, %v7126_v48 }
  0xc7   : > { %1916 = vst.msk [vmem:[#allocation3 + $0x120] sm:$0xf] %vm1891_vm2, %v1844_v40  ;;  %v1260_v30 = vrot.slane %v1258_v47, 5  ;;  %v5831_v31 = vrot.slane %v7155_v8, 9  ;;  %v2467_v33 = vld [vmem:[#allocation2 + $0xc8] sm:$0x1] }
  0xc8   : > { %1362 = vst.msk [vmem:[#allocation3 + $0x24] sm:$0xf] %vm1358_vm15, %v1269_v9  ;;  %1807 = vrot.lane.b32.xlu0 %v1737_v51, %s6402_s23  ;;  %2835 = vrot.lane.b32.xlu1 %v2764_v62, %s6401_s18  ;;  %v5815_v34 = vrot.slane %v7170_v6, 9  ;;  %v206_v41 = vsel %vm6440_vm3, 0, %v205_v63  ;;  %v1256_v45 = vrot.slane %v1255_v24, 4  ;;  %v1597_v23 = vrot.slane %v7172_v27, 5 }
  0xc9   : > { %207 = vst [vmem:[#allocation2 + $0x54] sm:$0x1] %v206_v41  ;;  %v791_v36 = vld [vmem:[#allocation2 + $0xa8] sm:$0xf]  ;;  %v792_v46 = vld [vmem:[#allocation2 + $0xac] sm:$0xf]  ;;  %v3092_v51 = vsel %vm6548_vm14, %v3087_v5, %v3091_v56  ;;  %v2624_v2 = vsel %vm6471_vm9, %v5831_v31, %v2623_v59 }
  0xca   : > { %v2633_v26 = vpop.permute.xlu0 %2632  ;;  %v1846_v4 = vpop.permute.xlu1 %1845  ;;  %v984_v52 = vshll.u32 %v840_v14, 16  ;;  %v988_v53 = vshrl.u32 %v840_v14, 16  ;;  %v690_v57 = vld [vmem:[#allocation2 + $0x50] sm:$0x1]  ;;  %v431_v58 = vshrl.u32 %v306_v55, 16  ;;  %v2625_v16 = vrot.slane %v2623_v59, 4 }
  0xcb   : > { %2726 = vst.msk [vmem:[#allocation3 + $0x1c] sm:$0xf] %vm1358_vm15, %v2633_v26  ;;  %v977_v15 = vrot.slane %v975_v10, 4  ;;  %v980_v37 = vrot.slane %v978_v54, 5  ;;  %v841_v38 = vld [vmem:[#allocation2 + $0x38] sm:$0x1]  ;;  %v691_v43 = vsel %vm6440_vm3, %v429_v29, %v690_v57  ;;  %v1261_v61 = vsel %vm6548_vm14, %v1256_v45, %v1260_v30 }
  0xcc   : > { %1917 = vst.msk [vmem:[#allocation3 + $0x12c] sm:$0xf] %vm1891_vm2, %v1846_v4  ;;  %3393 = vrot.lane.b32.xlu0 %v3082_v60, %s6402_s23  ;;  %1809 = vrot.lane.b32.xlu1 %v1738_v18, %s6402_s23  ;;  %v2626_v49 = vrot.slane %v2467_v33, 5  ;;  %v2994_v40 = vld [vmem:[#allocation2 + $0xcc] sm:$0xf]  ;;  %v434_v62 = vshll.u32 %v306_v55, 16  ;;  %v1598_v21 = vsel %vm6471_vm9, %v5815_v34, %v1597_v23 }
  0xcd   : > { %823 = vst.msk [vmem:[#allocation3 + $0x150] sm:$0xf] %vm172_vm0, %v791_v36  ;;  %824 = vst.msk [vmem:[#allocation3 + $0x15c] sm:$0xf] %vm172_vm0, %v792_v46  ;;  %v307_v0 = vld [vmem:[%s6455_s17 + $0x34] sm:$0xf]  ;;  %v981_v22 = vor.u32 %v980_v37, %v977_v15 }
  0xce   : > { %v3430_v50 = vpop.permute.xlu0 %3429  ;;  %v2635_v48 = vpop.permute.xlu1 %2634  ;;  %692 = vst [vmem:[#allocation2 + $0x50] sm:$0x1] %v691_v43  ;;  %v1599_v7 = vrot.slane %v1597_v23, 4  ;;  %v1438_v8 = vld [vmem:[#allocation2 + $0xbc] sm:$0x1]  ;;  %v7210_v13 = vrot.slane %v984_v52, 5  ;;  %v2627_v24 = vsel %vm6471_vm9, %v2625_v16, %v2626_v49 }
  0xcf   : > { %3501 = vst.msk [vmem:[#allocation3 + $0x124] sm:$0xf] %vm1891_vm2, %v3430_v50  ;;  %v990_v17 = vrot.slane %v988_v53, 4  ;;  %v994_v12 = vshll.u32 %v841_v38, 16  ;;  %v433_v18 = vrot.slane %v431_v58, 7  ;;  %v3358_v3 = vshrl.u32 %v2994_v40, 16 }
  0xd0   : > { %2727 = vst.msk [vmem:[#allocation3 + $0x28] sm:$0xf] %vm1358_vm15, %v2635_v48  ;;  %1322 = vrot.lane.b32.xlu0 %v1251_v32, %s6403_s30  ;;  %3395 = vrot.lane.b32.xlu1 %v3092_v51, %s6402_s23  ;;  %v7215_v39 = vld [vmem:[#allocation2 + $0xd0] sm:$0xf]  ;;  %v439_v60 = vshrl.u32 %v307_v0, 16  ;;  %v3361_v6 = vshll.u32 %v2994_v40, 16 }
  0xd1   : > { %v1966_v20 = vld [vmem:[#allocation2 + $0xb4] sm:$0xf]  ;;  %v436_v27 = vor.u32 %v434_v62, %v433_v18  ;;  %v442_v26 = vshll.u32 %v307_v0, 16  ;;  %v1967_v5 = vld [vmem:[#allocation2 + $0xb8] sm:$0xf]  ;;  %v1600_v56 = vrot.slane %v1438_v8, 5  ;;  %v991_v59 = vor.u32 %v990_v17, %v7210_v13 }
  0xd2   : > { %v1607_v9 = vpop.permute.xlu0 %1606  ;;  %v3432_v47 = vpop.permute.xlu1 %3431  ;;  %v693_v44 = vld [vmem:[#allocation2 + $0x54] sm:$0xf]  ;;  %v437_v14 = vrot.slane %v433_v18, 4  ;;  %v7222_v25 = vrot.slane %v439_v60, 7  ;;  %v2309_v63 = vshrl.u32 %v1966_v20, 16  ;;  %v7225_v10 = vrot.slane %v994_v12, 5 }
  0xd3   : > { %1701 = vst.msk [vmem:[#allocation3 + $0x18] sm:$0xf] %vm1698_vm1, %v1607_v9  ;;  %v694_v54 = vsel %vm6481_vm10, %v436_v27, %v693_v44  ;;  %v2312_v29 = vshll.u32 %v1966_v20, 16  ;;  %v261_v55 = vld [vmem:[#allocation2 + $0x5c] sm:$0x1]  ;;  %v982_v31 = vrot.slane %v981_v22, 4  ;;  %v1601_v48 = vsel %vm6471_vm9, %v1599_v7, %v1600_v56 }
  0xd4   : > { %3502 = vst.msk [vmem:[#allocation3 + $0x130] sm:$0xf] %vm1891_vm2, %v3432_v47  ;;  %2688 = vrot.lane.b32.xlu0 %v2624_v2, %s6403_s30  ;;  %1324 = vrot.lane.b32.xlu1 %v1261_v61, %s6403_s30  ;;  %v7230_v33 = vld [vmem:[#allocation2 + $0x40] sm:$0xf]  ;;  %v3367_v34 = vshll.u32 %v7215_v39, 16  ;;  %v444_v41 = vor.u32 %v442_v26, %v7222_v25  ;;  %v2318_v32 = vshll.u32 %v1967_v5, 16 }
  0xd5   : > { %695 = vst [vmem:[#allocation2 + $0x54] sm:$0xf] %v694_v54  ;;  %v3360_v45 = vrot.slane %v3358_v3, 4  ;;  %v3363_v23 = vrot.slane %v3361_v6, 5  ;;  %v2311_v36 = vrot.slane %v2309_v63, 4  ;;  %v2314_v46 = vrot.slane %v2312_v29, 5 }
  0xd6   : > { %v2826_v4 = vpop.permute.xlu0 %2825  ;;  %v1609_v30 = vpop.permute.xlu1 %1608  ;;  %v2787_v50 = vld [vmem:[#allocation2 + $0xcc] sm:$0xf]  ;;  %v3371_v51 = vshrl.u32 %v7215_v39, 16  ;;  %v445_v52 = vsel %vm6489_vm11, %v437_v14, %v444_v41  ;;  %v2322_v53 = vshrl.u32 %v1967_v5, 16  ;;  %v262_v57 = vsel %vm6464_vm8, 0, %v261_v55 }
  0xd7   : > { %2919 = vst.msk [vmem:[#allocation3 + $0x1c] sm:$0xf] %vm1698_vm1, %v2826_v4  ;;  %1702 = vst.msk [vmem:[#allocation3 + $0x24] sm:$0xf] %vm1698_vm1, %v1609_v30  ;;  %v7244_v16 = vrot.slane %v991_v59, 4  ;;  %v2546_v37 = vrot.slane %v7230_v33, 5  ;;  %v2315_v38 = vor.u32 %v2314_v46, %v2311_v36  ;;  %v987_v61 = vsel %vm6548_vm14, %v982_v31, %v7210_v13 }
  0xd8   : > { %1662 = vrot.lane.b32.xlu0 %v1598_v21, %s6401_s18  ;;  %2690 = vrot.lane.b32.xlu1 %v2627_v24, %s6403_s30  ;;  %v7246_v15 = vld [vmem:[#allocation2 + $0x3c] sm:$0xe]  ;;  %696 = vst.msk [vmem:[#allocation2 + $0x58] sm:$0xf] %vm172_vm0, %v445_v52  ;;  %263 = vst [vmem:[#allocation2 + $0x5c] sm:$0x1] %v262_v57  ;;  %v3364_v17 = vor.u32 %v3363_v23, %v3360_v45 }
  0xd9   : > { %v1968_v43 = vld [vmem:[#allocation2 + $0xbc] sm:$0x1]  ;;  %v6341_v40 = vld [vmem:[#allocation3 + $0x120] ss:$12 sps:$4 sm:$0xff]   ;;  %v2320_v0 = vrot.slane %v2318_v32, 5  ;;  %v7258_v7 = vrot.slane %v3367_v34, 5 }
  0xda   : > { %v1800_v58 = vpop.permute.xlu0 %1799  ;;  %v2828_v49 = vpop.permute.xlu1 %2827  ;;  %v7256_v2 = vld [vmem:[#allocation2 + $0x44] sm:$0x1]  ;;  %v2316_v9 = vrot.slane %v2315_v38, 4  ;;  %v3373_v12 = vrot.slane %v3371_v51, 4  ;;  %v7261_v18 = vld [vmem:[#allocation2 + $0x34] sm:$0xf] }
  0xdb   : > { %1894 = vst.msk [vmem:[#allocation3 + $0x18] sm:$0xf] %vm1891_vm2, %v1800_v58  ;;  %v6343_v62 = vld [vmem:[#allocation3 + $0x124] ss:$12 sps:$4 sm:$0xff]   ;;  %v769_v8 = vld [vmem:[#allocation2 + $0x24] sm:$0xf] }
  0xdc   : > { %2920 = vst.msk [vmem:[#allocation3 + $0x28] sm:$0xf] %vm1698_vm1, %v2828_v49  ;;  %2881 = vrot.lane.b32.xlu0 %v2787_v50, %s6401_s18  ;;  %1664 = vrot.lane.b32.xlu1 %v1601_v48, %s6401_s18  ;;  %v2324_v47 = vrot.slane %v2322_v53, 4  ;;  %v2328_v21 = vshll.u32 %v1968_v43, 16  ;;  %v2788_v13 = vld [vmem:[#allocation2 + $0xd0] sm:$0xf]  ;;  %v2321_v3 = vsel %vm6548_vm14, %v2316_v9, %v2320_v0  ;;  %v3374_v59 = vor.u32 %v3373_v12, %v7258_v7 }
  0xdd   : > { %4413 = vmatprep.mubr.bf16.mxu1 %v6343_v62  ;;  %801 = vst.msk [vmem:[#allocation3 + $0x48] sm:$0xf] %vm172_vm0, %v769_v8  ;;  %v1403_v39 = vld [vmem:[#allocation2 + $0x30] sm:$0xe]  ;;  %v5820_v20 = vrot.slane %v7246_v15, 9  ;;  %v446_v27 = vrot.slane %v7222_v25, 4  ;;  %v997_v25 = vsel %vm6548_vm14, %v7244_v16, %v7225_v10 }
  0xde   : > { %4414 = vmatmul.mubr.bf16.vlgmr.msra.gmra.mxu1 %v6341_v40  ;;  %v3386_v22 = vpop.permute.xlu0 %3385  ;;  %v1802_v60 = vpop.permute.xlu1 %1801  ;;  %v2996_v24 = vld [vmem:[#allocation2 + $0xd4] sm:$0x1]  ;;  %v842_v6 = vld [vmem:[#allocation2 + $0x3c] sm:$0xf]  ;;  %2416 = vst.msk [vmem:[#allocation3 + $0x154] sm:$0xf] %vm172_vm0, %v2321_v3  ;;  %v2325_v44 = vor.u32 %v2324_v47, %v2320_v0 }
  0xdf   : > { %3479 = vst.msk [vmem:[#allocation3 + $0x1c] sm:$0xf] %vm1891_vm2, %v3386_v22  ;;  %1895 = vst.msk [vmem:[#allocation3 + $0x24] sm:$0xf] %vm1891_vm2, %v1802_v60  ;;  %v1761_v26 = vld [vmem:[#allocation2 + $0xc0] sm:$0xf]  ;;  %v2547_v58 = vsel %vm6471_vm9, %v5820_v20, %v2546_v37 }
  0xe0   : > { %1278 = vrot.lane.b32.xlu0 %v987_v61, %s6403_s30  ;;  %v2548_v5 = vrot.slane %v2546_v37, 4  ;;  %v2549_v56 = vrot.slane %v7256_v2, 5  ;;  %v1520_v14 = vrot.slane %v7261_v18, 5  ;;  %v2330_v63 = vrot.slane %v2328_v21, 5  ;;  %2883 = vrot.lane.b32.xlu1 %v2788_v13, %s6401_s18  ;;  %v7284_v29 = vld [vmem:[#allocation2 + $0x38] sm:$0x1] }
  0xe1   : > { %v7281_v4 = vrot.slane %v3364_v17, 4  ;;  %v5804_v54 = vrot.slane %v1403_v39, 9  ;;  %v7286_v55 = vld [vmem:[#allocation2 + $0x40] sm:$0xf]  ;;  %v3377_v31 = vshll.u32 %v2996_v24, 16  ;;  %v999_v34 = vshrl.u32 %v842_v6, 16 }
  0xe2   : > { %v1315_v30 = vpop.permute.xlu0 %1314  ;;  %v1002_v41 = vshll.u32 %v842_v6, 16  ;;  %v697_v32 = vld [vmem:[#allocation2 + $0x5c] sm:$0x1]  ;;  %v2326_v45 = vrot.slane %v2325_v44, 4  ;;  %v3388_v23 = vpop.permute.xlu1 %3387  ;;  %v208_v36 = vld [vmem:[#allocation2 + $0x60] sm:$0x1]  ;;  %v2550_v48 = vsel %vm6471_vm9, %v2548_v5, %v2549_v56 }
  0xe3   : > { %1385 = vst.msk [vmem:[#allocation3 + $0x138] sm:$0xf] %vm1358_vm15, %v1315_v30  ;;  %v698_v10 = vsel %vm6440_vm3, %v446_v27, %v697_v32  ;;  %v308_v46 = vld [vmem:[%s6455_s17 + $0x38] sm:$0xf]  ;;  %v770_v50 = vld [vmem:[#allocation2 + $0x28] sm:$0xf]  ;;  %v3370_v33 = vsel %vm6548_vm14, %v7281_v4, %v7258_v7  ;;  %v7319_v37 = vsel %vm6471_vm9, %v5804_v54, %v1520_v14 }
  0xe4   : > { %3480 = vst.msk [vmem:[#allocation3 + $0x28] sm:$0xf] %vm1891_vm2, %v3388_v23  ;;  %1855 = vrot.lane.b32.xlu0 %v1761_v26, %s6402_s23  ;;  %v1762_v51 = vld [vmem:[#allocation2 + $0xc4] sm:$0xf]  ;;  %v7294_v52 = vrot.slane %v1520_v14, 4  ;;  %v1523_v53 = vrot.slane %v7284_v29, 5  ;;  %v2331_v57 = vsel %vm6548_vm14, %v2326_v45, %v2330_v63  ;;  %1280 = vrot.lane.b32.xlu1 %v997_v25, %s6403_s30 }
  0xe5   : > { %699 = vst [vmem:[#allocation2 + $0x5c] sm:$0x1] %v698_v10  ;;  %802 = vst.msk [vmem:[#allocation3 + $0x54] sm:$0xf] %vm172_vm0, %v770_v50  ;;  %v7307_v16 = vrot.slane %v3374_v59, 4  ;;  %v1008_v43 = vshll.u32 %v7286_v55, 16 }
  0xe6   : > { %v2961_v15 = vld [vmem:[#allocation2 + $0x48] sm:$0xf]  ;;  %v7309_v38 = vld [vmem:[#allocation2 + $0x4c] sm:$0xf]  ;;  %2417 = vst.msk [vmem:[#allocation3 + $0x160] sm:$0xf] %vm172_vm0, %v2331_v57  ;;  %v2681_v49 = vpop.permute.xlu0 %2680  ;;  %v1317_v2 = vpop.permute.xlu1 %1316 }
  0xe7   : > { %v209_v40 = vsel %vm6440_vm3, 0, %v208_v36  ;;  %v448_v62 = vshrl.u32 %v308_v46, 16  ;;  %v309_v0 = vld [vmem:[%s6455_s17 + $0x3c] sm:$0xf]  ;;  %v1933_v61 = vld [vmem:[#allocation2 + $0x30] sm:$0xf] }
  0xe8   : > { %2750 = vst.msk [vmem:[#allocation3 + $0x13c] sm:$0xf] %vm1358_vm15, %v2681_v49  ;;  %v7325_v9 = vrot.slane %v3377_v31, 5  ;;  %v7327_v8 = vrot.slane %v999_v34, 4  ;;  %v7329_v17 = vrot.slane %v1002_v41, 5  ;;  %v1012_v7 = vshrl.u32 %v7286_v55, 16  ;;  %2644 = vrot.lane.b32.xlu0 %v2547_v58, %s6403_s30  ;;  %1857 = vrot.lane.b32.xlu1 %v1762_v51, %s6402_s23 }
  0xe9   : > { %210 = vst [vmem:[#allocation2 + $0x60] sm:$0x1] %v209_v40  ;;  %v1934_v12 = vld [vmem:[#allocation2 + $0x34] sm:$0xf]  ;;  %1386 = vst.msk [vmem:[#allocation3 + $0x144] sm:$0xf] %vm1358_vm15, %v1317_v2 }
  0xea   : > { %v3094_v18 = vshrl.u32 %v2961_v15, 16  ;;  %v3097_v47 = vshll.u32 %v2961_v15, 16  ;;  %v3103_v21 = vshll.u32 %v7309_v38, 16  ;;  %v450_v22 = vrot.slane %v448_v62, 7  ;;  %v1655_v20 = vpop.permute.xlu0 %1654  ;;  %v1935_v26 = vld [vmem:[#allocation2 + $0x38] sm:$0x1]  ;;  %v2683_v5 = vpop.permute.xlu1 %2682 }
  0xeb   : > { %v451_v13 = vshll.u32 %v308_v46, 16  ;;  %v456_v39 = vshrl.u32 %v309_v0, 16  ;;  %v459_v3 = vshll.u32 %v309_v0, 16  ;;  %v2045_v60 = vshrl.u32 %v1933_v61, 16  ;;  %1725 = vst.msk [vmem:[#allocation3 + $0x138] sm:$0xf] %vm1698_vm1, %v1655_v20 }
  0xec   : > { %v3107_v24 = vshrl.u32 %v7309_v38, 16  ;;  %v7337_v6 = vrot.slane %v1008_v43, 5  ;;  %v2048_v27 = vshll.u32 %v1933_v61, 16  ;;  %v2054_v44 = vshll.u32 %v1934_v12, 16  ;;  %v3785_v56 = vld [vmem:[#allocation3 + $0x18] sm:$0xff]  ;;  %v3787_v14 = vld [vmem:[#allocation3 + $0x24] sm:$0xff]  ;;  %3441 = vrot.lane.b32.xlu0 %v3370_v33, %s6402_s23  ;;  %2646 = vrot.lane.b32.xlu1 %v2550_v48, %s6403_s30 }
  0xed   : > { %v6344_v63 = vld [vmem:[#allocation3 + $0x1c] ss:$12 sps:$4 sm:$0xff]   ;;  %v3380_v25 = vsel %vm6548_vm14, %v7307_v16, %v7325_v9  ;;  %v453_v4 = vor.u32 %v451_v13, %v450_v22  ;;  %v454_v59 = vrot.slane %v450_v22, 4  ;;  %v7344_v54 = vrot.slane %v456_v39, 7  ;;  %2751 = vst.msk [vmem:[#allocation3 + $0x148] sm:$0xf] %vm1358_vm15, %v2683_v5 }
  0xee   : > { %v5852_v55 = vcombine.low %v3785_v56, %v3787_v14  ;;  %v7348_v30 = vrot.slane %v1012_v7, 4  ;;  %v2047_v31 = vrot.slane %v2045_v60, 4  ;;  %v2050_v34 = vrot.slane %v2048_v27, 5  ;;  %v264_v41 = vld [vmem:[#allocation2 + $0x68] sm:$0x1]  ;;  %4325 = vmatprep.mubr.bf16.mxu0 %v6344_v63  ;;  %v2874_v50 = vpop.permute.xlu0 %2873  ;;  %v1657_v38 = vpop.permute.xlu1 %1656  ;;  %v6357_v0 = vld [vmem:[%s9078_s1 + $0x80] sm:$0xff]  }
  0xef   : > { %v6356_v32 = vld [vmem:[%s9078_s1 + $0x88] sm:$0xff]   ;;  %v3096_v45 = vrot.slane %v3094_v18, 4  ;;  %v3099_v23 = vrot.slane %v3097_v47, 5  ;;  %v7354_v10 = vrot.slane %v3103_v21, 5  ;;  %v7356_v36 = vld [vmem:[#allocation2 + $0x44] sm:$0x1]  ;;  %v461_v46 = vor.u32 %v459_v3, %v7344_v54 }
  0xf0   : > { %4326 = vmatmul.mubr.bf16.gmra.mxu0 %v5852_v55  ;;  %v700_v51 = vld [vmem:[#allocation2 + $0x60] sm:$0xf]  ;;  %v2051_v57 = vor.u32 %v2050_v34, %v2047_v31  ;;  %v2056_v58 = vrot.slane %v2054_v44, 5  ;;  %v2058_v16 = vshrl.u32 %v1934_v12, 16  ;;  %v2064_v15 = vshll.u32 %v1935_v26, 16  ;;  %6257 = vmatprep.subr.bf16.mxu1 %v6356_v32 }
  0xf1   : > { %2943 = vst.msk [vmem:[#allocation3 + $0x13c] sm:$0xf] %vm1698_vm1, %v2874_v50  ;;  %v3109_v48 = vrot.slane %v3107_v24, 4  ;;  %v701_v43 = vsel %vm6481_vm10, %v453_v4, %v700_v51  ;;  %v462_v49 = vsel %vm6489_vm11, %v454_v59, %v461_v46  ;;  %v265_v33 = vsel %vm6464_vm8, 0, %v264_v41  ;;  %6258 = vmatpush3.bf16.msra.mxu1 %v6356_v32  ;;  %1726 = vst.msk [vmem:[#allocation3 + $0x144] sm:$0xf] %vm1698_vm1, %v1657_v38 }
  0xf2   : > { %1618 = vrot.lane.b32.xlu0 %v7319_v37, %s6401_s18  ;;  %702 = vst [vmem:[#allocation2 + $0x60] sm:$0xf] %v701_v43  ;;  %703 = vst.msk [vmem:[#allocation2 + $0x64] sm:$0xf] %vm172_vm0, %v462_v49  ;;  %v2052_v40 = vrot.slane %v2051_v57, 4  ;;  %v2060_v62 = vrot.slane %v2058_v16, 4  ;;  %3443 = vrot.lane.b32.xlu1 %v3380_v25, %s6402_s23  ;;  %v1524_v61 = vsel %vm6471_vm9, %v7294_v52, %v1523_v53  ;;  %v1271_v18 = vpop.permute.xlu0 %1270  ;;  %v2876_v53 = vpop.permute.xlu1 %2875 }
  0xf3   : > { %266 = vst [vmem:[#allocation2 + $0x68] sm:$0x1] %v265_v33  ;;  %v2765_v2 = vld [vmem:[#allocation2 + $0x48] sm:$0xf]  ;;  %v3100_v37 = vor.u32 %v3099_v23, %v3096_v45  ;;  %v2963_v9 = vld [vmem:[#allocation2 + $0x50] sm:$0x1]  ;;  %v1005_v7 = vor.u32 %v7329_v17, %v7327_v8  ;;  %v1015_v47 = vor.u32 %v7348_v30, %v7337_v6  ;;  %6259 = vmatprep.subr.bf16.mxu1 %v6357_v0 }
  0xf4   : > { %v1018_v12 = vshll.u32 %v7356_v36, 16  ;;  %v7384_v21 = vld [vmem:[#allocation2 + $0x4c] sm:$0xf]  ;;  %v2057_v29 = vsel %vm6548_vm14, %v2052_v40, %v2056_v58  ;;  %v2061_v22 = vor.u32 %v2060_v62, %v2056_v58  ;;  %v2066_v13 = vrot.slane %v2064_v15, 5  ;;  %1363 = vst.msk [vmem:[#allocation3 + $0x30] sm:$0xf] %vm1358_vm15, %v1271_v18 }
  0xf5   : > { %v211_v52 = vld [vmem:[#allocation2 + $0x6c] sm:$0x1]  ;;  %v1739_v39 = vld [vmem:[#allocation2 + $0x3c] sm:$0xf]  ;;  %v3110_v8 = vor.u32 %v3109_v48, %v7354_v10  ;;  %v7390_v17 = vld [vmem:[#allocation2 + $0x48] sm:$0xe]  ;;  %6260 = vmatpush3.bf16.msra.mxu1 %v6357_v0 }
  0xf6   : > { %v7392_v3 = vld [vmem:[#allocation2 + $0x3c] sm:$0xe]  ;;  %2394 = vst.msk [vmem:[#allocation3 + $0x4c] sm:$0xf] %vm172_vm0, %v2057_v29  ;;  %v793_v60 = vld [vmem:[#allocation2 + $0xb4] sm:$0xf]  ;;  %2837 = vrot.lane.b32.xlu0 %v2765_v2, %s6401_s18  ;;  %1620 = vrot.lane.b32.xlu1 %v1524_v61, %s6401_s18  ;;  %v1848_v4 = vpop.permute.xlu0 %1847  ;;  %v1273_v41 = vpop.permute.xlu1 %1272 }
  0xf7   : > { %2944 = vst.msk [vmem:[#allocation3 + $0x148] sm:$0xf] %vm1698_vm1, %v2876_v53  ;;  %v3113_v20 = vshll.u32 %v2963_v9, 16  ;;  %v7397_v24 = vld [vmem:[#allocation2 + $0x40] sm:$0xf]  ;;  %v2062_v44 = vrot.slane %v2061_v22, 4 }
  0xf8   : > { %v7399_v27 = vld [vmem:[#allocation2 + $0x48] sm:$0xf]  ;;  %825 = vst.msk [vmem:[#allocation3 + $0x168] sm:$0xf] %vm172_vm0, %v793_v60  ;;  %v794_v26 = vld [vmem:[#allocation2 + $0xb8] sm:$0xf] }
  0xf9   : > { %v3101_v5 = vrot.slane %v3100_v37, 4  ;;  %v2553_v56 = vrot.slane %v7384_v21, 5  ;;  %v463_v14 = vrot.slane %v7344_v54, 4  ;;  %v212_v63 = vsel %vm6440_vm3, 0, %v211_v52  ;;  %v310_v25 = vld [vmem:[%s6455_s17 + $0x40] sm:$0xf] }
  0xfa   : > { %826 = vst.msk [vmem:[#allocation3 + $0x174] sm:$0xf] %vm172_vm0, %v794_v26  ;;  %v2766_v59 = vld [vmem:[#allocation2 + $0x4c] sm:$0xf]  ;;  %v7409_v55 = vrot.slane %v1005_v7, 4  ;;  %v7411_v30 = vrot.slane %v1015_v47, 4  ;;  %v2067_v34 = vsel %vm6548_vm14, %v2062_v44, %v2066_v13  ;;  %1811 = vrot.lane.b32.xlu0 %v1739_v39, %s6402_s23  ;;  %v2637_v49 = vpop.permute.xlu0 %2636  ;;  %v1850_v2 = vpop.permute.xlu1 %1849 }
  0xfb   : > { %v7413_v31 = vrot.slane %v1018_v12, 5  ;;  %213 = vst [vmem:[#allocation2 + $0x6c] sm:$0x1] %v212_v63  ;;  %1918 = vst.msk [vmem:[#allocation3 + $0x138] sm:$0xf] %vm1891_vm2, %v1848_v4  ;;  %v7418_v54 = vrot.slane %v3110_v8, 4  ;;  %2839 = vrot.lane.b32.xlu1 %v2766_v59, %s6401_s18  ;;  %v3106_v16 = vsel %vm6548_vm14, %v3101_v5, %v7354_v10 }
  0xfc   : > { %v5821_v32 = vrot.slane %v7390_v17, 9  ;;  %v7421_v45 = vld [vmem:[#allocation2 + $0x50] sm:$0x1]  ;;  %v5805_v23 = vrot.slane %v7392_v3, 9  ;;  %v1023_v36 = vshrl.u32 %v7399_v27, 16  ;;  %v3115_v46 = vrot.slane %v3113_v20, 5 }
  0xfd   : > { %2395 = vst.msk [vmem:[#allocation3 + $0x58] sm:$0xf] %vm172_vm0, %v2067_v34  ;;  %v7428_v50 = vld [vmem:[#allocation2 + $0x4c] sm:$0xf]  ;;  %v704_v51 = vld [vmem:[#allocation2 + $0x68] sm:$0x1]  ;;  %v1011_v33 = vsel %vm6548_vm14, %v7409_v55, %v7337_v6  ;;  %v1021_v40 = vsel %vm6548_vm14, %v7411_v30, %v7413_v31 }
  0xfe   : > { %1364 = vst.msk [vmem:[#allocation3 + $0x3c] sm:$0xf] %vm1358_vm15, %v1273_v41  ;;  %v465_v57 = vshrl.u32 %v310_v25, 16  ;;  %v1740_v58 = vld [vmem:[#allocation2 + $0x40] sm:$0xf]  ;;  %v7434_v15 = vrot.slane %v2553_v56, 4  ;;  %v705_v48 = vsel %vm6440_vm3, %v463_v14, %v704_v51  ;;  %3397 = vrot.lane.b32.xlu0 %v3106_v16, %s6402_s23  ;;  %v3116_v18 = vsel %vm6548_vm14, %v7418_v54, %v3115_v46  ;;  %v3434_v60 = vpop.permute.xlu0 %3433  ;;  %v2639_v5 = vpop.permute.xlu1 %2638 }
  0xff   : > { %v1527_v38 = vrot.slane %v7397_v24, 5  ;;  %v311_v43 = vld [vmem:[%s6455_s17 + $0x44] sm:$0xf]  ;;  %v2556_v10 = vrot.slane %v7421_v45, 5  ;;  %v2964_v62 = vld [vmem:[#allocation2 + $0x54] sm:$0xf]  ;;  %v2554_v47 = vsel %vm6471_vm9, %v5821_v32, %v2553_v56  ;;  %1813 = vrot.lane.b32.xlu1 %v1740_v58, %s6402_s23 }
 0x100   : > { %v2965_v0 = vld [vmem:[#allocation2 + $0x58] sm:$0xf]  ;;  %706 = vst [vmem:[#allocation2 + $0x68] sm:$0x1] %v705_v48  ;;  %v468_v61 = vshll.u32 %v310_v25, 16  ;;  %v7450_v37 = vrot.slane %v1023_v36, 4 }
 0x101   : > { %2728 = vst.msk [vmem:[#allocation3 + $0x34] sm:$0xf] %vm1358_vm15, %v2637_v49  ;;  %v1026_v9 = vshll.u32 %v7399_v27, 16  ;;  %v1032_v6 = vshll.u32 %v7428_v50, 16  ;;  %v1036_v7 = vshrl.u32 %v7428_v50, 16  ;;  %v467_v21 = vrot.slane %v465_v57, 7 }
 0x102   : > { %v7455_v12 = vld [vmem:[#allocation2 + $0x50] sm:$0x1]  ;;  %1919 = vst.msk [vmem:[#allocation3 + $0x144] sm:$0xf] %vm1891_vm2, %v1850_v2  ;;  %v473_v29 = vshrl.u32 %v311_v43, 16  ;;  %v3118_v52 = vshrl.u32 %v2964_v62, 16  ;;  %1282 = vrot.lane.b32.xlu0 %v1011_v33, %s6403_s30  ;;  %v1611_v57 = vpop.permute.xlu0 %1610  ;;  %v3436_v49 = vpop.permute.xlu1 %3435  ;;  %v2557_v30 = vsel %vm6471_vm9, %v7434_v15, %v2556_v10 }
 0x103   : > { %v1969_v22 = vld [vmem:[#allocation2 + $0xc0] sm:$0xf]  ;;  %v1970_v13 = vld [vmem:[#allocation2 + $0xc4] sm:$0xf]  ;;  %v3121_v53 = vshll.u32 %v2964_v62, 16  ;;  %v3127_v39 = vshll.u32 %v2965_v0, 16  ;;  %v470_v27 = vor.u32 %v468_v61, %v467_v21  ;;  %3399 = vrot.lane.b32.xlu1 %v3116_v18, %s6402_s23 }
 0x104   : > { %v707_v8 = vld [vmem:[#allocation2 + $0x6c] sm:$0xf]  ;;  %v476_v17 = vshll.u32 %v311_v43, 16  ;;  %v3131_v20 = vshrl.u32 %v2965_v0, 16  ;;  %v471_v44 = vrot.slane %v467_v21, 4  ;;  %v7465_v26 = vrot.slane %v473_v29, 7 }
 0x105   : > { %3503 = vst.msk [vmem:[#allocation3 + $0x13c] sm:$0xf] %vm1891_vm2, %v3434_v60  ;;  %v7468_v56 = vrot.slane %v1026_v9, 5  ;;  %v2333_v14 = vshrl.u32 %v1969_v22, 16  ;;  %v2336_v63 = vshll.u32 %v1969_v22, 16  ;;  %v2342_v25 = vshll.u32 %v1970_v13, 16 }
 0x106   : > { %2729 = vst.msk [vmem:[#allocation3 + $0x40] sm:$0xf] %vm1358_vm15, %v2639_v5  ;;  %v7472_v4 = vrot.slane %v1032_v6, 5  ;;  %v1042_v59 = vshll.u32 %v7455_v12, 16  ;;  %v708_v55 = vsel %vm6481_vm10, %v470_v27, %v707_v8  ;;  %v478_v34 = vor.u32 %v476_v17, %v7465_v26  ;;  %v267_v41 = vld [vmem:[#allocation2 + $0x74] sm:$0x1]  ;;  %2648 = vrot.lane.b32.xlu0 %v2554_v47, %s6403_s30 }
 0x107   : > { %v771_v54 = vld [vmem:[#allocation2 + $0x30] sm:$0xf]  ;;  %v7479_v32 = vld [vmem:[#allocation2 + $0x44] sm:$0x1]  ;;  %v3120_v36 = vrot.slane %v3118_v52, 4  ;;  %v3123_v46 = vrot.slane %v3121_v53, 5  ;;  %v1029_v12 = vor.u32 %v7468_v56, %v7450_v37  ;;  %1284 = vrot.lane.b32.xlu1 %v1021_v40, %s6403_s30  ;;  %v1528_v47 = vsel %vm6471_vm9, %v5805_v23, %v1527_v38  ;;  %v2830_v52 = vpop.permute.xlu0 %2829 }
 0x108   : > { %709 = vst [vmem:[#allocation2 + $0x6c] sm:$0xf] %v708_v55  ;;  %v2335_v50 = vrot.slane %v2333_v14, 4  ;;  %v2338_v51 = vrot.slane %v2336_v63, 5  ;;  %803 = vst.msk [vmem:[#allocation3 + $0x60] sm:$0xf] %vm172_vm0, %v771_v54  ;;  %v479_v43 = vsel %vm6489_vm11, %v471_v44, %v478_v34 }
 0x109   : > { %v7482_v58 = vrot.slane %v3127_v39, 5  ;;  %v7484_v16 = vrot.slane %v3131_v20, 4  ;;  %v1038_v48 = vrot.slane %v1036_v7, 4  ;;  %1703 = vst.msk [vmem:[#allocation3 + $0x30] sm:$0xf] %vm1698_vm1, %v1611_v57  ;;  %v2344_v62 = vrot.slane %v2342_v25, 5 }
 0x10a   : > { %710 = vst.msk [vmem:[#allocation2 + $0x70] sm:$0xf] %vm172_vm0, %v479_v43  ;;  %v2339_v33 = vor.u32 %v2338_v51, %v2335_v50  ;;  %v2346_v0 = vshrl.u32 %v1970_v13, 16  ;;  %v268_v61 = vsel %vm6464_vm8, 0, %v267_v41  ;;  %v1971_v2 = vld [vmem:[#allocation2 + $0xc8] sm:$0x1]  ;;  %v3124_v21 = vor.u32 %v3123_v46, %v3120_v36  ;;  %1622 = vrot.lane.b32.xlu0 %v1528_v47, %s6401_s18 }
 0x10b   : > { %3504 = vst.msk [vmem:[#allocation3 + $0x148] sm:$0xf] %vm1891_vm2, %v3436_v49  ;;  %v1529_v9 = vrot.slane %v1527_v38, 4  ;;  %v1530_v6 = vrot.slane %v7479_v32, 5  ;;  %v2966_v7 = vld [vmem:[#allocation2 + $0x5c] sm:$0x1]  ;;  %v1039_v24 = vor.u32 %v1038_v48, %v7472_v4  ;;  %v1613_v38 = vpop.permute.xlu1 %1612  ;;  %v3134_v40 = vor.u32 %v7484_v16, %v7482_v58  ;;  %2650 = vrot.lane.b32.xlu1 %v2557_v30, %s6403_s30  ;;  %v1804_v63 = vpop.permute.xlu0 %1803 }
 0x10c   : > { %v7499_v18 = vld [vmem:[#allocation2 + $0x48] sm:$0xe]  ;;  %269 = vst [vmem:[#allocation2 + $0x74] sm:$0x1] %v268_v61  ;;  %v7513_v29 = vld [vmem:[#allocation2 + $0x54] sm:$0xe] }
 0x10d   : > { %v2340_v37 = vrot.slane %v2339_v33, 4  ;;  %v2348_v22 = vrot.slane %v2346_v0, 4  ;;  %v772_v13 = vld [vmem:[#allocation2 + $0x34] sm:$0xf]  ;;  %v7521_v31 = vrot.slane %v1042_v59, 5  ;;  %v2352_v23 = vshll.u32 %v1971_v2, 16 }
 0x10e   : > { %v7523_v3 = vld [vmem:[#allocation2 + $0x58] sm:$0xf]  ;;  %804 = vst.msk [vmem:[#allocation3 + $0x6c] sm:$0xf] %vm172_vm0, %v772_v13  ;;  %v3137_v45 = vshll.u32 %v2966_v7, 16  ;;  %v7535_v39 = vrot.slane %v1029_v12, 4  ;;  %v1531_v25 = vsel %vm6471_vm9, %v1529_v9, %v1530_v6 }
 0x10f   : > { %2921 = vst.msk [vmem:[#allocation3 + $0x34] sm:$0xf] %vm1698_vm1, %v2830_v52  ;;  %v7529_v53 = vld [vmem:[#allocation2 + $0x4c] sm:$0xf]  ;;  %v2345_v15 = vsel %vm6548_vm14, %v2340_v37, %v2344_v62  ;;  %v2349_v10 = vor.u32 %v2348_v22, %v2344_v62  ;;  %1704 = vst.msk [vmem:[#allocation3 + $0x3c] sm:$0xf] %vm1698_vm1, %v1613_v38  ;;  %v2832_v54 = vpop.permute.xlu1 %2831  ;;  %1624 = vrot.lane.b32.xlu1 %v1531_v25, %s6401_s18  ;;  %v3390_v6 = vpop.permute.xlu0 %3389 }
 0x110   : > { %v5822_v8 = vrot.slane %v7513_v29, 9  ;;  %v5806_v17 = vrot.slane %v7499_v18, 9  ;;  %v7539_v60 = vld [vmem:[#allocation2 + $0x50] sm:$0x1]  ;;  %2418 = vst.msk [vmem:[#allocation3 + $0x16c] sm:$0xf] %vm172_vm0, %v2345_v15  ;;  %v1035_v12 = vsel %vm6548_vm14, %v7535_v39, %v7472_v4 }
 0x111   : > { %v2354_v20 = vrot.slane %v2352_v23, 5  ;;  %v2767_v27 = vld [vmem:[#allocation2 + $0x54] sm:$0xf]  ;;  %v7543_v44 = vrot.slane %v3124_v21, 4  ;;  %v2560_v5 = vrot.slane %v7523_v3, 5  ;;  %v480_v56 = vrot.slane %v7465_v26, 4 }
 0x112   : > { %v2350_v14 = vrot.slane %v2349_v10, 4  ;;  %v7549_v59 = vrot.slane %v1039_v24, 4  ;;  %v7551_v55 = vld [vmem:[#allocation2 + $0x5c] sm:$0x1]  ;;  %v1534_v34 = vrot.slane %v7529_v53, 5  ;;  %v3833_v32 = vld [vmem:[#allocation3 + $0x138] sm:$0xff]  ;;  %2841 = vrot.lane.b32.xlu0 %v2767_v27, %s6401_s18 }
 0x113   : > { %v7554_v41 = vld [vmem:[#allocation2 + $0x54] sm:$0xf]  ;;  %1896 = vst.msk [vmem:[#allocation3 + $0x30] sm:$0xf] %vm1891_vm2, %v1804_v63  ;;  %v3835_v36 = vld [vmem:[#allocation3 + $0x144] sm:$0xff]  ;;  %v7557_v50 = vrot.slane %v3134_v40, 4  ;;  %v3130_v7 = vsel %vm6548_vm14, %v7543_v44, %v7482_v58  ;;  %v1806_v22 = vpop.permute.xlu1 %1805  ;;  %v7594_v13 = vsel %vm6471_vm9, %v5822_v8, %v2560_v5 }
 0x114   : > { %v6346_v26 = vld [vmem:[#allocation3 + $0x13c] ss:$12 sps:$4 sm:$0xff]   ;;  %v1741_v46 = vld [vmem:[#allocation2 + $0x48] sm:$0xf]  ;;  %v7559_v51 = vrot.slane %v3137_v45, 5  ;;  %v2355_v57 = vsel %vm6548_vm14, %v2350_v14, %v2354_v20  ;;  %v5888_v16 = vcombine.low %v3833_v32, %v3835_v36  ;;  %v7568_v62 = vrot.slane %v2560_v5, 4  ;;  %v1319_v5 = vpop.permute.xlu0 %1318 }
 0x115   : > { %2922 = vst.msk [vmem:[#allocation3 + $0x40] sm:$0xf] %vm1698_vm1, %v2832_v54  ;;  %v2768_v48 = vld [vmem:[#allocation2 + $0x58] sm:$0xf]  ;;  %v711_v43 = vld [vmem:[#allocation2 + $0x74] sm:$0x1]  ;;  %4421 = vmatprep.mubr.bf16.mxu1 %v6346_v26 }
 0x116   : > { %2419 = vst.msk [vmem:[#allocation3 + $0x178] sm:$0xf] %vm172_vm0, %v2355_v57  ;;  %v214_v49 = vld [vmem:[#allocation2 + $0x78] sm:$0x1]  ;;  %v312_v33 = vld [vmem:[%s6455_s17 + $0x48] sm:$0xf]  ;;  %v712_v9 = vsel %vm6440_vm3, %v480_v56, %v711_v43  ;;  %4422 = vmatmul.mubr.bf16.gmra.mxu1 %v5888_v16  ;;  %v3140_v58 = vsel %vm6548_vm14, %v7557_v50, %v7559_v51  ;;  %1815 = vrot.lane.b32.xlu0 %v1741_v46, %s6402_s23 }
 0x117   : > { %v1537_v0 = vrot.slane %v7539_v60, 5  ;;  %v849_v61 = vld [vmem:[#allocation2 + $0x58] sm:$0xf]  ;;  %v7571_v2 = vld [vmem:[#allocation2 + $0x5c] sm:$0x1]  ;;  %v2563_v47 = vrot.slane %v7551_v55, 5  ;;  %2843 = vrot.lane.b32.xlu1 %v2768_v48, %s6401_s18  ;;  %v1045_v50 = vsel %vm6548_vm14, %v7549_v59, %v7521_v31  ;;  %v1535_v51 = vsel %vm6471_vm9, %v5806_v17, %v1534_v34 }
 0x118   : > { %v2967_v21 = vld [vmem:[#allocation2 + $0x60] sm:$0xf]  ;;  %v7584_v29 = vld [vmem:[#allocation2 + $0x64] sm:$0xf]  ;;  %v1047_v37 = vshrl.u32 %v7554_v41, 16  ;;  %v215_v52 = vsel %vm6440_vm3, 0, %v214_v49 }
 0x119   : > { %713 = vst [vmem:[#allocation2 + $0x74] sm:$0x1] %v712_v9  ;;  %3481 = vst.msk [vmem:[#allocation3 + $0x34] sm:$0xf] %vm1891_vm2, %v3390_v6  ;;  %v482_v30 = vshrl.u32 %v312_v33, 16  ;;  %v1050_v38 = vshll.u32 %v7554_v41, 16  ;;  %v3392_v41 = vpop.permute.xlu1 %3391  ;;  %v2685_v6 = vpop.permute.xlu0 %2684  ;;  %v2564_v18 = vsel %vm6471_vm9, %v7568_v62, %v2563_v47 }
 0x11a   : > { %v313_v24 = vld [vmem:[%s6455_s17 + $0x4c] sm:$0xf]  ;;  %v1936_v3 = vld [vmem:[#allocation2 + $0x3c] sm:$0xf]  ;;  %1897 = vst.msk [vmem:[#allocation3 + $0x3c] sm:$0xf] %vm1891_vm2, %v1806_v22  ;;  %3401 = vrot.lane.b32.xlu0 %v3130_v7, %s6402_s23 }
 0x11b   : > { %v1742_v23 = vld [vmem:[#allocation2 + $0x4c] sm:$0xf]  ;;  %v1056_v40 = vshll.u32 %v849_v61, 16  ;;  %v1060_v45 = vshrl.u32 %v849_v61, 16  ;;  %v1066_v15 = vshll.u32 %v7571_v2, 16  ;;  %v3142_v10 = vshrl.u32 %v2967_v21, 16 }
 0x11c   : > { %216 = vst [vmem:[#allocation2 + $0x78] sm:$0x1] %v215_v52  ;;  %v3145_v8 = vshll.u32 %v2967_v21, 16  ;;  %v484_v20 = vrot.slane %v482_v30, 7  ;;  %v485_v27 = vshll.u32 %v312_v33, 16  ;;  %v3151_v56 = vshll.u32 %v7584_v29, 16  ;;  %1817 = vrot.lane.b32.xlu1 %v1742_v23, %s6402_s23 }
 0x11d   : > { %v1937_v44 = vld [vmem:[#allocation2 + $0x40] sm:$0xf]  ;;  %v490_v14 = vshrl.u32 %v313_v24, 16  ;;  %v493_v63 = vshll.u32 %v313_v24, 16  ;;  %v2069_v25 = vshrl.u32 %v1936_v3, 16  ;;  %v3155_v32 = vshrl.u32 %v7584_v29, 16  ;;  %v1321_v30 = vpop.permute.xlu1 %1320 }
 0x11e   : > { %v1938_v54 = vld [vmem:[#allocation2 + $0x44] sm:$0x1]  ;;  %1387 = vst.msk [vmem:[#allocation3 + $0x150] sm:$0xf] %vm1358_vm15, %v1319_v5  ;;  %v487_v36 = vor.u32 %v485_v27, %v484_v20  ;;  %v488_v26 = vrot.slane %v484_v20, 4  ;;  %v2072_v46 = vshll.u32 %v1936_v3, 16  ;;  %1286 = vrot.lane.b32.xlu0 %v1035_v12, %s6403_s30  ;;  %v1659_v5 = vpop.permute.xlu0 %1658 }
 0x11f   : > { %3482 = vst.msk [vmem:[#allocation3 + $0x40] sm:$0xf] %vm1891_vm2, %v3392_v41  ;;  %v7609_v57 = vrot.slane %v490_v14, 7  ;;  %v2071_v16 = vrot.slane %v2069_v25, 4  ;;  %v2078_v48 = vshll.u32 %v1937_v44, 16  ;;  %v2082_v43 = vshrl.u32 %v1937_v44, 16 }
 0x120   : > { %v7612_v49 = vrot.slane %v1047_v37, 4  ;;  %v7614_v33 = vrot.slane %v1050_v38, 5  ;;  %v2074_v61 = vrot.slane %v2072_v46, 5  ;;  %v2088_v9 = vshll.u32 %v1938_v54, 16  ;;  %v270_v52 = vld [vmem:[#allocation2 + $0x80] sm:$0x1]  ;;  %3403 = vrot.lane.b32.xlu1 %v3140_v58, %s6402_s23 }
 0x121   : > { %v7616_v21 = vrot.slane %v3142_v10, 4  ;;  %v7618_v29 = vrot.slane %v1056_v40, 5  ;;  %v7620_v22 = vrot.slane %v1060_v45, 4  ;;  %v495_v7 = vor.u32 %v493_v63, %v7609_v57  ;;  %2752 = vst.msk [vmem:[#allocation3 + $0x154] sm:$0xf] %vm1358_vm15, %v2685_v6  ;;  %v2687_v63 = vpop.permute.xlu1 %2686  ;;  %v3789_v25 = vld [vmem:[#allocation3 + $0x30] sm:$0xff] }
 0x122   : > { %v7624_v24 = vrot.slane %v3145_v8, 5  ;;  %v2075_v3 = vor.u32 %v2074_v61, %v2071_v16  ;;  %v2080_v23 = vrot.slane %v2078_v48, 5  ;;  %v2084_v38 = vrot.slane %v2082_v43, 4  ;;  %1388 = vst.msk [vmem:[#allocation3 + $0x15c] sm:$0xf] %vm1358_vm15, %v1321_v30  ;;  %2652 = vrot.lane.b32.xlu0 %v7594_v13, %s6403_s30  ;;  %v2878_v48 = vpop.permute.xlu0 %2877 }
 0x123   : > { %v714_v37 = vld [vmem:[#allocation2 + $0x78] sm:$0xf]  ;;  %v7633_v40 = vrot.slane %v3151_v56, 5  ;;  %v7635_v45 = vrot.slane %v3155_v32, 4  ;;  %v496_v8 = vsel %vm6489_vm11, %v488_v26, %v495_v7  ;;  %v7647_v20 = vld [vmem:[#allocation2 + $0x54] sm:$0xe]  ;;  %v1053_v55 = vor.u32 %v7614_v33, %v7612_v49 }
 0x124   : > { %v715_v10 = vsel %vm6481_vm10, %v487_v36, %v714_v37  ;;  %v7649_v4 = vld [vmem:[#allocation2 + $0x58] sm:$0xf]  ;;  %717 = vst.msk [vmem:[#allocation2 + $0x7c] sm:$0xf] %vm172_vm0, %v496_v8  ;;  %v2076_v39 = vrot.slane %v2075_v3, 4  ;;  %v2085_v12 = vor.u32 %v2084_v38, %v2080_v23  ;;  %v2090_v27 = vrot.slane %v2088_v9, 5  ;;  %1288 = vrot.lane.b32.xlu1 %v1045_v50, %s6403_s30 }
 0x125   : > { %716 = vst [vmem:[#allocation2 + $0x78] sm:$0xf] %v715_v10  ;;  %v271_v44 = vsel %vm6464_vm8, 0, %v270_v52  ;;  %v7664_v58 = vld [vmem:[#allocation2 + $0x64] sm:$0xf]  ;;  %v1536_v31 = vrot.slane %v1534_v34, 4  ;;  %v1063_v62 = vor.u32 %v7620_v22, %v7618_v29  ;;  %v3148_v34 = vor.u32 %v7624_v24, %v7616_v21  ;;  %v1661_v6 = vpop.permute.xlu1 %1660 }
 0x126   : > { %v7666_v56 = vld [vmem:[#allocation2 + $0x5c] sm:$0x1]  ;;  %272 = vst [vmem:[#allocation2 + $0x80] sm:$0x1] %v271_v44  ;;  %v217_v14 = vld [vmem:[#allocation2 + $0x84] sm:$0x1]  ;;  %v2081_v17 = vsel %vm6548_vm14, %v2076_v39, %v2080_v23  ;;  %v3158_v47 = vor.u32 %v7635_v45, %v7633_v40  ;;  %1626 = vrot.lane.b32.xlu0 %v1535_v51, %s6401_s18  ;;  %v1275_v10 = vpop.permute.xlu0 %1274 }
 0x127   : > { %1727 = vst.msk [vmem:[#allocation3 + $0x150] sm:$0xf] %vm1698_vm1, %v1659_v5  ;;  %v3791_v54 = vld [vmem:[#allocation3 + $0x3c] sm:$0xff]  ;;  %v2086_v59 = vrot.slane %v2085_v12, 4  ;;  %v2969_v36 = vld [vmem:[#allocation2 + $0x68] sm:$0x1]  ;;  %v1538_v2 = vsel %vm6471_vm9, %v1536_v31, %v1537_v0 }
 0x128   : > { %v6348_v41 = vld [vmem:[#allocation3 + $0x34] ss:$12 sps:$4 sm:$0xff]   ;;  %2753 = vst.msk [vmem:[#allocation3 + $0x160] sm:$0xf] %vm1358_vm15, %v2687_v63  ;;  %v5855_v32 = vcombine.low %v3789_v25, %v3791_v54  ;;  %v1541_v53 = vrot.slane %v7649_v4, 5  ;;  %v2567_v26 = vrot.slane %v7664_v58, 5  ;;  %2654 = vrot.lane.b32.xlu1 %v2564_v18, %s6403_s30 }
 0x129   : > { %2396 = vst.msk [vmem:[#allocation3 + $0x64] sm:$0xf] %vm172_vm0, %v2081_v17  ;;  %4333 = vmatprep.mubr.bf16.mxu0 %v6348_v41  ;;  %v7692_v13 = vld [vmem:[#allocation2 + $0x60] sm:$0xe]  ;;  %v2091_v46 = vsel %vm6548_vm14, %v2086_v59, %v2090_v27  ;;  %v773_v16 = vld [vmem:[#allocation2 + $0x3c] sm:$0xf]  ;;  %v2880_v5 = vpop.permute.xlu1 %2879 }
 0x12a   : > { %4334 = vmatmul.mubr.bf16.gmra.mxu0 %v5855_v32  ;;  %v7699_v43 = vrot.slane %v1066_v15, 5  ;;  %v5807_v49 = vrot.slane %v7647_v20, 9  ;;  %v497_v33 = vrot.slane %v7609_v57, 4  ;;  %2397 = vst.msk [vmem:[#allocation3 + $0x70] sm:$0xf] %vm172_vm0, %v2091_v46  ;;  %v218_v61 = vsel %vm6440_vm3, 0, %v217_v14 }
 0x12b   : > { %v314_v9 = vld [vmem:[%s6455_s17 + $0x50] sm:$0xf]  ;;  %805 = vst.msk [vmem:[#allocation3 + $0x78] sm:$0xf] %vm172_vm0, %v773_v16  ;;  %v2769_v15 = vld [vmem:[#allocation2 + $0x60] sm:$0xf] }
 0x12c   : > { %2945 = vst.msk [vmem:[#allocation3 + $0x154] sm:$0xf] %vm1698_vm1, %v2878_v48  ;;  %v3161_v21 = vshll.u32 %v2969_v36, 16  ;;  %v1544_v57 = vrot.slane %v7666_v56, 5  ;;  %v851_v22 = vld [vmem:[#allocation2 + $0x60] sm:$0xf]  ;;  %2845 = vrot.lane.b32.xlu0 %v2769_v15, %s6401_s18  ;;  %1628 = vrot.lane.b32.xlu1 %v1538_v2, %s6401_s18 }
 0x12d   : > { %v852_v7 = vld [vmem:[#allocation2 + $0x64] sm:$0xf]  ;;  %219 = vst [vmem:[#allocation2 + $0x84] sm:$0x1] %v218_v61  ;;  %1728 = vst.msk [vmem:[#allocation3 + $0x15c] sm:$0xf] %vm1698_vm1, %v1661_v6  ;;  %v1277_v48 = vpop.permute.xlu1 %1276 }
 0x12e   : > { %v7716_v52 = vrot.slane %v1053_v55, 4  ;;  %v7718_v30 = vrot.slane %v1063_v62, 4  ;;  %v5823_v60 = vrot.slane %v7692_v13, 9  ;;  %v7721_v24 = vld [vmem:[#allocation2 + $0x68] sm:$0x1]  ;;  %v7725_v0 = vrot.slane %v1541_v53, 4  ;;  %v1852_v62 = vpop.permute.xlu0 %1851 }
 0x12f   : > { %v7728_v37 = vrot.slane %v3148_v34, 4  ;;  %v7730_v3 = vrot.slane %v3158_v47, 4  ;;  %v7734_v23 = vrot.slane %v2567_v26, 4  ;;  %v718_v38 = vld [vmem:[#allocation2 + $0x80] sm:$0x1]  ;;  %v499_v45 = vshrl.u32 %v314_v9, 16 }
 0x130   : > { %v1071_v8 = vshrl.u32 %v851_v22, 16  ;;  %v1074_v39 = vshll.u32 %v851_v22, 16  ;;  %v1080_v12 = vshll.u32 %v852_v7, 16  ;;  %v719_v27 = vsel %vm6440_vm3, %v497_v33, %v718_v38  ;;  %v315_v44 = vld [vmem:[%s6455_s17 + $0x54] sm:$0xf] }
 0x131   : > { %1365 = vst.msk [vmem:[#allocation3 + $0x48] sm:$0xf] %vm1358_vm15, %v1275_v10  ;;  %v1743_v50 = vld [vmem:[#allocation2 + $0x54] sm:$0xf]  ;;  %v7740_v51 = vrot.slane %v3161_v21, 5  ;;  %v2570_v14 = vrot.slane %v7721_v24, 5  ;;  %v1059_v17 = vsel %vm6548_vm14, %v7716_v52, %v7618_v29  ;;  %v7778_v10 = vsel %vm6471_vm9, %v5823_v60, %v2567_v26 }
 0x132   : > { %v1084_v63 = vshrl.u32 %v852_v7, 16  ;;  %720 = vst [vmem:[#allocation2 + $0x80] sm:$0x1] %v719_v27  ;;  %v502_v25 = vshll.u32 %v314_v9, 16  ;;  %2946 = vst.msk [vmem:[#allocation3 + $0x160] sm:$0xf] %vm1698_vm1, %v2880_v5  ;;  %1819 = vrot.lane.b32.xlu0 %v1743_v50, %s6402_s23  ;;  %v2641_v5 = vpop.permute.xlu0 %2640 }
 0x133   : > { %v2770_v54 = vld [vmem:[#allocation2 + $0x64] sm:$0xf]  ;;  %v7745_v41 = vld [vmem:[#allocation2 + $0x6c] sm:$0xf]  ;;  %v3509_v18 = vld [vmem:[#allocation2 + $0x18] sm:$0xe] }
 0x134   : > { %v3510_v31 = vld [vmem:[#allocation2 + $0x1c] sm:$0xf]  ;;  %v501_v59 = vrot.slane %v499_v45, 7  ;;  %v507_v32 = vshrl.u32 %v315_v44, 16  ;;  %v3511_v36 = vld [vmem:[#allocation2 + $0x20] sm:$0x1]  ;;  %2847 = vrot.lane.b32.xlu1 %v2770_v54, %s6401_s18  ;;  %v3154_v45 = vsel %vm6548_vm14, %v7728_v37, %v7633_v40  ;;  %v3164_v40 = vsel %vm6548_vm14, %v7730_v3, %v7740_v51  ;;  %v1854_v37 = vpop.permute.xlu1 %1853 }
 0x135   : > { %v774_v55 = vld [vmem:[#allocation2 + $0x40] sm:$0xf]  ;;  %v7752_v34 = vrot.slane %v1071_v8, 4  ;;  %v7754_v47 = vrot.slane %v1074_v39, 5  ;;  %v7756_v13 = vrot.slane %v1080_v12, 5  ;;  %v510_v16 = vshll.u32 %v315_v44, 16 }
 0x136   : > { %v721_v46 = vld [vmem:[#allocation2 + $0x84] sm:$0xf]  ;;  %806 = vst.msk [vmem:[#allocation3 + $0x84] sm:$0xf] %vm172_vm0, %v774_v55  ;;  %v7760_v33 = vld [vmem:[#allocation2 + $0x68] sm:$0x1]  ;;  %v504_v9 = vor.u32 %v502_v25, %v501_v59  ;;  %3405 = vrot.lane.b32.xlu0 %v3154_v45, %s6402_s23 }
 0x137   : > { %1920 = vst.msk [vmem:[#allocation3 + $0x150] sm:$0xf] %vm1891_vm2, %v1852_v62  ;;  %v7762_v61 = vrot.slane %v1084_v63, 4  ;;  %v505_v6 = vrot.slane %v501_v59, 4  ;;  %v7764_v2 = vrot.slane %v507_v32, 7  ;;  %v3166_v15 = vshrl.u32 %v7745_v41, 16 }
 0x138   : > { %1366 = vst.msk [vmem:[#allocation3 + $0x54] sm:$0xf] %vm1358_vm15, %v1277_v48  ;;  %v5832_v21 = vrot.slane %v3509_v18, 9  ;;  %v3607_v22 = vrot.slane %v3510_v31, 5  ;;  %v3610_v7 = vrot.slane %v3511_v36, 5  ;;  %v722_v8 = vsel %vm6481_vm10, %v504_v9, %v721_v46  ;;  %v2643_v9 = vpop.permute.xlu1 %2642 }
 0x139   : > { %v3512_v38 = vld [vmem:[#allocation2 + $0x24] sm:$0xe]  ;;  %v512_v39 = vor.u32 %v510_v16, %v7764_v2  ;;  %v3513_v12 = vld [vmem:[#allocation2 + $0x28] sm:$0xf]  ;;  %v3514_v27 = vld [vmem:[#allocation2 + $0x2c] sm:$0x1]  ;;  %v1077_v25 = vor.u32 %v7754_v47, %v7752_v34  ;;  %v1087_v55 = vor.u32 %v7762_v61, %v7756_v13  ;;  %v3438_v47 = vpop.permute.xlu0 %3437 }
 0x13a   : > { %v1939_v44 = vld [vmem:[#allocation2 + $0x48] sm:$0xf]  ;;  %v1744_v50 = vld [vmem:[#allocation2 + $0x58] sm:$0xf]  ;;  %v1090_v58 = vshll.u32 %v7760_v33, 16  ;;  %v3608_v26 = vsel %vm6471_vm9, %v5832_v21, %v3607_v22  ;;  %v3609_v28 = vrot.slane %v3607_v22, 4  ;;  %1290 = vrot.lane.b32.xlu0 %v1059_v17, %s6403_s30 }
 0x13b   : > { %723 = vst [vmem:[#allocation2 + $0x84] sm:$0xf] %v722_v8  ;;  %v1940_v60 = vld [vmem:[#allocation2 + $0x4c] sm:$0xf]  ;;  %2730 = vst.msk [vmem:[#allocation3 + $0x4c] sm:$0xf] %vm1358_vm15, %v2641_v5  ;;  %v513_v3 = vsel %vm6489_vm11, %v505_v6, %v512_v39  ;;  %1821 = vrot.lane.b32.xlu1 %v1744_v50, %s6402_s23 }
 0x13c   : > { %v3169_v63 = vshll.u32 %v7745_v41, 16  ;;  %v7794_v54 = vld [vmem:[#allocation2 + $0x60] sm:$0xe]  ;;  %3749 = vst.msk [vmem:[#allocation3 + $0x8] sm:$0xf] %vm172_vm0, %v3608_v26  ;;  %v5833_v51 = vrot.slane %v3512_v38, 9  ;;  %v3611_v41 = vsel %vm6471_vm9, %v3609_v28, %v3610_v7  ;;  %v3440_v50 = vpop.permute.xlu1 %3439 }
 0x13d   : > { %1921 = vst.msk [vmem:[#allocation3 + $0x15c] sm:$0xf] %vm1891_vm2, %v1854_v37  ;;  %v3614_v18 = vrot.slane %v3513_v12, 5  ;;  %v3617_v31 = vrot.slane %v3514_v27, 5  ;;  %v2093_v59 = vshrl.u32 %v1939_v44, 16  ;;  %v7805_v36 = vrot.slane %v3166_v15, 4  ;;  %v1615_v17 = vpop.permute.xlu0 %1614 }
 0x13e   : > { %724 = vst.msk [vmem:[#allocation2 + $0x88] sm:$0xf] %vm172_vm0, %v513_v3  ;;  %v273_v32 = vld [vmem:[#allocation2 + $0x8c] sm:$0x1]  ;;  %v2971_v35 = vld [vmem:[#allocation2 + $0x70] sm:$0xf]  ;;  %v1069_v12 = vsel %vm6548_vm14, %v7718_v30, %v7699_v43  ;;  %v1542_v27 = vsel %vm6471_vm9, %v5807_v49, %v1541_v53  ;;  %2656 = vrot.lane.b32.xlu0 %v7778_v10, %s6403_s30 }
 0x13f   : > { %3750 = vst.msk [vmem:[#allocation3 + $0x14] sm:$0xf] %vm172_vm0, %v3611_v41  ;;  %v2096_v62 = vshll.u32 %v1939_v44, 16  ;;  %v2102_v34 = vshll.u32 %v1940_v60, 16  ;;  %v3615_v46 = vsel %vm6471_vm9, %v5833_v51, %v3614_v18  ;;  %v3616_v16 = vrot.slane %v3614_v18, 4  ;;  %3407 = vrot.lane.b32.xlu1 %v3164_v40, %s6402_s23 }
 0x140   : > { %v2095_v48 = vrot.slane %v2093_v59, 4  ;;  %v2106_v33 = vshrl.u32 %v1940_v60, 16  ;;  %3505 = vst.msk [vmem:[#allocation3 + $0x154] sm:$0xf] %vm1891_vm2, %v3438_v47  ;;  %v3171_v6 = vrot.slane %v3169_v63, 5  ;;  %v274_v61 = vsel %vm6464_vm8, 0, %v273_v32  ;;  %v1617_v18 = vpop.permute.xlu1 %1616 }
 0x141   : > { %3751 = vst.msk [vmem:[#allocation3 + $0x20] sm:$0xf] %vm172_vm0, %v3615_v46  ;;  %v2098_v15 = vrot.slane %v2096_v62, 5  ;;  %v2104_v21 = vrot.slane %v2102_v34, 5  ;;  %v3175_v22 = vshll.u32 %v2971_v35, 16  ;;  %v3179_v7 = vshrl.u32 %v2971_v35, 16  ;;  %v2834_v10 = vpop.permute.xlu0 %2833 }
 0x142   : > { %2731 = vst.msk [vmem:[#allocation3 + $0x58] sm:$0xf] %vm1358_vm15, %v2643_v9  ;;  %v5808_v38 = vrot.slane %v7794_v54, 9  ;;  %v3618_v45 = vsel %vm6471_vm9, %v3616_v16, %v3617_v31  ;;  %275 = vst [vmem:[#allocation2 + $0x8c] sm:$0x1] %v274_v61  ;;  %v7827_v11 = vrot.slane %v1077_v25, 4  ;;  %v3172_v40 = vor.u32 %v3171_v6, %v7805_v36  ;;  %1630 = vrot.lane.b32.xlu0 %v1542_v27, %s6401_s18 }
 0x143   : > { %v7829_v8 = vrot.slane %v1090_v58, 5  ;;  %v7831_v39 = vld [vmem:[#allocation2 + $0x6c] sm:$0xe]  ;;  %3752 = vst.msk [vmem:[#allocation3 + $0x2c] sm:$0xf] %vm172_vm0, %v3618_v45  ;;  %v2099_v29 = vor.u32 %v2098_v15, %v2095_v48  ;;  %v2108_v52 = vrot.slane %v2106_v33, 4  ;;  %1292 = vrot.lane.b32.xlu1 %v1069_v12, %s6403_s30  ;;  %v2571_v51 = vsel %vm6471_vm9, %v7734_v23, %v2570_v14 }
 0x144   : > { %v7844_v44 = vld [vmem:[#allocation2 + $0x70] sm:$0xf]  ;;  %1705 = vst.msk [vmem:[#allocation3 + $0x48] sm:$0xf] %vm1698_vm1, %v1615_v17  ;;  %v7848_v58 = vrot.slane %v1087_v55, 4  ;;  %v7857_v20 = vrot.slane %v3175_v22, 5  ;;  %v1545_v31 = vsel %vm6471_vm9, %v7725_v0, %v1544_v57  ;;  %v2836_v6 = vpop.permute.xlu1 %2835 }
 0x145   : > { %v1941_v5 = vld [vmem:[#allocation2 + $0x50] sm:$0x1]  ;;  %v7850_v26 = vld [vmem:[#allocation2 + $0x64] sm:$0xf]  ;;  %v7852_v43 = vld [vmem:[#allocation2 + $0x68] sm:$0x1]  ;;  %v2109_v30 = vor.u32 %v2108_v52, %v2104_v21  ;;  %v1808_v46 = vpop.permute.xlu0 %1807 }
 0x146   : > { %v2100_v4 = vrot.slane %v2099_v29, 4  ;;  %3506 = vst.msk [vmem:[#allocation3 + $0x160] sm:$0xf] %vm1891_vm2, %v3440_v50  ;;  %v7859_v53 = vrot.slane %v3179_v7, 4  ;;  %v5824_v49 = vrot.slane %v7831_v39, 9  ;;  %v514_v28 = vrot.slane %v7764_v2, 4 }
 0x147   : > { %v2574_v60 = vrot.slane %v7844_v44, 5  ;;  %v7865_v37 = vld [vmem:[#allocation2 + $0x6c] sm:$0xf]  ;;  %v2110_v25 = vrot.slane %v2109_v30, 4  ;;  %v2112_v3 = vshll.u32 %v1941_v5, 16  ;;  %v1548_v59 = vrot.slane %v7850_v26, 5  ;;  %2658 = vrot.lane.b32.xlu1 %v2571_v51, %s6403_s30 }
 0x148   : > { %v2105_v63 = vsel %vm6548_vm14, %v2100_v4, %v2104_v21  ;;  %v2972_v41 = vld [vmem:[#allocation2 + $0x74] sm:$0x1]  ;;  %v3515_v2 = vld [vmem:[#allocation2 + $0x30] sm:$0xe]  ;;  %2923 = vst.msk [vmem:[#allocation3 + $0x4c] sm:$0xf] %vm1698_vm1, %v2834_v10  ;;  %v3182_v56 = vor.u32 %v7859_v53, %v7857_v20  ;;  %v1810_v10 = vpop.permute.xlu1 %1809 }
 0x149   : > { %2398 = vst.msk [vmem:[#allocation3 + $0x7c] sm:$0xf] %vm172_vm0, %v2105_v63  ;;  %v7882_v24 = vld [vmem:[#allocation2 + $0x70] sm:$0xf]  ;;  %v725_v32 = vld [vmem:[#allocation2 + $0x8c] sm:$0x1]  ;;  %v3394_v53 = vpop.permute.xlu0 %3393 }
 0x14a   : > { %v2114_v35 = vrot.slane %v2112_v3, 5  ;;  %1706 = vst.msk [vmem:[#allocation3 + $0x54] sm:$0xf] %vm1698_vm1, %v1617_v18  ;;  %v2771_v23 = vld [vmem:[#allocation2 + $0x6c] sm:$0xf]  ;;  %v7886_v14 = vrot.slane %v3172_v40, 4  ;;  %v726_v57 = vsel %vm6440_vm3, %v514_v28, %v725_v32 }
 0x14b   : > { %v1551_v36 = vrot.slane %v7852_v43, 5  ;;  %v3185_v0 = vshll.u32 %v2972_v41, 16  ;;  %v7896_v55 = vrot.slane %v2574_v60, 4  ;;  %727 = vst [vmem:[#allocation2 + $0x8c] sm:$0x1] %v726_v57  ;;  %v5834_v47 = vrot.slane %v3515_v2, 9  ;;  %2849 = vrot.lane.b32.xlu0 %v2771_v23, %s6401_s18  ;;  %1632 = vrot.lane.b32.xlu1 %v1545_v31, %s6401_s18 }
 0x14c   : > { %v2115_v62 = vsel %vm6548_vm14, %v2110_v25, %v2114_v35  ;;  %v3516_v34 = vld [vmem:[#allocation2 + $0x34] sm:$0xf]  ;;  %v1095_v16 = vshrl.u32 %v7865_v37, 16  ;;  %v1098_v48 = vshll.u32 %v7865_v37, 16  ;;  %v1104_v1 = vshll.u32 %v7882_v24, 16  ;;  %v3837_v15 = vld [vmem:[#allocation3 + $0x150] sm:$0xff] }
 0x14d   : > { %v1108_v33 = vshrl.u32 %v7882_v24, 16  ;;  %2399 = vst.msk [vmem:[#allocation3 + $0x88] sm:$0xf] %vm172_vm0, %v2115_v62  ;;  %v3517_v9 = vld [vmem:[#allocation2 + $0x38] sm:$0x1]  ;;  %v3621_v45 = vrot.slane %v3516_v34, 5 }
 0x14e   : > { %1898 = vst.msk [vmem:[#allocation3 + $0x48] sm:$0xf] %vm1891_vm2, %v1808_v46  ;;  %v3839_v21 = vld [vmem:[#allocation3 + $0x15c] sm:$0xff]  ;;  %v1745_v22 = vld [vmem:[#allocation2 + $0x60] sm:$0xf]  ;;  %v3624_v29 = vrot.slane %v3517_v9, 5 }
 0x14f   : > { %v6350_v61 = vld [vmem:[#allocation3 + $0x154] ss:$12 sps:$4 sm:$0xff]   ;;  %v7906_v7 = vld [vmem:[#allocation2 + $0x74] sm:$0x1]  ;;  %2924 = vst.msk [vmem:[#allocation3 + $0x58] sm:$0xf] %vm1698_vm1, %v2836_v6  ;;  %v5891_v52 = vcombine.low %v3837_v15, %v3839_v21  ;;  %v3622_v50 = vsel %vm6471_vm9, %v5834_v47, %v3621_v45  ;;  %1823 = vrot.lane.b32.xlu0 %v1745_v22, %s6402_s23  ;;  %v3396_v21 = vpop.permute.xlu1 %3395 }
 0x150   : > { %v3518_v17 = vld [vmem:[#allocation2 + $0x3c] sm:$0xe]  ;;  %v3519_v12 = vld [vmem:[#allocation2 + $0x40] sm:$0xf]  ;;  %v3520_v27 = vld [vmem:[#allocation2 + $0x44] sm:$0x1]  ;;  %4429 = vmatprep.mubr.bf16.mxu1 %v6350_v61 }
 0x151   : > { %v7911_v5 = vld [vmem:[#allocation2 + $0x78] sm:$0xf]  ;;  %v3623_v40 = vrot.slane %v3621_v45, 4  ;;  %v5835_v4 = vrot.slane %v3518_v17, 9  ;;  %v3628_v30 = vrot.slane %v3519_v12, 5  ;;  %4430 = vmatmul.mubr.bf16.gmra.mxu1 %v5891_v52  ;;  %v7915_v37 = vrot.slane %v3182_v56, 4 }
 0x152   : > { %v2772_v28 = vld [vmem:[#allocation2 + $0x70] sm:$0xf]  ;;  %v7917_v63 = vrot.slane %v3185_v0, 5  ;;  %v7921_v25 = vrot.slane %v1548_v59, 4  ;;  %3753 = vst.msk [vmem:[#allocation3 + $0x38] sm:$0xf] %vm172_vm0, %v3622_v50  ;;  %v3178_v0 = vsel %vm6548_vm14, %v7886_v14, %v7857_v20  ;;  %v1083_v50 = vsel %vm6548_vm14, %v7827_v11, %v7756_v13 }
 0x153   : > { %v3631_v3 = vrot.slane %v3520_v27, 5  ;;  %3483 = vst.msk [vmem:[#allocation3 + $0x4c] sm:$0xf] %vm1891_vm2, %v3394_v53  ;;  %v7925_v51 = vld [vmem:[#allocation2 + $0x7c] sm:$0xf]  ;;  %v7927_v41 = vrot.slane %v1095_v16, 4  ;;  %v3625_v18 = vsel %vm6471_vm9, %v3623_v40, %v3624_v29  ;;  %v3629_v31 = vsel %vm6471_vm9, %v5835_v4, %v3628_v30  ;;  %2851 = vrot.lane.b32.xlu1 %v2772_v28, %s6401_s18  ;;  %3409 = vrot.lane.b32.xlu0 %v3178_v0, %s6402_s23  ;;  %v1325_v11 = vpop.permute.xlu1 %1324 }
 0x154   : > { %v7929_v2 = vld [vmem:[#allocation2 + $0x70] sm:$0xf]  ;;  %v3630_v24 = vrot.slane %v3628_v30, 4  ;;  %1899 = vst.msk [vmem:[#allocation3 + $0x54] sm:$0xf] %vm1891_vm2, %v1810_v10  ;;  %v3190_v35 = vshrl.u32 %v7911_v5, 16 }
 0x155   : > { %v1746_v32 = vld [vmem:[#allocation2 + $0x64] sm:$0xf]  ;;  %v7938_v23 = vrot.slane %v1098_v48, 5  ;;  %v7940_v56 = vrot.slane %v1104_v1, 5  ;;  %v1114_v57 = vshll.u32 %v7906_v7, 16  ;;  %v3193_v62 = vshll.u32 %v7911_v5, 16  ;;  %v1323_v48 = vpop.permute.xlu0 %1322 }
 0x156   : > { %3754 = vst.msk [vmem:[#allocation3 + $0x44] sm:$0xf] %vm172_vm0, %v3625_v18  ;;  %3755 = vst.msk [vmem:[#allocation3 + $0x50] sm:$0xf] %vm172_vm0, %v3629_v31  ;;  %v7951_v34 = vrot.slane %v1108_v33, 4  ;;  %v3632_v47 = vsel %vm6471_vm9, %v3630_v24, %v3631_v3  ;;  %v3199_v9 = vshll.u32 %v7925_v51, 16  ;;  %v3188_v5 = vsel %vm6548_vm14, %v7915_v37, %v7917_v63 }
 0x157   : > { %v3521_v46 = vld [vmem:[#allocation2 + $0x48] sm:$0xe]  ;;  %v3522_v16 = vld [vmem:[#allocation2 + $0x4c] sm:$0xf]  ;;  %v7955_v1 = vld [vmem:[#allocation2 + $0x74] sm:$0x1]  ;;  %1825 = vrot.lane.b32.xlu1 %v1746_v32, %s6402_s23  ;;  %v1101_v28 = vor.u32 %v7938_v23, %v7927_v41  ;;  %1294 = vrot.lane.b32.xlu0 %v1083_v50, %s6403_s30 }
 0x158   : > { %v1555_v6 = vrot.slane %v7929_v2, 5  ;;  %3756 = vst.msk [vmem:[#allocation3 + $0x5c] sm:$0xf] %vm172_vm0, %v3632_v47  ;;  %v3523_v15 = vld [vmem:[#allocation2 + $0x50] sm:$0x1]  ;;  %v5836_v20 = vrot.slane %v3521_v46, 9  ;;  %v1111_v3 = vor.u32 %v7951_v34, %v7940_v56 }
 0x159   : > { %v3635_v14 = vrot.slane %v3522_v16, 5  ;;  %1389 = vst.msk [vmem:[#allocation3 + $0x168] sm:$0xf] %vm1358_vm15, %v1323_v48  ;;  %v3203_v33 = vshrl.u32 %v7925_v51, 16  ;;  %v3638_v61 = vrot.slane %v3523_v15, 5  ;;  %v7964_v45 = vrot.slane %v3190_v35, 4  ;;  %v2689_v53 = vpop.permute.xlu0 %2688 }
 0x15a   : > { %v3524_v22 = vld [vmem:[#allocation2 + $0x54] sm:$0xe]  ;;  %v3525_v7 = vld [vmem:[#allocation2 + $0x58] sm:$0xf]  ;;  %3484 = vst.msk [vmem:[#allocation3 + $0x58] sm:$0xf] %vm1891_vm2, %v3396_v21  ;;  %v2575_v51 = vsel %vm6471_vm9, %v5824_v49, %v2574_v60 }
 0x15b   : > { %v7966_v29 = vld [vmem:[#allocation2 + $0x6c] sm:$0xe]  ;;  %v3636_v52 = vsel %vm6471_vm9, %v5836_v20, %v3635_v14  ;;  %v3637_v17 = vrot.slane %v3635_v14, 4  ;;  %v3526_v12 = vld [vmem:[#allocation2 + $0x5c] sm:$0x1]  ;;  %v5837_v27 = vrot.slane %v3524_v22, 9  ;;  %3411 = vrot.lane.b32.xlu1 %v3188_v5, %s6402_s23  ;;  %2660 = vrot.lane.b32.xlu0 %v2575_v51, %s6403_s30 }
 0x15c   : > { %v3195_v40 = vrot.slane %v3193_v62, 5  ;;  %v7979_v4 = vld [vmem:[#allocation2 + $0x7c] sm:$0xf]  ;;  %3757 = vst.msk [vmem:[#allocation3 + $0x68] sm:$0xf] %vm172_vm0, %v3636_v52  ;;  %v3642_v30 = vrot.slane %v3525_v7, 5  ;;  %v1093_v62 = vsel %vm6548_vm14, %v7848_v58, %v7829_v8 }
 0x15d   : > { %v7986_v10 = vld [vmem:[#allocation2 + $0x74] sm:$0x1]  ;;  %v3639_v37 = vsel %vm6471_vm9, %v3637_v17, %v3638_v61  ;;  %v3645_v63 = vrot.slane %v3526_v12, 5  ;;  %v775_v13 = vld [vmem:[#allocation2 + $0x48] sm:$0xf]  ;;  %v2577_v41 = vrot.slane %v7955_v1, 5  ;;  %v1663_v0 = vpop.permute.xlu0 %1662  ;;  %v2691_v1 = vpop.permute.xlu1 %2690 }
 0x15e   : > { %2754 = vst.msk [vmem:[#allocation3 + $0x16c] sm:$0xf] %vm1358_vm15, %v2689_v53  ;;  %v7998_v18 = vrot.slane %v1114_v57, 5  ;;  %v3643_v31 = vsel %vm6471_vm9, %v5837_v27, %v3642_v30  ;;  %1390 = vst.msk [vmem:[#allocation3 + $0x174] sm:$0xf] %vm1358_vm15, %v1325_v11  ;;  %v8006_v44 = vrot.slane %v3199_v9, 5  ;;  %v3196_v32 = vor.u32 %v3195_v40, %v7964_v45 }
 0x15f   : > { %3758 = vst.msk [vmem:[#allocation3 + $0x74] sm:$0xf] %vm172_vm0, %v3639_v37  ;;  %807 = vst.msk [vmem:[#allocation3 + $0x90] sm:$0xf] %vm172_vm0, %v775_v13  ;;  %v3205_v39 = vrot.slane %v3203_v33, 4  ;;  %v2581_v49 = vrot.slane %v7979_v4, 5  ;;  %1296 = vrot.lane.b32.xlu1 %v1093_v62, %s6403_s30  ;;  %v1549_v45 = vsel %vm6471_vm9, %v5808_v38, %v1548_v59  ;;  %v2578_v50 = vsel %vm6471_vm9, %v7896_v55, %v2577_v41 }
 0x160   : > { %v8008_v24 = vld [vmem:[#allocation2 + $0x78] sm:$0xe]  ;;  %v3644_v60 = vrot.slane %v3642_v30, 4  ;;  %3759 = vst.msk [vmem:[#allocation3 + $0x80] sm:$0xf] %vm172_vm0, %v3643_v31  ;;  %v5809_v35 = vrot.slane %v7966_v29, 9  ;;  %1634 = vrot.lane.b32.xlu0 %v1549_v45, %s6401_s18  ;;  %v1552_v55 = vsel %vm6471_vm9, %v7921_v25, %v1551_v36 }
 0x161   : > { %v8017_v23 = vrot.slane %v1555_v6, 4  ;;  %v1558_v57 = vrot.slane %v7986_v10, 5  ;;  %v8024_v34 = vrot.slane %v1101_v28, 4  ;;  %v8026_v47 = vrot.slane %v1111_v3, 4  ;;  %v3527_v16 = vld [vmem:[#allocation2 + $0x60] sm:$0xe]  ;;  %v2882_v5 = vpop.permute.xlu0 %2881  ;;  %v1665_v59 = vpop.permute.xlu1 %1664 }
 0x162   : > { %v3646_v46 = vsel %vm6471_vm9, %v3644_v60, %v3645_v63  ;;  %v3528_v48 = vld [vmem:[#allocation2 + $0x64] sm:$0xf]  ;;  %1729 = vst.msk [vmem:[#allocation3 + $0x168] sm:$0xf] %vm1698_vm1, %v1663_v0  ;;  %v3795_v15 = vld [vmem:[#allocation3 + $0x54] sm:$0xff]  ;;  %v5825_v14 = vrot.slane %v8008_v24, 9  ;;  %v3206_v33 = vor.u32 %v3205_v39, %v8006_v44 }
 0x163   : > { %v3793_v9 = vld [vmem:[#allocation3 + $0x48] sm:$0xff]  ;;  %3760 = vst.msk [vmem:[#allocation3 + $0x8c] sm:$0xf] %vm172_vm0, %v3646_v46  ;;  %v5838_v8 = vrot.slane %v3527_v16, 9  ;;  %v8040_v61 = vrot.slane %v2581_v49, 4  ;;  %v3649_v7 = vrot.slane %v3528_v48, 5  ;;  %2662 = vrot.lane.b32.xlu1 %v2578_v50, %s6403_s30 }
 0x164   : > { %v6352_v20 = vld [vmem:[#allocation3 + $0x4c] ss:$12 sps:$4 sm:$0xff]   ;;  %2755 = vst.msk [vmem:[#allocation3 + $0x178] sm:$0xf] %vm1358_vm15, %v2691_v1  ;;  %v5858_v58 = vcombine.low %v3793_v9, %v3795_v15  ;;  %v8035_v21 = vld [vmem:[#allocation2 + $0x80] sm:$0x1]  ;;  %v2582_v10 = vsel %vm6471_vm9, %v5825_v14, %v2581_v49 }
 0x165   : > { %v3529_v22 = vld [vmem:[#allocation2 + $0x68] sm:$0x1]  ;;  %4341 = vmatprep.mubr.bf16.mxu0 %v6352_v20  ;;  %v8049_v52 = vrot.slane %v3196_v32, 4  ;;  %v776_v12 = vld [vmem:[#allocation2 + $0x4c] sm:$0xf]  ;;  %v3650_v26 = vsel %vm6471_vm9, %v5838_v8, %v3649_v7  ;;  %v3651_v54 = vrot.slane %v3649_v7, 4  ;;  %v1279_v36 = vpop.permute.xlu0 %1278  ;;  %v2884_v16 = vpop.permute.xlu1 %2883 }
 0x166   : > { %v3652_v17 = vrot.slane %v3529_v22, 5  ;;  %v3530_v27 = vld [vmem:[#allocation2 + $0x6c] sm:$0xe]  ;;  %4342 = vmatmul.mubr.bf16.gmra.mxu0 %v5858_v58  ;;  %v8054_v40 = vld [vmem:[#allocation2 + $0x78] sm:$0xf]  ;;  %v8070_v3 = vrot.slane %v3206_v33, 4 }
 0x167   : > { %808 = vst.msk [vmem:[#allocation3 + $0x9c] sm:$0xf] %vm172_vm0, %v776_v12  ;;  %v5839_v38 = vrot.slane %v3530_v27, 9  ;;  %v2773_v30 = vld [vmem:[#allocation2 + $0x78] sm:$0xf]  ;;  %v3209_v41 = vshll.u32 %v8035_v21, 16  ;;  %v3202_v25 = vsel %vm6548_vm14, %v8049_v52, %v8006_v44  ;;  %1636 = vrot.lane.b32.xlu1 %v1552_v55, %s6401_s18  ;;  %v8155_v44 = vsel %vm6471_vm9, %v8017_v23, %v1558_v57 }
 0x168   : > { %2947 = vst.msk [vmem:[#allocation3 + $0x16c] sm:$0xf] %vm1698_vm1, %v2882_v5  ;;  %v8060_v53 = vld [vmem:[#allocation2 + $0x7c] sm:$0xf]  ;;  %v3531_v28 = vld [vmem:[#allocation2 + $0x70] sm:$0xf]  ;;  %v3653_v63 = vsel %vm6471_vm9, %v3651_v54, %v3652_v17  ;;  %2853 = vrot.lane.b32.xlu0 %v2773_v30, %s6401_s18 }
 0x169   : > { %3761 = vst.msk [vmem:[#allocation3 + $0x98] sm:$0xf] %vm172_vm0, %v3650_v26  ;;  %v2976_v37 = vld [vmem:[#allocation2 + $0x84] sm:$0xf]  ;;  %v3532_v13 = vld [vmem:[#allocation2 + $0x74] sm:$0x1]  ;;  %v1856_v50 = vpop.permute.xlu0 %1855 }
 0x16a   : > { %1730 = vst.msk [vmem:[#allocation3 + $0x174] sm:$0xf] %vm1698_vm1, %v1665_v59  ;;  %v3656_v11 = vrot.slane %v3531_v28, 5  ;;  %v1942_v51 = vld [vmem:[#allocation2 + $0x54] sm:$0xf]  ;;  %v3659_v43 = vrot.slane %v3532_v13, 5  ;;  %v1281_v59 = vpop.permute.xlu1 %1280 }
 0x16b   : > { %3762 = vst.msk [vmem:[#allocation3 + $0xa4] sm:$0xf] %vm172_vm0, %v3653_v63  ;;  %v1943_v31 = vld [vmem:[#allocation2 + $0x58] sm:$0xf]  ;;  %v2117_v39 = vshrl.u32 %v1942_v51, 16  ;;  %v2120_v60 = vshll.u32 %v1942_v51, 16 }
 0x16c   : > { %v2977_v32 = vld [vmem:[#allocation2 + $0x88] sm:$0xf]  ;;  %v3657_v0 = vsel %vm6471_vm9, %v5839_v38, %v3656_v11  ;;  %v3658_v62 = vrot.slane %v3656_v11, 4  ;;  %v2126_v46 = vshll.u32 %v1943_v31, 16  ;;  %1367 = vst.msk [vmem:[#allocation3 + $0x60] sm:$0xf] %vm1358_vm15, %v1279_v36 }
 0x16d   : > { %v1747_v48 = vld [vmem:[#allocation2 + $0x6c] sm:$0xf]  ;;  %v8084_v1 = vld [vmem:[#allocation2 + $0x80] sm:$0x1]  ;;  %v1119_v9 = vshrl.u32 %v8054_v40, 16  ;;  %v2119_v15 = vrot.slane %v2117_v39, 4 }
 0x16e   : > { %3763 = vst.msk [vmem:[#allocation3 + $0xb0] sm:$0xf] %vm172_vm0, %v3657_v0  ;;  %v2122_v20 = vrot.slane %v2120_v60, 5  ;;  %v2130_v8 = vshrl.u32 %v1943_v31, 16  ;;  %v2774_v58 = vld [vmem:[#allocation2 + $0x7c] sm:$0xf]  ;;  %v3660_v22 = vsel %vm6471_vm9, %v3658_v62, %v3659_v43  ;;  %1827 = vrot.lane.b32.xlu0 %v1747_v48, %s6402_s23  ;;  %v2645_v60 = vpop.permute.xlu0 %2644  ;;  %v1858_v62 = vpop.permute.xlu1 %1857 }
 0x16f   : > { %2948 = vst.msk [vmem:[#allocation3 + $0x178] sm:$0xf] %vm1698_vm1, %v2884_v16  ;;  %v1122_v21 = vshll.u32 %v8054_v40, 16  ;;  %v1128_v33 = vshll.u32 %v8060_v53, 16  ;;  %v2128_v7 = vrot.slane %v2126_v46, 5  ;;  %v3214_v45 = vshrl.u32 %v2976_v37, 16  ;;  %2855 = vrot.lane.b32.xlu1 %v2774_v58, %s6401_s18 }
 0x170   : > { %v3217_v17 = vshll.u32 %v2976_v37, 16  ;;  %v3223_v12 = vshll.u32 %v2977_v32, 16  ;;  %3764 = vst.msk [vmem:[#allocation3 + $0xbc] sm:$0xf] %vm172_vm0, %v3660_v22  ;;  %v2123_v27 = vor.u32 %v2122_v20, %v2119_v15  ;;  %v1944_v5 = vld [vmem:[#allocation2 + $0x5c] sm:$0x1]  ;;  %v8126_v46 = vsel %vm6471_vm9, %v5809_v35, %v1555_v6 }
 0x171   : > { %v2584_v26 = vrot.slane %v8084_v1, 5  ;;  %v3227_v54 = vshrl.u32 %v2977_v32, 16  ;;  %v2132_v40 = vrot.slane %v2130_v8, 4  ;;  %v2136_v38 = vshll.u32 %v1944_v5, 16  ;;  %1922 = vst.msk [vmem:[#allocation3 + $0x168] sm:$0xf] %vm1891_vm2, %v1856_v50 }
 0x172   : > { %v8098_v30 = vrot.slane %v3209_v41, 5  ;;  %v1121_v28 = vrot.slane %v1119_v9, 4  ;;  %v1132_v55 = vshrl.u32 %v8060_v53, 16  ;;  %v2124_v37 = vrot.slane %v2123_v27, 4  ;;  %1368 = vst.msk [vmem:[#allocation3 + $0x6c] sm:$0xf] %vm1358_vm15, %v1281_v59  ;;  %3413 = vrot.lane.b32.xlu0 %v3202_v25, %s6402_s23 }
 0x173   : > { %v1124_v63 = vrot.slane %v1122_v21, 5  ;;  %v8103_v13 = vrot.slane %v1128_v33, 5  ;;  %v2133_v11 = vor.u32 %v2132_v40, %v2128_v7  ;;  %v2138_v51 = vrot.slane %v2136_v38, 5  ;;  %v1748_v43 = vld [vmem:[#allocation2 + $0x70] sm:$0xf]  ;;  %v3442_v33 = vpop.permute.xlu0 %3441 }
 0x174   : > { %v8106_v31 = vrot.slane %v3214_v45, 4  ;;  %v8108_v41 = vrot.slane %v3217_v17, 5  ;;  %v8110_v39 = vrot.slane %v3223_v12, 5  ;;  %v2129_v53 = vsel %vm6548_vm14, %v2124_v37, %v2128_v7  ;;  %v8116_v32 = vld [vmem:[#allocation2 + $0x90] sm:$0xf]  ;;  %1829 = vrot.lane.b32.xlu1 %v1748_v43, %s6402_s23  ;;  %v2647_v7 = vpop.permute.xlu1 %2646 }
 0x175   : > { %v8114_v36 = vrot.slane %v3227_v54, 4  ;;  %2400 = vst.msk [vmem:[#allocation3 + $0x94] sm:$0xf] %vm172_vm0, %v2129_v53  ;;  %v2134_v0 = vrot.slane %v2133_v11, 4  ;;  %v8128_v16 = vld [vmem:[#allocation2 + $0x80] sm:$0x1]  ;;  %v1125_v2 = vor.u32 %v1124_v63, %v1121_v28  ;;  %v1107_v8 = vsel %vm6548_vm14, %v8024_v34, %v7940_v56 }
 0x176   : > { %2732 = vst.msk [vmem:[#allocation3 + $0x64] sm:$0xf] %vm1358_vm15, %v2645_v60  ;;  %v8130_v48 = vld [vmem:[#allocation2 + $0x88] sm:$0xf]  ;;  %v3533_v9 = vld [vmem:[#allocation2 + $0x78] sm:$0xe]  ;;  %v3212_v56 = vsel %vm6548_vm14, %v8070_v3, %v8098_v30  ;;  %1298 = vrot.lane.b32.xlu0 %v1107_v8, %s6403_s30  ;;  %v1117_v59 = vsel %vm6548_vm14, %v8026_v47, %v7998_v18  ;;  %v2585_v30 = vsel %vm6471_vm9, %v8040_v61, %v2584_v26 }
 0x177   : > { %v3534_v15 = vld [vmem:[#allocation2 + $0x7c] sm:$0xf]  ;;  %1923 = vst.msk [vmem:[#allocation3 + $0x174] sm:$0xf] %vm1891_vm2, %v1858_v62  ;;  %v8139_v29 = vrot.slane %v1132_v55, 4  ;;  %v2139_v35 = vsel %vm6548_vm14, %v2134_v0, %v2138_v51  ;;  %v5840_v20 = vrot.slane %v3533_v9, 9  ;;  %v1619_v38 = vpop.permute.xlu0 %1618  ;;  %v3220_v18 = vor.u32 %v8108_v41, %v8106_v31 }
 0x178   : > { %v8141_v6 = vld [vmem:[#allocation2 + $0x94] sm:$0xf]  ;;  %v3238_v52 = vshrl.u32 %v8116_v32, 16  ;;  %2401 = vst.msk [vmem:[#allocation3 + $0xa0] sm:$0xf] %vm172_vm0, %v2139_v35  ;;  %v3663_v58 = vrot.slane %v3534_v15, 5  ;;  %3415 = vrot.lane.b32.xlu1 %v3212_v56, %s6402_s23  ;;  %v3444_v11 = vpop.permute.xlu1 %3443  ;;  %v3230_v53 = vor.u32 %v8114_v36, %v8110_v39 }
 0x179   : > { %v3535_v25 = vld [vmem:[#allocation2 + $0x80] sm:$0x1]  ;;  %v3536_v21 = vld [vmem:[#allocation2 + $0x84] sm:$0xe]  ;;  %v3537_v57 = vld [vmem:[#allocation2 + $0x88] sm:$0xf]  ;;  %v1135_v31 = vor.u32 %v8139_v29, %v8103_v13 }
 0x17a   : > { %v3666_v23 = vrot.slane %v3535_v25, 5  ;;  %v3538_v34 = vld [vmem:[#allocation2 + $0x8c] sm:$0x1]  ;;  %v5841_v22 = vrot.slane %v3536_v21, 9  ;;  %3507 = vst.msk [vmem:[#allocation3 + $0x16c] sm:$0xf] %vm1891_vm2, %v3442_v33  ;;  %v3664_v45 = vsel %vm6471_vm9, %v5840_v20, %v3663_v58  ;;  %2664 = vrot.lane.b32.xlu0 %v2582_v10, %s6403_s30 }
 0x17b   : > { %v3665_v17 = vrot.slane %v3663_v58, 4  ;;  %v3670_v12 = vrot.slane %v3537_v57, 5  ;;  %v3673_v3 = vrot.slane %v3538_v34, 5  ;;  %2733 = vst.msk [vmem:[#allocation3 + $0x70] sm:$0xf] %vm1358_vm15, %v2647_v7  ;;  %v8174_v4 = vrot.slane %v1125_v2, 4  ;;  %v2838_v35 = vpop.permute.xlu0 %2837 }
 0x17c   : > { %v1138_v24 = vshll.u32 %v8128_v16, 16  ;;  %v2588_v49 = vrot.slane %v8130_v48, 5  ;;  %v3241_v14 = vshll.u32 %v8116_v32, 16  ;;  %3765 = vst.msk [vmem:[#allocation3 + $0xc8] sm:$0xf] %vm172_vm0, %v3664_v45  ;;  %v3247_v5 = vshll.u32 %v8141_v6, 16  ;;  %1300 = vrot.lane.b32.xlu1 %v1117_v59, %s6403_s30  ;;  %v1621_v21 = vpop.permute.xlu1 %1620 }
 0x17d   : > { %v8181_v27 = vld [vmem:[#allocation2 + $0x84] sm:$0xe]  ;;  %v3667_v50 = vsel %vm6471_vm9, %v3665_v17, %v3666_v23  ;;  %v3671_v54 = vsel %vm6471_vm9, %v5841_v22, %v3670_v12  ;;  %v3672_v40 = vrot.slane %v3670_v12, 4  ;;  %v8197_v28 = vrot.slane %v3238_v52, 4  ;;  %v3539_v37 = vld [vmem:[#allocation2 + $0x90] sm:$0xe] }
 0x17e   : > { %v3251_v55 = vshrl.u32 %v8141_v6, 16  ;;  %3766 = vst.msk [vmem:[#allocation3 + $0xd4] sm:$0xf] %vm172_vm0, %v3667_v50  ;;  %3767 = vst.msk [vmem:[#allocation3 + $0xe0] sm:$0xf] %vm172_vm0, %v3671_v54  ;;  %v5842_v26 = vrot.slane %v3539_v37, 9  ;;  %1638 = vrot.lane.b32.xlu0 %v8126_v46, %s6401_s18 }
 0x17f   : > { %v3540_v63 = vld [vmem:[#allocation2 + $0x94] sm:$0xf]  ;;  %1707 = vst.msk [vmem:[#allocation3 + $0x60] sm:$0xf] %vm1698_vm1, %v1619_v38  ;;  %v8205_v47 = vld [vmem:[#allocation2 + $0x7c] sm:$0xf]  ;;  %v3674_v61 = vsel %vm6471_vm9, %v3672_v40, %v3673_v3 }
 0x180   : > { %v3541_v1 = vld [vmem:[#allocation2 + $0x98] sm:$0x1]  ;;  %v3677_v51 = vrot.slane %v3540_v63, 5  ;;  %v3542_v43 = vld [vmem:[#allocation2 + $0x9c] sm:$0xe]  ;;  %vm4236_vm3 = vcmask 261120   ;;  %2666 = vrot.lane.b32.xlu1 %v2585_v30, %s6403_s30 }
 0x181   : > { %3508 = vst.msk [vmem:[#allocation3 + $0x178] sm:$0xf] %vm1891_vm2, %v3444_v11  ;;  %v8215_v41 = vrot.slane %v3241_v14, 5  ;;  %v3680_v60 = vrot.slane %v3541_v1, 5  ;;  %v3543_v32 = vld [vmem:[#allocation2 + $0xa0] sm:$0xf] }
 0x182   : > { %3768 = vst.msk [vmem:[#allocation3 + $0xec] sm:$0xf] %vm172_vm0, %v3674_v61  ;;  %v3544_v0 = vld [vmem:[#allocation2 + $0xa4] sm:$0x1]  ;;  %v2978_v62 = vld [vmem:[#allocation2 + $0x8c] sm:$0x1]  ;;  %v3678_v36 = vsel %vm6471_vm9, %v5842_v26, %v3677_v51 }
 0x183   : > { %v8219_v9 = vld [vmem:[#allocation2 + $0x78] sm:$0xe]  ;;  %v8221_v15 = vld [vmem:[#allocation2 + $0x80] sm:$0x1]  ;;  %v3679_v2 = vrot.slane %v3677_v51, 4  ;;  %v5843_v6 = vrot.slane %v3542_v43, 9  ;;  %v3244_v16 = vor.u32 %v8215_v41, %v8197_v28 }
 0x184   : > { %v3684_v29 = vrot.slane %v3543_v32, 5  ;;  %v5826_v20 = vrot.slane %v8181_v27, 9  ;;  %v8226_v8 = vrot.slane %v3247_v5, 5  ;;  %v3253_v52 = vrot.slane %v3251_v55, 4  ;;  %3769 = vst.msk [vmem:[#allocation3 + $0xf8] sm:$0xf] %vm172_vm0, %v3678_v36  ;;  %v1812_v5 = vpop.permute.xlu0 %1811  ;;  %v2840_v55 = vpop.permute.xlu1 %2839  ;;  %1640 = vrot.lane.b32.xlu1 %v8155_v44, %s6401_s18 }
 0x185   : > { %v3687_v25 = vrot.slane %v3544_v0, 5  ;;  %v777_v58 = vld [vmem:[#allocation2 + $0x54] sm:$0xf]  ;;  %2925 = vst.msk [vmem:[#allocation3 + $0x64] sm:$0xf] %vm1698_vm1, %v2838_v35  ;;  %v8230_v56 = vrot.slane %v3220_v18, 4  ;;  %v3681_v23 = vsel %vm6471_vm9, %v3679_v2, %v3680_v60 }
 0x186   : > { %v2775_v33 = vld [vmem:[#allocation2 + $0x84] sm:$0xf]  ;;  %v8232_v10 = vld [vmem:[#allocation2 + $0x8c] sm:$0x1]  ;;  %v3685_v57 = vsel %vm6471_vm9, %v5843_v6, %v3684_v29  ;;  %v3686_v34 = vrot.slane %v3684_v29, 4  ;;  %v8242_v22 = vrot.slane %v3230_v53, 4  ;;  %v3254_v59 = vor.u32 %v3253_v52, %v8226_v8 }
 0x187   : > { %809 = vst.msk [vmem:[#allocation3 + $0xa8] sm:$0xf] %vm172_vm0, %v777_v58  ;;  %v3233_v7 = vshll.u32 %v2978_v62, 16  ;;  %v8246_v45 = vrot.slane %v1138_v24, 5  ;;  %v1562_v17 = vrot.slane %v8205_v47, 5  ;;  %v8252_v14 = vrot.slane %v1135_v31, 4  ;;  %2857 = vrot.lane.b32.xlu0 %v2775_v33, %s6401_s18 }
 0x188   : > { %1708 = vst.msk [vmem:[#allocation3 + $0x6c] sm:$0xf] %vm1698_vm1, %v1621_v21  ;;  %v3545_v12 = vld [vmem:[#allocation2 + $0xa8] sm:$0xe]  ;;  %v6358_v3 = vld [vmem:[#allocation3 + $0x8] ss:$12 sps:$4 sm:$0xff]   ;;  %v3688_v24 = vsel %vm6471_vm9, %v3686_v34, %v3687_v25  ;;  %v3398_v60 = vpop.permute.xlu0 %3397  ;;  %v1814_v2 = vpop.permute.xlu1 %1813  ;;  %v3226_v35 = vsel %vm6548_vm14, %v8230_v56, %v8110_v39  ;;  %v1131_v25 = vsel %vm6548_vm14, %v8174_v4, %v8103_v13 }
 0x189   : > { %3770 = vst.msk [vmem:[#allocation3 + $0x104] sm:$0xf] %vm172_vm0, %v3681_v23  ;;  %3771 = vst.msk [vmem:[#allocation3 + $0x110] sm:$0xf] %vm172_vm0, %v3685_v57  ;;  %v8256_v46 = vrot.slane %v2588_v49, 4  ;;  %v3841_v50 = vld [vmem:[#allocation3 + $0x168] sm:$0xff] }
 0x18a   : > { %v2591_v54 = vrot.slane %v8232_v10, 5  ;;  %v5810_v40 = vrot.slane %v8219_v9, 9  ;;  %v1565_v38 = vrot.slane %v8221_v15, 5  ;;  %3772 = vst.msk [vmem:[#allocation3 + $0x11c] sm:$0xf] %vm172_vm0, %v3688_v24  ;;  %v3843_v28 = vld [vmem:[#allocation3 + $0x174] sm:$0xff] }
 0x18b   : > { %v3546_v30 = vld [vmem:[#allocation2 + $0xac] sm:$0xf]  ;;  %1900 = vst.msk [vmem:[#allocation3 + $0x60] sm:$0xf] %vm1891_vm2, %v1812_v5  ;;  %v6354_v37 = vld [vmem:[#allocation3 + $0x16c] ss:$12 sps:$4 sm:$0xff]   ;;  %v5894_v18 = vcombine.low %v3841_v50, %v3843_v28 }
 0x18c   : > { %v1749_v63 = vld [vmem:[#allocation2 + $0x78] sm:$0xf]  ;;  %v5844_v11 = vrot.slane %v3545_v12, 9  ;;  %2926 = vst.msk [vmem:[#allocation3 + $0x70] sm:$0xf] %vm1698_vm1, %v2840_v55  ;;  %v8270_v1 = vrot.slane %v3233_v7, 5  ;;  %4437 = vmatprep.mubr.bf16.mxu1 %v6354_v37  ;;  %v1283_v56 = vpop.permute.xlu0 %1282  ;;  %v3400_v5 = vpop.permute.xlu1 %3399 }
 0x18d   : > { %v2776_v61 = vld [vmem:[#allocation2 + $0x88] sm:$0xf]  ;;  %v8274_v26 = vrot.slane %v1562_v17, 4  ;;  %v2981_v51 = vld [vmem:[#allocation2 + $0x98] sm:$0x1]  ;;  %v8280_v53 = vrot.slane %v3244_v16, 4  ;;  %4438 = vmatmul.mubr.bf16.gmra.mxu1 %v5894_v18  ;;  %1831 = vrot.lane.b32.xlu0 %v1749_v63, %s6402_s23 }
 0x18e   : > { %v8276_v43 = vld [vmem:[#allocation2 + $0x84] sm:$0xf]  ;;  %v3547_v31 = vld [vmem:[#allocation2 + $0xb0] sm:$0x1]  ;;  %v3691_v41 = vrot.slane %v3546_v30, 5  ;;  %v8282_v32 = vrot.slane %v3254_v59, 4  ;;  %6261 = vmatprep.mubr.msk.bf16.mxu1 %vm4236_vm3, %v6358_v3  ;;  %2859 = vrot.lane.b32.xlu1 %v2776_v61, %s6401_s18  ;;  %v3236_v13 = vsel %vm6548_vm14, %v8242_v22, %v8270_v1 }
 0x18f   : > { %v3694_v0 = vrot.slane %v3547_v31, 5  ;;  %v778_v62 = vld [vmem:[#allocation2 + $0x58] sm:$0xf]  ;;  %v3548_v36 = vld [vmem:[#allocation2 + $0xb4] sm:$0xe]  ;;  %v3257_v58 = vshll.u32 %v2981_v51, 16 }
 0x190   : > { %3485 = vst.msk [vmem:[#allocation3 + $0x64] sm:$0xf] %vm1891_vm2, %v3398_v60  ;;  %v8286_v6 = vld [vmem:[#allocation2 + $0x88] sm:$0xf]  ;;  %v3692_v44 = vsel %vm6471_vm9, %v5844_v11, %v3691_v41  ;;  %1901 = vst.msk [vmem:[#allocation3 + $0x6c] sm:$0xf] %vm1891_vm2, %v1814_v2 }
 0x191   : > { %810 = vst.msk [vmem:[#allocation3 + $0xb4] sm:$0xf] %vm172_vm0, %v778_v62  ;;  %v1750_v29 = vld [vmem:[#allocation2 + $0x7c] sm:$0xf]  ;;  %v6359_v52 = vld [vmem:[#allocation3 + $0x20] ss:$12 sps:$4 sm:$0xff]   ;;  %3417 = vrot.lane.b32.xlu0 %v3226_v35, %s6402_s23 }
 0x192   : > { %v3693_v21 = vrot.slane %v3691_v41, 4  ;;  %3773 = vst.msk [vmem:[#allocation3 + $0x128] sm:$0xf] %vm172_vm0, %v3692_v44  ;;  %v3549_v33 = vld [vmem:[#allocation2 + $0xb8] sm:$0xf]  ;;  %v1143_v57 = vshrl.u32 %v8276_v43, 16  ;;  %1833 = vrot.lane.b32.xlu1 %v1750_v29, %s6402_s23  ;;  %v2649_v41 = vpop.permute.xlu0 %2648  ;;  %v1141_v44 = vsel %vm6548_vm14, %v8252_v14, %v8246_v45 }
 0x193   : > { %v3550_v23 = vld [vmem:[#allocation2 + $0xbc] sm:$0x1]  ;;  %v1146_v34 = vshll.u32 %v8276_v43, 16  ;;  %v5845_v7 = vrot.slane %v3548_v36, 9  ;;  %v3698_v39 = vrot.slane %v3549_v33, 5  ;;  %v1152_v4 = vshll.u32 %v8286_v6, 16 }
 0x194   : > { %v3695_v12 = vsel %vm6471_vm9, %v3693_v21, %v3694_v0  ;;  %v3701_v3 = vrot.slane %v3550_v23, 5  ;;  %v1945_v16 = vld [vmem:[#allocation2 + $0x60] sm:$0xf]  ;;  %v1946_v24 = vld [vmem:[#allocation2 + $0x64] sm:$0xf]  ;;  %v8318_v28 = vrot.slane %v3257_v58, 5  ;;  %v2589_v21 = vsel %vm6471_vm9, %v5826_v20, %v2588_v49 }
 0x195   : > { %1369 = vst.msk [vmem:[#allocation3 + $0x78] sm:$0xf] %vm1358_vm15, %v1283_v56  ;;  %v6362_v50 = vld [vmem:[#allocation3 + $0x38] ss:$12 sps:$4 sm:$0xff]   ;;  %v3699_v59 = vsel %vm6471_vm9, %v5845_v7, %v3698_v39  ;;  %v3700_v30 = vrot.slane %v3698_v39, 4  ;;  %v2141_v55 = vshrl.u32 %v1945_v16, 16  ;;  %6262 = vmatmul.mubr.msk.bf16.vlgmr.msra.gmra.mxu1 %vm4236_vm3, %v6359_v52  ;;  %1302 = vrot.lane.b32.xlu0 %v1131_v25, %s6403_s30 }
 0x196   : > { %3774 = vst.msk [vmem:[#allocation3 + $0x134] sm:$0xf] %vm172_vm0, %v3695_v12  ;;  %v2144_v22 = vshll.u32 %v1945_v16, 16  ;;  %v1156_v37 = vshrl.u32 %v8286_v6, 16  ;;  %3775 = vst.msk [vmem:[#allocation3 + $0x140] sm:$0xf] %vm172_vm0, %v3699_v59  ;;  %v1285_v6 = vpop.permute.xlu1 %1284  ;;  %6265 = vmatprep.mubr.msk.bf16.mxu1 %vm4236_vm3, %v6362_v50  ;;  %3419 = vrot.lane.b32.xlu1 %v3236_v13, %s6402_s23  ;;  %v1563_v59 = vsel %vm6471_vm9, %v5810_v40, %v1562_v17 }
 0x197   : > { %3486 = vst.msk [vmem:[#allocation3 + $0x70] sm:$0xf] %vm1891_vm2, %v3400_v5  ;;  %v2150_v63 = vshll.u32 %v1946_v24, 16  ;;  %v2154_v11 = vshrl.u32 %v1946_v24, 16  ;;  %v1947_v18 = vld [vmem:[#allocation2 + $0x68] sm:$0x1]  ;;  %v3702_v61 = vsel %vm6471_vm9, %v3700_v30, %v3701_v3  ;;  %v1623_v3 = vpop.permute.xlu0 %1622 }
 0x198   : > { %v2143_v1 = vrot.slane %v2141_v55, 4  ;;  %v2146_v51 = vrot.slane %v2144_v22, 5  ;;  %v2160_v43 = vshll.u32 %v1947_v18, 16  ;;  %v3551_v31 = vld [vmem:[#allocation2 + $0xc0] sm:$0xe]  ;;  %v8326_v60 = vrot.slane %v1143_v57, 4  ;;  %v6143_v18 = vpop.f32.mrf.mxu0 }
 0x199   : > { %v8328_v0 = vrot.slane %v1146_v34, 5  ;;  %3776 = vst.msk [vmem:[#allocation3 + $0x14c] sm:$0xf] %vm172_vm0, %v3702_v61  ;;  %v2152_v62 = vrot.slane %v2150_v63, 5  ;;  %v2156_v36 = vrot.slane %v2154_v11, 4  ;;  %v5846_v58 = vrot.slane %v3551_v31, 9  ;;  %2668 = vrot.lane.b32.xlu0 %v2589_v21, %s6403_s30 }
 0x19a   : > { %v3552_v2 = vld [vmem:[#allocation2 + $0xc4] sm:$0xf]  ;;  %2734 = vst.msk [vmem:[#allocation3 + $0x7c] sm:$0xf] %vm1358_vm15, %v2649_v41  ;;  %v2147_v29 = vor.u32 %v2146_v51, %v2143_v1  ;;  %v2162_v35 = vrot.slane %v2160_v43, 5  ;;  %v8346_v39 = vrot.slane %v1152_v4, 5  ;;  %v2651_v50 = vpop.permute.xlu1 %2650  ;;  %1304 = vrot.lane.b32.xlu1 %v1141_v44, %s6403_s30  ;;  %v2592_v11 = vsel %vm6471_vm9, %v8256_v46, %v2591_v54 }
 0x19b   : > { %v3553_v52 = vld [vmem:[#allocation2 + $0xc8] sm:$0x1]  ;;  %1370 = vst.msk [vmem:[#allocation3 + $0x84] sm:$0xf] %vm1358_vm15, %v1285_v6  ;;  %v2157_v23 = vor.u32 %v2156_v36, %v2152_v62  ;;  %v3705_v45 = vrot.slane %v3552_v2, 5  ;;  %v3797_v27 = vld [vmem:[#allocation3 + $0x60] sm:$0xff]  ;;  %v8385_v61 = vsel %vm6471_vm9, %v8274_v26, %v1565_v38  ;;  %v3250_v1 = vsel %vm6548_vm14, %v8280_v53, %v8226_v8  ;;  %v2842_v10 = vpop.permute.xlu0 %2841 }
 0x19c   : > { %v6363_v33 = vld [vmem:[#allocation3 + $0x50] ss:$12 sps:$4 sm:$0xff]   ;;  %v3708_v14 = vrot.slane %v3553_v52, 5  ;;  %v3554_v57 = vld [vmem:[#allocation2 + $0xcc] sm:$0xe]  ;;  %v2148_v56 = vrot.slane %v2147_v29, 4  ;;  %v3260_v46 = vsel %vm6548_vm14, %v8282_v32, %v8318_v28 }
 0x19d   : > { %v3555_v34 = vld [vmem:[#allocation2 + $0xd0] sm:$0xf]  ;;  %v6364_v7 = vld [vmem:[#allocation3 + $0x68] ss:$12 sps:$4 sm:$0xff]   ;;  %v3556_v25 = vld [vmem:[#allocation2 + $0xd4] sm:$0x1]  ;;  %v3706_v24 = vsel %vm6471_vm9, %v5846_v58, %v3705_v45  ;;  %6266 = vmatmul.mubr.msk.bf16.gmra.mxu1 %vm4236_vm3, %v6363_v33  ;;  %1642 = vrot.lane.b32.xlu0 %v1563_v59, %s6401_s18  ;;  %v1149_v33 = vor.u32 %v8328_v0, %v8326_v60 }
 0x19e   : > { %v5847_v12 = vrot.slane %v3554_v57, 9  ;;  %v3712_v48 = vrot.slane %v3555_v34, 5  ;;  %v8348_v16 = vld [vmem:[#allocation2 + $0x8c] sm:$0x1]  ;;  %v8350_v49 = vrot.slane %v1156_v37, 4  ;;  %v2158_v20 = vrot.slane %v2157_v23, 4  ;;  %v1625_v41 = vpop.permute.xlu1 %1624  ;;  %6269 = vmatprep.mubr.msk.bf16.mxu1 %vm4236_vm3, %v6364_v7  ;;  %2670 = vrot.lane.b32.xlu1 %v2592_v11, %s6403_s30 }
 0x19f   : > { %v3707_v5 = vrot.slane %v3705_v45, 4  ;;  %1709 = vst.msk [vmem:[#allocation3 + $0x78] sm:$0xf] %vm1698_vm1, %v1623_v3  ;;  %v3799_v13 = vld [vmem:[#allocation3 + $0x6c] sm:$0xff]  ;;  %v2153_v30 = vsel %vm6548_vm14, %v2148_v56, %v2152_v62  ;;  %v3715_v17 = vrot.slane %v3556_v25, 5  ;;  %v6144_v62 = vpop.f32.mrf.mxu0  ;;  %v1162_v2 = vshll.u32 %v8348_v16, 16 }
 0x1a0   : > { %v6360_v4 = vld [vmem:[#allocation3 + $0x64] ss:$12 sps:$4 sm:$0xff]   ;;  %3777 = vst.msk [vmem:[#allocation3 + $0x158] sm:$0xf] %vm172_vm0, %v3706_v24  ;;  %v3713_v55 = vsel %vm6471_vm9, %v5847_v12, %v3712_v48  ;;  %v3714_v22 = vrot.slane %v3712_v48, 4  ;;  %v5861_v37 = vcombine.low %v3797_v27, %v3799_v13  ;;  %v2163_v47 = vsel %vm6548_vm14, %v2158_v20, %v2162_v35  ;;  %v1816_v27 = vpop.permute.xlu0 %1815 }
 0x1a1   : > { %2735 = vst.msk [vmem:[#allocation3 + $0x88] sm:$0xf] %vm1358_vm15, %v2651_v50  ;;  %v3709_v9 = vsel %vm6471_vm9, %v3707_v5, %v3708_v14  ;;  %v779_v40 = vld [vmem:[#allocation2 + $0x60] sm:$0xf]  ;;  %v780_v63 = vld [vmem:[#allocation2 + $0x64] sm:$0xf]  ;;  %4349 = vmatprep.mubr.bf16.mxu0 %v6360_v4  ;;  %v8412_v58 = vadd.f32 %v6144_v62, %v6143_v18  ;;  %v6146_v34 = vpop.f32.mrf.mxu0  ;;  %v1159_v13 = vor.u32 %v8350_v49, %v8346_v39 }
 0x1a2   : > { %2402 = vst.msk [vmem:[#allocation3 + $0xac] sm:$0xf] %vm172_vm0, %v2153_v30  ;;  %3779 = vst.msk [vmem:[#allocation3 + $0x170] sm:$0xf] %vm172_vm0, %v3713_v55  ;;  %v8391_v51 = vld [vmem:[#allocation2 + $0x90] sm:$0xe]  ;;  %4350 = vmatmul.mubr.bf16.gmra.mxu0 %v5861_v37  ;;  %v3716_v54 = vsel %vm6471_vm9, %v3714_v22, %v3715_v17  ;;  %v2844_v24 = vpop.permute.xlu1 %2843  ;;  %1644 = vrot.lane.b32.xlu1 %v8385_v61, %s6401_s18 }
 0x1a3   : > { %2403 = vst.msk [vmem:[#allocation3 + $0xb8] sm:$0xf] %vm172_vm0, %v2163_v47  ;;  %3778 = vst.msk [vmem:[#allocation3 + $0x164] sm:$0xf] %vm172_vm0, %v3709_v9  ;;  %v1948_v15 = vld [vmem:[#allocation2 + $0x6c] sm:$0xf]  ;;  %v6147_v5 = vpop.f32.mrf.mxu0 }
 0x1a4   : > { %811 = vst.msk [vmem:[#allocation3 + $0xc0] sm:$0xf] %vm172_vm0, %v779_v40  ;;  %812 = vst.msk [vmem:[#allocation3 + $0xcc] sm:$0xf] %vm172_vm0, %v780_v63  ;;  %v1949_v38 = vld [vmem:[#allocation2 + $0x70] sm:$0xf]  ;;  %v8425_v37 = vadd.f32 %v6147_v5, %v6146_v34 }
 0x1a5   : > { %v2165_v26 = vshrl.u32 %v1948_v15, 16  ;;  %v2168_v43 = vshll.u32 %v1948_v15, 16  ;;  %v1950_v31 = vld [vmem:[#allocation2 + $0x74] sm:$0x1]  ;;  %2927 = vst.msk [vmem:[#allocation3 + $0x7c] sm:$0xf] %vm1698_vm1, %v2842_v10  ;;  %v3402_v15 = vpop.permute.xlu0 %3401 }
 0x1a6   : > { %v2777_v36 = vld [vmem:[#allocation2 + $0x90] sm:$0xf]  ;;  %v8407_v6 = vld [vmem:[#allocation2 + $0x94] sm:$0xf]  ;;  %3780 = vst.msk [vmem:[#allocation3 + $0x17c] sm:$0xf] %vm172_vm0, %v3716_v54  ;;  %v1818_v61 = vpop.permute.xlu1 %1817 }
 0x1a7   : > { %v2174_v44 = vshll.u32 %v1949_v38, 16  ;;  %v2178_v29 = vshrl.u32 %v1949_v38, 16  ;;  %v2184_v35 = vshll.u32 %v1950_v31, 16  ;;  %v781_v52 = vld [vmem:[#allocation2 + $0x6c] sm:$0xf]  ;;  %v2167_v23 = vrot.slane %v2165_v26, 4  ;;  %2861 = vrot.lane.b32.xlu0 %v2777_v36, %s6401_s18 }
 0x1a8   : > { %1710 = vst.msk [vmem:[#allocation3 + $0x84] sm:$0xf] %vm1698_vm1, %v1625_v41  ;;  %v6365_v21 = vld [vmem:[#allocation3 + $0x80] ss:$12 sps:$4 sm:$0xff]   ;;  %v2170_v45 = vrot.slane %v2168_v43, 5  ;;  %v5827_v56 = vrot.slane %v8391_v51, 9 }
 0x1a9   : > { %813 = vst.msk [vmem:[#allocation3 + $0xd8] sm:$0xf] %vm172_vm0, %v781_v52  ;;  %v782_v14 = vld [vmem:[#allocation2 + $0x70] sm:$0xf]  ;;  %v1951_v57 = vld [vmem:[#allocation2 + $0x78] sm:$0xf]  ;;  %6270 = vmatmul.mubr.msk.bf16.gmra.mxu1 %vm4236_vm3, %v6365_v21 }
 0x1aa   : > { %v6366_v7 = vld [vmem:[#allocation3 + $0x98] ss:$12 sps:$4 sm:$0xff]   ;;  %v2176_v25 = vrot.slane %v2174_v44, 5  ;;  %v2180_v12 = vrot.slane %v2178_v29, 4  ;;  %814 = vst.msk [vmem:[#allocation3 + $0xe4] sm:$0xf] %vm172_vm0, %v782_v14  ;;  %v2171_v60 = vor.u32 %v2170_v45, %v2167_v23 }
 0x1ab   : > { %v1952_v48 = vld [vmem:[#allocation2 + $0x7c] sm:$0xf]  ;;  %v2189_v3 = vshrl.u32 %v1951_v57, 16  ;;  %v2192_v0 = vshll.u32 %v1951_v57, 16  ;;  %1902 = vst.msk [vmem:[#allocation3 + $0x78] sm:$0xf] %vm1891_vm2, %v1816_v27  ;;  %6273 = vmatprep.mubr.msk.bf16.mxu1 %vm4236_vm3, %v6366_v7 }
 0x1ac   : > { %v2198_v16 = vshll.u32 %v1952_v48, 16  ;;  %v2202_v20 = vshrl.u32 %v1952_v48, 16  ;;  %v1751_v50 = vld [vmem:[#allocation2 + $0x84] sm:$0xf]  ;;  %v2181_v4 = vor.u32 %v2180_v12, %v2176_v25  ;;  %v2186_v59 = vrot.slane %v2184_v35, 5  ;;  %v1287_v12 = vpop.permute.xlu0 %1286 }
 0x1ad   : > { %v2191_v30 = vrot.slane %v2189_v3, 4  ;;  %v1953_v55 = vld [vmem:[#allocation2 + $0x80] sm:$0x1]  ;;  %2928 = vst.msk [vmem:[#allocation3 + $0x88] sm:$0xf] %vm1698_vm1, %v2844_v24  ;;  %v2595_v47 = vrot.slane %v8407_v6, 5  ;;  %1835 = vrot.lane.b32.xlu0 %v1751_v50, %s6402_s23 }
 0x1ae   : > { %v2778_v22 = vld [vmem:[#allocation2 + $0x94] sm:$0xf]  ;;  %v2172_v9 = vrot.slane %v2171_v60, 4  ;;  %v2194_v17 = vrot.slane %v2192_v0, 5  ;;  %v2182_v40 = vrot.slane %v2181_v4, 4  ;;  %v2200_v49 = vrot.slane %v2198_v16, 5  ;;  %v3404_v16 = vpop.permute.xlu1 %3403 }
 0x1af   : > { %v2204_v63 = vrot.slane %v2202_v20, 4  ;;  %v2208_v11 = vshll.u32 %v1953_v55, 16  ;;  %v783_v18 = vld [vmem:[#allocation2 + $0x78] sm:$0xf]  ;;  %v8431_v10 = vrot.slane %v1149_v33, 4  ;;  %v8433_v54 = vrot.slane %v1162_v2, 5  ;;  %2863 = vrot.lane.b32.xlu1 %v2778_v22, %s6401_s18 }
 0x1b0   : > { %v2177_v38 = vsel %vm6548_vm14, %v2172_v9, %v2176_v25  ;;  %v2195_v26 = vor.u32 %v2194_v17, %v2191_v30  ;;  %815 = vst.msk [vmem:[#allocation3 + $0xf0] sm:$0xf] %vm172_vm0, %v783_v18  ;;  %v784_v43 = vld [vmem:[#allocation2 + $0x7c] sm:$0xf]  ;;  %v8440_v31 = vrot.slane %v1159_v13, 4  ;;  %v2187_v41 = vsel %vm6548_vm14, %v2182_v40, %v2186_v59 }
 0x1b1   : > { %3487 = vst.msk [vmem:[#allocation3 + $0x7c] sm:$0xf] %vm1891_vm2, %v3402_v15  ;;  %v2205_v62 = vor.u32 %v2204_v63, %v2200_v49  ;;  %v2210_v36 = vrot.slane %v2208_v11, 5  ;;  %v1954_v2 = vld [vmem:[#allocation2 + $0x84] sm:$0xf]  ;;  %v8454_v45 = vsel %vm6471_vm9, %v5827_v56, %v2595_v47  ;;  %v1155_v20 = vsel %vm6548_vm14, %v8431_v10, %v8346_v39  ;;  %3421 = vrot.lane.b32.xlu0 %v3250_v1, %s6402_s23  ;;  %v2653_v11 = vpop.permute.xlu0 %2652 }
 0x1b2   : > { %2404 = vst.msk [vmem:[#allocation3 + $0xc4] sm:$0xf] %vm172_vm0, %v2177_v38  ;;  %816 = vst.msk [vmem:[#allocation3 + $0xfc] sm:$0xf] %vm172_vm0, %v784_v43  ;;  %v1955_v6 = vld [vmem:[#allocation2 + $0x88] sm:$0xf]  ;;  %v1289_v15 = vpop.permute.xlu1 %1288 }
 0x1b3   : > { %1903 = vst.msk [vmem:[#allocation3 + $0x84] sm:$0xf] %vm1891_vm2, %v1818_v61  ;;  %v1752_v44 = vld [vmem:[#allocation2 + $0x88] sm:$0xf]  ;;  %v2196_v35 = vrot.slane %v2195_v26, 4  ;;  %v2213_v52 = vshrl.u32 %v1954_v2, 16 }
 0x1b4   : > { %v6367_v29 = vld [vmem:[#allocation3 + $0xb0] ss:$12 sps:$4 sm:$0xff]   ;;  %2405 = vst.msk [vmem:[#allocation3 + $0xd0] sm:$0xf] %vm172_vm0, %v2187_v41  ;;  %v2216_v21 = vshll.u32 %v1954_v2, 16  ;;  %v2222_v33 = vshll.u32 %v1955_v6, 16  ;;  %1837 = vrot.lane.b32.xlu1 %v1752_v44, %s6402_s23 }
 0x1b5   : > { %v1956_v23 = vld [vmem:[#allocation2 + $0x8c] sm:$0x1]  ;;  %v2206_v57 = vrot.slane %v2205_v62, 4  ;;  %v2226_v34 = vshrl.u32 %v1955_v6, 16  ;;  %v785_v25 = vld [vmem:[#allocation2 + $0x84] sm:$0xf]  ;;  %v2201_v27 = vsel %vm6548_vm14, %v2196_v35, %v2200_v49  ;;  %6274 = vmatmul.mubr.msk.bf16.gmra.mxu1 %vm4236_vm3, %v6367_v29  ;;  %1306 = vrot.lane.b32.xlu0 %v1155_v20, %s6403_s30 }
 0x1b6   : > { %v6370_v14 = vld [vmem:[#allocation3 + $0xc8] ss:$12 sps:$4 sm:$0xff]   ;;  %v2232_v7 = vshll.u32 %v1956_v23, 16  ;;  %v8456_v48 = vld [vmem:[#allocation2 + $0x98] sm:$0x1]  ;;  %v2215_v60 = vrot.slane %v2213_v52, 4  ;;  %v2655_v28 = vpop.permute.xlu1 %2654 }
 0x1b7   : > { %v8458_v3 = vld [vmem:[#allocation2 + $0x84] sm:$0xe]  ;;  %v2218_v0 = vrot.slane %v2216_v21, 5  ;;  %v2224_v51 = vrot.slane %v2222_v33, 5  ;;  %817 = vst.msk [vmem:[#allocation3 + $0x108] sm:$0xf] %vm172_vm0, %v785_v25  ;;  %v2211_v50 = vsel %vm6548_vm14, %v2206_v57, %v2210_v36  ;;  %6277 = vmatprep.mubr.msk.bf16.mxu1 %vm4236_vm3, %v6370_v14  ;;  %v1627_v21 = vpop.permute.xlu0 %1626  ;;  %v1165_v33 = vsel %vm6548_vm14, %v8440_v31, %v8433_v54 }
 0x1b8   : > { %v786_v56 = vld [vmem:[#allocation2 + $0x88] sm:$0xf]  ;;  %1371 = vst.msk [vmem:[#allocation3 + $0x90] sm:$0xf] %vm1358_vm15, %v1287_v12  ;;  %v8468_v24 = vrot.slane %v2595_v47, 4  ;;  %v2228_v13 = vrot.slane %v2226_v34, 4  ;;  %3423 = vrot.lane.b32.xlu1 %v3260_v46, %s6402_s23 }
 0x1b9   : > { %v8470_v5 = vld [vmem:[#allocation2 + $0x88] sm:$0xf]  ;;  %2406 = vst.msk [vmem:[#allocation3 + $0xdc] sm:$0xf] %vm172_vm0, %v2201_v27  ;;  %818 = vst.msk [vmem:[#allocation3 + $0x114] sm:$0xf] %vm172_vm0, %v786_v56  ;;  %v2219_v39 = vor.u32 %v2218_v0, %v2215_v60  ;;  %2672 = vrot.lane.b32.xlu0 %v8454_v45, %s6403_s30 }
 0x1ba   : > { %v1957_v4 = vld [vmem:[#allocation2 + $0x90] sm:$0xf]  ;;  %v1958_v59 = vld [vmem:[#allocation2 + $0x94] sm:$0xf]  ;;  %3488 = vst.msk [vmem:[#allocation3 + $0x88] sm:$0xf] %vm1891_vm2, %v3404_v16  ;;  %v2229_v17 = vor.u32 %v2228_v13, %v2224_v51  ;;  %v1629_v16 = vpop.permute.xlu1 %1628 }
 0x1bb   : > { %2407 = vst.msk [vmem:[#allocation3 + $0xe8] sm:$0xf] %vm172_vm0, %v2211_v50  ;;  %v2237_v30 = vshrl.u32 %v1957_v4, 16  ;;  %v2240_v55 = vshll.u32 %v1957_v4, 16  ;;  %v2246_v22 = vshll.u32 %v1958_v59, 16  ;;  %v2234_v40 = vrot.slane %v2232_v7, 5  ;;  %v2846_v27 = vpop.permute.xlu0 %2845 }
 0x1bc   : > { %v1959_v47 = vld [vmem:[#allocation2 + $0x98] sm:$0x1]  ;;  %v2982_v9 = vld [vmem:[#allocation2 + $0x9c] sm:$0xf]  ;;  %v2250_v49 = vshrl.u32 %v1958_v59, 16  ;;  %v2220_v18 = vrot.slane %v2219_v39, 4  ;;  %1308 = vrot.lane.b32.xlu1 %v1165_v33, %s6403_s30 }
 0x1bd   : > { %v2256_v63 = vshll.u32 %v1959_v47, 16  ;;  %v2239_v8 = vrot.slane %v2237_v30, 4  ;;  %v2242_v53 = vrot.slane %v2240_v55, 5  ;;  %v2248_v1 = vrot.slane %v2246_v22, 5  ;;  %2736 = vst.msk [vmem:[#allocation3 + $0x94] sm:$0xf] %vm1358_vm15, %v2653_v11 }
 0x1be   : > { %v2598_v10 = vrot.slane %v8456_v48, 5  ;;  %v5811_v38 = vrot.slane %v8458_v3, 9  ;;  %v2230_v26 = vrot.slane %v2229_v17, 4  ;;  %v2252_v43 = vrot.slane %v2250_v49, 4  ;;  %1372 = vst.msk [vmem:[#allocation3 + $0x9c] sm:$0xf] %vm1358_vm15, %v1289_v15  ;;  %v2848_v39 = vpop.permute.xlu1 %2847 }
 0x1bf   : > { %v1569_v61 = vrot.slane %v8470_v5, 5  ;;  %v3262_v41 = vshrl.u32 %v2982_v9, 16  ;;  %v2225_v62 = vsel %vm6548_vm14, %v2220_v18, %v2224_v51  ;;  %v2243_v36 = vor.u32 %v2242_v53, %v2239_v8  ;;  %v1426_v2 = vld [vmem:[#allocation2 + $0x8c] sm:$0x1]  ;;  %v2983_v6 = vld [vmem:[#allocation2 + $0xa0] sm:$0xf]  ;;  %v1820_v5 = vpop.permute.xlu0 %1819 }
 0x1c0   : > { %v3265_v44 = vshll.u32 %v2982_v9, 16  ;;  %2408 = vst.msk [vmem:[#allocation3 + $0xf4] sm:$0xf] %vm172_vm0, %v2225_v62  ;;  %v2235_v29 = vsel %vm6548_vm14, %v2230_v26, %v2234_v40  ;;  %v2253_v35 = vor.u32 %v2252_v43, %v2248_v1  ;;  %v2258_v52 = vrot.slane %v2256_v63, 5  ;;  %v6371_v23 = vld [vmem:[#allocation3 + $0xe0] ss:$12 sps:$4 sm:$0xff]   ;;  %v6215_v9 = vpop.f32.mrf.mxu1 }
 0x1c1   : > { %v6372_v14 = vld [vmem:[#allocation3 + $0xf8] ss:$12 sps:$4 sm:$0xff]   ;;  %2409 = vst.msk [vmem:[#allocation3 + $0x100] sm:$0xf] %vm172_vm0, %v2235_v29  ;;  %v2244_v32 = vrot.slane %v2243_v36, 4  ;;  %v2599_v54 = vsel %vm6471_vm9, %v8468_v24, %v2598_v10  ;;  %v1570_v12 = vsel %vm6471_vm9, %v5811_v38, %v1569_v61  ;;  %v3264_v48 = vrot.slane %v3262_v41, 4  ;;  %6278 = vmatmul.mubr.msk.bf16.gmra.mxu1 %vm4236_vm3, %v6371_v23  ;;  %v6149_v23 = vpop.f32.mrf.mxu0 }
 0x1c2   : > { %1711 = vst.msk [vmem:[#allocation3 + $0x90] sm:$0xf] %vm1698_vm1, %v1627_v21  ;;  %v3801_v46 = vld [vmem:[#allocation3 + $0x78] sm:$0xff]  ;;  %v3803_v57 = vld [vmem:[#allocation3 + $0x84] sm:$0xff]  ;;  %v2254_v7 = vrot.slane %v2253_v35, 4  ;;  %v3267_v3 = vrot.slane %v3265_v44, 5  ;;  %6281 = vmatprep.mubr.msk.bf16.mxu1 %vm4236_vm3, %v6372_v14  ;;  %1646 = vrot.lane.b32.xlu0 %v1570_v12, %s6401_s18  ;;  %v1822_v63 = vpop.permute.xlu1 %1821  ;;  %v6216_v11 = vpop.f32.mrf.mxu1 }
 0x1c3   : > { %v6368_v34 = vld [vmem:[#allocation3 + $0x7c] ss:$12 sps:$4 sm:$0xff]   ;;  %2737 = vst.msk [vmem:[#allocation3 + $0xa0] sm:$0xf] %vm1358_vm15, %v2655_v28  ;;  %v5864_v25 = vcombine.low %v3801_v46, %v3803_v57  ;;  %v2249_v31 = vsel %vm6548_vm14, %v2244_v32, %v2248_v1  ;;  %v1571_v60 = vrot.slane %v1569_v61, 4  ;;  %v1572_v0 = vrot.slane %v1426_v2, 5  ;;  %2674 = vrot.lane.b32.xlu1 %v2599_v54, %s6403_s30  ;;  %v3406_v19 = vpop.permute.xlu0 %3405  ;;  %v6150_v28 = vpop.f32.mrf.mxu0 }
 0x1c4   : > { %4357 = vmatprep.mubr.bf16.mxu0 %v6368_v34  ;;  %2410 = vst.msk [vmem:[#allocation3 + $0x10c] sm:$0xf] %vm172_vm0, %v2249_v31  ;;  %v2259_v45 = vsel %vm6548_vm14, %v2254_v7, %v2258_v52  ;;  %v3271_v51 = vshll.u32 %v2983_v6, 16  ;;  %v3275_v56 = vshrl.u32 %v2983_v6, 16  ;;  %v2779_v20 = vld [vmem:[#allocation2 + $0x9c] sm:$0xf]  ;;  %v3268_v24 = vor.u32 %v3267_v3, %v3264_v48  ;;  %v6218_v53 = vpop.f32.mrf.mxu1 }
 0x1c5   : > { %4358 = vmatmul.mubr.bf16.gmra.mxu0 %v5864_v25  ;;  %2411 = vst.msk [vmem:[#allocation3 + $0x118] sm:$0xf] %vm172_vm0, %v2259_v45  ;;  %v1573_v50 = vsel %vm6471_vm9, %v1571_v60, %v1572_v0  ;;  %v6373_v13 = vld [vmem:[#allocation3 + $0x110] ss:$12 sps:$4 sm:$0xff]   ;;  %v6374_v30 = vld [vmem:[#allocation3 + $0x128] ss:$12 sps:$4 sm:$0xff]   ;;  %v8543_v18 = vadd.f32 %v6216_v11, %v6215_v9  ;;  %v8565_v46 = vadd.f32 %v6150_v28, %v6149_v23  ;;  %v6152_v57 = vpop.f32.mrf.mxu0 }
 0x1c6   : > { %2929 = vst.msk [vmem:[#allocation3 + $0x94] sm:$0xf] %vm1698_vm1, %v2846_v27  ;;  %1712 = vst.msk [vmem:[#allocation3 + $0x9c] sm:$0xf] %vm1698_vm1, %v1629_v16  ;;  %v3273_v4 = vrot.slane %v3271_v51, 5  ;;  %v3277_v59 = vrot.slane %v3275_v56, 4  ;;  %2865 = vrot.lane.b32.xlu0 %v2779_v20, %s6401_s18  ;;  %v3408_v43 = vpop.permute.xlu1 %3407  ;;  %v6219_v41 = vpop.f32.mrf.mxu1 }
 0x1c7   : > { %1904 = vst.msk [vmem:[#allocation3 + $0x90] sm:$0xf] %vm1891_vm2, %v1820_v5  ;;  %v2984_v55 = vld [vmem:[#allocation2 + $0xa4] sm:$0x1]  ;;  %1648 = vrot.lane.b32.xlu1 %v1573_v50, %s6401_s18  ;;  %v1753_v22 = vld [vmem:[#allocation2 + $0x90] sm:$0xf]  ;;  %v1291_v1 = vpop.permute.xlu0 %1290  ;;  %v8551_v62 = vadd.f32 %v6219_v41, %v6218_v53  ;;  %v6153_v25 = vpop.f32.mrf.mxu0 }
 0x1c8   : > { %2930 = vst.msk [vmem:[#allocation3 + $0xa0] sm:$0xf] %vm1698_vm1, %v2848_v39  ;;  %v3269_v47 = vrot.slane %v3268_v24, 4  ;;  %v2780_v17 = vld [vmem:[#allocation2 + $0xa0] sm:$0xf]  ;;  %v3278_v40 = vor.u32 %v3277_v59, %v3273_v4  ;;  %v3281_v49 = vshll.u32 %v2984_v55, 16  ;;  %v8569_v54 = vadd.f32 %v6153_v25, %v6152_v57 }
 0x1c9   : > { %6282 = vmatmul.mubr.msk.bf16.gmra.mxu1 %vm4236_vm3, %v6373_v13  ;;  %3489 = vst.msk [vmem:[#allocation3 + $0x94] sm:$0xf] %vm1891_vm2, %v3406_v19  ;;  %1905 = vst.msk [vmem:[#allocation3 + $0x9c] sm:$0xf] %vm1891_vm2, %v1822_v63  ;;  %v1754_v15 = vld [vmem:[#allocation2 + $0x94] sm:$0xf] }
 0x1ca   : > { %6285 = vmatprep.mubr.msk.bf16.mxu1 %vm4236_vm3, %v6374_v30  ;;  %1839 = vrot.lane.b32.xlu0 %v1753_v22, %s6402_s23  ;;  %v3274_v8 = vsel %vm6548_vm14, %v3269_v47, %v3273_v4  ;;  %v6375_v10 = vld [vmem:[#allocation3 + $0x140] ss:$12 sps:$4 sm:$0xff]   ;;  %v3279_v38 = vrot.slane %v3278_v40, 4  ;;  %v3283_v26 = vrot.slane %v3281_v49, 5  ;;  %1373 = vst.msk [vmem:[#allocation3 + $0xa8] sm:$0xf] %vm1358_vm15, %v1291_v1  ;;  %v1293_v6 = vpop.permute.xlu1 %1292 }
 0x1cb   : > { %2867 = vrot.lane.b32.xlu1 %v2780_v17, %s6401_s18  ;;  %v6378_v61 = vld [vmem:[#allocation3 + $0x158] ss:$12 sps:$4 sm:$0xff]   ;;  %3490 = vst.msk [vmem:[#allocation3 + $0xa0] sm:$0xf] %vm1891_vm2, %v3408_v43  ;;  %v2657_v36 = vpop.permute.xlu0 %2656  ;;  %v6379_v29 = vld [vmem:[#allocation3 + $0x170] ss:$12 sps:$4 sm:$0xff]  }
 0x1cc   : > { %v3284_v2 = vsel %vm6548_vm14, %v3279_v38, %v3283_v26  ;;  %2738 = vst.msk [vmem:[#allocation3 + $0xac] sm:$0xf] %vm1358_vm15, %v2657_v36  ;;  %1374 = vst.msk [vmem:[#allocation3 + $0xb4] sm:$0xf] %vm1358_vm15, %v1293_v6  ;;  %vm5360_vm0 = vcmask 1041409   ;;  %vm5375_vm8 = vcmask 1046534  }
 0x1cd   : > { %vm5378_vm9 = vcmask 1047559   ;;  %vm5382_vm10 = vcmask 519168   ;;  %vm5434_vm11 = vcmask 1043968  }
 0x1ce   : > { %3425 = vrot.lane.b32.xlu0 %v3274_v8, %s6402_s23  ;;  %v2659_v35 = vpop.permute.xlu1 %2658 }
 0x1cf   : > { %1841 = vrot.lane.b32.xlu1 %v1754_v15, %s6402_s23  ;;  %v1631_v44 = vpop.permute.xlu0 %1630  ;;  %2739 = vst.msk [vmem:[#allocation3 + $0xb8] sm:$0xf] %vm1358_vm15, %v2659_v35 }
 0x1d0   : > { %1713 = vst.msk [vmem:[#allocation3 + $0xa8] sm:$0xf] %vm1698_vm1, %v1631_v44  ;;  %v3805_v52 = vld [vmem:[#allocation3 + $0x90] sm:$0xff] }
 0x1d1   : > { %6286 = vmatmul.mubr.msk.bf16.gmra.mxu1 %vm4236_vm3, %v6375_v10 }
 0x1d2   : > { %6289 = vmatprep.mubr.msk.bf16.mxu1 %vm4236_vm3, %v6378_v61  ;;  %v3807_v21 = vld [vmem:[#allocation3 + $0x9c] sm:$0xff]  ;;  %v1633_v32 = vpop.permute.xlu1 %1632 }
 0x1d3   : > { %3427 = vrot.lane.b32.xlu1 %v3284_v2, %s6402_s23  ;;  %v6376_v33 = vld [vmem:[#allocation3 + $0x94] ss:$12 sps:$4 sm:$0xff]   ;;  %v5867_v42 = vcombine.low %v3805_v52, %v3807_v21  ;;  %v2850_v14 = vpop.permute.xlu0 %2849  ;;  %1714 = vst.msk [vmem:[#allocation3 + $0xb4] sm:$0xf] %vm1698_vm1, %v1633_v32 }
 0x1d4   : > { %4365 = vmatprep.mubr.bf16.mxu0 %v6376_v33  ;;  %2931 = vst.msk [vmem:[#allocation3 + $0xac] sm:$0xf] %vm1698_vm1, %v2850_v14 }
 0x1d5   : > { %4366 = vmatmul.mubr.bf16.gmra.mxu0 %v5867_v42 }
 0x1d6   : > { %v2852_v7 = vpop.permute.xlu1 %2851  ;;  %v6221_v4 = vpop.f32.mrf.mxu1 }
 0x1d7   : > { %v1824_v34 = vpop.permute.xlu0 %1823  ;;  %2932 = vst.msk [vmem:[#allocation3 + $0xb8] sm:$0xf] %vm1698_vm1, %v2852_v7 }
 0x1d8   : > { %1906 = vst.msk [vmem:[#allocation3 + $0xa8] sm:$0xf] %vm1891_vm2, %v1824_v34  ;;  %v6222_v30 = vpop.f32.mrf.mxu1 }
 0x1d9   : > { %6290 = vmatmul.mubr.msk.bf16.gmra.mxu1 %vm4236_vm3, %v6379_v29  ;;  %v8585_v55 = vadd.f32 %v6222_v30, %v6221_v4 }
 0x1da   : > { %v1826_v12 = vpop.permute.xlu1 %1825  ;;  %v6224_v22 = vpop.f32.mrf.mxu1 }
 0x1db   : > { %v3410_v31 = vpop.permute.xlu0 %3409  ;;  %1907 = vst.msk [vmem:[#allocation3 + $0xb4] sm:$0xf] %vm1891_vm2, %v1826_v12 }
 0x1dc   : > { %3491 = vst.msk [vmem:[#allocation3 + $0xac] sm:$0xf] %vm1891_vm2, %v3410_v31  ;;  %v6225_v19 = vpop.f32.mrf.mxu1 }
 0x1dd   : > { %v8589_v17 = vadd.f32 %v6225_v19, %v6224_v22 }
 0x1de   : > { %v3412_v3 = vpop.permute.xlu1 %3411 }
 0x1df   : > { %v1295_v48 = vpop.permute.xlu0 %1294  ;;  %3492 = vst.msk [vmem:[#allocation3 + $0xb8] sm:$0xf] %vm1891_vm2, %v3412_v3 }
 0x1e0   : > { %1375 = vst.msk [vmem:[#allocation3 + $0xc0] sm:$0xf] %vm1358_vm15, %v1295_v48 }
 0x1e2   : > { %v1297_v27 = vpop.permute.xlu1 %1296 }
 0x1e3   : > { %v2661_v45 = vpop.permute.xlu0 %2660  ;;  %1376 = vst.msk [vmem:[#allocation3 + $0xcc] sm:$0xf] %vm1358_vm15, %v1297_v27  ;;  %v3809_v51 = vld [vmem:[#allocation3 + $0xa8] sm:$0xff] }
 0x1e4   : > { %2740 = vst.msk [vmem:[#allocation3 + $0xc4] sm:$0xf] %vm1358_vm15, %v2661_v45 }
 0x1e6   : > { %v2663_v0 = vpop.permute.xlu1 %2662  ;;  %v3811_v56 = vld [vmem:[#allocation3 + $0xb4] sm:$0xff] }
 0x1e7   : > { %v1635_v60 = vpop.permute.xlu0 %1634  ;;  %v6380_v16 = vld [vmem:[#allocation3 + $0xac] ss:$12 sps:$4 sm:$0xff]   ;;  %2741 = vst.msk [vmem:[#allocation3 + $0xd0] sm:$0xf] %vm1358_vm15, %v2663_v0  ;;  %v5870_v20 = vcombine.low %v3809_v51, %v3811_v56 }
 0x1e8   : > { %1715 = vst.msk [vmem:[#allocation3 + $0xc0] sm:$0xf] %vm1698_vm1, %v1635_v60  ;;  %4373 = vmatprep.mubr.bf16.mxu0 %v6380_v16 }
 0x1e9   : > { %4374 = vmatmul.mubr.bf16.gmra.mxu0 %v5870_v20 }
 0x1ea   : > { %v1637_v5 = vpop.permute.xlu1 %1636  ;;  %v6155_v10 = vpop.f32.mrf.mxu0 }
 0x1eb   : > { %v2854_v24 = vpop.permute.xlu0 %2853  ;;  %1716 = vst.msk [vmem:[#allocation3 + $0xcc] sm:$0xf] %vm1698_vm1, %v1637_v5 }
 0x1ec   : > { %2933 = vst.msk [vmem:[#allocation3 + $0xc4] sm:$0xf] %vm1698_vm1, %v2854_v24  ;;  %v6156_v43 = vpop.f32.mrf.mxu0 }
 0x1ed   : > { %v8597_v61 = vadd.f32 %v6156_v43, %v6155_v10  ;;  %v4675_v43 = vlaneseq }
 0x1ee   : > { %v2856_v13 = vpop.permute.xlu1 %2855  ;;  %v6158_v41 = vpop.f32.mrf.mxu0 }
 0x1ef   : > { %v1828_v50 = vpop.permute.xlu0 %1827  ;;  %2934 = vst.msk [vmem:[#allocation3 + $0xd0] sm:$0xf] %vm1698_vm1, %v2856_v13 }
 0x1f0   : > { %1908 = vst.msk [vmem:[#allocation3 + $0xc0] sm:$0xf] %vm1891_vm2, %v1828_v50  ;;  %v6159_v6 = vpop.f32.mrf.mxu0 }
 0x1f1   : > { %v8601_v44 = vadd.f32 %v6159_v6, %v6158_v41 }
 0x1f2   : > { %v1830_v39 = vpop.permute.xlu1 %1829 }
 0x1f3   : > { %v3414_v59 = vpop.permute.xlu0 %3413  ;;  %1909 = vst.msk [vmem:[#allocation3 + $0xcc] sm:$0xf] %vm1891_vm2, %v1830_v39 }
 0x1f4   : > { %3493 = vst.msk [vmem:[#allocation3 + $0xc4] sm:$0xf] %vm1891_vm2, %v3414_v59 }
 0x1f6   : > { %v3416_v9 = vpop.permute.xlu1 %3415 }
 0x1f7   : > { %v1299_v47 = vpop.permute.xlu0 %1298  ;;  %3494 = vst.msk [vmem:[#allocation3 + $0xd0] sm:$0xf] %vm1891_vm2, %v3416_v9 }
 0x1f8   : > { %1377 = vst.msk [vmem:[#allocation3 + $0xd8] sm:$0xf] %vm1358_vm15, %v1299_v47 }
 0x1fa   : > { %v1301_v49 = vpop.permute.xlu1 %1300 }
 0x1fb   : > { %v2665_v40 = vpop.permute.xlu0 %2664  ;;  %1378 = vst.msk [vmem:[#allocation3 + $0xe4] sm:$0xf] %vm1358_vm15, %v1301_v49  ;;  %v3813_v8 = vld [vmem:[#allocation3 + $0xc0] sm:$0xff] }
 0x1fc   : > { %2742 = vst.msk [vmem:[#allocation3 + $0xdc] sm:$0xf] %vm1358_vm15, %v2665_v40 }
 0x1fe   : > { %v2667_v11 = vpop.permute.xlu1 %2666  ;;  %v3815_v53 = vld [vmem:[#allocation3 + $0xcc] sm:$0xff] }
 0x1ff   : > { %v1639_v63 = vpop.permute.xlu0 %1638  ;;  %v6382_v1 = vld [vmem:[#allocation3 + $0xc4] ss:$12 sps:$4 sm:$0xff]   ;;  %2743 = vst.msk [vmem:[#allocation3 + $0xe8] sm:$0xf] %vm1358_vm15, %v2667_v11  ;;  %v5873_v15 = vcombine.low %v3813_v8, %v3815_v53 }
 0x200   : > { %1717 = vst.msk [vmem:[#allocation3 + $0xd8] sm:$0xf] %vm1698_vm1, %v1639_v63  ;;  %4381 = vmatprep.mubr.bf16.mxu0 %v6382_v1 }
 0x201   : > { %4382 = vmatmul.mubr.bf16.gmra.mxu0 %v5873_v15 }
 0x202   : > { %v1641_v26 = vpop.permute.xlu1 %1640 }
 0x203   : > { %v2858_v38 = vpop.permute.xlu0 %2857  ;;  %1718 = vst.msk [vmem:[#allocation3 + $0xe4] sm:$0xf] %vm1698_vm1, %v1641_v26 }
 0x204   : > { %2935 = vst.msk [vmem:[#allocation3 + $0xdc] sm:$0xf] %vm1698_vm1, %v2858_v38  ;;  %v6404_v38 = vmov 1983009808  }
 0x205   : > { %v4673_v26 = vunpack.c.l.s4 %v6404_v38 }
 0x206   : > { %v2860_v2 = vpop.permute.xlu1 %2859 }
 0x207   : > { %v1832_v36 = vpop.permute.xlu0 %1831  ;;  %2936 = vst.msk [vmem:[#allocation3 + $0xe8] sm:$0xf] %vm1698_vm1, %v2860_v2 }
 0x208   : > { %1910 = vst.msk [vmem:[#allocation3 + $0xd8] sm:$0xf] %vm1891_vm2, %v1832_v36  ;;  %v8645_v36 = vld [vmem:[%s9079_s2] ss:$0 sm:$0xff] }
 0x209   : > { %v4328_v2 = vadd.f32 %v8565_v46, %v8645_v36 }
 0x20a   : > { %v1834_v35 = vpop.permute.xlu1 %1833 }
 0x20b   : > { %v3418_v29 = vpop.permute.xlu0 %3417  ;;  %1911 = vst.msk [vmem:[#allocation3 + $0xe4] sm:$0xf] %vm1891_vm2, %v1834_v35 }
 0x20c   : > { %3495 = vst.msk [vmem:[#allocation3 + $0xdc] sm:$0xf] %vm1891_vm2, %v3418_v29 }
 0x20e   : > { %v3420_v21 = vpop.permute.xlu1 %3419 }
 0x20f   : > { %v1303_v52 = vpop.permute.xlu0 %1302  ;;  %3496 = vst.msk [vmem:[#allocation3 + $0xe8] sm:$0xf] %vm1891_vm2, %v3420_v21  ;;  %v4674_v21 = vunpack.c.0.s8 %v4673_v26 }
 0x210   : > { %1379 = vst.msk [vmem:[#allocation3 + $0xf0] sm:$0xf] %vm1358_vm15, %v1303_v52  ;;  %v4320_v52 = vadd.f32 %v8412_v58, %v8645_v36 }
 0x211   : > { %v6227_v48 = vpop.f32.mrf.mxu1 }
 0x212   : > { %v1305_v42 = vpop.permute.xlu1 %1304 }
 0x213   : > { %v2669_v33 = vpop.permute.xlu0 %2668  ;;  %1380 = vst.msk [vmem:[#allocation3 + $0xfc] sm:$0xf] %vm1358_vm15, %v1305_v42  ;;  %v3817_v32 = vld [vmem:[#allocation3 + $0xd8] sm:$0xff]  ;;  %v6228_v27 = vpop.f32.mrf.mxu1 }
 0x214   : > { %2744 = vst.msk [vmem:[#allocation3 + $0xf4] sm:$0xf] %vm1358_vm15, %v2669_v33  ;;  %v8617_v60 = vadd.f32 %v6228_v27, %v6227_v48  ;;  %v4676_v33 = vshrl.u32 %v4675_v43, 7 }
 0x215   : > { %v6230_v0 = vpop.f32.mrf.mxu1 }
 0x216   : > { %v2671_v14 = vpop.permute.xlu1 %2670  ;;  %v3819_v28 = vld [vmem:[#allocation3 + $0xe4] sm:$0xff] }
 0x217   : > { %v1643_v23 = vpop.permute.xlu0 %1642  ;;  %v6384_v57 = vld [vmem:[#allocation3 + $0xdc] ss:$12 sps:$4 sm:$0xff]   ;;  %2745 = vst.msk [vmem:[#allocation3 + $0x100] sm:$0xf] %vm1358_vm15, %v2671_v14  ;;  %v5876_v34 = vcombine.low %v3817_v32, %v3819_v28  ;;  %v6231_v16 = vpop.f32.mrf.mxu1  ;;  %v4331_v14 = vadd.f32 %v8569_v54, %v8645_v36 }
 0x218   : > { %1719 = vst.msk [vmem:[#allocation3 + $0xf0] sm:$0xf] %vm1698_vm1, %v1643_v23  ;;  %4389 = vmatprep.mubr.bf16.mxu0 %v6384_v57  ;;  %v8621_v20 = vadd.f32 %v6231_v16, %v6230_v0  ;;  %v4323_v57 = vadd.f32 %v8425_v37, %v8645_v36  ;;  %v4336_v37 = vadd.f32 %v8597_v61, %v8645_v36 }
 0x219   : > { %4390 = vmatmul.mubr.bf16.gmra.mxu0 %v5876_v34 }
 0x21a   : > { %v1645_v25 = vpop.permute.xlu1 %1644 }
 0x21b   : > { %v2862_v7 = vpop.permute.xlu0 %2861  ;;  %1720 = vst.msk [vmem:[#allocation3 + $0xfc] sm:$0xf] %vm1698_vm1, %v1645_v25 }
 0x21c   : > { %2937 = vst.msk [vmem:[#allocation3 + $0xf4] sm:$0xf] %vm1698_vm1, %v2862_v7  ;;  %v8655_v7 = vsub.s32 %v4674_v21, %v4676_v33  ;;  %v4339_v33 = vadd.f32 %v8601_v44, %v8645_v36 }
 0x21f   : > { %v1836_v31 = vpop.permute.xlu0 %1835 }
 0x220   : > { %1912 = vst.msk [vmem:[#allocation3 + $0xf0] sm:$0xf] %vm1891_vm2, %v1836_v31 }
 0x221   : > { %v2864_v12 = vpop.permute.xlu1 %2863 }
 0x222   : > { %2938 = vst.msk [vmem:[#allocation3 + $0x100] sm:$0xf] %vm1698_vm1, %v2864_v12 }
 0x223   : > { %v3422_v3 = vpop.permute.xlu0 %3421 }
 0x224   : > { %3497 = vst.msk [vmem:[#allocation3 + $0xf4] sm:$0xf] %vm1891_vm2, %v3422_v3 }
 0x226   : > { %v1838_v45 = vpop.permute.xlu1 %1837  ;;  %v6161_v10 = vpop.f32.mrf.mxu0 }
 0x227   : > { %1913 = vst.msk [vmem:[#allocation3 + $0xfc] sm:$0xf] %vm1891_vm2, %v1838_v45  ;;  %v1307_v51 = vpop.permute.xlu0 %1306 }
 0x228   : > { %1381 = vst.msk [vmem:[#allocation3 + $0x108] sm:$0xf] %vm1358_vm15, %v1307_v51  ;;  %v6162_v29 = vpop.f32.mrf.mxu0 }
 0x229   : > { %v6163_v32 = vadd.f32 %v6162_v29, %v6161_v10 }
 0x22a   : > { %v3424_v56 = vpop.permute.xlu1 %3423  ;;  %v6164_v48 = vpop.f32.mrf.mxu0 }
 0x22b   : > { %3498 = vst.msk [vmem:[#allocation3 + $0x100] sm:$0xf] %vm1891_vm2, %v3424_v56  ;;  %v2673_v24 = vpop.permute.xlu0 %2672  ;;  %v3821_v4 = vld [vmem:[#allocation3 + $0xf0] sm:$0xff]  ;;  %v4344_v3 = vadd.f32 %v6163_v32, %v8645_v36 }
 0x22c   : > { %2746 = vst.msk [vmem:[#allocation3 + $0x10c] sm:$0xf] %vm1358_vm15, %v2673_v24 }
 0x22e   : > { %v1309_v5 = vpop.permute.xlu1 %1308 }
 0x22f   : > { %1382 = vst.msk [vmem:[#allocation3 + $0x114] sm:$0xf] %vm1358_vm15, %v1309_v5  ;;  %v6165_v5 = vpop.f32.mrf.mxu0 }
 0x232   : > { %v3823_v59 = vld [vmem:[#allocation3 + $0xfc] sm:$0xff] }
 0x233   : > { %v6386_v39 = vld [vmem:[#allocation3 + $0xf4] ss:$12 sps:$4 sm:$0xff]   ;;  %v5879_v30 = vcombine.low %v3821_v4, %v3823_v59 }
 0x234   : > { %v1647_v50 = vpop.permute.xlu0 %1646  ;;  %4397 = vmatprep.mubr.bf16.mxu0 %v6386_v39 }
 0x235   : > { %v2675_v13 = vpop.permute.xlu1 %2674  ;;  %1721 = vst.msk [vmem:[#allocation3 + $0x108] sm:$0xf] %vm1698_vm1, %v1647_v50  ;;  %4398 = vmatmul.mubr.bf16.gmra.mxu0 %v5879_v30 }
 0x236   : > { %2747 = vst.msk [vmem:[#allocation3 + $0x118] sm:$0xf] %vm1358_vm15, %v2675_v13 }
 0x238   : > { %v2866_v22 = vpop.permute.xlu0 %2865 }
 0x239   : > { %v1649_v47 = vpop.permute.xlu1 %1648  ;;  %2939 = vst.msk [vmem:[#allocation3 + $0x10c] sm:$0xf] %vm1698_vm1, %v2866_v22 }
 0x23a   : > { %1722 = vst.msk [vmem:[#allocation3 + $0x114] sm:$0xf] %vm1698_vm1, %v1649_v47 }
 0x23c   : > { %v1840_v9 = vpop.permute.xlu0 %1839 }
 0x23d   : > { %v2868_v19 = vpop.permute.xlu1 %2867  ;;  %1914 = vst.msk [vmem:[#allocation3 + $0x108] sm:$0xf] %vm1891_vm2, %v1840_v9  ;;  %v6166_v9 = vadd.f32 %v6165_v5, %v6164_v48 }
 0x23e   : > { %2940 = vst.msk [vmem:[#allocation3 + $0x118] sm:$0xf] %vm1698_vm1, %v2868_v19 }
 0x23f   : > { %v4347_v29 = vadd.f32 %v6166_v9, %v8645_v36 }
 0x240   : > { %v3426_v40 = vpop.permute.xlu0 %3425 }
 0x241   : > { %v1842_v49 = vpop.permute.xlu1 %1841  ;;  %3499 = vst.msk [vmem:[#allocation3 + $0x10c] sm:$0xf] %vm1891_vm2, %v3426_v40 }
 0x242   : > { %1915 = vst.msk [vmem:[#allocation3 + $0x114] sm:$0xf] %vm1891_vm2, %v1842_v49 }
 0x245   : > { %v3428_v63 = vpop.permute.xlu1 %3427 }
 0x246   : > { %3500 = vst.msk [vmem:[#allocation3 + $0x118] sm:$0xf] %vm1891_vm2, %v3428_v63 }
 0x249   : > { %v6390_v8 = vld [vmem:[#allocation3 + $0x108] ss:$12 sps:$4 sm:$0xff]  }
 0x24d   : > { %v6388_v11 = vld [vmem:[#allocation3 + $0x10c] ss:$12 sps:$4 sm:$0xff]   ;;  %v8634_v53 = vpop.f32.mrf.mxu1 }
 0x24e   : > { %4405 = vmatprep.mubr.bf16.mxu0 %v6388_v11 }
 0x24f   : > { %4406 = vmatmul.mubr.bf16.gmra.mxu0 %v6390_v8  ;;  %v8636_v1 = vpop.f32.mrf.mxu1 }
 0x251   : > { %v8638_v15 = vpop.f32.mrf.mxu1 }
 0x253   : > { %v8640_v41 = vpop.f32.mrf.mxu1 }
 0x255   : > { %v6263_v6 = vpop.f32.mrf.mxu1 }
 0x256   : > { %v4489_v35 = vadd.f32 %v6263_v6, %v4328_v2 }
 0x257   : > { %v4480_v42 = vpop.f32.mrf.mxu1 }
 0x258   : > { %v4481_v23 = vadd.f32 %v4480_v42, %v4320_v52  ;;  %v4609_v34 = vmax.f32 %v4489_v35, 0.0 }
 0x259   : > { %v6264_v28 = vpop.f32.mrf.mxu1 }
 0x25a   : > { %v4607_v46 = vmax.f32 %v4481_v23, 0.0  ;;  %v4492_v25 = vadd.f32 %v6264_v28, %v4331_v14 }
 0x25b   : > { %v4483_v31 = vpop.f32.mrf.mxu1 }
 0x25c   : > { %v4639_v12 = vmax.f32 %v4607_v46, %v4609_v34  ;;  %v4484_v58 = vadd.f32 %v4483_v31, %v4323_v57  ;;  %v4610_v0 = vmax.f32 %v4492_v25, 0.0 }
 0x25d   : > { %v6267_v45 = vpop.f32.mrf.mxu1 }
 0x25e   : > { %v4671_v27 = vcombine.high %v4639_v12, %v4639_v12  ;;  %v4678_v54 = vrot.slane %v4639_v12, %v8655_v7  ;;  %v4608_v51 = vmax.f32 %v4484_v58, 0.0  ;;  %v4505_v56 = vadd.f32 %v6267_v45, %v4344_v3 }
 0x25f   : > { %v4496_v16 = vpop.f32.mrf.mxu1 }
 0x260   : > { %v4640_v24 = vmax.f32 %v4608_v51, %v4610_v0  ;;  %v4685_v50 = vrot.slane %v4671_v27, %v8655_v7  ;;  %v4686_v13 = vcombine.high %v4678_v54, %v4678_v54  ;;  %v5931_v4 = vrot.slane %v4678_v54, 9 }
 0x261   : > { %v4497_v59 = vadd.f32 %v4496_v16, %v4336_v37  ;;  %v6268_v39 = vpop.f32.mrf.mxu1  ;;  %v4613_v30 = vmax.f32 %v4505_v56, 0.0 }
 0x262   : > { %v4687_v19 = vcombine.high %v4685_v50, %v4685_v50  ;;  %v5932_v40 = vrot.slane %v4686_v13, 9  ;;  %v5199_v49 = vmax.f32 %v4678_v54, %v5931_v4  ;;  %v5933_v61 = vrot.slane %v4685_v50, 9 }
 0x263   : > { %v4611_v22 = vmax.f32 %v4497_v59, 0.0  ;;  %v4499_v47 = vpop.f32.mrf.mxu1  ;;  %v4688_v8 = vcombine.high %v4640_v24, %v4640_v24  ;;  %v4695_v10 = vrot.slane %v4640_v24, %v8655_v7  ;;  %v4508_v32 = vadd.f32 %v6268_v39, %v4347_v29 }
 0x264   : > { %v5934_v43 = vrot.slane %v4687_v19, 9  ;;  %v5200_v2 = vmax.f32 %v4686_v13, %v5932_v40  ;;  %v6063_v6 = vpack.c.bf16 %v5199_v49, %v5199_v49  ;;  %v5201_v42 = vmax.f32 %v4685_v50, %v5933_v61 }
 0x265   : > { %v4641_v63 = vmax.f32 %v4611_v22, %v4613_v30  ;;  %v4702_v23 = vrot.slane %v4688_v8, %v8655_v7  ;;  %v4703_v14 = vcombine.high %v4695_v10, %v4695_v10  ;;  %v5935_v48 = vrot.slane %v4695_v10, 9 }
 0x266   : > { %v5202_v31 = vmax.f32 %v4687_v19, %v5934_v43  ;;  %v5351_v12 = vunpack.c.l.b16 %v6063_v6  ;;  %v6071_v58 = vpack.c.bf16 %v5200_v2, %v5200_v2  ;;  %v6079_v0 = vpack.c.bf16 %v5201_v42, %v5201_v42 }
 0x267   : > { %v4705_v26 = vcombine.high %v4641_v63, %v4641_v63  ;;  %v4712_v52 = vrot.slane %v4641_v63, %v8655_v7  ;;  %v4704_v51 = vcombine.high %v4702_v23, %v4702_v23  ;;  %v5936_v56 = vrot.slane %v4703_v14, 9 }
 0x268   : > { %v4500_v37 = vadd.f32 %v4499_v47, %v4339_v33  ;;  %v6087_v4 = vpack.c.bf16 %v5202_v31, %v5202_v31  ;;  %v5937_v59 = vrot.slane %v4702_v23, 9  ;;  %v4614_v39 = vmax.f32 %v4508_v32, 0.0 }
 0x269   : > { %v8662_v11 = vpop.f32.mrf.mxu1  ;;  %v4719_v21 = vrot.slane %v4705_v26, %v8655_v7  ;;  %v4720_v57 = vcombine.high %v4712_v52, %v4712_v52  ;;  %v5939_v46 = vrot.slane %v4712_v52, 9  ;;  %v5408_v63 = vunpack.c.l.b16 %v6071_v58 }
 0x26a   : > { %v4612_v30 = vmax.f32 %v4500_v37, 0.0  ;;  %v5460_v61 = vunpack.c.l.b16 %v6079_v0  ;;  %v5203_v8 = vmax.f32 %v4695_v10, %v5935_v48 }
 0x26b   : > { %v8665_v38 = vpop.f32.mrf.mxu1  ;;  %v4721_v34 = vcombine.high %v4719_v21, %v4719_v21  ;;  %v5941_v25 = vrot.slane %v4719_v21, 9  ;;  %v5940_v45 = vrot.slane %v4720_v57, 9  ;;  %v5207_v27 = vmax.f32 %v4712_v52, %v5939_v46 }
 0x26c   : > { %v4642_v47 = vmax.f32 %v4612_v30, %v4614_v39  ;;  %v5509_v52 = vunpack.c.l.b16 %v6087_v4 }
 0x26d   : > { %v8668_v35 = vpop.f32.mrf.mxu1  ;;  %v5942_v44 = vrot.slane %v4721_v34, 9  ;;  %v5209_v54 = vmax.f32 %v4719_v21, %v5941_v25  ;;  %v5208_v24 = vmax.f32 %v4720_v57, %v5940_v45  ;;  %v6064_v50 = vpack.c.bf16 %v5207_v27, %v5207_v27 }
 0x26e   : > { %v5938_v21 = vrot.slane %v4704_v51, 9  ;;  %v4722_v33 = vcombine.high %v4642_v47, %v4642_v47  ;;  %v4729_v42 = vrot.slane %v4642_v47, %v8655_v7  ;;  %v5204_v45 = vmax.f32 %v4703_v14, %v5936_v56 }
 0x26f   : > { %v8675_v28 = vpop.f32.mrf.mxu1  ;;  %v5210_v5 = vmax.f32 %v4721_v34, %v5942_v44  ;;  %v6080_v13 = vpack.c.bf16 %v5209_v54, %v5209_v54  ;;  %v5352_v9 = vunpack.c.l.b16 %v6064_v50  ;;  %v6072_v19 = vpack.c.bf16 %v5208_v24, %v5208_v24 }
 0x270   : > { %v4736_v25 = vrot.slane %v4722_v33, %v8655_v7  ;;  %v4737_v31 = vcombine.high %v4729_v42, %v4729_v42  ;;  %v5943_v58 = vrot.slane %v4729_v42, 9  ;;  %v5205_v44 = vmax.f32 %v4702_v23, %v5937_v59 }
 0x271   : > { %v5461_v40 = vunpack.c.l.b16 %v6080_v13  ;;  %v6088_v49 = vpack.c.bf16 %v5210_v5, %v5210_v5  ;;  %v5359_v43 = vrot.slane %v5352_v9, 7  ;;  %v5409_v2 = vunpack.c.l.b16 %v6072_v19 }
 0x272   : > { %v5944_v0 = vrot.slane %v4737_v31, 9  ;;  %v5945_v37 = vrot.slane %v4736_v25, 9  ;;  %v5211_v24 = vmax.f32 %v4729_v42, %v5943_v58  ;;  %v5206_v50 = vmax.f32 %v4704_v51, %v5938_v21 }
 0x273   : > { %v5468_v6 = vrot.slane %v5461_v40, 7  ;;  %v5510_v29 = vunpack.c.l.b16 %v6088_v49  ;;  %v8689_v57 = vsel %vm5360_vm0, %v5359_v43, %v5351_v12  ;;  %v5416_v34 = vrot.slane %v5409_v2, 7 }
 0x274   : > { %v4738_v12 = vcombine.high %v4736_v25, %v4736_v25  ;;  %v6095_v13 = vpack.c.bf16 %v5203_v8, %v5203_v8  ;;  %v5212_v39 = vmax.f32 %v4737_v31, %v5944_v0  ;;  %v5213_v30 = vmax.f32 %v4736_v25, %v5945_v37 }
 0x275   : > { %v8677_v3 = vpop.f32.mrf.mxu1  ;;  %v8692_v10 = vsel %vm5360_vm0, %v5468_v6, %v5460_v61  ;;  %v5517_v46 = vrot.slane %v5510_v29, 7  ;;  %v8698_v27 = vsel %vm5360_vm0, %v5416_v34, %v5408_v63  ;;  %v6096_v9 = vpack.c.bf16 %v5211_v24, %v5211_v24  ;;  %v6167_v24 = vpop.f32.mrf.mxu0 }
 0x276   : > { %v5946_v4 = vrot.slane %v4738_v12, 9  ;;  %v6103_v23 = vpack.c.bf16 %v5204_v45, %v5204_v45  ;;  %v6111_v56 = vpack.c.bf16 %v5205_v44, %v5205_v44  ;;  %v6104_v40 = vpack.c.bf16 %v5212_v39, %v5212_v39 }
 0x277   : > { %v8679_v16 = vpop.f32.mrf.mxu1  ;;  %v8701_v54 = vsel %vm5360_vm0, %v5517_v46, %v5509_v52  ;;  %v5561_v19 = vunpack.c.l.b16 %v6096_v9  ;;  %v6112_v49 = vpack.c.bf16 %v5213_v30, %v5213_v30  ;;  %v5560_v61 = vunpack.c.l.b16 %v6095_v13  ;;  %v6168_v13 = vpop.f32.mrf.mxu0 }
 0x278   : > { %v5214_v59 = vmax.f32 %v4738_v12, %v5946_v4  ;;  %v6119_v47 = vpack.c.bf16 %v5206_v50, %v5206_v50  ;;  %v5610_v2 = vunpack.c.l.b16 %v6104_v40  ;;  %v5609_v29 = vunpack.c.l.b16 %v6103_v23 }
 0x279   : > { %v8681_v22 = vpop.f32.mrf.mxu1  ;;  %v5568_v43 = vrot.slane %v5561_v19, 7  ;;  %v5661_v51 = vunpack.c.l.b16 %v6112_v49  ;;  %v5660_v52 = vunpack.c.l.b16 %v6111_v56  ;;  %v4424_v4 = vadd.f32 %v8585_v55, %v8645_v36  ;;  %v6170_v56 = vpop.f32.mrf.mxu0 }
 0x27a   : > { %v6120_v8 = vpack.c.bf16 %v5214_v59, %v5214_v59  ;;  %v5617_v33 = vrot.slane %v5610_v2, 7  ;;  %v5709_v25 = vunpack.c.l.b16 %v6119_v47  ;;  %v4416_v30 = vadd.f32 %v8543_v18, %v8645_v36 }
 0x27b   : > { %v8683_v26 = vpop.f32.mrf.mxu1  ;;  %v8712_v21 = vsel %vm5360_vm0, %v5568_v43, %v5560_v61  ;;  %v5668_v42 = vrot.slane %v5661_v51, 7  ;;  %v4427_v9 = vadd.f32 %v8589_v17, %v8645_v36  ;;  %v4419_v40 = vadd.f32 %v8551_v62, %v8645_v36  ;;  %v6171_v43 = vpop.f32.mrf.mxu0 }
 0x27c   : > { %v5710_v34 = vunpack.c.l.b16 %v6120_v8  ;;  %v8717_v31 = vsel %vm5360_vm0, %v5617_v33, %v5609_v29 }
 0x27d   : > { %v8720_v58 = vsel %vm5360_vm0, %v5668_v42, %v5660_v52  ;;  %v6169_v42 = vadd.f32 %v6168_v13, %v6167_v24 }
 0x27e   : > { %v5717_v45 = vrot.slane %v5710_v34, 7 }
 0x27f   : > { %v4352_v62 = vadd.f32 %v6169_v42, %v8645_v36 }
 0x280   : > { %v8725_v12 = vsel %vm5360_vm0, %v5717_v45, %v5709_v25 }
 0x281   : > { %v8686_v32 = vpop.f32.mrf.mxu1 }
 0x283   : > { %v8695_v48 = vpop.f32.mrf.mxu1 }
 0x285   : > { %v8703_v5 = vpop.f32.mrf.mxu1  ;;  %v6173_v8 = vpop.f32.mrf.mxu0 }
 0x287   : > { %v8705_v14 = vpop.f32.mrf.mxu1  ;;  %v6174_v29 = vpop.f32.mrf.mxu0 }
 0x288   : > { %v6175_v52 = vadd.f32 %v6174_v29, %v6173_v8 }
 0x289   : > { %v8707_v63 = vpop.f32.mrf.mxu1  ;;  %v6176_v17 = vpop.f32.mrf.mxu0 }
 0x28a   : > { %v4360_v34 = vadd.f32 %v6175_v52, %v8645_v36 }
 0x28b   : > { %v8709_v6 = vpop.f32.mrf.mxu1  ;;  %v6177_v33 = vpop.f32.mrf.mxu0 }
 0x28c   : > { %v6178_v25 = vadd.f32 %v6177_v33, %v6176_v17  ;;  %v4521_v45 = vadd.f32 %v8662_v11, %v4360_v34 }
 0x28d   : > { %v8714_v46 = vpop.f32.mrf.mxu1 }
 0x28e   : > { %9093 = vst [vmem:[#allocation4_spill] sm:$0xff] %v8714_v46 }
 0x28f   : > { %v8722_v44 = vpop.f32.mrf.mxu1 }
 0x291   : > { %v6287_v0 = vpop.f32.mrf.mxu1 }
 0x292   : > { %v4585_v39 = vadd.f32 %v6287_v0, %v4424_v4  ;;  %v6172_v0 = vadd.f32 %v6171_v43, %v6170_v56  ;;  %v4617_v4 = vmax.f32 %v4521_v45, 0.0 }
 0x293   : > { %v4576_v37 = vpop.f32.mrf.mxu1 }
 0x294   : > { %v4577_v59 = vadd.f32 %v4576_v37, %v4416_v30  ;;  %v4633_v49 = vmax.f32 %v4585_v39, 0.0  ;;  %v4513_v37 = vadd.f32 %v8665_v38, %v4352_v62  ;;  %v4355_v30 = vadd.f32 %v6172_v0, %v8645_v36 }
 0x295   : > { %v6288_v50 = vpop.f32.mrf.mxu1 }
 0x296   : > { %v4588_v19 = vadd.f32 %v6288_v50, %v4427_v9  ;;  %v4631_v61 = vmax.f32 %v4577_v59, 0.0  ;;  %v4363_v50 = vadd.f32 %v6178_v25, %v8645_v36  ;;  %v4615_v39 = vmax.f32 %v4513_v37, 0.0 }
 0x297   : > { %v4579_v23 = vpop.f32.mrf.mxu1  ;;  %v4516_v24 = vadd.f32 %v8675_v28, %v4355_v30  ;;  %v6235_v30 = vadd.f32 %v8636_v1, %v8634_v53 }
 0x298   : > { %v4580_v47 = vadd.f32 %v4579_v23, %v4419_v40  ;;  %v8735_v2 = vmax.f32 %v4631_v61, %v4633_v49  ;;  %v4634_v55 = vmax.f32 %v4588_v19, 0.0  ;;  %v4524_v9 = vadd.f32 %v8668_v35, %v4363_v50  ;;  %v8746_v23 = vpop.f32.mrf.mxu0 }
 0x299   : > { %v4643_v13 = vmax.f32 %v4615_v39, %v4617_v4  ;;  %v4616_v11 = vmax.f32 %v4516_v24, 0.0  ;;  %v6291_v50 = vpop.f32.mrf.mxu1  ;;  %v4440_v1 = vadd.f32 %v6235_v30, %v8645_v36 }
 0x29a   : > { %v4632_v51 = vmax.f32 %v4580_v47, 0.0  ;;  %v4618_v59 = vmax.f32 %v4524_v9, 0.0  ;;  %v8749_v19 = vpop.f32.mrf.mxu0  ;;  %v4882_v53 = vrot.slane %v8735_v2, %v8655_v7 }
 0x29b   : > { %v4739_v56 = vcombine.high %v4643_v13, %v4643_v13  ;;  %v4746_v38 = vrot.slane %v4643_v13, %v8655_v7 }
 0x29c   : > { %v8737_v18 = vmax.f32 %v4632_v51, %v4634_v55  ;;  %v4644_v40 = vmax.f32 %v4616_v11, %v4618_v59  ;;  %v8752_v49 = vpop.f32.mrf.mxu0  ;;  %v4890_v30 = vcombine.high %v4882_v53, %v4882_v53 }
 0x29d   : > { %v4753_v61 = vrot.slane %v4739_v56, %v8655_v7  ;;  %v4754_v43 = vcombine.high %v4746_v38, %v4746_v38  ;;  %v5947_v55 = vrot.slane %v4746_v38, 9 }
 0x29e   : > { %v4756_v47 = vcombine.high %v4644_v40, %v4644_v40  ;;  %v4763_v35 = vrot.slane %v4644_v40, %v8655_v7  ;;  %v8756_v51 = vpop.f32.mrf.mxu0 }
 0x29f   : > { %v5949_v28 = vrot.slane %v4753_v61, 9  ;;  %v4755_v8 = vcombine.high %v4753_v61, %v4753_v61  ;;  %v5948_v33 = vrot.slane %v4754_v43, 9  ;;  %v5215_v42 = vmax.f32 %v4746_v38, %v5947_v55  ;;  %v4592_v38 = vpop.f32.mrf.mxu1 }
 0x2a0   : > { %v4770_v17 = vrot.slane %v4756_v47, %v8655_v7  ;;  %v5951_v52 = vrot.slane %v4763_v35, 9  ;;  %v4771_v62 = vcombine.high %v4763_v35, %v4763_v35 }
 0x2a1   : > { %v5217_v34 = vmax.f32 %v4753_v61, %v5949_v28  ;;  %v5950_v25 = vrot.slane %v4755_v8, 9  ;;  %v5216_v4 = vmax.f32 %v4754_v43, %v5948_v33  ;;  %v6065_v39 = vpack.c.bf16 %v5215_v42, %v5215_v42 }
 0x2a2   : > { %v5953_v0 = vrot.slane %v4770_v17, 9  ;;  %v5219_v37 = vmax.f32 %v4763_v35, %v5951_v52  ;;  %v4772_v13 = vcombine.high %v4770_v17, %v4770_v17  ;;  %v5952_v59 = vrot.slane %v4771_v62, 9 }
 0x2a3   : > { %v6081_v9 = vpack.c.bf16 %v5217_v34, %v5217_v34  ;;  %v5218_v24 = vmax.f32 %v4755_v8, %v5950_v25  ;;  %v5353_v61 = vunpack.c.l.b16 %v6065_v39  ;;  %v6073_v47 = vpack.c.bf16 %v5216_v4, %v5216_v4 }
 0x2a4   : > { %v5221_v56 = vmax.f32 %v4770_v17, %v5953_v0  ;;  %v6097_v40 = vpack.c.bf16 %v5219_v37, %v5219_v37  ;;  %v4432_v35 = vadd.f32 %v8617_v60, %v8645_v36  ;;  %v4875_v43 = vcombine.high %v8735_v2, %v8735_v2 }
 0x2a5   : > { %v5462_v55 = vunpack.c.l.b16 %v6081_v9  ;;  %v6089_v28 = vpack.c.bf16 %v5218_v24, %v5218_v24  ;;  %v5954_v8 = vrot.slane %v4772_v13, 9  ;;  %v5220_v52 = vmax.f32 %v4771_v62, %v5952_v59 }
 0x2a6   : > { %v4593_v17 = vadd.f32 %v4592_v38, %v4432_v35  ;;  %v6238_v42 = vadd.f32 %v8640_v41, %v8638_v15  ;;  %v5562_v60 = vunpack.c.l.b16 %v6097_v40  ;;  %v6113_v34 = vpack.c.bf16 %v5221_v56, %v5221_v56  ;;  %v6292_v56 = vpop.f32.mrf.mxu1 }
 0x2a7   : > { %v5362_v25 = vrot.slane %v5353_v61, 6  ;;  %v8778_v0 = vunpack.c.l.b16 %v6073_v47  ;;  %v4601_v37 = vadd.f32 %v6291_v50, %v4440_v1  ;;  %v4435_v2 = vadd.f32 %v8621_v20, %v8645_v36 }
 0x2a8   : > { %v5470_v39 = vrot.slane %v5462_v55, 6  ;;  %v4889_v62 = vrot.slane %v4875_v43, %v8655_v7  ;;  %v4899_v9 = vrot.slane %v8737_v18, %v8655_v7  ;;  %v8787_v15 = vunpack.c.l.b16 %v6089_v28 }
 0x2a9   : > { %v8758_v29 = vpop.f32.mrf.mxu0  ;;  %v5222_v41 = vmax.f32 %v4772_v13, %v5954_v8  ;;  %v6105_v24 = vpack.c.bf16 %v5220_v52, %v5220_v52  ;;  %v4635_v59 = vmax.f32 %v4593_v17, 0.0  ;;  %v5570_v40 = vrot.slane %v5562_v60, 6 }
 0x2aa   : > { %v5662_v50 = vunpack.c.l.b16 %v6113_v34  ;;  %v4892_v20 = vcombine.high %v8737_v18, %v8737_v18  ;;  %v4443_v38 = vadd.f32 %v6238_v42, %v8645_v36  ;;  %v8794_v61 = vsel %vm5363_vm4, %v5362_v25, %v8689_v57  ;;  %v4595_v42 = vpop.f32.mrf.mxu1 }
 0x2ab   : > { %v8761_v45 = vpop.f32.mrf.mxu0  ;;  %v5979_v35 = vrot.slane %v4882_v53, 9  ;;  %v4637_v55 = vmax.f32 %v4601_v37, 0.0  ;;  %v8801_v13 = vsel %vm5363_vm4, %v5470_v39, %v8692_v10  ;;  %v5980_v1 = vrot.slane %v4890_v30, 9 }
 0x2ac   : > { %v5981_v28 = vrot.slane %v4889_v62, 9  ;;  %v4907_v8 = vcombine.high %v4899_v9, %v4899_v9  ;;  %v8804_v52 = vunpack.c.l.b16 %v6105_v24  ;;  %v6121_v17 = vpack.c.bf16 %v5222_v41, %v5222_v41 }
 0x2ad   : > { %v8765_v11 = vpop.f32.mrf.mxu0  ;;  %v4653_v57 = vmax.f32 %v4635_v59, %v4637_v55  ;;  %v8808_v60 = vsel %vm5363_vm4, %v5570_v40, %v8712_v21  ;;  %v5670_v34 = vrot.slane %v5662_v50, 6  ;;  %v4906_v25 = vrot.slane %v4892_v20, %v8655_v7 }
 0x2ae   : > { %v6181_v10 = vadd.f32 %v8749_v19, %v8746_v23  ;;  %v4891_v37 = vcombine.high %v4889_v62, %v4889_v62  ;;  %v5247_v39 = vmax.f32 %v4882_v53, %v5979_v35  ;;  %v5983_v47 = vrot.slane %v4899_v9, 9 }
 0x2af   : > { %v8774_v33 = vpop.f32.mrf.mxu0  ;;  %v6187_v24 = vadd.f32 %v8761_v45, %v8758_v29  ;;  %v5248_v41 = vmax.f32 %v4890_v30, %v5980_v1  ;;  %v5249_v59 = vmax.f32 %v4889_v62, %v5981_v28  ;;  %v5984_v55 = vrot.slane %v4907_v8, 9 }
 0x2b0   : > { %v4596_v46 = vadd.f32 %v4595_v42, %v4435_v2  ;;  %v8818_v40 = vunpack.c.l.b16 %v6121_v17  ;;  %v4909_v50 = vcombine.high %v4653_v57, %v4653_v57  ;;  %v4604_v20 = vadd.f32 %v6292_v56, %v4443_v38 }
 0x2b1   : > { %v8822_v23 = vsel %vm5363_vm4, %v5670_v34, %v8720_v58  ;;  %v4908_v19 = vcombine.high %v4906_v25, %v4906_v25  ;;  %v5985_v53 = vrot.slane %v4906_v25, 9  ;;  %v4368_v29 = vadd.f32 %v6181_v10, %v8645_v36 }
 0x2b2   : > { %9094 = vst [vmem:[#allocation5_spill] sm:$0xff] %v8822_v23  ;;  %v5982_v45 = vrot.slane %v4891_v37, 9  ;;  %v6069_v35 = vpack.c.bf16 %v5247_v39, %v5247_v39  ;;  %v5251_v30 = vmax.f32 %v4899_v9, %v5983_v47  ;;  %v4376_v62 = vadd.f32 %v6187_v24, %v8645_v36 }
 0x2b3   : > { %v6077_v1 = vpack.c.bf16 %v5248_v41, %v5248_v41  ;;  %v6085_v28 = vpack.c.bf16 %v5249_v59, %v5249_v59  ;;  %v5252_v17 = vmax.f32 %v4907_v8, %v5984_v55  ;;  %v4636_v42 = vmax.f32 %v4596_v46, 0.0 }
 0x2b4   : > { %v5719_v56 = vrot.slane %v8818_v40, 6  ;;  %v4916_v58 = vrot.slane %v4653_v57, %v8655_v7  ;;  %v4923_v38 = vrot.slane %v4909_v50, %v8655_v7  ;;  %v4638_v34 = vmax.f32 %v4604_v20, 0.0 }
 0x2b5   : > { %v5986_v10 = vrot.slane %v4908_v19, 9  ;;  %v5253_v23 = vmax.f32 %v4906_v25, %v5985_v53  ;;  %v4529_v9 = vadd.f32 %v8679_v16, %v4368_v29  ;;  %v6184_v47 = vadd.f32 %v8756_v51, %v8752_v49 }
 0x2b6   : > { %v5250_v39 = vmax.f32 %v4891_v37, %v5982_v45  ;;  %v8834_v24 = vunpack.c.l.b16 %v6069_v35  ;;  %v6101_v8 = vpack.c.bf16 %v5251_v30, %v5251_v30  ;;  %v4537_v46 = vadd.f32 %v8677_v3, %v4376_v62 }
 0x2b7   : > { %v8837_v41 = vunpack.c.l.b16 %v6077_v1  ;;  %v8839_v57 = vunpack.c.l.b16 %v6085_v28  ;;  %v6109_v59 = vpack.c.bf16 %v5252_v17, %v5252_v17  ;;  %v4654_v55 = vmax.f32 %v4636_v42, %v4638_v34 }
 0x2b8   : > { %v4924_v50 = vcombine.high %v4916_v58, %v4916_v58  ;;  %v5987_v20 = vrot.slane %v4916_v58, 9  ;;  %v5989_v25 = vrot.slane %v4923_v38, 9  ;;  %v6190_v16 = vadd.f32 %v8774_v33, %v8765_v11 }
 0x2b9   : > { %v5254_v49 = vmax.f32 %v4908_v19, %v5986_v10  ;;  %v6117_v51 = vpack.c.bf16 %v5253_v23, %v5253_v23  ;;  %v4619_v37 = vmax.f32 %v4529_v9, 0.0  ;;  %v4371_v29 = vadd.f32 %v6184_v47, %v8645_v36 }
 0x2ba   : > { %v6093_v45 = vpack.c.bf16 %v5250_v39, %v5250_v39  ;;  %v8845_v35 = vunpack.c.l.b16 %v6101_v8  ;;  %v4621_v30 = vmax.f32 %v4537_v46, 0.0  ;;  %v8849_v28 = vunpack.c.l.b16 %v6109_v59 }
 0x2bb   : > { %v4933_v11 = vrot.slane %v4654_v55, %v8655_v7  ;;  %v5988_v33 = vrot.slane %v4924_v50, 9  ;;  %v5255_v19 = vmax.f32 %v4916_v58, %v5987_v20  ;;  %v5257_v23 = vmax.f32 %v4923_v38, %v5989_v25 }
 0x2bc   : > { %v4379_v17 = vadd.f32 %v6190_v16, %v8645_v36  ;;  %v8853_v34 = vunpack.c.l.b16 %v6117_v51  ;;  %v6125_v10 = vpack.c.bf16 %v5254_v49, %v5254_v49  ;;  %v4926_v9 = vcombine.high %v4654_v55, %v4654_v55 }
 0x2bd   : > { %v8855_v39 = vunpack.c.l.b16 %v6093_v45  ;;  %v4532_v46 = vadd.f32 %v8683_v26, %v4371_v29  ;;  %v4645_v59 = vmax.f32 %v4619_v37, %v4621_v30  ;;  %v4925_v62 = vcombine.high %v4923_v38, %v4923_v38 }
 0x2be   : > { %v5991_v58 = vrot.slane %v4933_v11, 9  ;;  %v5256_v25 = vmax.f32 %v4924_v50, %v5988_v33  ;;  %v6070_v16 = vpack.c.bf16 %v5255_v19, %v5255_v19  ;;  %v6086_v51 = vpack.c.bf16 %v5257_v23, %v5257_v23 }
 0x2bf   : > { %v4540_v55 = vadd.f32 %v8681_v22, %v4379_v17  ;;  %v8864_v49 = vunpack.c.l.b16 %v6125_v10  ;;  %v4940_v26 = vrot.slane %v4926_v9, %v8655_v7  ;;  %v4620_v29 = vmax.f32 %v4532_v46, 0.0 }
 0x2c0   : > { %v4941_v38 = vcombine.high %v4933_v11, %v4933_v11  ;;  %v4773_v45 = vcombine.high %v4645_v59, %v4645_v59  ;;  %v4780_v30 = vrot.slane %v4645_v59, %v8655_v7  ;;  %v8870_v22 = vunpack.c.l.b16 %v6070_v16 }
 0x2c1   : > { %v8782_v4 = vpop.f32.mrf.mxu0  ;;  %v6078_v19 = vpack.c.bf16 %v5256_v25, %v5256_v25  ;;  %v8872_v23 = vunpack.c.l.b16 %v6086_v51  ;;  %v4622_v17 = vmax.f32 %v4540_v55, 0.0  ;;  %v5993_v10 = vrot.slane %v4940_v26, 9 }
 0x2c2   : > { %v9095_v46 = vrot.slane %v8778_v0, 6  ;;  %v4942_v59 = vcombine.high %v4940_v26, %v4940_v26 }
 0x2c3   : > { %v8797_v43 = vpop.f32.mrf.mxu0 }
 0x2c4   : > { %v6193_v20 = vadd.f32 %v8797_v43, %v8782_v4  ;;  %v5990_v4 = vrot.slane %v4925_v62, 9  ;;  %v5259_v43 = vmax.f32 %v4933_v11, %v5991_v58  ;;  %v8881_v11 = vsel %vm5363_vm4, %v9095_v46, %v8698_v27 }
 0x2c5   : > { %v8815_v18 = vpop.f32.mrf.mxu0  ;;  %v4787_v58 = vrot.slane %v4773_v45, %v8655_v7  ;;  %v5261_v27 = vmax.f32 %v4940_v26, %v5993_v10  ;;  %v5994_v45 = vrot.slane %v4942_v59, 9 }
 0x2c6   : > { %v4384_v50 = vadd.f32 %v6193_v20, %v8645_v36  ;;  %v4788_v20 = vcombine.high %v4780_v30, %v4780_v30  ;;  %v5258_v25 = vmax.f32 %v4925_v62, %v5990_v4  ;;  %v6102_v16 = vpack.c.bf16 %v5259_v43, %v5259_v43 }
 0x2c7   : > { %v8826_v2 = vpop.f32.mrf.mxu0  ;;  %v4789_v62 = vcombine.high %v4787_v58, %v4787_v58 }
 0x2c8   : > { %v6196_v9 = vadd.f32 %v8826_v2, %v8815_v18  ;;  %v4545_v51 = vadd.f32 %v8695_v48, %v4384_v50  ;;  %v4646_v2 = vmax.f32 %v4620_v29, %v4622_v17  ;;  %v5956_v4 = vrot.slane %v4788_v20, 9 }
 0x2c9   : > { %v8891_v43 = vunpack.c.l.b16 %v6102_v16  ;;  %v6118_v29 = vpack.c.bf16 %v5261_v27, %v5261_v27 }
 0x2ca   : > { %v4623_v48 = vmax.f32 %v4545_v51, 0.0  ;;  %v4790_v8 = vcombine.high %v4646_v2, %v4646_v2  ;;  %v4797_v1 = vrot.slane %v4646_v2, %v8655_v7 }
 0x2cc   : > { %v5959_v27 = vrot.slane %v4797_v1, 9 }
 0x2d9   : > { %v6197_v21 = vpop.f32.mrf.mxu0 }
 0x2db   : > { %v6198_v53 = vpop.f32.mrf.mxu0 }
 0x2dc   : > { %v6199_v47 = vadd.f32 %v6198_v53, %v6197_v21 }
 0x2dd   : > { %v6200_v42 = vpop.f32.mrf.mxu0 }
 0x2de   : > { %v4392_v37 = vadd.f32 %v6199_v47, %v8645_v36 }
 0x2df   : > { %v6201_v21 = vpop.f32.mrf.mxu0 }
 0x2e0   : > { %v6202_v33 = vadd.f32 %v6201_v21, %v6200_v42  ;;  %v4553_v47 = vadd.f32 %v8686_v32, %v4392_v37  ;;  %v5992_v42 = vrot.slane %v4941_v38, 9  ;;  %v8887_v32 = vunpack.c.l.b16 %v6078_v19 }
 0x2e1   : > { %v5955_v21 = vrot.slane %v4780_v30, 9  ;;  %v4387_v37 = vadd.f32 %v6196_v9, %v8645_v36  ;;  %v5957_v19 = vrot.slane %v4787_v58, 9 }
 0x2e2   : > { %v4395_v55 = vadd.f32 %v6202_v33, %v8645_v36  ;;  %v4625_v46 = vmax.f32 %v4553_v47, 0.0  ;;  %v5260_v53 = vmax.f32 %v4941_v38, %v5992_v42  ;;  %v6094_v33 = vpack.c.bf16 %v5258_v25, %v5258_v25 }
 0x2e3   : > { %v5223_v17 = vmax.f32 %v4780_v30, %v5955_v21  ;;  %v4548_v36 = vadd.f32 %v8705_v14, %v4387_v37  ;;  %v5262_v38 = vmax.f32 %v4942_v59, %v5994_v45  ;;  %v5958_v47 = vrot.slane %v4789_v62, 9 }
 0x2e4   : > { %v4556_v50 = vadd.f32 %v8703_v5, %v4395_v55  ;;  %v4647_v10 = vmax.f32 %v4623_v48, %v4625_v46  ;;  %v6110_v9 = vpack.c.bf16 %v5260_v53, %v5260_v53  ;;  %v5224_v42 = vmax.f32 %v4788_v20, %v5956_v4 }
 0x2e5   : > { %v8898_v5 = vunpack.c.l.b16 %v6094_v33  ;;  %v9096_v25 = vrot.slane %v8787_v15, 6  ;;  %v5225_v2 = vmax.f32 %v4787_v58, %v5957_v19  ;;  %v4804_v30 = vrot.slane %v4790_v8, %v8655_v7 }
 0x2e6   : > { %v4626_v51 = vmax.f32 %v4556_v50, 0.0  ;;  %v4805_v14 = vcombine.high %v4797_v1, %v4797_v1  ;;  %v8907_v59 = vunpack.c.l.b16 %v6118_v29  ;;  %v6066_v53 = vpack.c.bf16 %v5223_v17, %v5223_v17 }
 0x2e7   : > { %v8904_v55 = vsel %vm5363_vm4, %v9096_v25, %v8701_v54  ;;  %v4624_v20 = vmax.f32 %v4548_v36, 0.0  ;;  %v4807_v21 = vcombine.high %v4647_v10, %v4647_v10  ;;  %v8909_v37 = vunpack.c.l.b16 %v6110_v9 }
 0x2e8   : > { %v5226_v46 = vmax.f32 %v4789_v62, %v5958_v47  ;;  %v6074_v45 = vpack.c.bf16 %v5224_v42, %v5224_v42  ;;  %v6126_v4 = vpack.c.bf16 %v5262_v38, %v5262_v38  ;;  %v4814_v15 = vrot.slane %v4647_v10, %v8655_v7 }
 0x2e9   : > { %v4648_v54 = vmax.f32 %v4624_v20, %v4626_v51  ;;  %v6082_v50 = vpack.c.bf16 %v5225_v2, %v5225_v2  ;;  %v4806_v33 = vcombine.high %v4804_v30, %v4804_v30  ;;  %v5960_v19 = vrot.slane %v4805_v14, 9 }
 0x2ea   : > { %v5227_v29 = vmax.f32 %v4797_v1, %v5959_v27  ;;  %v5354_v36 = vunpack.c.l.b16 %v6066_v53  ;;  %v4821_v62 = vrot.slane %v4807_v21, %v8655_v7  ;;  %v9097_v38 = vrot.slane %v8804_v52, 6 }
 0x2eb   : > { %v5411_v9 = vunpack.c.l.b16 %v6074_v45  ;;  %v6090_v47 = vpack.c.bf16 %v5226_v46, %v5226_v46  ;;  %v5961_v42 = vrot.slane %v4804_v30, 9  ;;  %v8922_v51 = vunpack.c.l.b16 %v6126_v4 }
 0x2ec   : > { %v8920_v10 = vsel %vm5363_vm4, %v9097_v38, %v8717_v31  ;;  %v4822_v25 = vcombine.high %v4814_v15, %v4814_v15  ;;  %v4824_v2 = vcombine.high %v4648_v54, %v4648_v54  ;;  %v4831_v1 = vrot.slane %v4648_v54, %v8655_v7 }
 0x2ed   : > { %v5463_v20 = vunpack.c.l.b16 %v6082_v50  ;;  %v5962_v21 = vrot.slane %v4806_v33, 9  ;;  %v5228_v17 = vmax.f32 %v4805_v14, %v5960_v19  ;;  %v6098_v16 = vpack.c.bf16 %v5227_v29, %v5227_v29 }
 0x2ee   : > { %v5365_v52 = vrot.slane %v5354_v36, 5  ;;  %v4823_v0 = vcombine.high %v4821_v62, %v4821_v62  ;;  %v8930_v31 = vsel %vm5363_vm4, %v5719_v56, %v8725_v12  ;;  %v5420_v45 = vrot.slane %v5411_v9, 5 }
 0x2ef   : > { %v5512_v4 = vunpack.c.l.b16 %v6090_v47  ;;  %v5229_v54 = vmax.f32 %v4804_v30, %v5961_v42  ;;  %v5963_v53 = vrot.slane %v4814_v15, 9  ;;  %v5964_v50 = vrot.slane %v4822_v25, 9 }
 0x2f0   : > { %v4838_v14 = vrot.slane %v4824_v2, %v8655_v7  ;;  %v4839_v19 = vcombine.high %v4831_v1, %v4831_v1  ;;  %v5472_v36 = vrot.slane %v5463_v20, 5  ;;  %v5230_v8 = vmax.f32 %v4806_v33, %v5962_v21 }
 0x2f1   : > { %v5563_v58 = vunpack.c.l.b16 %v6098_v16  ;;  %v6106_v40 = vpack.c.bf16 %v5228_v17, %v5228_v17  ;;  %v8937_v12 = vsel %vm5366_vm5, %v5365_v52, %v8794_v61  ;;  %v5965_v56 = vrot.slane %v4821_v62, 9 }
 0x2f2   : > { %v5966_v9 = vrot.slane %v4823_v0, 9  ;;  %v5967_v47 = vrot.slane %v4831_v1, 9  ;;  %v5521_v30 = vrot.slane %v5512_v4, 5  ;;  %v6114_v42 = vpack.c.bf16 %v5229_v54, %v5229_v54 }
 0x2f3   : > { %v8941_v46 = vsel %vm5366_vm5, %v5420_v45, %v8881_v11  ;;  %v5231_v2 = vmax.f32 %v4814_v15, %v5963_v53  ;;  %v5232_v18 = vmax.f32 %v4822_v25, %v5964_v50  ;;  %v4840_v20 = vcombine.high %v4838_v14, %v4838_v14  ;;  %v6391_v11 = vld [vmem:[%s9079_s2] ss:$0 sm:$0xff] }
 0x2f4   : > { %v5968_v33 = vrot.slane %v4839_v19, 9  ;;  %v5572_v17 = vrot.slane %v5563_v58, 5  ;;  %v5612_v21 = vunpack.c.l.b16 %v6106_v40  ;;  %v6122_v26 = vpack.c.bf16 %v5230_v8, %v5230_v8 }
 0x2f5   : > { %v6203_v48 = vpop.f32.mrf.mxu0  ;;  %v8945_v61 = vsel %vm5366_vm5, %v5472_v36, %v8801_v13  ;;  %v5233_v52 = vmax.f32 %v4821_v62, %v5965_v56  ;;  %v5234_v4 = vmax.f32 %v4823_v0, %v5966_v9  ;;  %v5969_v54 = vrot.slane %v4838_v14, 9 }
 0x2f6   : > { %v5663_v3 = vunpack.c.l.b16 %v6114_v42  ;;  %v8952_v58 = vsel %vm5366_vm5, %v5521_v30, %v8904_v55  ;;  %v6067_v8 = vpack.c.bf16 %v5231_v2, %v5231_v2  ;;  %v6075_v53 = vpack.c.bf16 %v5232_v18, %v5232_v18 }
 0x2f7   : > { %v6204_v27 = vpop.f32.mrf.mxu0  ;;  %v5970_v13 = vrot.slane %v4840_v20, 9  ;;  %v5236_v45 = vmax.f32 %v4839_v19, %v5968_v33  ;;  %v5573_v0 = vsel %vm5366_vm5, %v5572_v17, %v8808_v60  ;;  %v5712_v50 = vunpack.c.l.b16 %v6122_v26 }
 0x2f8   : > { %v6205_v38 = vadd.f32 %v6204_v27, %v6203_v48  ;;  %v5235_v48 = vmax.f32 %v4831_v1, %v5967_v47  ;;  %v5621_v1 = vrot.slane %v5612_v21, 5  ;;  %v6083_v40 = vpack.c.bf16 %v5233_v52, %v5233_v52 }
 0x2f9   : > { %v6206_v29 = vpop.f32.mrf.mxu0  ;;  %v6091_v56 = vpack.c.bf16 %v5234_v4, %v5234_v4  ;;  %v5672_v47 = vrot.slane %v5663_v3, 5  ;;  %v5355_v42 = vunpack.c.l.b16 %v6067_v8  ;;  %v5412_v19 = vunpack.c.l.b16 %v6075_v53 }
 0x2fa   : > { %v4400_v15 = vadd.f32 %v6391_v11, %v6205_v38  ;;  %v5237_v38 = vmax.f32 %v4838_v14, %v5969_v54  ;;  %v5238_v2 = vmax.f32 %v4840_v20, %v5970_v13  ;;  %v6107_v33 = vpack.c.bf16 %v5236_v45, %v5236_v45  ;;  %v9098_v13 = vld [vmem:[#allocation4_spill] sm:$0xff] }
 0x2fb   : > { %v6207_v16 = vpop.f32.mrf.mxu0  ;;  %v5721_v60 = vrot.slane %v5712_v50, 5  ;;  %v5622_v21 = vsel %vm5366_vm5, %v5621_v1, %v8920_v10  ;;  %v5464_v14 = vunpack.c.l.b16 %v6083_v40  ;;  %v5513_v52 = vunpack.c.l.b16 %v6091_v56  ;;  %v9099_v10 = vld [vmem:[#allocation5_spill] sm:$0xff] }
 0x2fc   : > { %v6208_v25 = vadd.f32 %v6207_v16, %v6206_v29  ;;  %v6099_v29 = vpack.c.bf16 %v5235_v48, %v5235_v48  ;;  %v4561_v55 = vadd.f32 %v8709_v6, %v4400_v15  ;;  %v6115_v3 = vpack.c.bf16 %v5237_v38, %v5237_v38 }
 0x2fd   : > { %v5368_v15 = vrot.slane %v5355_v42, 4  ;;  %v5422_v20 = vrot.slane %v5412_v19, 4  ;;  %v6123_v8 = vpack.c.bf16 %v5238_v2, %v5238_v2  ;;  %v8964_v45 = vsel %vm5366_vm5, %v5721_v60, %v8930_v31 }
 0x2fe   : > { %v4403_v30 = vadd.f32 %v6391_v11, %v6208_v25  ;;  %v5564_v4 = vunpack.c.l.b16 %v6099_v29  ;;  %v4627_v54 = vmax.f32 %v4561_v55, 0.0  ;;  %v5613_v25 = vunpack.c.l.b16 %v6107_v33 }
 0x2ff   : > { %v5474_v1 = vrot.slane %v5464_v14, 4  ;;  %v5423_v31 = vsel %vm5369_vm6, %v5422_v20, %v8941_v46  ;;  %v5370_v55 = vsel %vm5369_vm6, %v5368_v15, %v8937_v12 }
 0x300   : > { %v4564_v6 = vadd.f32 %v8722_v44, %v4403_v30  ;;  %v5574_v50 = vrot.slane %v5564_v4, 4  ;;  %v5523_v44 = vrot.slane %v5513_v52, 4  ;;  %v5623_v29 = vrot.slane %v5613_v25, 4 }
 0x301   : > { %v5475_v33 = vsel %vm5369_vm6, %v5474_v1, %v8945_v61 }
 0x302   : > { %v4628_v40 = vmax.f32 %v4564_v6, 0.0  ;;  %v5524_v2 = vsel %vm5369_vm6, %v5523_v44, %v8952_v58  ;;  %v5624_v52 = vsel %vm5369_vm6, %v5623_v29, %v5622_v21 }
 0x30f   : > { %v6209_v27 = vpop.f32.mrf.mxu0 }
 0x311   : > { %v6210_v62 = vpop.f32.mrf.mxu0 }
 0x312   : > { %v6211_v36 = vadd.f32 %v6210_v62, %v6209_v27  ;;  %v5673_v62 = vsel %vm5366_vm5, %v5672_v47, %v9099_v10 }
 0x313   : > { %v6212_v9 = vpop.f32.mrf.mxu0 }
 0x314   : > { %v4408_v18 = vadd.f32 %v6391_v11, %v6211_v36  ;;  %v5664_v36 = vunpack.c.l.b16 %v6115_v3 }
 0x315   : > { %v6213_v16 = vpop.f32.mrf.mxu0 }
 0x316   : > { %v4569_v26 = vadd.f32 %v8707_v63, %v4408_v18  ;;  %v6214_v17 = vadd.f32 %v6213_v16, %v6212_v9  ;;  %v8969_v9 = vunpack.c.l.b16 %v6123_v8  ;;  %v5674_v19 = vrot.slane %v5664_v36, 4 }
 0x317   : > { %v8981_v16 = vsel %vm5369_vm6, %v5574_v50, %v5573_v0 }
 0x318   : > { %v4629_v48 = vmax.f32 %v4569_v26, 0.0  ;;  %v4411_v27 = vadd.f32 %v6391_v11, %v6214_v17  ;;  %v5723_v4 = vrot.slane %v8969_v9, 4  ;;  %v9112_v9 = vrot.slane %v8853_v34, 2 }
 0x31a   : > { %v4649_v53 = vmax.f32 %v4627_v54, %v4629_v48  ;;  %v4572_v63 = vadd.f32 %v9098_v13, %v4411_v27  ;;  %v8988_v27 = vsel %vm5369_vm6, %v5674_v19, %v5673_v62 }
 0x31c   : > { %v4841_v11 = vcombine.high %v4649_v53, %v4649_v53  ;;  %v4848_v56 = vrot.slane %v4649_v53, %v8655_v7  ;;  %v4630_v38 = vmax.f32 %v4572_v63, 0.0 }
 0x31e   : > { %v4855_v47 = vrot.slane %v4841_v11, %v8655_v7  ;;  %v4856_v30 = vcombine.high %v4848_v56, %v4848_v56  ;;  %v5971_v18 = vrot.slane %v4848_v56, 9  ;;  %v4650_v42 = vmax.f32 %v4628_v40, %v4630_v38 }
 0x320   : > { %v4857_v46 = vcombine.high %v4855_v47, %v4855_v47  ;;  %v5972_v60 = vrot.slane %v4856_v30, 9  ;;  %v5973_v26 = vrot.slane %v4855_v47, 9  ;;  %v5239_v12 = vmax.f32 %v4848_v56, %v5971_v18 }
 0x321   : > { %v4858_v17 = vcombine.high %v4650_v42, %v4650_v42  ;;  %v4865_v14 = vrot.slane %v4650_v42, %v8655_v7 }
 0x322   : > { %v5974_v3 = vrot.slane %v4857_v46, 9  ;;  %v5240_v58 = vmax.f32 %v4856_v30, %v5972_v60  ;;  %v5241_v54 = vmax.f32 %v4855_v47, %v5973_v26  ;;  %v6068_v6 = vpack.c.bf16 %v5239_v12, %v5239_v12 }
 0x323   : > { %v4872_v61 = vrot.slane %v4858_v17, %v8655_v7  ;;  %v4873_v0 = vcombine.high %v4865_v14, %v4865_v14  ;;  %v5975_v48 = vrot.slane %v4865_v14, 9  ;;  %v9100_v60 = vrot.slane %v8834_v24, 2 }
 0x324   : > { %v5242_v15 = vmax.f32 %v4857_v46, %v5974_v3  ;;  %v5356_v20 = vunpack.c.l.b16 %v6068_v6  ;;  %v6076_v25 = vpack.c.bf16 %v5240_v58, %v5240_v58  ;;  %v6084_v8 = vpack.c.bf16 %v5241_v54, %v5241_v54 }
 0x325   : > { %v4874_v53 = vcombine.high %v4872_v61, %v4872_v61  ;;  %v5976_v13 = vrot.slane %v4873_v0, 9  ;;  %v5977_v21 = vrot.slane %v4872_v61, 9  ;;  %v5243_v63 = vmax.f32 %v4865_v14, %v5975_v48 }
 0x326   : > { %v5371_v10 = vrot.slane %v5356_v20, 3  ;;  %v5413_v1 = vunpack.c.l.b16 %v6076_v25  ;;  %v5465_v50 = vunpack.c.l.b16 %v6084_v8  ;;  %v6092_v36 = vpack.c.bf16 %v5242_v15, %v5242_v15 }
 0x327   : > { %v5978_v7 = vrot.slane %v4874_v53, 9  ;;  %v5244_v44 = vmax.f32 %v4873_v0, %v5976_v13  ;;  %v5245_v40 = vmax.f32 %v4872_v61, %v5977_v21  ;;  %v6100_v11 = vpack.c.bf16 %v5243_v63, %v5243_v63 }
 0x328   : > { %v5476_v62 = vrot.slane %v5465_v50, 3  ;;  %v5424_v56 = vrot.slane %v5413_v1, 3  ;;  %v5514_v38 = vunpack.c.l.b16 %v6092_v36  ;;  %v5373_v29 = vsel %vm5372_vm7, %v5371_v10, %v5370_v55 }
 0x329   : > { %v5246_v47 = vmax.f32 %v4874_v53, %v5978_v7  ;;  %v5565_v30 = vunpack.c.l.b16 %v6100_v11  ;;  %v6108_v18 = vpack.c.bf16 %v5244_v44, %v5244_v44  ;;  %v6116_v42 = vpack.c.bf16 %v5245_v40, %v5245_v40 }
 0x32a   : > { %v5425_v19 = vsel %vm5372_vm7, %v5424_v56, %v5423_v31  ;;  %v5525_v46 = vrot.slane %v5514_v38, 3  ;;  %v5376_v26 = vsel %vm5375_vm8, %v9100_v60, %v5373_v29  ;;  %v5477_v12 = vsel %vm5372_vm7, %v5476_v62, %v5475_v33 }
 0x32b   : > { %v5576_v17 = vrot.slane %v5565_v30, 3  ;;  %v5614_v14 = vunpack.c.l.b16 %v6108_v18  ;;  %v5665_v3 = vunpack.c.l.b16 %v6116_v42  ;;  %v9101_v58 = vrot.slane %v8837_v41, 2 }
 0x32c   : > { %v9102_v54 = vrot.slane %v8887_v32, 1  ;;  %v5526_v31 = vsel %vm5372_vm7, %v5525_v46, %v5524_v2  ;;  %v6124_v61 = vpack.c.bf16 %v5246_v47, %v5246_v47  ;;  %v9103_v24 = vrot.slane %v8870_v22, 1 }
 0x32d   : > { %v5427_v55 = vsel %vm5375_vm8, %v9101_v58, %v5425_v19  ;;  %v5676_v48 = vrot.slane %v5665_v3, 3  ;;  %v9104_v15 = vrot.slane %v8855_v39, 2  ;;  %v5625_v41 = vrot.slane %v5614_v14, 3 }
 0x32e   : > { %v5429_v6 = vsel %vm5378_vm9, %v9102_v54, %v5427_v55  ;;  %v5379_v0 = vsel %vm5378_vm9, %v9103_v24, %v5376_v26  ;;  %v9105_v32 = vrot.slane %v8898_v5, 1  ;;  %v5714_v22 = vunpack.c.l.b16 %v6124_v61 }
 0x32f   : > { %v5430_v33 = vpack.c.b16 %v5429_v6, %v5429_v6  ;;  %v5528_v20 = vsel %vm5375_vm8, %v9104_v15, %v5526_v31  ;;  %v5380_v25 = vpack.c.b16 %v5379_v0, %v5379_v0  ;;  %v9106_v8 = vrot.slane %v8839_v57, 2 }
 0x330   : > { %v5530_v2 = vsel %vm5378_vm9, %v9105_v32, %v5528_v20  ;;  %v5626_v13 = vsel %vm5372_vm7, %v5625_v41, %v5624_v52  ;;  %v9107_v21 = vrot.slane %v8872_v23, 1  ;;  %v5577_v5 = vsel %vm5372_vm7, %v5576_v17, %v8981_v16 }
 0x331   : > { %v5479_v53 = vsel %vm5375_vm8, %v9106_v8, %v5477_v12  ;;  %5431 = vrot.lane.b32.xlu0 %v5430_v33, %s6401_s18  ;;  %v5531_v39 = vpack.c.b16 %v5530_v2, %v5530_v2  ;;  %v9108_v10 = vrot.slane %v8849_v28, 2  ;;  %v5725_v57 = vrot.slane %v5714_v22, 3  ;;  %5383 = vst.msk [vmem:[%s9013_s14] sm:$0xf] %vm5382_vm10, %v5380_v25 }
 0x332   : > { %v5481_v63 = vsel %vm5378_vm9, %v9107_v21, %v5479_v53  ;;  %v9109_v36 = vrot.slane %v8845_v35, 2  ;;  %v9110_v23 = vrot.slane %v8909_v37, 1  ;;  %v5724_v28 = vsel %vm5369_vm6, %v5723_v4, %v8964_v45 }
 0x333   : > { %v5628_v1 = vsel %vm5375_vm8, %v9108_v10, %v5626_v13  ;;  %v5482_v50 = vpack.c.b16 %v5481_v63, %v5481_v63  ;;  %5532 = vrot.lane.b32.xlu1 %v5531_v39, %s6401_s18  ;;  %v9111_v16 = vrot.slane %v8891_v43, 1  ;;  %v5677_v35 = vsel %vm5372_vm7, %v5676_v48, %v8988_v27 }
 0x334   : > { %v5579_v52 = vsel %vm5375_vm8, %v9109_v36, %v5577_v5  ;;  %v5630_v7 = vsel %vm5378_vm9, %v9110_v23, %v5628_v1  ;;  %v5726_v11 = vsel %vm5372_vm7, %v5725_v57, %v5724_v28  ;;  %v5679_v62 = vsel %vm5375_vm8, %v9112_v9, %v5677_v35 }
 0x335   : > { %v5581_v44 = vsel %vm5378_vm9, %v9111_v16, %v5579_v52  ;;  %v5631_v40 = vpack.c.b16 %v5630_v7, %v5630_v7  ;;  %5484 = vst.msk [vmem:[%s9013_s14 + $0x4] sm:$0xf] %vm5382_vm10, %v5482_v50  ;;  %v9113_v45 = vrot.slane %v8864_v49, 2  ;;  %v9114_v4 = vrot.slane %v8907_v59, 1 }
 0x336   : > { %v5582_v37 = vpack.c.b16 %v5581_v44, %v5581_v44  ;;  %v9115_v56 = vrot.slane %v8922_v51, 1 }
 0x337   : > { %v5728_v43 = vsel %vm5375_vm8, %v9113_v45, %v5726_v11  ;;  %v5681_v27 = vsel %vm5378_vm9, %v9114_v4, %v5679_v62  ;;  %5632 = vrot.lane.b32.xlu0 %v5631_v40, %s6401_s18 }
 0x338   : > { %v5730_v38 = vsel %vm5378_vm9, %v9115_v56, %v5728_v43  ;;  %5584 = vst.msk [vmem:[%s9013_s14 + $0x8] sm:$0xf] %vm5382_vm10, %v5582_v37  ;;  %v5682_v34 = vpack.c.b16 %v5681_v27, %v5681_v27 }
 0x339   : > { %v5731_v29 = vpack.c.b16 %v5730_v38, %v5730_v38 }
 0x33a   : > { %5684 = vst.msk [vmem:[%s9013_s14 + $0xc] sm:$0xf] %vm5382_vm10, %v5682_v34 }
 0x33b   : > { %5732 = vrot.lane.b32.xlu1 %v5731_v29, %s6401_s18 }
 0x3a3   : > { %v5432_v49 = vpop.permute.xlu0 %5431 }
 0x3a4   : > { %5435 = vst.msk [vmem:[%s9013_s14] sm:$0xf] %vm5434_vm11, %v5432_v49 }
 0x3a5   : > { %v5533_v59 = vpop.permute.xlu1 %5532 }
 0x3a6   : > { %5535 = vst.msk [vmem:[%s9013_s14 + $0x4] sm:$0xf] %vm5434_vm11, %v5533_v59 }
 0x3a9   : > { %v5633_v47 = vpop.permute.xlu0 %5632 }
 0x3aa   : > { %5635 = vst.msk [vmem:[%s9013_s14 + $0x8] sm:$0xf] %vm5434_vm11, %v5633_v47 }
 0x3ad   : > { %v5733_v30 = vpop.permute.xlu1 %5732 }
 0x3ae   : > { %5735 = vst.msk [vmem:[%s9013_s14 + $0xc] sm:$0xf] %vm5434_vm11, %v5733_v30 }
 0x3af PF: > { %s13_s12 = sadd.s32 1, %s6398_s12  }
 0x3b0   : > { %p10_p4 = scmp.ge.s32.totalorder %s13_s12, 4  }
 0x3b2   :  { %12 = sbr.rel (!%p10_p4) target bundleno = 1 (0x1), region = 65 }

</bundles_post_ra>
